<compile_context>
chip_gen: v7x
topology: tpu7x:2x2x1
jax: 0.10.0
libtpu: 0.0.40
codegen_flags: <defaults>
</compile_context>

<pallas_src>
import functools

import jax
import jax.numpy as jnp
import numpy as np
from jax.experimental import pallas as pl
from jax.experimental.pallas import tpu as pltpu


def _unet_up_kernel(x_ref, w_ref, skip_ref, noise_ref, o_ref, xp_ref, acc_ref,
                    *, H, W, C_in, C_out, C_skip, C_noise, eps):
    # x_ref    : (1, H, W, C_in)           one batch element
    # w_ref    : (2, 2, 4*C_in, C_out)     folded weight slabs, indexed [dy, dx]
    # skip_ref : (1, H, 2, W, 2*C_skip)    skip, free-reshaped so that
    #                                      [0, m, dy, n, dx*C_skip + c] == skip[2m+dy, 2n+dx, c]
    # noise_ref: (1, H, 2, W, 2*C_noise)   same layout as skip
    # o_ref    : (1, H, 2, W, 2*C_total)   final fused output (reshapes to (2H, 2W, C_total))
    # xp_ref   : VMEM (H+2, W+2, C_in)     zero-padded input scratch
    # acc_ref  : VMEM (4, H*W, C_out) f32  staging for the 4 sub-grid conv results

    # ---- in-kernel zero padding (replaces host jnp.pad) ----
    xp_ref[...] = jnp.zeros_like(xp_ref)
    xp_ref[1:H + 1, 1:W + 1, :] = x_ref[0]

    # ---- pass 1: transposed conv as 4 folded-K matmuls + running stats ----
    # out[2m+dy, 2n+dx, co] = sum_{ry,rx,ci} Xpad[m+dy+ry, n+dx+rx, ci]
    #                                        * Wt[ci, co, 3-dy-2ry, 3-dx-2rx]
    ssum = jnp.zeros((1, C_out), jnp.float32)
    ssq = jnp.zeros((1, C_out), jnp.float32)
    for dy in range(2):
        for dx in range(2):
            wins = [xp_ref[dy + ry:dy + ry + H, dx + rx:dx + rx + W, :]
                    for ry in range(2) for rx in range(2)]        # 4 x (H, W, C_in)
            lhs = jnp.concatenate(wins, axis=-1)                  # (H, W, 4*C_in)
            lhs = lhs.reshape(H * W, 4 * C_in)                    # minor dim unchanged
            acc = jnp.dot(lhs, w_ref[dy, dx],
                          preferred_element_type=jnp.float32)     # (H*W, C_out) f32
            acc_ref[2 * dy + dx] = acc
            ssum = ssum + acc.sum(axis=0, keepdims=True)
            ssq = ssq + (acc * acc).sum(axis=0, keepdims=True)

    # ---- InstanceNorm2d stats (biased variance, eps, affine=False) ----
    n = jnp.float32(4 * H * W)
    mean = ssum / n
    var = jnp.maximum(ssq / n - mean * mean, 0.0)
    inv_std = jax.lax.rsqrt(var + jnp.float32(eps))

    # ---- pass 2: normalize + ReLU, fused spatial interleave + channel concat ----
    for dy in range(2):
        skip_row = skip_ref[0, :, dy, :, :]       # (H, W, 2*C_skip)
        noise_row = noise_ref[0, :, dy, :, :]     # (H, W, 2*C_noise)
        pieces = []
        for dx in range(2):
            y = acc_ref[2 * dy + dx]                              # (H*W, C_out) f32
            y = jnp.maximum((y - mean) * inv_std, 0.0)
            y = y.reshape(H, W, C_out).astype(o_ref.dtype)
            pieces.append(y)
            pieces.append(skip_row[:, :, dx * C_skip:(dx + 1) * C_skip])
            pieces.append(noise_row[:, :, dx * C_noise:(dx + 1) * C_noise])
        # lane order per pixel: [y | skip | noise] for dx=0, then dx=1
        o_ref[0, :, dy, :, :] = jnp.concatenate(pieces, axis=-1)  # (H, W, 2*C_total)


def unet_up_forward(x_nhwc, skip_nhwc, noise_nhwc, weight):
    """UNetUp.forward. weight has PyTorch ConvTranspose2d layout (C_in, C_out, 4, 4)."""
    B, H, W, C_in = x_nhwc.shape
    C_out = weight.shape[1]
    C_skip = skip_nhwc.shape[-1]
    C_noise = noise_nhwc.shape[-1]
    C_total = C_out + C_skip + C_noise

    # Folded weight slabs: w_slab[dy, dx, (2*ry+rx)*C_in + ci, co]
    #   = weight[ci, co, 3-dy-2*ry, 3-dx-2*rx]   (tiny tensor, negligible cost)
    w_k = jnp.transpose(weight, (2, 3, 0, 1))                 # (ky, kx, ci, co)
    rows = []
    for dy in range(2):
        cols = []
        for dx in range(2):
            taps = [w_k[3 - dy - 2 * ry, 3 - dx - 2 * rx]
                    for ry in range(2) for rx in range(2)]    # each (C_in, C_out)
            cols.append(jnp.concatenate(taps, axis=0))        # (4*C_in, C_out)
        rows.append(jnp.stack(cols, axis=0))
    w_slab = jnp.stack(rows, axis=0)                          # (2, 2, 4*C_in, C_out)

    # Free, layout-preserving reshapes so the kernel can emit the final layout.
    skip_r = skip_nhwc.reshape(B, H, 2, W, 2 * C_skip)
    noise_r = noise_nhwc.reshape(B, H, 2, W, 2 * C_noise)

    kern = functools.partial(_unet_up_kernel, H=H, W=W, C_in=C_in, C_out=C_out,
                             C_skip=C_skip, C_noise=C_noise, eps=1e-5)

    out = pl.pallas_call(
        kern,
        out_shape=jax.ShapeDtypeStruct((B, H, 2, W, 2 * C_total), x_nhwc.dtype),
        grid=(B,),
        in_specs=[
            pl.BlockSpec((1, H, W, C_in), lambda b: (b, 0, 0, 0)),
            pl.BlockSpec((2, 2, 4 * C_in, C_out), lambda b: (0, 0, 0, 0)),
            pl.BlockSpec((1, H, 2, W, 2 * C_skip), lambda b: (b, 0, 0, 0, 0)),
            pl.BlockSpec((1, H, 2, W, 2 * C_noise), lambda b: (b, 0, 0, 0, 0)),
        ],
        out_specs=pl.BlockSpec((1, H, 2, W, 2 * C_total), lambda b: (b, 0, 0, 0, 0)),
        scratch_shapes=[
            pltpu.VMEM((H + 2, W + 2, C_in), x_nhwc.dtype),     # padded input
            pltpu.VMEM((4, H * W, C_out), jnp.float32),          # sub-grid staging
        ],
        compiler_params=pltpu.CompilerParams(
            dimension_semantics=("parallel",),
            vmem_limit_bytes=64 * 1024 * 1024),
    )(x_nhwc, w_slab, skip_r, noise_r)

    # (B, H, 2, W, 2*C_total) -> (B, 2H, 2W, C_total): pure row-major reshape
    return out.reshape(B, 2 * H, 2 * W, C_total)


def _reference(x_nhwc, skip, noise, weight, eps=1e-5):
    # ConvTranspose2d(s=2,k=4,p=1) == input-dilated conv with spatially-flipped kernel, pad 2
    w_flip = weight[:, :, ::-1, ::-1]                       # (C_in, C_out, 4, 4)
    w_hwio = jnp.transpose(w_flip, (2, 3, 0, 1))            # (kH, kW, C_in, C_out)
    y = jax.lax.conv_general_dilated(
        x_nhwc, w_hwio, window_strides=(1, 1),
        padding=((2, 2), (2, 2)), lhs_dilation=(2, 2),
        dimension_numbers=("NHWC", "HWIO", "NHWC"))
    mean = jnp.mean(y, axis=(1, 2), keepdims=True)
    var = jnp.mean((y - mean) ** 2, axis=(1, 2), keepdims=True)
    y = jnp.maximum((y - mean) / jnp.sqrt(var + eps), 0.0)
    return jnp.concatenate([y, skip, noise], axis=-1)


if __name__ == "__main__":
    key = jax.random.PRNGKey(0)
    k1, k2, k3, k4 = jax.random.split(key, 4)

    B, C_in, H, W = 2, 4, 16, 16
    C_out, C_skip, C_noise = 4, 4, 2

    # NHWC inputs (PyTorch equivalents NCHW: x=(2,4,16,16), skip=(2,4,32,32), noise=(2,2,32,32))
    x = jax.random.normal(k1, (B, H, W, C_in), jnp.float32)
    skip = jax.random.normal(k2, (B, 2 * H, 2 * W, C_skip), jnp.float32)
    noise = jax.random.normal(k3, (B, 2 * H, 2 * W, C_noise), jnp.float32)
    # deterministic synthetic ConvTranspose2d weight: (in_size, out_size, 4, 4)
    weight = jax.random.normal(k4, (C_in, C_out, 4, 4), jnp.float32) * 0.1

    out = jax.jit(unet_up_forward)(x, skip, noise, weight)
    out = jax.block_until_ready(out)

    ref = _reference(x, skip, noise, weight)
    np.testing.assert_allclose(np.asarray(out), np.asarray(ref), atol=2e-4, rtol=2e-4)
    assert out.shape == (B, 2 * H, 2 * W, C_out + C_skip + C_noise)

    print("KERNEL_OK")
</pallas_src>

<mosaic_0001>
module attributes {stable_mosaic.version = 11 : i64} {
  func.func @_unet_up_kernel(%arg0: i32, %arg1: memref<1x16x16x4xf32, #tpu.memory_space<vmem>>, %arg2: memref<2x2x16x4xf32, #tpu.memory_space<vmem>>, %arg3: memref<1x16x2x16x8xf32, #tpu.memory_space<vmem>>, %arg4: memref<1x16x2x16x4xf32, #tpu.memory_space<vmem>>, %arg5: memref<1x16x2x16x20xf32, #tpu.memory_space<vmem>>, %arg6: memref<18x18x4xf32, #tpu.memory_space<vmem>>, %arg7: memref<4x256x4xf32, #tpu.memory_space<vmem>>) attributes {dimension_semantics = [#tpu.dimension_semantics<parallel>], iteration_bounds = array<i64: 2>, scalar_prefetch = 0 : i64, scratch_operands = 2 : i64, tpu.core_type = #tpu.core_type<tc>, window_params = [{transform_indices = @transform_0, window_bounds = array<i64: 1, 16, 16, 4>}, {pipeline_mode = #tpu.pipeline_mode<synchronous>, transform_indices = @transform_1, window_bounds = array<i64: 2, 2, 16, 4>}, {transform_indices = @transform_2, window_bounds = array<i64: 1, 16, 2, 16, 8>}, {transform_indices = @transform_3, window_bounds = array<i64: 1, 16, 2, 16, 4>}, {transform_indices = @transform_4, window_bounds = array<i64: 1, 16, 2, 16, 20>}]} {
    %cst = arith.constant 0.000000e+00 : f32
    %0 = vector.broadcast %cst : f32 to vector<18x18x4xf32>
    %c0 = arith.constant 0 : index
    %c0_0 = arith.constant 0 : index
    %c0_1 = arith.constant 0 : index
    %1 = vector.load %arg6[%c0, %c0_0, %c0_1] : memref<18x18x4xf32, #tpu.memory_space<vmem>>, vector<18x18x4xf32>
    tpu.vector_store %arg6[%c0, %c0_0, %c0_1], %0 {strides = array<i32>} : memref<18x18x4xf32, #tpu.memory_space<vmem>>, vector<18x18x4xf32>,
    %c0_2 = arith.constant 0 : index
    %c0_3 = arith.constant 0 : index
    %c0_4 = arith.constant 0 : index
    %c0_5 = arith.constant 0 : index
    %2 = vector.load %arg1[%c0_2, %c0_3, %c0_4, %c0_5] : memref<1x16x16x4xf32, #tpu.memory_space<vmem>>, vector<1x16x16x4xf32>
    %3 = vector.shape_cast %2 : vector<1x16x16x4xf32> to vector<16x16x4xf32>
    %c1 = arith.constant 1 : index
    %c1_6 = arith.constant 1 : index
    %c0_7 = arith.constant 0 : index
    %4 = vector.load %arg6[%c1, %c1_6, %c0_7] : memref<18x18x4xf32, #tpu.memory_space<vmem>>, vector<16x16x4xf32>
    tpu.vector_store %arg6[%c1, %c1_6, %c0_7], %3 {strides = array<i32>} : memref<18x18x4xf32, #tpu.memory_space<vmem>>, vector<16x16x4xf32>,
    %cst_8 = arith.constant 0.000000e+00 : f32
    %5 = vector.broadcast %cst_8 : f32 to vector<1x4xf32>
    %cst_9 = arith.constant 0.000000e+00 : f32
    %6 = vector.broadcast %cst_9 : f32 to vector<1x4xf32>
    %c0_10 = arith.constant 0 : index
    %c0_11 = arith.constant 0 : index
    %c0_12 = arith.constant 0 : index
    %7 = vector.load %arg6[%c0_10, %c0_11, %c0_12] : memref<18x18x4xf32, #tpu.memory_space<vmem>>, vector<16x16x4xf32>
    %c0_13 = arith.constant 0 : index
    %c1_14 = arith.constant 1 : index
    %c0_15 = arith.constant 0 : index
    %8 = vector.load %arg6[%c0_13, %c1_14, %c0_15] : memref<18x18x4xf32, #tpu.memory_space<vmem>>, vector<16x16x4xf32>
    %c1_16 = arith.constant 1 : index
    %c0_17 = arith.constant 0 : index
    %c0_18 = arith.constant 0 : index
    %9 = vector.load %arg6[%c1_16, %c0_17, %c0_18] : memref<18x18x4xf32, #tpu.memory_space<vmem>>, vector<16x16x4xf32>
    %c1_19 = arith.constant 1 : index
    %c1_20 = arith.constant 1 : index
    %c0_21 = arith.constant 0 : index
    %10 = vector.load %arg6[%c1_19, %c1_20, %c0_21] : memref<18x18x4xf32, #tpu.memory_space<vmem>>, vector<16x16x4xf32>
    %11 = tpu.concatenate %7, %8, %9, %10 in 2 : vector<16x16x4xf32>, vector<16x16x4xf32>, vector<16x16x4xf32>, vector<16x16x4xf32> -> vector<16x16x16xf32>
    %12 = vector.shape_cast %11 : vector<16x16x16xf32> to vector<256x16xf32>
    %c0_22 = arith.constant 0 : index
    %c0_23 = arith.constant 0 : index
    %c0_24 = arith.constant 0 : index
    %c0_25 = arith.constant 0 : index
    %13 = vector.load %arg2[%c0_22, %c0_23, %c0_24, %c0_25] : memref<2x2x16x4xf32, #tpu.memory_space<vmem>>, vector<1x1x16x4xf32>
    %14 = vector.shape_cast %13 : vector<1x1x16x4xf32> to vector<16x4xf32>
    %cst_26 = arith.constant dense<0.000000e+00> : vector<256x4xf32>
    %15 = tpu.matmul %12, %14, %cst_26 {dimension_numbers = #tpu.dot_dimension_numbers<[1], [0], [0], [1], [0, 0, 1, 1], [], []>} : vector<256x16xf32>, vector<16x4xf32>, vector<256x4xf32> -> vector<256x4xf32>
    %c0_27 = arith.constant 0 : index
    %c0_28 = arith.constant 0 : index
    %c0_29 = arith.constant 0 : index
    %16 = vector.load %arg7[%c0_27, %c0_28, %c0_29] : memref<4x256x4xf32, #tpu.memory_space<vmem>>, vector<1x256x4xf32>
    %17 = vector.shape_cast %16 : vector<1x256x4xf32> to vector<256x4xf32>
    %18 = vector.shape_cast %15 : vector<256x4xf32> to vector<1x256x4xf32>
    tpu.vector_store %arg7[%c0_27, %c0_28, %c0_29], %18 {strides = array<i32>} : memref<4x256x4xf32, #tpu.memory_space<vmem>>, vector<1x256x4xf32>,
    %cst_30 = arith.constant dense<0.000000e+00> : vector<4xf32>
    %19 = vector.multi_reduction <add>, %15, %cst_30 [0] : vector<256x4xf32> to vector<4xf32>
    %20 = vector.shape_cast %19 : vector<4xf32> to vector<1x4xf32>
    %21 = arith.addf %5, %20 : vector<1x4xf32>
    %22 = arith.mulf %15, %15 : vector<256x4xf32>
    %cst_31 = arith.constant dense<0.000000e+00> : vector<4xf32>
    %23 = vector.multi_reduction <add>, %22, %cst_31 [0] : vector<256x4xf32> to vector<4xf32>
    %24 = vector.shape_cast %23 : vector<4xf32> to vector<1x4xf32>
    %25 = arith.addf %6, %24 : vector<1x4xf32>
    %c0_32 = arith.constant 0 : index
    %c1_33 = arith.constant 1 : index
    %c0_34 = arith.constant 0 : index
    %26 = vector.load %arg6[%c0_32, %c1_33, %c0_34] : memref<18x18x4xf32, #tpu.memory_space<vmem>>, vector<16x16x4xf32>
    %c0_35 = arith.constant 0 : index
    %c2 = arith.constant 2 : index
    %c0_36 = arith.constant 0 : index
    %27 = vector.load %arg6[%c0_35, %c2, %c0_36] : memref<18x18x4xf32, #tpu.memory_space<vmem>>, vector<16x16x4xf32>
    %c1_37 = arith.constant 1 : index
    %c1_38 = arith.constant 1 : index
    %c0_39 = arith.constant 0 : index
    %28 = vector.load %arg6[%c1_37, %c1_38, %c0_39] : memref<18x18x4xf32, #tpu.memory_space<vmem>>, vector<16x16x4xf32>
    %c1_40 = arith.constant 1 : index
    %c2_41 = arith.constant 2 : index
    %c0_42 = arith.constant 0 : index
    %29 = vector.load %arg6[%c1_40, %c2_41, %c0_42] : memref<18x18x4xf32, #tpu.memory_space<vmem>>, vector<16x16x4xf32>
    %30 = tpu.concatenate %26, %27, %28, %29 in 2 : vector<16x16x4xf32>, vector<16x16x4xf32>, vector<16x16x4xf32>, vector<16x16x4xf32> -> vector<16x16x16xf32>
    %31 = vector.shape_cast %30 : vector<16x16x16xf32> to vector<256x16xf32>
    %c0_43 = arith.constant 0 : index
    %c1_44 = arith.constant 1 : index
    %c0_45 = arith.constant 0 : index
    %c0_46 = arith.constant 0 : index
    %32 = vector.load %arg2[%c0_43, %c1_44, %c0_45, %c0_46] : memref<2x2x16x4xf32, #tpu.memory_space<vmem>>, vector<1x1x16x4xf32>
    %33 = vector.shape_cast %32 : vector<1x1x16x4xf32> to vector<16x4xf32>
    %cst_47 = arith.constant dense<0.000000e+00> : vector<256x4xf32>
    %34 = tpu.matmul %31, %33, %cst_47 {dimension_numbers = #tpu.dot_dimension_numbers<[1], [0], [0], [1], [0, 0, 1, 1], [], []>} : vector<256x16xf32>, vector<16x4xf32>, vector<256x4xf32> -> vector<256x4xf32>
    %c1_48 = arith.constant 1 : index
    %c0_49 = arith.constant 0 : index
    %c0_50 = arith.constant 0 : index
    %35 = vector.load %arg7[%c1_48, %c0_49, %c0_50] : memref<4x256x4xf32, #tpu.memory_space<vmem>>, vector<1x256x4xf32>
    %36 = vector.shape_cast %35 : vector<1x256x4xf32> to vector<256x4xf32>
    %37 = vector.shape_cast %34 : vector<256x4xf32> to vector<1x256x4xf32>
    tpu.vector_store %arg7[%c1_48, %c0_49, %c0_50], %37 {strides = array<i32>} : memref<4x256x4xf32, #tpu.memory_space<vmem>>, vector<1x256x4xf32>,
    %cst_51 = arith.constant dense<0.000000e+00> : vector<4xf32>
    %38 = vector.multi_reduction <add>, %34, %cst_51 [0] : vector<256x4xf32> to vector<4xf32>
    %39 = vector.shape_cast %38 : vector<4xf32> to vector<1x4xf32>
    %40 = arith.addf %21, %39 : vector<1x4xf32>
    %41 = arith.mulf %34, %34 : vector<256x4xf32>
    %cst_52 = arith.constant dense<0.000000e+00> : vector<4xf32>
    %42 = vector.multi_reduction <add>, %41, %cst_52 [0] : vector<256x4xf32> to vector<4xf32>
    %43 = vector.shape_cast %42 : vector<4xf32> to vector<1x4xf32>
    %44 = arith.addf %25, %43 : vector<1x4xf32>
    %c1_53 = arith.constant 1 : index
    %c0_54 = arith.constant 0 : index
    %c0_55 = arith.constant 0 : index
    %45 = vector.load %arg6[%c1_53, %c0_54, %c0_55] : memref<18x18x4xf32, #tpu.memory_space<vmem>>, vector<16x16x4xf32>
    %c1_56 = arith.constant 1 : index
    %c1_57 = arith.constant 1 : index
    %c0_58 = arith.constant 0 : index
    %46 = vector.load %arg6[%c1_56, %c1_57, %c0_58] : memref<18x18x4xf32, #tpu.memory_space<vmem>>, vector<16x16x4xf32>
    %c2_59 = arith.constant 2 : index
    %c0_60 = arith.constant 0 : index
    %c0_61 = arith.constant 0 : index
    %47 = vector.load %arg6[%c2_59, %c0_60, %c0_61] : memref<18x18x4xf32, #tpu.memory_space<vmem>>, vector<16x16x4xf32>
    %c2_62 = arith.constant 2 : index
    %c1_63 = arith.constant 1 : index
    %c0_64 = arith.constant 0 : index
    %48 = vector.load %arg6[%c2_62, %c1_63, %c0_64] : memref<18x18x4xf32, #tpu.memory_space<vmem>>, vector<16x16x4xf32>
    %49 = tpu.concatenate %45, %46, %47, %48 in 2 : vector<16x16x4xf32>, vector<16x16x4xf32>, vector<16x16x4xf32>, vector<16x16x4xf32> -> vector<16x16x16xf32>
    %50 = vector.shape_cast %49 : vector<16x16x16xf32> to vector<256x16xf32>
    %c1_65 = arith.constant 1 : index
    %c0_66 = arith.constant 0 : index
    %c0_67 = arith.constant 0 : index
    %c0_68 = arith.constant 0 : index
    %51 = vector.load %arg2[%c1_65, %c0_66, %c0_67, %c0_68] : memref<2x2x16x4xf32, #tpu.memory_space<vmem>>, vector<1x1x16x4xf32>
    %52 = vector.shape_cast %51 : vector<1x1x16x4xf32> to vector<16x4xf32>
    %cst_69 = arith.constant dense<0.000000e+00> : vector<256x4xf32>
    %53 = tpu.matmul %50, %52, %cst_69 {dimension_numbers = #tpu.dot_dimension_numbers<[1], [0], [0], [1], [0, 0, 1, 1], [], []>} : vector<256x16xf32>, vector<16x4xf32>, vector<256x4xf32> -> vector<256x4xf32>
    %c2_70 = arith.constant 2 : index
    %c0_71 = arith.constant 0 : index
    %c0_72 = arith.constant 0 : index
    %54 = vector.load %arg7[%c2_70, %c0_71, %c0_72] : memref<4x256x4xf32, #tpu.memory_space<vmem>>, vector<1x256x4xf32>
    %55 = vector.shape_cast %54 : vector<1x256x4xf32> to vector<256x4xf32>
    %56 = vector.shape_cast %53 : vector<256x4xf32> to vector<1x256x4xf32>
    tpu.vector_store %arg7[%c2_70, %c0_71, %c0_72], %56 {strides = array<i32>} : memref<4x256x4xf32, #tpu.memory_space<vmem>>, vector<1x256x4xf32>,
    %cst_73 = arith.constant dense<0.000000e+00> : vector<4xf32>
    %57 = vector.multi_reduction <add>, %53, %cst_73 [0] : vector<256x4xf32> to vector<4xf32>
    %58 = vector.shape_cast %57 : vector<4xf32> to vector<1x4xf32>
    %59 = arith.addf %40, %58 : vector<1x4xf32>
    %60 = arith.mulf %53, %53 : vector<256x4xf32>
    %cst_74 = arith.constant dense<0.000000e+00> : vector<4xf32>
    %61 = vector.multi_reduction <add>, %60, %cst_74 [0] : vector<256x4xf32> to vector<4xf32>
    %62 = vector.shape_cast %61 : vector<4xf32> to vector<1x4xf32>
    %63 = arith.addf %44, %62 : vector<1x4xf32>
    %c1_75 = arith.constant 1 : index
    %c1_76 = arith.constant 1 : index
    %c0_77 = arith.constant 0 : index
    %64 = vector.load %arg6[%c1_75, %c1_76, %c0_77] : memref<18x18x4xf32, #tpu.memory_space<vmem>>, vector<16x16x4xf32>
    %c1_78 = arith.constant 1 : index
    %c2_79 = arith.constant 2 : index
    %c0_80 = arith.constant 0 : index
    %65 = vector.load %arg6[%c1_78, %c2_79, %c0_80] : memref<18x18x4xf32, #tpu.memory_space<vmem>>, vector<16x16x4xf32>
    %c2_81 = arith.constant 2 : index
    %c1_82 = arith.constant 1 : index
    %c0_83 = arith.constant 0 : index
    %66 = vector.load %arg6[%c2_81, %c1_82, %c0_83] : memref<18x18x4xf32, #tpu.memory_space<vmem>>, vector<16x16x4xf32>
    %c2_84 = arith.constant 2 : index
    %c2_85 = arith.constant 2 : index
    %c0_86 = arith.constant 0 : index
    %67 = vector.load %arg6[%c2_84, %c2_85, %c0_86] : memref<18x18x4xf32, #tpu.memory_space<vmem>>, vector<16x16x4xf32>
    %68 = tpu.concatenate %64, %65, %66, %67 in 2 : vector<16x16x4xf32>, vector<16x16x4xf32>, vector<16x16x4xf32>, vector<16x16x4xf32> -> vector<16x16x16xf32>
    %69 = vector.shape_cast %68 : vector<16x16x16xf32> to vector<256x16xf32>
    %c1_87 = arith.constant 1 : index
    %c1_88 = arith.constant 1 : index
    %c0_89 = arith.constant 0 : index
    %c0_90 = arith.constant 0 : index
    %70 = vector.load %arg2[%c1_87, %c1_88, %c0_89, %c0_90] : memref<2x2x16x4xf32, #tpu.memory_space<vmem>>, vector<1x1x16x4xf32>
    %71 = vector.shape_cast %70 : vector<1x1x16x4xf32> to vector<16x4xf32>
    %cst_91 = arith.constant dense<0.000000e+00> : vector<256x4xf32>
    %72 = tpu.matmul %69, %71, %cst_91 {dimension_numbers = #tpu.dot_dimension_numbers<[1], [0], [0], [1], [0, 0, 1, 1], [], []>} : vector<256x16xf32>, vector<16x4xf32>, vector<256x4xf32> -> vector<256x4xf32>
    %c3 = arith.constant 3 : index
    %c0_92 = arith.constant 0 : index
    %c0_93 = arith.constant 0 : index
    %73 = vector.load %arg7[%c3, %c0_92, %c0_93] : memref<4x256x4xf32, #tpu.memory_space<vmem>>, vector<1x256x4xf32>
    %74 = vector.shape_cast %73 : vector<1x256x4xf32> to vector<256x4xf32>
    %75 = vector.shape_cast %72 : vector<256x4xf32> to vector<1x256x4xf32>
    tpu.vector_store %arg7[%c3, %c0_92, %c0_93], %75 {strides = array<i32>} : memref<4x256x4xf32, #tpu.memory_space<vmem>>, vector<1x256x4xf32>,
    %cst_94 = arith.constant dense<0.000000e+00> : vector<4xf32>
    %76 = vector.multi_reduction <add>, %72, %cst_94 [0] : vector<256x4xf32> to vector<4xf32>
    %77 = vector.shape_cast %76 : vector<4xf32> to vector<1x4xf32>
    %78 = arith.addf %59, %77 : vector<1x4xf32>
    %79 = arith.mulf %72, %72 : vector<256x4xf32>
    %cst_95 = arith.constant dense<0.000000e+00> : vector<4xf32>
    %80 = vector.multi_reduction <add>, %79, %cst_95 [0] : vector<256x4xf32> to vector<4xf32>
    %81 = vector.shape_cast %80 : vector<4xf32> to vector<1x4xf32>
    %82 = arith.addf %63, %81 : vector<1x4xf32>
    %cst_96 = arith.constant 1.024000e+03 : f32
    %83 = vector.broadcast %cst_96 : f32 to vector<1x4xf32>
    %84 = arith.divf %78, %83 : vector<1x4xf32>
    %cst_97 = arith.constant 1.024000e+03 : f32
    %85 = vector.broadcast %cst_97 : f32 to vector<1x4xf32>
    %86 = arith.divf %82, %85 : vector<1x4xf32>
    %87 = arith.mulf %84, %84 : vector<1x4xf32>
    %88 = arith.subf %86, %87 : vector<1x4xf32>
    %cst_98 = arith.constant 0.000000e+00 : f32
    %89 = vector.broadcast %cst_98 : f32 to vector<1x4xf32>
    %90 = arith.maximumf %88, %89 : vector<1x4xf32>
    %cst_99 = arith.constant 9.99999974E-6 : f32
    %91 = vector.broadcast %cst_99 : f32 to vector<1x4xf32>
    %92 = arith.addf %90, %91 : vector<1x4xf32>
    %93 = math.rsqrt %92 : vector<1x4xf32>
    %c0_100 = arith.constant 0 : index
    %c0_101 = arith.constant 0 : index
    %c0_102 = arith.constant 0 : index
    %c0_103 = arith.constant 0 : index
    %c0_104 = arith.constant 0 : index
    %94 = vector.load %arg3[%c0_100, %c0_101, %c0_102, %c0_103, %c0_104] : memref<1x16x2x16x8xf32, #tpu.memory_space<vmem>>, vector<1x16x1x16x8xf32>
    %95 = vector.shape_cast %94 : vector<1x16x1x16x8xf32> to vector<16x16x8xf32>
    %c0_105 = arith.constant 0 : index
    %c0_106 = arith.constant 0 : index
    %c0_107 = arith.constant 0 : index
    %c0_108 = arith.constant 0 : index
    %c0_109 = arith.constant 0 : index
    %96 = vector.load %arg4[%c0_105, %c0_106, %c0_107, %c0_108, %c0_109] : memref<1x16x2x16x4xf32, #tpu.memory_space<vmem>>, vector<1x16x1x16x4xf32>
    %97 = vector.shape_cast %96 : vector<1x16x1x16x4xf32> to vector<16x16x4xf32>
    %c0_110 = arith.constant 0 : index
    %c0_111 = arith.constant 0 : index
    %c0_112 = arith.constant 0 : index
    %98 = vector.load %arg7[%c0_110, %c0_111, %c0_112] : memref<4x256x4xf32, #tpu.memory_space<vmem>>, vector<1x256x4xf32>
    %99 = vector.shape_cast %98 : vector<1x256x4xf32> to vector<256x4xf32>
    %100 = vector.broadcast %84 : vector<1x4xf32> to vector<256x4xf32>
    %101 = arith.subf %99, %100 : vector<256x4xf32>
    %102 = vector.broadcast %93 : vector<1x4xf32> to vector<256x4xf32>
    %103 = arith.mulf %101, %102 : vector<256x4xf32>
    %cst_113 = arith.constant 0.000000e+00 : f32
    %104 = vector.broadcast %cst_113 : f32 to vector<256x4xf32>
    %105 = arith.maximumf %103, %104 : vector<256x4xf32>
    %106 = vector.shape_cast %105 : vector<256x4xf32> to vector<16x16x4xf32>
    %107 = vector.extract_strided_slice %95 {offsets = [0, 0, 0], sizes = [16, 16, 4], strides = [1, 1, 1]} : vector<16x16x8xf32> to vector<16x16x4xf32>
    %108 = vector.extract_strided_slice %97 {offsets = [0, 0, 0], sizes = [16, 16, 2], strides = [1, 1, 1]} : vector<16x16x4xf32> to vector<16x16x2xf32>
    %c1_114 = arith.constant 1 : index
    %c0_115 = arith.constant 0 : index
    %c0_116 = arith.constant 0 : index
    %109 = vector.load %arg7[%c1_114, %c0_115, %c0_116] : memref<4x256x4xf32, #tpu.memory_space<vmem>>, vector<1x256x4xf32>
    %110 = vector.shape_cast %109 : vector<1x256x4xf32> to vector<256x4xf32>
    %111 = vector.broadcast %84 : vector<1x4xf32> to vector<256x4xf32>
    %112 = arith.subf %110, %111 : vector<256x4xf32>
    %113 = vector.broadcast %93 : vector<1x4xf32> to vector<256x4xf32>
    %114 = arith.mulf %112, %113 : vector<256x4xf32>
    %cst_117 = arith.constant 0.000000e+00 : f32
    %115 = vector.broadcast %cst_117 : f32 to vector<256x4xf32>
    %116 = arith.maximumf %114, %115 : vector<256x4xf32>
    %117 = vector.shape_cast %116 : vector<256x4xf32> to vector<16x16x4xf32>
    %118 = vector.extract_strided_slice %95 {offsets = [0, 0, 4], sizes = [16, 16, 4], strides = [1, 1, 1]} : vector<16x16x8xf32> to vector<16x16x4xf32>
    %119 = vector.extract_strided_slice %97 {offsets = [0, 0, 2], sizes = [16, 16, 2], strides = [1, 1, 1]} : vector<16x16x4xf32> to vector<16x16x2xf32>
    %120 = tpu.concatenate %106, %107, %108, %117, %118, %119 in 2 : vector<16x16x4xf32>, vector<16x16x4xf32>, vector<16x16x2xf32>, vector<16x16x4xf32>, vector<16x16x4xf32>, vector<16x16x2xf32> -> vector<16x16x20xf32>
    %c0_118 = arith.constant 0 : index
    %c0_119 = arith.constant 0 : index
    %c0_120 = arith.constant 0 : index
    %c0_121 = arith.constant 0 : index
    %c0_122 = arith.constant 0 : index
    %121 = vector.load %arg5[%c0_118, %c0_119, %c0_120, %c0_121, %c0_122] : memref<1x16x2x16x20xf32, #tpu.memory_space<vmem>>, vector<1x16x1x16x20xf32>
    %122 = vector.shape_cast %121 : vector<1x16x1x16x20xf32> to vector<16x16x20xf32>
    %123 = vector.shape_cast %120 : vector<16x16x20xf32> to vector<1x16x1x16x20xf32>
    tpu.vector_store %arg5[%c0_118, %c0_119, %c0_120, %c0_121, %c0_122], %123 {strides = array<i32>} : memref<1x16x2x16x20xf32, #tpu.memory_space<vmem>>, vector<1x16x1x16x20xf32>,
    %c0_123 = arith.constant 0 : index
    %c0_124 = arith.constant 0 : index
    %c1_125 = arith.constant 1 : index
    %c0_126 = arith.constant 0 : index
    %c0_127 = arith.constant 0 : index
    %124 = vector.load %arg3[%c0_123, %c0_124, %c1_125, %c0_126, %c0_127] : memref<1x16x2x16x8xf32, #tpu.memory_space<vmem>>, vector<1x16x1x16x8xf32>
    %125 = vector.shape_cast %124 : vector<1x16x1x16x8xf32> to vector<16x16x8xf32>
    %c0_128 = arith.constant 0 : index
    %c0_129 = arith.constant 0 : index
    %c1_130 = arith.constant 1 : index
    %c0_131 = arith.constant 0 : index
    %c0_132 = arith.constant 0 : index
    %126 = vector.load %arg4[%c0_128, %c0_129, %c1_130, %c0_131, %c0_132] : memref<1x16x2x16x4xf32, #tpu.memory_space<vmem>>, vector<1x16x1x16x4xf32>
    %127 = vector.shape_cast %126 : vector<1x16x1x16x4xf32> to vector<16x16x4xf32>
    %c2_133 = arith.constant 2 : index
    %c0_134 = arith.constant 0 : index
    %c0_135 = arith.constant 0 : index
    %128 = vector.load %arg7[%c2_133, %c0_134, %c0_135] : memref<4x256x4xf32, #tpu.memory_space<vmem>>, vector<1x256x4xf32>
    %129 = vector.shape_cast %128 : vector<1x256x4xf32> to vector<256x4xf32>
    %130 = vector.broadcast %84 : vector<1x4xf32> to vector<256x4xf32>
    %131 = arith.subf %129, %130 : vector<256x4xf32>
    %132 = vector.broadcast %93 : vector<1x4xf32> to vector<256x4xf32>
    %133 = arith.mulf %131, %132 : vector<256x4xf32>
    %cst_136 = arith.constant 0.000000e+00 : f32
    %134 = vector.broadcast %cst_136 : f32 to vector<256x4xf32>
    %135 = arith.maximumf %133, %134 : vector<256x4xf32>
    %136 = vector.shape_cast %135 : vector<256x4xf32> to vector<16x16x4xf32>
    %137 = vector.extract_strided_slice %125 {offsets = [0, 0, 0], sizes = [16, 16, 4], strides = [1, 1, 1]} : vector<16x16x8xf32> to vector<16x16x4xf32>
    %138 = vector.extract_strided_slice %127 {offsets = [0, 0, 0], sizes = [16, 16, 2], strides = [1, 1, 1]} : vector<16x16x4xf32> to vector<16x16x2xf32>
    %c3_137 = arith.constant 3 : index
    %c0_138 = arith.constant 0 : index
    %c0_139 = arith.constant 0 : index
    %139 = vector.load %arg7[%c3_137, %c0_138, %c0_139] : memref<4x256x4xf32, #tpu.memory_space<vmem>>, vector<1x256x4xf32>
    %140 = vector.shape_cast %139 : vector<1x256x4xf32> to vector<256x4xf32>
    %141 = vector.broadcast %84 : vector<1x4xf32> to vector<256x4xf32>
    %142 = arith.subf %140, %141 : vector<256x4xf32>
    %143 = vector.broadcast %93 : vector<1x4xf32> to vector<256x4xf32>
    %144 = arith.mulf %142, %143 : vector<256x4xf32>
    %cst_140 = arith.constant 0.000000e+00 : f32
    %145 = vector.broadcast %cst_140 : f32 to vector<256x4xf32>
    %146 = arith.maximumf %144, %145 : vector<256x4xf32>
    %147 = vector.shape_cast %146 : vector<256x4xf32> to vector<16x16x4xf32>
    %148 = vector.extract_strided_slice %125 {offsets = [0, 0, 4], sizes = [16, 16, 4], strides = [1, 1, 1]} : vector<16x16x8xf32> to vector<16x16x4xf32>
    %149 = vector.extract_strided_slice %127 {offsets = [0, 0, 2], sizes = [16, 16, 2], strides = [1, 1, 1]} : vector<16x16x4xf32> to vector<16x16x2xf32>
    %150 = tpu.concatenate %136, %137, %138, %147, %148, %149 in 2 : vector<16x16x4xf32>, vector<16x16x4xf32>, vector<16x16x2xf32>, vector<16x16x4xf32>, vector<16x16x4xf32>, vector<16x16x2xf32> -> vector<16x16x20xf32>
    %c0_141 = arith.constant 0 : index
    %c0_142 = arith.constant 0 : index
    %c1_143 = arith.constant 1 : index
    %c0_144 = arith.constant 0 : index
    %c0_145 = arith.constant 0 : index
    %151 = vector.load %arg5[%c0_141, %c0_142, %c1_143, %c0_144, %c0_145] : memref<1x16x2x16x20xf32, #tpu.memory_space<vmem>>, vector<1x16x1x16x20xf32>
    %152 = vector.shape_cast %151 : vector<1x16x1x16x20xf32> to vector<16x16x20xf32>
    %153 = vector.shape_cast %150 : vector<16x16x20xf32> to vector<1x16x1x16x20xf32>
    tpu.vector_store %arg5[%c0_141, %c0_142, %c1_143, %c0_144, %c0_145], %153 {strides = array<i32>} : memref<1x16x2x16x20xf32, #tpu.memory_space<vmem>>, vector<1x16x1x16x20xf32>,
    return
  }
  func.func @transform_0(%arg0: i32) -> (i32, i32, i32, i32) {
    %c0_i32 = arith.constant 0 : i32
    %c0_i32_0 = arith.constant 0 : i32
    %c0_i32_1 = arith.constant 0 : i32
    %c0_i32_2 = arith.constant 0 : i32
    return %arg0, %c0_i32, %c0_i32_0, %c0_i32_1 : i32, i32, i32, i32
  }
  func.func @transform_1(%arg0: i32) -> (i32, i32, i32, i32) {
    %c0_i32 = arith.constant 0 : i32
    %c0_i32_0 = arith.constant 0 : i32
    %c0_i32_1 = arith.constant 0 : i32
    %c0_i32_2 = arith.constant 0 : i32
    %c0_i32_3 = arith.constant 0 : i32
    return %c0_i32, %c0_i32_0, %c0_i32_1, %c0_i32_2 : i32, i32, i32, i32
  }
  func.func @transform_2(%arg0: i32) -> (i32, i32, i32, i32, i32) {
    %c0_i32 = arith.constant 0 : i32
    %c0_i32_0 = arith.constant 0 : i32
    %c0_i32_1 = arith.constant 0 : i32
    %c0_i32_2 = arith.constant 0 : i32
    %c0_i32_3 = arith.constant 0 : i32
    return %arg0, %c0_i32, %c0_i32_0, %c0_i32_1, %c0_i32_2 : i32, i32, i32, i32, i32
  }
  func.func @transform_3(%arg0: i32) -> (i32, i32, i32, i32, i32) {
    %c0_i32 = arith.constant 0 : i32
    %c0_i32_0 = arith.constant 0 : i32
    %c0_i32_1 = arith.constant 0 : i32
    %c0_i32_2 = arith.constant 0 : i32
    %c0_i32_3 = arith.constant 0 : i32
    return %arg0, %c0_i32, %c0_i32_0, %c0_i32_1, %c0_i32_2 : i32, i32, i32, i32, i32
  }
  func.func @transform_4(%arg0: i32) -> (i32, i32, i32, i32, i32) {
    %c0_i32 = arith.constant 0 : i32
    %c0_i32_0 = arith.constant 0 : i32
    %c0_i32_1 = arith.constant 0 : i32
    %c0_i32_2 = arith.constant 0 : i32
    %c0_i32_3 = arith.constant 0 : i32
    return %arg0, %c0_i32, %c0_i32_0, %c0_i32_1, %c0_i32_2 : i32, i32, i32, i32, i32
  }
}

</mosaic_0001>

<bundles_post_ra>
// kernel: unet_up_forward.1
= control target key start
LH: loop header
LB: loop body
LE: loop exit
PB: predicated region body
PF: predicated region fallthrough
CT: control target
= control target key end

     0   :  { %9 = vsyncpa [#allocation5], 0  ;;  %s13713_s0 = inlined_call_operand.hbm [shape: f32[2,16,16,4], index: 0, kind: input, shape index: {}]   ;;  %s13714_s1 = inlined_call_operand.hbm [shape: f32[2,2,16,4], index: 1, kind: input, shape index: {}]   ;;  %s13715_s2 = inlined_call_operand.hbm [shape: f32[2,16,2,16,8], index: 2, kind: input, shape index: {}]   ;;  %s13716_s3 = inlined_call_operand.hbm [shape: f32[2,16,2,16,4], index: 3, kind: input, shape index: {}]   ;;  %s13717_s4 = inlined_call_operand.hbm [shape: f32[2,16,2,16,20], index: 4, kind: output, shape index: {}]  }
   0x1   :  { %11 = vsyncpa [#allocation5 + $0x1], 0 }
   0x2   :  { %12 = vsyncpa [#allocation8], 0 }
   0x3   :  { %13 = vsyncpa [#allocation6], 0 }
   0x4   :  { %15 = vsyncpa [#allocation6 + $0x1], 0  ;;  %s8359_s15 = smov 0   ;;  %s8361_s16 = smov 0  }
   0x5   :  { %s8363_s17 = smov 0   ;;  %s8365_s18 = smov 0  }
   0x6 LB: > { %s8380_s19 = sadd.s32 1, %s8318_s18   ;;  %s28_s20 = sadd.s32 1, %s8314_s17  ;;  %s8318_s18 = sphi %s8365_s18, %s14500_s18   ;;  %s8314_s17 = sphi %s8363_s17, %s14499_s17   ;;  %s8310_s16 = sphi %s8361_s16, %s14498_s16   ;;  %s8306_s15 = sphi %s8359_s15, %s14497_s15  }
   0x7   : > { %s25_s21 = ssub.s32 %s8318_s18, %s8380_s19  ;;  %p13718_p0 = scmp.ne.s32.totalorder %s8314_s17, %s8310_s16 }
   0x8   : > { %p26_p1 = scmp.eq.s32.totalorder %s25_s21, 0  ;;  %p36_p2 = scmp.eq.s32.totalorder %s8318_s18, 0 }
   0x9   : > { %p7947_p5 = scmp.lt.s32.totalorder %s8318_s18, 2  ;;  %s177_s23 = sand.u32 1, %s8318_s18  }
   0xa   : > { %s8389_s22 = scalar_select %p26_p1, %s8314_s17, %s28_s20  }
   0xb   : > { %p37_p3 = por %p36_p2, %p13718_p0  ;;  %s179_s24 = sand.u32 1, %s8314_s17  }
   0xc   : > { %s7308_s25 = sshll.u32 %s179_s24, 8  ;;  %s7552_s26 = sshll.u32 %s8318_s18, 12 }
   0xd   : > { %s8402_s29 = scalar_lea.hbm %s13713_s0, %s7552_s26  ;;  %s181_s30 = scalar_lea.vmem [#allocation4], %s7308_s25 }
   0xe   : > { %s188_s5 = sshll.u32 %s181_s30, 4  ;;  %p8404_p6 = pnand %p7947_p5, %p37_p3  ;;  %s8408_s5 = int_to_ptr.vmem [resolvable:$true] %s188_s5 }
   0xf   : > { %s8410_s7 = sshll.u32 %s179_s24, 9  ;;  %s8412_s8 = scalar_lea.sflag [#allocation5], %s177_s23 }
  0x10   : > { %s8126_s9 = scalar_lea.hbm %s8402_s29, 4096  ;;  %p8418_p8 = pneg %p8404_p6 }
  0x11   : > { %p8127_p7 = scmp.ne.s32.totalorder %s8402_s29, %s8126_s9  ;;  %s8131_s13 = scalar_lea.hbm %s13713_s0, 8192 }
  0x12   : > { %p8132_p11 = scmp.lt.u32.totalorder %s8402_s29, %s13713_s0  ;;  %p8133_p12 = scmp.lt.u32.totalorder %s8131_s13, %s8126_s9 }
  0x13   : > { %p8129_p9 = pnand %p8418_p8, %p8127_p7  ;;  %p8135_p1 = scmp.lt.u32.totalorder %s8126_s9, %s8402_s29 }
  0x14   : > { %p8134_p13 = por %p8133_p12, %p8132_p11 }
  0x15   : > { %p8130_p10 = pneg %p8129_p9 }
  0x16   : > { %p8136_p2 = por %p8135_p1, %p8134_p13 }
  0x18   : > { %p8137_p3 = pnand %p8136_p2, %p8130_p10 }
  0x1a   : > { %8140 = shalt.err (!%p8137_p3)
}
  0x1b   : > { %s8141_s21 = scalar_lea.vmem %s8408_s5, 4096  ;;  %s8320_s23 = smov [#allocation4]  }
  0x1c   : > { %p8142_p5 = scmp.ne.s32.totalorder %s8408_s5, %s8141_s21  ;;  %s8146_s24 = sshll.u32 %s8320_s23, 4  ;;  %s8147_s24 = int_to_ptr.vmem [resolvable:$false] %s8146_s24 }
  0x1d   : > { %s8148_s25 = scalar_lea.vmem %s8147_s24, 8192  ;;  %p8149_p4 = scmp.lt.s32.totalorder %s8408_s5, %s8147_s24 }
  0x1e   : > { %p8144_p7 = pnand %p8142_p5, %p8418_p8  ;;  %p8150_p0 = scmp.lt.s32.totalorder %s8148_s25, %s8141_s21 }
  0x20   : > { %p8145_p9 = pneg %p8144_p7  ;;  %p8151_p11 = por %p8150_p0, %p8149_p4 }
  0x22   : > { %p8152_p12 = pnand %p8151_p11, %p8145_p9 }
  0x24   : > { %8155 = shalt.err (!%p8152_p12)
}
  0x25   : > { %s13721_s26 = smov 128   ;;  %s8322_s27 = smov 8  }
  0x26   : > { %7935 = dma.hbm_to_vmem [thread:$0]  (!%p8404_p6), %s8402_s29, 4096, %s8408_s5, %s8412_s8, %s13721_s26, %s13721_s26, %s8322_s27  }
  0x27   : > { %s7553_s28 = sshll.u32 %s8318_s18, 13  ;;  %s202_s30 = scalar_lea.vmem [#allocation9], %s8410_s7 }
  0x28   : > { %s209_s9 = sshll.u32 %s202_s30, 4  ;;  %s8452_s13 = scalar_lea.hbm %s13715_s2, %s7553_s28  ;;  %s8454_s9 = int_to_ptr.vmem [resolvable:$true] %s209_s9 }
  0x29   : > { %s8156_s14 = scalar_lea.hbm %s8452_s13, 8192  ;;  %s8161_s20 = scalar_lea.hbm %s13715_s2, 16384 }
  0x2a   : > { %p8157_p0 = scmp.ne.s32.totalorder %s8452_s13, %s8156_s14  ;;  %p8162_p13 = scmp.lt.u32.totalorder %s8452_s13, %s13715_s2 }
  0x2b   : > { %p8163_p1 = scmp.lt.u32.totalorder %s8161_s20, %s8156_s14  ;;  %p8165_p3 = scmp.lt.u32.totalorder %s8156_s14, %s8452_s13 }
  0x2c   : > { %p8159_p4 = pnand %p8157_p0, %p8418_p8 }
  0x2d   : > { %p8164_p2 = por %p8163_p1, %p8162_p13 }
  0x2e   : > { %p8160_p10 = pneg %p8159_p4 }
  0x2f   : > { %p8166_p5 = por %p8165_p3, %p8164_p2 }
  0x31   : > { %p8167_p7 = pnand %p8166_p5, %p8160_p10 }
  0x33   : > { %8170 = shalt.err (!%p8167_p7)
}
  0x34   : > { %s8171_s24 = scalar_lea.vmem %s8454_s9, 8192  ;;  %s8323_s25 = smov [#allocation9]  }
  0x35   : > { %p8172_p9 = scmp.ne.s32.totalorder %s8454_s9, %s8171_s24  ;;  %s8176_s30 = sshll.u32 %s8323_s25, 4  ;;  %s8177_s30 = int_to_ptr.vmem [resolvable:$false] %s8176_s30 }
  0x36   : > { %s8178_s11 = scalar_lea.vmem %s8177_s30, 16384  ;;  %p8179_p0 = scmp.lt.s32.totalorder %s8454_s9, %s8177_s30 }
  0x37   : > { %p8174_p11 = pnand %p8172_p9, %p8418_p8  ;;  %p8180_p4 = scmp.lt.s32.totalorder %s8178_s11, %s8171_s24 }
  0x39   : > { %p8175_p12 = pneg %p8174_p11  ;;  %p8181_p13 = por %p8180_p4, %p8179_p0 }
  0x3b   : > { %p8182_p1 = pnand %p8181_p13, %p8175_p12 }
  0x3d   : > { %8185 = shalt.err (!%p8182_p1)
}
  0x3e   : > { %7938 = dma.hbm_to_vmem [thread:$0]  (!%p8404_p6), %s8452_s13, 8192, %s8454_s9, %s8412_s8, %s13721_s26, %s13721_s26, %s8322_s27  }
  0x3f   : > { %s8482_s12 = sadd.s32 4294967295, %s8318_s18   ;;  %s7304_s14 = sadd.s32 4294967294, %s8318_s18  }
  0x40   : > { %p41_p10 = scmp.ne.s32.totalorder %s8310_s16, %s8306_s15  ;;  %p13720_p2 = scmp.eq.s32.totalorder %s8482_s12, 0 }
  0x41   : > { %p138_p3 = scmp.eq.s32.totalorder %s8482_s12, 1  ;;  %p144_p5 = scmp.eq.s32.totalorder %s7304_s14, 1 }
  0x42   : > { %p8491_p7 = por %p13720_p2, %p41_p10  ;;  %p7305_p9 = scmp.ge.s32.totalorder %s8318_s18, 1 }
  0x43   : > { %p13801_p11 = scmp.ne.s32.totalorder %s8314_s17, %s8310_s16  ;;  %p8503_p0 = por %p144_p5, %p41_p10 }
  0x44   : > { %s13800_s29 = scalar_select %p8491_p7, 1, 0 }
  0x45   : > { %p8499_p12 = por %p138_p3, %p13801_p11  ;;  %p151_p4 = scmp.lt.s32.totalorder %s8318_s18, 3 }
  0x46   : > { %s13803_s13 = scalar_select %p8503_p0, 1, 0 }
  0x47   : > { %s13802_s9 = scalar_select %p8499_p12, 1, 0 }
  0x48   : > { %p8508_p13 = pnand %p7305_p9, %p151_p4  ;;  %s8324_s20 = smov [#allocation7]  }
  0x49   : > { %s163_s21 = sshll.u32 %s8324_s20, 4  ;;  %s8517_s25 = scalar_lea.hbm %s13716_s3, %s7553_s28  ;;  %s8524_s21 = int_to_ptr.vmem [resolvable:$true] %s163_s21 }
  0x4a   : > { %s13804_s5 = scalar_select %p8508_p13, 1, 0 }
  0x4b   : > { %p7928_p1 = pneg %p8508_p13  ;;  %s223_s30 = scalar_lea.vmem [#allocation10], %s8410_s7 }
  0x4c   : > { %s230_s11 = sshll.u32 %s223_s30, 4  ;;  %s8186_s20 = scalar_lea.hbm %s8517_s25, 8192  ;;  %s8522_s11 = int_to_ptr.vmem [resolvable:$true] %s230_s11 }
  0x4d   : > { %p8528_p10 = pnand %p7928_p1, %p13720_p2  ;;  %p8187_p3 = scmp.ne.s32.totalorder %s8517_s25, %s8186_s20 }
  0x4e   : > { %s8191_s24 = scalar_lea.hbm %s13716_s3, 16384  ;;  %p8192_p11 = scmp.lt.u32.totalorder %s8517_s25, %s13716_s3 }
  0x4f   : > { %s13805_s14 = scalar_select %p8528_p10, 1, 0 }
  0x50   : > { %p8189_p5 = pnand %p8187_p3, %p8418_p8  ;;  %p8193_p4 = scmp.lt.u32.totalorder %s8191_s24, %s8186_s20 }
  0x51   : > { %p8195_p12 = scmp.lt.u32.totalorder %s8186_s20, %s8517_s25 }
  0x52   : > { %p8190_p9 = pneg %p8189_p5  ;;  %p8194_p0 = por %p8193_p4, %p8192_p11 }
  0x54   : > { %p8196_p1 = por %p8195_p12, %p8194_p0 }
  0x56   : > { %p8197_p2 = pnand %p8196_p1, %p8190_p9 }
  0x58   : > { %8200 = shalt.err (!%p8197_p2)
}
  0x59   : > { %s8201_s26 = scalar_lea.vmem %s8522_s11, 8192  ;;  %s8325_s28 = smov [#allocation10]  }
  0x5a   : > { %p8202_p3 = scmp.ne.s32.totalorder %s8522_s11, %s8201_s26  ;;  %s8206_s23 = sshll.u32 %s8325_s28, 4  ;;  %s8207_s23 = int_to_ptr.vmem [resolvable:$false] %s8206_s23 }
  0x5b   : > { %s8208_s7 = scalar_lea.vmem %s8207_s23, 16384  ;;  %p8209_p13 = scmp.lt.s32.totalorder %s8522_s11, %s8207_s23 }
  0x5c   : > { %p8204_p5 = pnand %p8202_p3, %p8418_p8  ;;  %p8210_p10 = scmp.lt.s32.totalorder %s8208_s7, %s8201_s26 }
  0x5e   : > { %p8205_p7 = pneg %p8204_p5  ;;  %p8211_p11 = por %p8210_p10, %p8209_p13 }
  0x60   : > { %p8212_p4 = pnand %p8211_p11, %p8205_p7 }
  0x62   : > { %8215 = shalt.err (!%p8212_p4)
}
  0x63   : > { %s13806_s20 = smov 128   ;;  %s8216_s30 = scalar_lea.hbm %s13714_s1, 1024 }
  0x64   : > { %7941 = dma.hbm_to_vmem [thread:$0]  (!%p8404_p6), %s8517_s25, 8192, %s8522_s11, %s8412_s8, %s13806_s20, %s13806_s20, %s8322_s27  }
  0x65   : > { %p8217_p8 = scmp.ne.s32.totalorder %s13714_s1, %s8216_s30  ;;  %p13807_p2 = scmp.ne.s32.totalorder %s13805_s14, 0 }
  0x66   : > { %p8223_p13 = scmp.lt.u32.totalorder %s8216_s30, %s13714_s1 }
  0x67   : > { %p8218_p7 = pneg %p13807_p2 }
  0x69   : > { %p8219_p12 = pnand %p8218_p7, %p8217_p8 }
  0x6b   : > { %p8220_p0 = pneg %p8219_p12 }
  0x6d   : > { %p8225_p10 = pnand %p8223_p13, %p8220_p0 }
  0x6f   : > { %8228 = shalt.err (!%p8225_p10)
}
  0x70   : > { %s8229_s8 = scalar_lea.vmem %s8524_s21, 1024  ;;  %p8237_p3 = scmp.lt.s32.totalorder %s8524_s21, %s8524_s21 }
  0x71   : > { %p8230_p6 = scmp.ne.s32.totalorder %s8524_s21, %s8229_s8  ;;  %p8238_p5 = scmp.lt.s32.totalorder %s8229_s8, %s8229_s8 }
  0x73   : > { %p8232_p9 = pnand %p8230_p6, %p8218_p7  ;;  %p8239_p11 = por %p8238_p5, %p8237_p3 }
  0x75   : > { %p8233_p1 = pneg %p8232_p9 }
  0x77   : > { %p8240_p4 = pnand %p8239_p11, %p8233_p1 }
  0x79   : > { %8243 = shalt.err (!%p8240_p4)
}
  0x7a   : > { %7931 = dma.hbm_to_vmem [thread:$0]  (!%p13807_p2), %s13714_s1, 1024, %s8524_s21, [#allocation8], %s13806_s20, %s13806_s20, %s8322_s27  }
  0x7b   : > { %p13808_p8 = scmp.ne.s32.totalorder %s13804_s5, 0 }
  0x7d   : > { %242 = sbr.rel (%p13808_p8) target bundleno = 1955 (0x7a3), region = 36 }
  0x84   : > { %s244_s7 = sand.u32 1, %s8482_s12   ;;  %s8585_s10 = sand.u32 1, %s8310_s16  }
  0x85   : > { %s7318_s24 = sshll.u32 %s8585_s10, 8  ;;  %s245_s14 = scalar_lea.sflag [#allocation5], %s244_s7 }
  0x86   : > { %s8588_s30 = scalar_lea.vmem [#allocation4], %s7318_s24  ;;  %p13809_p7 = scmp.ne.s32.totalorder %s13800_s29, 0 }
  0x88   : > { %8289 = dma.done.wait (%p13809_p7), %s245_s14, 4096  }
  0x89   : > { %8291 = vsyncadd (%p13809_p7), %s245_s14, 4294963200  ;;  %p13810_p2 = scmp.eq.s32.totalorder %s8482_s12, 0 }
  0x8b   : > { %8293 = dma.done.wait (%p13810_p2), [#allocation8], 1024   ;;  %p13811_p12 = pmov %p13810_p2 }
  0x8c   : > { %s8599_s27 = sshll.u32 %s8585_s10, 9 }
  0x8d   : > { %8295 = vsyncadd (%p13811_p12), [#allocation8], 4294966272  ;;  %s8602_s5 = scalar_lea.vmem [#allocation9], %s8599_s27 }
  0x8e   : > { %8297 = dma.done.wait (%p13809_p7), %s245_s14, 16384  }
  0x8f   : > { %8299 = vsyncadd (%p13809_p7), %s245_s14, 4294950912  ;;  %vm305_vm0 = vcmask 31744   ;;  %vm308_vm1 = vcmask 25600   ;;  %v8326_v0 = vmov 0.0   ;;  %v361_v1 = vld [vmem:[%s8588_s30] sm:$0xff]  ;;  %v363_v2 = vld [vmem:[%s8588_s30 + $0x10] sm:$0xff] }
  0x90   : > { %306 = vst.msk [vmem:[#allocation2] sm:$0xff] %vm305_vm0, %v8326_v0  ;;  %307 = vst.msk [vmem:[#allocation2 + $0x8] sm:$0xff] %vm305_vm0, %v8326_v0  ;;  %v362_v3 = vld [vmem:[%s8588_s30 + $0x8] sm:$0xff]  ;;  %v365_v6 = vld [vmem:[%s8588_s30 + $0x20] sm:$0xff]  ;;  %s8327_s29 = smov 4   ;;  %s8328_s21 = smov 8  }
  0x91   : > { %310 = vst.msk [vmem:[#allocation2 + $0x18] sm:$0xff] %vm305_vm0, %v8326_v0  ;;  %311 = vst.msk [vmem:[#allocation2 + $0x20] sm:$0xff] %vm305_vm0, %v8326_v0  ;;  %v364_v7 = vld [vmem:[%s8588_s30 + $0x18] sm:$0xff]  ;;  %v367_v8 = vld [vmem:[%s8588_s30 + $0x30] sm:$0xff]  ;;  %s8329_s20 = smov 12   ;;  %vm970_vm2 = vcmask 64512  }
  0x92   : > { %313 = vst.msk [vmem:[#allocation2 + $0x30] sm:$0xff] %vm305_vm0, %v8326_v0  ;;  %314 = vst.msk [vmem:[#allocation2 + $0x38] sm:$0xff] %vm305_vm0, %v8326_v0  ;;  %v366_v9 = vld [vmem:[%s8588_s30 + $0x28] sm:$0xff]  ;;  %v369_v10 = vld [vmem:[%s8588_s30 + $0x40] sm:$0xff]  ;;  %vm1003_vm3 = vcmask 97280   ;;  %vm1038_vm4 = vcmask 130048  }
  0x93   : > { %316 = vst.msk [vmem:[#allocation2 + $0x48] sm:$0xff] %vm305_vm0, %v8326_v0  ;;  %317 = vst.msk [vmem:[#allocation2 + $0x50] sm:$0xff] %vm305_vm0, %v8326_v0  ;;  %v368_v11 = vld [vmem:[%s8588_s30 + $0x38] sm:$0xff]  ;;  %v371_v12 = vld [vmem:[%s8588_s30 + $0x50] sm:$0xff]  ;;  %s11189_s28 = scalar_lea.vmem [#allocation10], %s8599_s27  ;;  %s8330_s23 = smov 10  }
  0x94   : > { %319 = vst.msk [vmem:[#allocation2 + $0x60] sm:$0xff] %vm305_vm0, %v8326_v0  ;;  %320 = vst.msk [vmem:[#allocation2 + $0x68] sm:$0xff] %vm305_vm0, %v8326_v0  ;;  %v370_v13 = vld [vmem:[%s8588_s30 + $0x48] sm:$0xff]  ;;  %v373_v14 = vld [vmem:[%s8588_s30 + $0x60] sm:$0xff]  ;;  %s8331_s6 = smov 16   ;;  %vm5944_vm5 = vcmask 80896  }
  0x95   : > { %322 = vst.msk [vmem:[#allocation2 + $0x78] sm:$0xff] %vm305_vm0, %v8326_v0  ;;  %323 = vst.msk [vmem:[#allocation2 + $0x80] sm:$0xff] %vm305_vm0, %v8326_v0  ;;  %v372_v15 = vld [vmem:[%s8588_s30 + $0x58] sm:$0xff]  ;;  %v375_v16 = vld [vmem:[%s8588_s30 + $0x70] sm:$0xff]  ;;  %vm5977_vm6 = vcmask 113664   ;;  %vm6010_vm7 = vcmask 146432  }
  0x96   : > { %325 = vst.msk [vmem:[#allocation2 + $0x90] sm:$0xff] %vm305_vm0, %v8326_v0  ;;  %326 = vst.msk [vmem:[#allocation2 + $0x98] sm:$0xff] %vm305_vm0, %v8326_v0  ;;  %v374_v17 = vld [vmem:[%s8588_s30 + $0x68] sm:$0xff]  ;;  %v377_v18 = vld [vmem:[%s8588_s30 + $0x80] sm:$0xff]  ;;  %vm6043_vm8 = vcmask 162816   ;;  %s12196_s26 = scalar_lea.vmem [#allocation11], %s8599_s27 }
  0x97   : > { %328 = vst.msk [vmem:[#allocation2 + $0xa8] sm:$0xff] %vm305_vm0, %v8326_v0  ;;  %329 = vst.msk [vmem:[#allocation2 + $0xb0] sm:$0xff] %vm305_vm0, %v8326_v0  ;;  %v458_v4 = vld [vmem:[#allocation2 + $0x1] sm:$0xff]  ;;  %v378_v21 = vld [vmem:[%s8588_s30 + $0x88] sm:$0xff]  ;;  %s7555_s8 = sshll.u32 %s8482_s12, 13  ;;  %s7181_s25 = sshll.u32 %s12196_s26, 4  ;;  %s13662_s25 = int_to_ptr.vmem [resolvable:$true] %s7181_s25 }
  0x98   : > { %331 = vst.msk [vmem:[#allocation2 + $0xc0] sm:$0xff] %vm305_vm0, %v8326_v0  ;;  %332 = vst.msk [vmem:[#allocation2 + $0xc8] sm:$0xff] %vm305_vm0, %v8326_v0  ;;  %586 = vrot.lane.b32.xlu0 %v458_v4, %s8327_s29  ;;  %v376_v19 = vld [vmem:[%s8588_s30 + $0x78] sm:$0xff]  ;;  %v379_v20 = vld [vmem:[%s8588_s30 + $0x90] sm:$0xff]  ;;  %s13654_s24 = scalar_lea.hbm %s13717_s4, %s7555_s8  ;;  %s7168_s12 = scalar_lea.sflag [#allocation6], %s8585_s10 }
  0x99   : > { %334 = vst.msk [vmem:[#allocation2 + $0xd8] sm:$0xff] %vm305_vm0, %v8326_v0  ;;  %335 = vst.msk [vmem:[#allocation2 + $0xe0] sm:$0xff] %vm305_vm0, %v8326_v0  ;;  %v381_v22 = vld [vmem:[%s8588_s30 + $0xa0] sm:$0xff]  ;;  %v380_v23 = vld [vmem:[%s8588_s30 + $0x98] sm:$0xff]  ;;  %s8244_s14 = scalar_lea.vmem %s13662_s25, 8192  ;;  %p14494_p13 = scmp.ne.s32.totalorder %s13802_s9, 0 }
  0x9a   : > { %337 = vst.msk [vmem:[#allocation2 + $0xf0] sm:$0xff] %vm305_vm0, %v8326_v0  ;;  %338 = vst.msk [vmem:[#allocation2 + $0xf8] sm:$0xff] %vm305_vm0, %v8326_v0  ;;  %v383_v24 = vld [vmem:[%s8588_s30 + $0xb0] sm:$0xff]  ;;  %v382_v27 = vld [vmem:[%s8588_s30 + $0xa8] sm:$0xff]  ;;  %p8245_p0 = scmp.ne.s32.totalorder %s13662_s25, %s8244_s14 }
  0x9b   : > { %340 = vst.msk [vmem:[#allocation2 + $0x108] sm:$0xff] %vm305_vm0, %v8326_v0  ;;  %341 = vst.msk [vmem:[#allocation2 + $0x110] sm:$0xff] %vm305_vm0, %v8326_v0  ;;  %v385_v28 = vld [vmem:[%s8588_s30 + $0xc0] sm:$0xff]  ;;  %v384_v33 = vld [vmem:[%s8588_s30 + $0xb8] sm:$0xff] }
  0x9c   : > { %343 = vst.msk [vmem:[#allocation2 + $0x120] sm:$0xff] %vm305_vm0, %v8326_v0  ;;  %344 = vst.msk [vmem:[#allocation2 + $0x128] sm:$0xff] %vm305_vm0, %v8326_v0  ;;  %v387_v34 = vld [vmem:[%s8588_s30 + $0xd0] sm:$0xff]  ;;  %v386_v35 = vld [vmem:[%s8588_s30 + $0xc8] sm:$0xff]  ;;  %p8246_p10 = pnand %p8245_p0, %p14494_p13 }
  0x9d   : > { %346 = vst.msk [vmem:[#allocation2 + $0x138] sm:$0xff] %vm305_vm0, %v8326_v0  ;;  %347 = vst.msk [vmem:[#allocation2 + $0x140] sm:$0xff] %vm305_vm0, %v8326_v0  ;;  %v389_v36 = vld [vmem:[%s8588_s30 + $0xe0] sm:$0xff]  ;;  %v388_v38 = vld [vmem:[%s8588_s30 + $0xd8] sm:$0xff] }
  0x9e   : > { %349 = vst.msk [vmem:[#allocation2 + $0x150] sm:$0xff] %vm305_vm0, %v8326_v0  ;;  %350 = vst.msk [vmem:[#allocation2 + $0x158] sm:$0xff] %vm305_vm0, %v8326_v0  ;;  %v390_v39 = vld [vmem:[%s8588_s30 + $0xe8] sm:$0xff]  ;;  %v391_v47 = vld [vmem:[%s8588_s30 + $0xf0] sm:$0xff]  ;;  %p8247_p6 = pneg %p8246_p10 }
  0x9f   : > { %352 = vst.msk [vmem:[#allocation2 + $0x168] sm:$0xff] %vm305_vm0, %v8326_v0  ;;  %353 = vst.msk [vmem:[#allocation2 + $0x170] sm:$0xff] %vm305_vm0, %v8326_v0  ;;  %v392_v48 = vld [vmem:[%s8588_s30 + $0xf8] sm:$0xff]  ;;  %s8332_s30 = smov [#allocation11]  }
  0xa0   : > { %355 = vst.msk [vmem:[#allocation2 + $0x180] sm:$0xff] %vm305_vm0, %v8326_v0  ;;  %356 = vst.msk [vmem:[#allocation2 + $0x188] sm:$0xff] %vm305_vm0, %v8326_v0  ;;  %s8248_s27 = sshll.u32 %s8332_s30, 4  ;;  %s8249_s27 = int_to_ptr.vmem [resolvable:$false] %s8248_s27 }
  0xa1   : > { %358 = vst.msk [vmem:[#allocation2 + $0x198] sm:$0xff] %vm305_vm0, %v8326_v0  ;;  %359 = vst.msk [vmem:[#allocation2 + $0x1a0] sm:$0xff] %vm305_vm0, %v8326_v0  ;;  %p8251_p9 = scmp.lt.s32.totalorder %s13662_s25, %s8249_s27 }
  0xa2   : > { %309 = vst.msk [vmem:[#allocation2 + $0x10] sm:$0x3] %vm308_vm1, %v8326_v0  ;;  %312 = vst.msk [vmem:[#allocation2 + $0x28] sm:$0x3] %vm308_vm1, %v8326_v0 }
  0xa3   : > { %315 = vst.msk [vmem:[#allocation2 + $0x40] sm:$0x3] %vm308_vm1, %v8326_v0  ;;  %318 = vst.msk [vmem:[#allocation2 + $0x58] sm:$0x3] %vm308_vm1, %v8326_v0 }
  0xa4   : > { %321 = vst.msk [vmem:[#allocation2 + $0x70] sm:$0x3] %vm308_vm1, %v8326_v0  ;;  %324 = vst.msk [vmem:[#allocation2 + $0x88] sm:$0x3] %vm308_vm1, %v8326_v0 }
  0xa5   : > { %327 = vst.msk [vmem:[#allocation2 + $0xa0] sm:$0x3] %vm308_vm1, %v8326_v0  ;;  %330 = vst.msk [vmem:[#allocation2 + $0xb8] sm:$0x3] %vm308_vm1, %v8326_v0 }
  0xa6   : > { %333 = vst.msk [vmem:[#allocation2 + $0xd0] sm:$0x3] %vm308_vm1, %v8326_v0  ;;  %336 = vst.msk [vmem:[#allocation2 + $0xe8] sm:$0x3] %vm308_vm1, %v8326_v0 }
  0xa7   : > { %339 = vst.msk [vmem:[#allocation2 + $0x100] sm:$0x3] %vm308_vm1, %v8326_v0  ;;  %342 = vst.msk [vmem:[#allocation2 + $0x118] sm:$0x3] %vm308_vm1, %v8326_v0 }
  0xa8   : > { %345 = vst.msk [vmem:[#allocation2 + $0x130] sm:$0x3] %vm308_vm1, %v8326_v0  ;;  %348 = vst.msk [vmem:[#allocation2 + $0x148] sm:$0x3] %vm308_vm1, %v8326_v0 }
  0xa9   : > { %351 = vst.msk [vmem:[#allocation2 + $0x160] sm:$0x3] %vm308_vm1, %v8326_v0  ;;  %354 = vst.msk [vmem:[#allocation2 + $0x178] sm:$0x3] %vm308_vm1, %v8326_v0  ;;  %v459_v5 = vld [vmem:[#allocation2 + $0x9] sm:$0xff] }
  0xaa   : > { %357 = vst.msk [vmem:[#allocation2 + $0x190] sm:$0x3] %vm308_vm1, %v8326_v0  ;;  %360 = vst.msk [vmem:[#allocation2 + $0x1a8] sm:$0x3] %vm308_vm1, %v8326_v0  ;;  %588 = vrot.lane.b32.xlu0 %v459_v5, %s8327_s29 }
  0xab   : > { %394 = vst.msk [vmem:[#allocation2 + $0x19] sm:$0xff] %vm305_vm0, %v361_v1  ;;  %396 = vst.msk [vmem:[#allocation2 + $0x31] sm:$0xff] %vm305_vm0, %v363_v2 }
  0xac   : > { %395 = vst.msk [vmem:[#allocation2 + $0x21] sm:$0xff] %vm305_vm0, %v362_v3  ;;  %398 = vst.msk [vmem:[#allocation2 + $0x49] sm:$0xff] %vm305_vm0, %v365_v6 }
  0xad   : > { %397 = vst.msk [vmem:[#allocation2 + $0x39] sm:$0xff] %vm305_vm0, %v364_v7  ;;  %400 = vst.msk [vmem:[#allocation2 + $0x61] sm:$0xff] %vm305_vm0, %v367_v8 }
  0xae   : > { %399 = vst.msk [vmem:[#allocation2 + $0x51] sm:$0xff] %vm305_vm0, %v366_v9  ;;  %402 = vst.msk [vmem:[#allocation2 + $0x79] sm:$0xff] %vm305_vm0, %v369_v10 }
  0xaf   : > { %401 = vst.msk [vmem:[#allocation2 + $0x69] sm:$0xff] %vm305_vm0, %v368_v11  ;;  %404 = vst.msk [vmem:[#allocation2 + $0x91] sm:$0xff] %vm305_vm0, %v371_v12 }
  0xb0   : > { %403 = vst.msk [vmem:[#allocation2 + $0x81] sm:$0xff] %vm305_vm0, %v370_v13  ;;  %406 = vst.msk [vmem:[#allocation2 + $0xa9] sm:$0xff] %vm305_vm0, %v373_v14 }
  0xb1   : > { %405 = vst.msk [vmem:[#allocation2 + $0x99] sm:$0xff] %vm305_vm0, %v372_v15  ;;  %408 = vst.msk [vmem:[#allocation2 + $0xc1] sm:$0xff] %vm305_vm0, %v375_v16 }
  0xb2   : > { %407 = vst.msk [vmem:[#allocation2 + $0xb1] sm:$0xff] %vm305_vm0, %v374_v17  ;;  %410 = vst.msk [vmem:[#allocation2 + $0xd9] sm:$0xff] %vm305_vm0, %v377_v18  ;;  %v8705_v25 = vld [vmem:[#allocation2 + $0x19] sm:$0xff]  ;;  %v8707_v26 = vld [vmem:[#allocation2 + $0x31] sm:$0xff] }
  0xb3   : > { %409 = vst.msk [vmem:[#allocation2 + $0xc9] sm:$0xff] %vm305_vm0, %v376_v19  ;;  %412 = vst.msk [vmem:[#allocation2 + $0xf1] sm:$0xff] %vm305_vm0, %v379_v20  ;;  %590 = vrot.lane.b32.xlu1 %v8705_v25, %s8327_s29  ;;  %594 = vrot.lane.b32.xlu0 %v8707_v26, %s8327_s29  ;;  %v8718_v29 = vld [vmem:[#allocation2 + $0x21] sm:$0xff]  ;;  %v8722_v30 = vld [vmem:[#allocation2 + $0x49] sm:$0xff] }
  0xb4   : > { %411 = vst.msk [vmem:[#allocation2 + $0xe1] sm:$0xff] %vm305_vm0, %v378_v21  ;;  %414 = vst.msk [vmem:[#allocation2 + $0x109] sm:$0xff] %vm305_vm0, %v381_v22  ;;  %v8728_v31 = vld [vmem:[#allocation2 + $0x39] sm:$0xff]  ;;  %v8730_v32 = vld [vmem:[#allocation2 + $0x61] sm:$0xff] }
  0xb5   : > { %413 = vst.msk [vmem:[#allocation2 + $0xf9] sm:$0xff] %vm305_vm0, %v380_v23  ;;  %416 = vst.msk [vmem:[#allocation2 + $0x121] sm:$0xff] %vm305_vm0, %v383_v24  ;;  %v8743_v37 = vld [vmem:[#allocation2 + $0x51] sm:$0xff]  ;;  %v8748_v40 = vld [vmem:[#allocation2 + $0x79] sm:$0xff] }
  0xb6   : > { %415 = vst.msk [vmem:[#allocation2 + $0x111] sm:$0xff] %vm305_vm0, %v382_v27  ;;  %418 = vst.msk [vmem:[#allocation2 + $0x139] sm:$0xff] %vm305_vm0, %v385_v28  ;;  %v8756_v41 = vld [vmem:[#allocation2 + $0x69] sm:$0xff]  ;;  %v8758_v42 = vld [vmem:[#allocation2 + $0x91] sm:$0xff] }
  0xb7   : > { %592 = vrot.lane.b32.xlu1 %v8718_v29, %s8327_s29  ;;  %598 = vrot.lane.b32.xlu0 %v8722_v30, %s8327_s29  ;;  %417 = vst.msk [vmem:[#allocation2 + $0x129] sm:$0xff] %vm305_vm0, %v384_v33  ;;  %420 = vst.msk [vmem:[#allocation2 + $0x151] sm:$0xff] %vm305_vm0, %v387_v34  ;;  %v8764_v43 = vld [vmem:[#allocation2 + $0x81] sm:$0xff]  ;;  %v8766_v44 = vld [vmem:[#allocation2 + $0xa9] sm:$0xff] }
  0xb8   : > { %419 = vst.msk [vmem:[#allocation2 + $0x141] sm:$0xff] %vm305_vm0, %v386_v35  ;;  %422 = vst.msk [vmem:[#allocation2 + $0x169] sm:$0xff] %vm305_vm0, %v389_v36  ;;  %v8772_v45 = vld [vmem:[#allocation2 + $0x99] sm:$0xff]  ;;  %v8774_v46 = vld [vmem:[#allocation2 + $0xc1] sm:$0xff] }
  0xb9   : > { %421 = vst.msk [vmem:[#allocation2 + $0x159] sm:$0xff] %vm305_vm0, %v388_v38  ;;  %423 = vst.msk [vmem:[#allocation2 + $0x171] sm:$0xff] %vm305_vm0, %v390_v39  ;;  %v8784_v49 = vld [vmem:[#allocation2 + $0xb1] sm:$0xff]  ;;  %v8786_v50 = vld [vmem:[#allocation2 + $0xd9] sm:$0xff] }
  0xba   : > { %424 = vst.msk [vmem:[#allocation2 + $0x181] sm:$0xff] %vm305_vm0, %v391_v47  ;;  %425 = vst.msk [vmem:[#allocation2 + $0x189] sm:$0xff] %vm305_vm0, %v392_v48  ;;  %v8792_v51 = vld [vmem:[#allocation2 + $0xc9] sm:$0xff]  ;;  %v8794_v52 = vld [vmem:[#allocation2 + $0xf1] sm:$0xff] }
  0xbb   : > { %596 = vrot.lane.b32.xlu1 %v8728_v31, %s8327_s29  ;;  %602 = vrot.lane.b32.xlu0 %v8730_v32, %s8327_s29  ;;  %v8800_v53 = vld [vmem:[#allocation2 + $0xe1] sm:$0xff]  ;;  %v8802_v54 = vld [vmem:[#allocation2 + $0x109] sm:$0xff]  ;;  %v8842_v0 = vld [vmem:[#allocation2 + $0x18] sm:$0xff] }
  0xbc   : > { %v8808_v55 = vld [vmem:[#allocation2 + $0xf9] sm:$0xff]  ;;  %v8810_v56 = vld [vmem:[#allocation2 + $0x121] sm:$0xff]  ;;  %v8850_v2 = vld [vmem:[#allocation2 + $0x30] sm:$0xff] }
  0xbd   : > { %v8816_v57 = vld [vmem:[#allocation2 + $0x111] sm:$0xff]  ;;  %v8818_v58 = vld [vmem:[#allocation2 + $0x139] sm:$0xff]  ;;  %v8858_v4 = vld [vmem:[#allocation2 + $0x48] sm:$0xff] }
  0xbe   : > { %v8824_v59 = vld [vmem:[#allocation2 + $0x129] sm:$0xff]  ;;  %v8826_v60 = vld [vmem:[#allocation2 + $0x151] sm:$0xff]  ;;  %v8856_v3 = vld [vmem:[#allocation2 + $0x20] sm:$0xff] }
  0xbf   : > { %600 = vrot.lane.b32.xlu1 %v8743_v37, %s8327_s29  ;;  %606 = vrot.lane.b32.xlu0 %v8748_v40, %s8327_s29  ;;  %v8832_v61 = vld [vmem:[#allocation2 + $0x141] sm:$0xff]  ;;  %v8834_v62 = vld [vmem:[#allocation2 + $0x169] sm:$0xff]  ;;  %v8864_v5 = vld [vmem:[#allocation2 + $0x38] sm:$0xff] }
  0xc0   : > { %v8840_v63 = vld [vmem:[#allocation2 + $0x159] sm:$0xff]  ;;  %v8848_v1 = vld [vmem:[#allocation2 + $0x171] sm:$0xff]  ;;  %v8880_v9 = vld [vmem:[#allocation2 + $0x68] sm:$0xff] }
  0xc1   : > { %v8866_v6 = vld [vmem:[#allocation2 + $0x60] sm:$0xff]  ;;  %v8872_v7 = vld [vmem:[#allocation2 + $0x50] sm:$0xff]  ;;  %v8874_v8 = vld [vmem:[#allocation2 + $0x78] sm:$0xff] }
  0xc2   : > { %v8882_v10 = vld [vmem:[#allocation2 + $0x90] sm:$0xff]  ;;  %v8888_v11 = vld [vmem:[#allocation2 + $0x80] sm:$0xff]  ;;  %v8890_v12 = vld [vmem:[#allocation2 + $0xa8] sm:$0xff] }
  0xc3   : > { %604 = vrot.lane.b32.xlu1 %v8756_v41, %s8327_s29  ;;  %610 = vrot.lane.b32.xlu0 %v8758_v42, %s8327_s29  ;;  %v8896_v13 = vld [vmem:[#allocation2 + $0x98] sm:$0xff]  ;;  %v8898_v14 = vld [vmem:[#allocation2 + $0xc0] sm:$0xff]  ;;  %v8904_v15 = vld [vmem:[#allocation2 + $0xb0] sm:$0xff] }
  0xc4   : > { %13812 = vst [vmem:[#allocation16_spill] sm:$0xff] %v8898_v14  ;;  %v8906_v16 = vld [vmem:[#allocation2 + $0xd8] sm:$0xff]  ;;  %v8912_v17 = vld [vmem:[#allocation2 + $0xc8] sm:$0xff]  ;;  %v8914_v18 = vld [vmem:[#allocation2 + $0xf0] sm:$0xff] }
  0xc5   : > { %13813 = vst [vmem:[#allocation17_spill] sm:$0xff] %v8906_v16  ;;  %13814 = vst [vmem:[#allocation18_spill] sm:$0xff] %v8912_v17  ;;  %v8920_v19 = vld [vmem:[#allocation2 + $0xe0] sm:$0xff]  ;;  %v8922_v20 = vld [vmem:[#allocation2 + $0x108] sm:$0xff] }
  0xc6   : > { %13815 = vst [vmem:[#allocation19_spill] sm:$0xff] %v8914_v18  ;;  %13816 = vst [vmem:[#allocation20_spill] sm:$0xff] %v8920_v19  ;;  %v8928_v21 = vld [vmem:[#allocation2 + $0xf8] sm:$0xff]  ;;  %v8930_v22 = vld [vmem:[#allocation2 + $0x120] sm:$0xff] }
  0xc7   : > { %608 = vrot.lane.b32.xlu1 %v8764_v43, %s8327_s29  ;;  %614 = vrot.lane.b32.xlu0 %v8766_v44, %s8327_s29  ;;  %13817 = vst [vmem:[#allocation21_spill] sm:$0xff] %v8922_v20  ;;  %13818 = vst [vmem:[#allocation22_spill] sm:$0xff] %v8928_v21  ;;  %v8936_v23 = vld [vmem:[#allocation2 + $0x110] sm:$0xff]  ;;  %v8938_v24 = vld [vmem:[#allocation2 + $0x138] sm:$0xff] }
  0xc8   : > { %13819 = vst [vmem:[#allocation23_spill] sm:$0xff] %v8930_v22  ;;  %13820 = vst [vmem:[#allocation24_spill] sm:$0xff] %v8936_v23  ;;  %v8944_v27 = vld [vmem:[#allocation2 + $0x128] sm:$0xff]  ;;  %v8946_v28 = vld [vmem:[#allocation2 + $0x150] sm:$0xff] }
  0xc9   : > { %13821 = vst [vmem:[#allocation25_spill] sm:$0xff] %v8938_v24  ;;  %13822 = vst [vmem:[#allocation26_spill] sm:$0xff] %v8944_v27  ;;  %v8954_v34 = vld [vmem:[#allocation2 + $0x140] sm:$0xff]  ;;  %v1036_v35 = vld [vmem:[#allocation7] sm:$0xff] }
  0xca   : > { %13823 = vst [vmem:[#allocation27_spill] sm:$0xff] %v8946_v28  ;;  %13824 = vst [vmem:[#allocation28_spill] sm:$0xff] %v8954_v34  ;;  %v1037_v36 = vld [vmem:[#allocation7 + $0x8] sm:$0xff]  ;;  %v8956_v38 = vld [vmem:[#allocation2 + $0x168] sm:$0xff] }
  0xcb   : > { %612 = vrot.lane.b32.xlu1 %v8772_v45, %s8327_s29  ;;  %618 = vrot.lane.b32.xlu0 %v8774_v46, %s8327_s29  ;;  %13825 = vst [vmem:[#allocation29_spill] sm:$0xff] %v8956_v38  ;;  %v7900_v39 = vpack.c.bf16 %v1037_v36, %v1036_v35  ;;  %v8964_v48 = vld [vmem:[#allocation2 + $0x158] sm:$0xff]  ;;  %v8973_v35 = vld [vmem:[#allocation2 + $0x170] sm:$0xff] }
  0xcc   : > { %13826 = vst [vmem:[#allocation30_spill] sm:$0xff] %v8964_v48  ;;  %13827 = vst [vmem:[#allocation31_spill] sm:$0xff] %v8973_v35 }
  0xcd   : > { %7901 = vmatprep.subr.bf16.mxu0 %v7900_v39 }
  0xce   : > { %7903 = vmatpush3.bf16.msra.mxu0 %v7900_v39  ;;  %v521_v39 = vld [vmem:[#allocation2 + $0x188] sm:$0xff] }
  0xcf   : > { %616 = vrot.lane.b32.xlu1 %v8784_v49, %s8327_s29  ;;  %622 = vrot.lane.b32.xlu0 %v8786_v50, %s8327_s29 }
  0xd3   : > { %620 = vrot.lane.b32.xlu1 %v8792_v51, %s8327_s29  ;;  %626 = vrot.lane.b32.xlu0 %v8794_v52, %s8327_s29 }
  0xd7   : > { %624 = vrot.lane.b32.xlu1 %v8800_v53, %s8327_s29  ;;  %630 = vrot.lane.b32.xlu0 %v8802_v54, %s8327_s29 }
  0xdb   : > { %628 = vrot.lane.b32.xlu1 %v8808_v55, %s8327_s29  ;;  %634 = vrot.lane.b32.xlu0 %v8810_v56, %s8327_s29 }
  0xdf   : > { %632 = vrot.lane.b32.xlu1 %v8816_v57, %s8327_s29  ;;  %638 = vrot.lane.b32.xlu0 %v8818_v58, %s8327_s29 }
  0xe3   : > { %636 = vrot.lane.b32.xlu1 %v8824_v59, %s8327_s29  ;;  %642 = vrot.lane.b32.xlu0 %v8826_v60, %s8327_s29 }
  0xe7   : > { %640 = vrot.lane.b32.xlu1 %v8832_v61, %s8327_s29  ;;  %646 = vrot.lane.b32.xlu0 %v8834_v62, %s8327_s29 }
  0xeb   : > { %644 = vrot.lane.b32.xlu1 %v8840_v63, %s8327_s29  ;;  %714 = vrot.lane.b32.xlu0 %v8842_v0, %s8328_s21 }
  0xef   : > { %648 = vrot.lane.b32.xlu1 %v8848_v1, %s8327_s29  ;;  %718 = vrot.lane.b32.xlu0 %v8850_v2, %s8328_s21 }
  0xf3   : > { %716 = vrot.lane.b32.xlu1 %v8856_v3, %s8328_s21  ;;  %722 = vrot.lane.b32.xlu0 %v8858_v4, %s8328_s21 }
  0xf7   : > { %720 = vrot.lane.b32.xlu1 %v8864_v5, %s8328_s21  ;;  %726 = vrot.lane.b32.xlu0 %v8866_v6, %s8328_s21 }
  0xfb   : > { %724 = vrot.lane.b32.xlu1 %v8872_v7, %s8328_s21  ;;  %730 = vrot.lane.b32.xlu0 %v8874_v8, %s8328_s21 }
  0xff   : > { %728 = vrot.lane.b32.xlu1 %v8880_v9, %s8328_s21  ;;  %734 = vrot.lane.b32.xlu0 %v8882_v10, %s8328_s21 }
 0x103   : > { %732 = vrot.lane.b32.xlu1 %v8888_v11, %s8328_s21  ;;  %738 = vrot.lane.b32.xlu0 %v8890_v12, %s8328_s21 }
 0x107   : > { %736 = vrot.lane.b32.xlu1 %v8896_v13, %s8328_s21  ;;  %742 = vrot.lane.b32.xlu0 %v8898_v14, %s8328_s21 }
 0x10a   : > { %v8948_v33 = vpop.permute.xlu0 %586 }
 0x10b   : > { %740 = vrot.lane.b32.xlu1 %v8904_v15, %s8328_s21  ;;  %746 = vrot.lane.b32.xlu0 %v8906_v16, %s8328_s21 }
 0x10f   : > { %744 = vrot.lane.b32.xlu1 %v8912_v17, %s8328_s21  ;;  %750 = vrot.lane.b32.xlu0 %v8914_v18, %s8328_s21 }
 0x113   : > { %748 = vrot.lane.b32.xlu1 %v8920_v19, %s8328_s21  ;;  %754 = vrot.lane.b32.xlu0 %v8922_v20, %s8328_s21 }
 0x117   : > { %752 = vrot.lane.b32.xlu1 %v8928_v21, %s8328_s21  ;;  %758 = vrot.lane.b32.xlu0 %v8930_v22, %s8328_s21 }
 0x11b   : > { %756 = vrot.lane.b32.xlu1 %v8936_v23, %s8328_s21  ;;  %762 = vrot.lane.b32.xlu0 %v8938_v24, %s8328_s21  ;;  %v520_v24 = vld [vmem:[#allocation2 + $0x180] sm:$0xff] }
 0x11c   : > { %v8958_v47 = vpop.permute.xlu0 %588 }
 0x11f   : > { %760 = vrot.lane.b32.xlu1 %v8944_v27, %s8328_s21  ;;  %766 = vrot.lane.b32.xlu0 %v8946_v28, %s8328_s21 }
 0x123   : > { %764 = vrot.lane.b32.xlu1 %v8954_v34, %s8328_s21  ;;  %770 = vrot.lane.b32.xlu0 %v8956_v38, %s8328_s21 }
 0x125   : > { %v8966_v28 = vpop.permute.xlu1 %590  ;;  %v8968_v27 = vpop.permute.xlu0 %594 }
 0x127   : > { %768 = vrot.lane.b32.xlu1 %v8964_v48, %s8328_s21  ;;  %774 = vrot.lane.b32.xlu0 %v520_v24, %s8328_s21 }
 0x129   : > { %v8975_v36 = vpop.permute.xlu1 %592  ;;  %v8977_v34 = vpop.permute.xlu0 %598 }
 0x12b   : > { %772 = vrot.lane.b32.xlu1 %v8973_v35, %s8328_s21  ;;  %842 = vrot.lane.b32.xlu0 %v8705_v25, %s8329_s20 }
 0x12d   : > { %v8983_v38 = vpop.permute.xlu1 %596  ;;  %v8985_v22 = vpop.permute.xlu0 %602 }
 0x12f   : > { %776 = vrot.lane.b32.xlu1 %v521_v39, %s8328_s21  ;;  %846 = vrot.lane.b32.xlu0 %v8707_v26, %s8329_s20 }
 0x131   : > { %v8990_v24 = vpop.permute.xlu1 %600  ;;  %v8992_v48 = vpop.permute.xlu0 %606 }
 0x133   : > { %844 = vrot.lane.b32.xlu1 %v8718_v29, %s8329_s20  ;;  %850 = vrot.lane.b32.xlu0 %v8722_v30, %s8329_s20 }
 0x135   : > { %v8998_v35 = vpop.permute.xlu1 %604  ;;  %v9000_v23 = vpop.permute.xlu0 %610 }
 0x137   : > { %848 = vrot.lane.b32.xlu1 %v8728_v31, %s8329_s20  ;;  %854 = vrot.lane.b32.xlu0 %v8730_v32, %s8329_s20 }
 0x139   : > { %v9006_v39 = vpop.permute.xlu1 %608  ;;  %v9008_v20 = vpop.permute.xlu0 %614 }
 0x13b   : > { %852 = vrot.lane.b32.xlu1 %v8743_v37, %s8329_s20  ;;  %858 = vrot.lane.b32.xlu0 %v8748_v40, %s8329_s20 }
 0x13d   : > { %v9014_v21 = vpop.permute.xlu1 %612  ;;  %v9016_v18 = vpop.permute.xlu0 %618 }
 0x13e   : > { %13828 = vst [vmem:[#allocation32_spill] sm:$0xff] %v9016_v18 }
 0x13f   : > { %856 = vrot.lane.b32.xlu1 %v8756_v41, %s8329_s20  ;;  %862 = vrot.lane.b32.xlu0 %v8758_v42, %s8329_s20 }
 0x141   : > { %v9022_v19 = vpop.permute.xlu1 %616  ;;  %v9024_v16 = vpop.permute.xlu0 %622 }
 0x142   : > { %13829 = vst [vmem:[#allocation33_spill] sm:$0xff] %v9024_v16  ;;  %v9184_v16 = vld [vmem:[#allocation2 + $0xaa] sm:$0xff] }
 0x143   : > { %860 = vrot.lane.b32.xlu1 %v8764_v43, %s8329_s20  ;;  %866 = vrot.lane.b32.xlu0 %v8766_v44, %s8329_s20  ;;  %13861 = vst [vmem:[#allocation65_spill] sm:$0xff] %v9184_v16 }
 0x145   : > { %v9030_v17 = vpop.permute.xlu1 %620  ;;  %v9032_v14 = vpop.permute.xlu0 %626 }
 0x146   : > { %13830 = vst [vmem:[#allocation34_spill] sm:$0xff] %v9030_v17  ;;  %13831 = vst [vmem:[#allocation35_spill] sm:$0xff] %v9032_v14  ;;  %v9172_v14 = vld [vmem:[#allocation2 + $0x92] sm:$0xff]  ;;  %v9196_v17 = vld [vmem:[#allocation2 + $0xc2] sm:$0xff] }
 0x147   : > { %864 = vrot.lane.b32.xlu1 %v8772_v45, %s8329_s20  ;;  %870 = vrot.lane.b32.xlu0 %v8774_v46, %s8329_s20  ;;  %13857 = vst [vmem:[#allocation61_spill] sm:$0xff] %v9172_v14  ;;  %13865 = vst [vmem:[#allocation69_spill] sm:$0xff] %v9196_v17 }
 0x149   : > { %v9038_v41 = vpop.permute.xlu1 %624  ;;  %v9040_v18 = vpop.permute.xlu0 %630 }
 0x14a   : > { %13832 = vst [vmem:[#allocation36_spill] sm:$0xff] %v9038_v41  ;;  %13833 = vst [vmem:[#allocation37_spill] sm:$0xff] %v9040_v18  ;;  %v9160_v18 = vld [vmem:[#allocation2 + $0x7a] sm:$0xff]  ;;  %v9180_v41 = vld [vmem:[#allocation2 + $0x82] sm:$0xff] }
 0x14b   : > { %868 = vrot.lane.b32.xlu1 %v8784_v49, %s8329_s20  ;;  %874 = vrot.lane.b32.xlu0 %v8786_v50, %s8329_s20  ;;  %13853 = vst [vmem:[#allocation57_spill] sm:$0xff] %v9160_v18  ;;  %13859 = vst [vmem:[#allocation63_spill] sm:$0xff] %v9180_v41 }
 0x14d   : > { %v9046_v43 = vpop.permute.xlu1 %628  ;;  %v9048_v44 = vpop.permute.xlu0 %634 }
 0x14e   : > { %13834 = vst [vmem:[#allocation38_spill] sm:$0xff] %v9046_v43  ;;  %13835 = vst [vmem:[#allocation39_spill] sm:$0xff] %v9048_v44  ;;  %v9148_v44 = vld [vmem:[#allocation2 + $0x62] sm:$0xff]  ;;  %v9168_v43 = vld [vmem:[#allocation2 + $0x6a] sm:$0xff] }
 0x14f   : > { %872 = vrot.lane.b32.xlu1 %v8792_v51, %s8329_s20  ;;  %878 = vrot.lane.b32.xlu0 %v8794_v52, %s8329_s20  ;;  %13851 = vst [vmem:[#allocation55_spill] sm:$0xff] %v9148_v44  ;;  %13855 = vst [vmem:[#allocation59_spill] sm:$0xff] %v9168_v43 }
 0x151   : > { %v9054_v45 = vpop.permute.xlu1 %632  ;;  %v9056_v46 = vpop.permute.xlu0 %638 }
 0x152   : > { %13836 = vst [vmem:[#allocation40_spill] sm:$0xff] %v9054_v45  ;;  %13837 = vst [vmem:[#allocation41_spill] sm:$0xff] %v9056_v46  ;;  %v9156_v45 = vld [vmem:[#allocation2 + $0x52] sm:$0xff] }
 0x153   : > { %876 = vrot.lane.b32.xlu1 %v8800_v53, %s8329_s20  ;;  %882 = vrot.lane.b32.xlu0 %v8802_v54, %s8329_s20  ;;  %13852 = vst [vmem:[#allocation56_spill] sm:$0xff] %v9156_v45 }
 0x155   : > { %v9062_v49 = vpop.permute.xlu1 %636  ;;  %v9064_v50 = vpop.permute.xlu0 %642 }
 0x156   : > { %13838 = vst [vmem:[#allocation42_spill] sm:$0xff] %v9062_v49  ;;  %13839 = vst [vmem:[#allocation43_spill] sm:$0xff] %v9064_v50 }
 0x157   : > { %880 = vrot.lane.b32.xlu1 %v8808_v55, %s8329_s20  ;;  %886 = vrot.lane.b32.xlu0 %v8810_v56, %s8329_s20 }
 0x159   : > { %v9070_v51 = vpop.permute.xlu1 %640  ;;  %v9072_v52 = vpop.permute.xlu0 %646 }
 0x15a   : > { %13840 = vst [vmem:[#allocation44_spill] sm:$0xff] %v9070_v51  ;;  %13841 = vst [vmem:[#allocation45_spill] sm:$0xff] %v9072_v52  ;;  %v9132_v51 = vld [vmem:[#allocation2 + $0x22] sm:$0xff] }
 0x15b   : > { %884 = vrot.lane.b32.xlu1 %v8816_v57, %s8329_s20  ;;  %890 = vrot.lane.b32.xlu0 %v8818_v58, %s8329_s20  ;;  %v9096_v58 = vld [vmem:[#allocation2 + $0x181] sm:$0xff]  ;;  %13848 = vst [vmem:[#allocation52_spill] sm:$0xff] %v9132_v51 }
 0x15c   : > { %13844 = vst [vmem:[#allocation48_spill] sm:$0xff] %v9096_v58 }
 0x15d   : > { %v9078_v53 = vpop.permute.xlu1 %644  ;;  %v9080_v54 = vpop.permute.xlu0 %714 }
 0x15e   : > { %13842 = vst [vmem:[#allocation46_spill] sm:$0xff] %v9078_v53  ;;  %v9115_v53 = vld [vmem:[#allocation2 + $0x1a] sm:$0xff] }
 0x15f   : > { %888 = vrot.lane.b32.xlu1 %v8824_v59, %s8329_s20  ;;  %894 = vrot.lane.b32.xlu0 %v8826_v60, %s8329_s20  ;;  %v1596_v60 = vld [vmem:[#allocation2 + $0x2] sm:$0xff]  ;;  %13846 = vst [vmem:[#allocation50_spill] sm:$0xff] %v9115_v53 }
 0x161   : > { %v9086_v55 = vpop.permute.xlu1 %648  ;;  %v9088_v56 = vpop.permute.xlu0 %718 }
 0x162   : > { %13843 = vst [vmem:[#allocation47_spill] sm:$0xff] %v9086_v55 }
 0x163   : > { %892 = vrot.lane.b32.xlu1 %v8832_v61, %s8329_s20  ;;  %898 = vrot.lane.b32.xlu0 %v8834_v62, %s8329_s20  ;;  %v9111_v61 = vld [vmem:[#allocation2 + $0x189] sm:$0xff] }
 0x164   : > { %13845 = vst [vmem:[#allocation49_spill] sm:$0xff] %v9111_v61 }
 0x165   : > { %v9094_v57 = vpop.permute.xlu1 %716  ;;  %v9098_v52 = vpop.permute.xlu0 %722 }
 0x167   : > { %896 = vrot.lane.b32.xlu1 %v8840_v63, %s8329_s20  ;;  %902 = vrot.lane.b32.xlu0 %v9096_v58, %s8329_s20  ;;  %v1597_v58 = vld [vmem:[#allocation2 + $0xa] sm:$0xff] }
 0x169   : > { %v9104_v59 = vpop.permute.xlu1 %720  ;;  %v9106_v55 = vpop.permute.xlu0 %726 }
 0x16b   : > { %900 = vrot.lane.b32.xlu1 %v8848_v1, %s8329_s20  ;;  %1724 = vrot.lane.b32.xlu0 %v1596_v60, %s8327_s29  ;;  %v9125_v1 = vld [vmem:[#allocation2 + $0x32] sm:$0xff] }
 0x16c   : > { %13847 = vst [vmem:[#allocation51_spill] sm:$0xff] %v9125_v1 }
 0x16d   : > { %v9113_v62 = vpop.permute.xlu1 %724  ;;  %v9117_v63 = vpop.permute.xlu0 %730 }
 0x16f   : > { %904 = vrot.lane.b32.xlu1 %v9111_v61, %s8329_s20  ;;  %1728 = vrot.lane.b32.xlu0 %v9115_v53, %s8327_s29  ;;  %v9136_v61 = vld [vmem:[#allocation2 + $0x4a] sm:$0xff]  ;;  %v9144_v53 = vld [vmem:[#allocation2 + $0x3a] sm:$0xff] }
 0x170   : > { %13849 = vst [vmem:[#allocation53_spill] sm:$0xff] %v9136_v61  ;;  %13850 = vst [vmem:[#allocation54_spill] sm:$0xff] %v9144_v53 }
 0x171   : > { %v9123_v50 = vpop.permute.xlu1 %728  ;;  %v9127_v60 = vpop.permute.xlu0 %734 }
 0x173   : > { %1726 = vrot.lane.b32.xlu1 %v1597_v58, %s8327_s29  ;;  %1732 = vrot.lane.b32.xlu0 %v9125_v1, %s8327_s29 }
 0x175   : > { %v9134_v46 = vpop.permute.xlu1 %732  ;;  %v9138_v49 = vpop.permute.xlu0 %738 }
 0x177   : > { %1730 = vrot.lane.b32.xlu1 %v9132_v51, %s8327_s29  ;;  %1736 = vrot.lane.b32.xlu0 %v9136_v61, %s8327_s29 }
 0x179   : > { %v9146_v58 = vpop.permute.xlu1 %736  ;;  %v9150_v1 = vpop.permute.xlu0 %742 }
 0x17b   : > { %1734 = vrot.lane.b32.xlu1 %v9144_v53, %s8327_s29  ;;  %1740 = vrot.lane.b32.xlu0 %v9148_v44, %s8327_s29 }
 0x17d   : > { %v9158_v51 = vpop.permute.xlu1 %740  ;;  %v9162_v61 = vpop.permute.xlu0 %746 }
 0x17e   : > { %13854 = vst [vmem:[#allocation58_spill] sm:$0xff] %v9162_v61 }
 0x17f   : > { %1738 = vrot.lane.b32.xlu1 %v9156_v45, %s8327_s29  ;;  %1744 = vrot.lane.b32.xlu0 %v9160_v18, %s8327_s29 }
 0x181   : > { %v9170_v53 = vpop.permute.xlu1 %744  ;;  %v9174_v44 = vpop.permute.xlu0 %750 }
 0x182   : > { %13856 = vst [vmem:[#allocation60_spill] sm:$0xff] %v9170_v53  ;;  %13858 = vst [vmem:[#allocation62_spill] sm:$0xff] %v9174_v44  ;;  %v9192_v44 = vld [vmem:[#allocation2 + $0x9a] sm:$0xff] }
 0x183   : > { %1742 = vrot.lane.b32.xlu1 %v9168_v43, %s8327_s29  ;;  %1748 = vrot.lane.b32.xlu0 %v9172_v14, %s8327_s29  ;;  %13863 = vst [vmem:[#allocation67_spill] sm:$0xff] %v9192_v44 }
 0x185   : > { %v9182_v45 = vpop.permute.xlu1 %748  ;;  %v9186_v18 = vpop.permute.xlu0 %754 }
 0x186   : > { %13860 = vst [vmem:[#allocation64_spill] sm:$0xff] %v9182_v45  ;;  %13862 = vst [vmem:[#allocation66_spill] sm:$0xff] %v9186_v18  ;;  %v9204_v18 = vld [vmem:[#allocation2 + $0xb2] sm:$0xff]  ;;  %v9208_v45 = vld [vmem:[#allocation2 + $0xda] sm:$0xff] }
 0x187   : > { %1746 = vrot.lane.b32.xlu1 %v9180_v41, %s8327_s29  ;;  %1752 = vrot.lane.b32.xlu0 %v9184_v16, %s8327_s29  ;;  %13867 = vst [vmem:[#allocation71_spill] sm:$0xff] %v9204_v18  ;;  %13869 = vst [vmem:[#allocation73_spill] sm:$0xff] %v9208_v45 }
 0x189   : > { %v9194_v43 = vpop.permute.xlu1 %752  ;;  %v9198_v14 = vpop.permute.xlu0 %758 }
 0x18a   : > { %13864 = vst [vmem:[#allocation68_spill] sm:$0xff] %v9194_v43  ;;  %13866 = vst [vmem:[#allocation70_spill] sm:$0xff] %v9198_v14  ;;  %v9216_v14 = vld [vmem:[#allocation2 + $0xca] sm:$0xff]  ;;  %v9220_v43 = vld [vmem:[#allocation2 + $0xf2] sm:$0xff] }
 0x18b   : > { %1750 = vrot.lane.b32.xlu1 %v9192_v44, %s8327_s29  ;;  %1756 = vrot.lane.b32.xlu0 %v9196_v17, %s8327_s29  ;;  %13871 = vst [vmem:[#allocation75_spill] sm:$0xff] %v9216_v14  ;;  %13873 = vst [vmem:[#allocation77_spill] sm:$0xff] %v9220_v43 }
 0x18d   : > { %v9206_v41 = vpop.permute.xlu1 %756  ;;  %v9210_v16 = vpop.permute.xlu0 %762 }
 0x18e   : > { %13868 = vst [vmem:[#allocation72_spill] sm:$0xff] %v9206_v41  ;;  %13870 = vst [vmem:[#allocation74_spill] sm:$0xff] %v9210_v16  ;;  %v9228_v16 = vld [vmem:[#allocation2 + $0xe2] sm:$0xff]  ;;  %v9232_v41 = vld [vmem:[#allocation2 + $0x10a] sm:$0xff] }
 0x18f   : > { %1754 = vrot.lane.b32.xlu1 %v9204_v18, %s8327_s29  ;;  %1760 = vrot.lane.b32.xlu0 %v9208_v45, %s8327_s29  ;;  %13875 = vst [vmem:[#allocation79_spill] sm:$0xff] %v9228_v16  ;;  %13877 = vst [vmem:[#allocation81_spill] sm:$0xff] %v9232_v41 }
 0x191   : > { %v9218_v44 = vpop.permute.xlu1 %760  ;;  %v9222_v17 = vpop.permute.xlu0 %766 }
 0x192   : > { %13872 = vst [vmem:[#allocation76_spill] sm:$0xff] %v9218_v44  ;;  %13874 = vst [vmem:[#allocation78_spill] sm:$0xff] %v9222_v17  ;;  %v9240_v17 = vld [vmem:[#allocation2 + $0xfa] sm:$0xff]  ;;  %v9244_v44 = vld [vmem:[#allocation2 + $0x122] sm:$0xff] }
 0x193   : > { %1758 = vrot.lane.b32.xlu1 %v9216_v14, %s8327_s29  ;;  %1764 = vrot.lane.b32.xlu0 %v9220_v43, %s8327_s29  ;;  %13879 = vst [vmem:[#allocation83_spill] sm:$0xff] %v9240_v17  ;;  %13881 = vst [vmem:[#allocation85_spill] sm:$0xff] %v9244_v44  ;;  %v426_v43 = vld [vmem:[#allocation2] sm:$0xff] }
 0x195   : > { %v9230_v18 = vpop.permute.xlu1 %764  ;;  %v9234_v45 = vpop.permute.xlu0 %770 }
 0x196   : > { %13876 = vst [vmem:[#allocation80_spill] sm:$0xff] %v9230_v18  ;;  %13878 = vst [vmem:[#allocation82_spill] sm:$0xff] %v9234_v45 }
 0x197   : > { %1762 = vrot.lane.b32.xlu1 %v9228_v16, %s8327_s29  ;;  %1768 = vrot.lane.b32.xlu0 %v9232_v41, %s8327_s29  ;;  %v9252_v16 = vld [vmem:[#allocation2 + $0x112] sm:$0xff]  ;;  %v938_v41 = vsel %vm305_vm0, %v426_v43, %v8948_v33  ;;  %v9268_v33 = vld [vmem:[#allocation2 + $0x12a] sm:$0xff] }
 0x198   : > { %13885 = vst [vmem:[#allocation89_spill] sm:$0xff] %v9268_v33  ;;  %v427_v43 = vld [vmem:[#allocation2 + $0x8] sm:$0xff] }
 0x199   : > { %v9242_v14 = vpop.permute.xlu1 %768  ;;  %v9246_v61 = vpop.permute.xlu0 %774 }
 0x19a   : > { %13880 = vst [vmem:[#allocation84_spill] sm:$0xff] %v9242_v14  ;;  %13882 = vst [vmem:[#allocation86_spill] sm:$0xff] %v9246_v61  ;;  %v9258_v14 = vld [vmem:[#allocation2 + $0x13a] sm:$0xff]  ;;  %v971_v61 = vsel %vm970_vm2, %v938_v41, %v9080_v54  ;;  %v939_v41 = vsel %vm305_vm0, %v427_v43, %v8958_v47 }
 0x19b   : > { %1766 = vrot.lane.b32.xlu1 %v9240_v17, %s8327_s29  ;;  %1772 = vrot.lane.b32.xlu0 %v9244_v44, %s8327_s29  ;;  %13884 = vst [vmem:[#allocation88_spill] sm:$0xff] %v9258_v14  ;;  %v972_v54 = vsel %vm970_vm2, %v939_v41, %v9094_v57 }
 0x19d   : > { %v9256_v45 = vpop.permute.xlu1 %772  ;;  %v843_v18 = vpop.permute.xlu0 %842 }
 0x19e   : > { %13883 = vst [vmem:[#allocation87_spill] sm:$0xff] %v9256_v45  ;;  %v1004_v44 = vsel %vm1003_vm3, %v971_v61, %v843_v18  ;;  %v9272_v45 = vld [vmem:[#allocation2 + $0x152] sm:$0xff]  ;;  %v9280_v18 = vld [vmem:[#allocation2 + $0x142] sm:$0xff] }
 0x19f   : > { %1770 = vrot.lane.b32.xlu1 %v9252_v16, %s8327_s29  ;;  %1776 = vrot.lane.b32.xlu0 %v9258_v14, %s8327_s29  ;;  %13886 = vst [vmem:[#allocation90_spill] sm:$0xff] %v9272_v45  ;;  %v9287_v14 = vld [vmem:[#allocation2 + $0x16a] sm:$0xff] }
 0x1a0   : > { %7696 = vmatprep.mubr.msk.f32.mxu0 %vm1038_vm4, %v1004_v44  ;;  %v940_v44 = vsel %vm305_vm0, %v8842_v0, %v8966_v28  ;;  %v941_v0 = vsel %vm305_vm0, %v8856_v3, %v8975_v36  ;;  %v9302_v28 = vld [vmem:[#allocation2 + $0x15a] sm:$0xff] }
 0x1a1   : > { %v9270_v17 = vpop.permute.xlu1 %776  ;;  %v847_v53 = vpop.permute.xlu0 %846 }
 0x1a3   : > { %1774 = vrot.lane.b32.xlu1 %v9268_v33, %s8327_s29  ;;  %1780 = vrot.lane.b32.xlu0 %v9272_v45, %s8327_s29  ;;  %v973_v33 = vsel %vm970_vm2, %v940_v44, %v9088_v56  ;;  %v974_v56 = vsel %vm970_vm2, %v941_v0, %v9104_v59 }
 0x1a4   : > { %v1006_v45 = vsel %vm1003_vm3, %v973_v33, %v847_v53  ;;  %v942_v53 = vsel %vm305_vm0, %v8850_v2, %v8968_v27  ;;  %v943_v2 = vsel %vm305_vm0, %v8864_v5, %v8983_v38  ;;  %v9322_v27 = vld [vmem:[#allocation2 + $0x172] sm:$0xff] }
 0x1a5   : > { %v845_v61 = vpop.permute.xlu1 %844  ;;  %v851_v43 = vpop.permute.xlu0 %850  ;;  %v975_v33 = vsel %vm970_vm2, %v942_v53, %v9098_v52  ;;  %v976_v52 = vsel %vm970_vm2, %v943_v2, %v9113_v62  ;;  %v9438_v2 = vld [vmem:[#allocation2 + $0x99] sm:$0xff] }
 0x1a6   : > { %v1005_v47 = vsel %vm1003_vm3, %v972_v54, %v845_v61  ;;  %v1008_v41 = vsel %vm1003_vm3, %v975_v33, %v851_v43  ;;  %v13889_v43 = vld [vmem:[#allocation60_spill] sm:$0xff] }
 0x1a7   : > { %1778 = vrot.lane.b32.xlu1 %v9280_v18, %s8327_s29  ;;  %7697 = vmatmul.mubr.msk.f32.vlgmr.msra.gmra.mrb[0].mxu0 %vm1038_vm4, %v1005_v47 }
 0x1a8   : > { %1784 = vrot.lane.b32.xlu0 %v9287_v14, %s8327_s29  ;;  %7699 = vmatprep.mubr.msk.f32.mxu0 %vm1038_vm4, %v1006_v45  ;;  %v944_v45 = vsel %vm305_vm0, %v8858_v4, %v8977_v34  ;;  %v945_v4 = vsel %vm305_vm0, %v8872_v7, %v8990_v24  ;;  %v946_v34 = vsel %vm305_vm0, %v8866_v6, %v8985_v22 }
 0x1a9   : > { %v849_v57 = vpop.permute.xlu1 %848  ;;  %v855_v36 = vpop.permute.xlu0 %854  ;;  %v977_v44 = vsel %vm970_vm2, %v944_v45, %v9106_v55  ;;  %v978_v55 = vsel %vm970_vm2, %v945_v4, %v9123_v50  ;;  %v979_v54 = vsel %vm970_vm2, %v946_v34, %v9117_v63  ;;  %v948_v6 = vsel %vm305_vm0, %v8874_v8, %v8992_v48  ;;  %v13893_v45 = vld [vmem:[#allocation33_spill] sm:$0xff]  ;;  %v13896_v4 = vld [vmem:[#allocation62_spill] sm:$0xff] }
 0x1aa   : > { %v1007_v3 = vsel %vm1003_vm3, %v974_v56, %v849_v57  ;;  %v950_v8 = vsel %vm305_vm0, %v8882_v10, %v9000_v23  ;;  %v9396_v10 = vld [vmem:[#allocation2 + $0x69] sm:$0xff]  ;;  %v952_v23 = vsel %vm305_vm0, %v8890_v12, %v9008_v20  ;;  %v953_v12 = vsel %vm305_vm0, %v8904_v15, %v9022_v19  ;;  %v9416_v20 = vld [vmem:[#allocation2 + $0x81] sm:$0xff] }
 0x1ab   : > { %1782 = vrot.lane.b32.xlu1 %v9302_v28, %s8327_s29  ;;  %7700 = vmatmul.mubr.msk.f32.gmra.mrb[2].mxu0 %vm1038_vm4, %v1007_v3  ;;  %v986_v0 = vsel %vm970_vm2, %v953_v12, %v13889_v43  ;;  %v9423_v56 = vld [vmem:[#allocation2 + $0xa9] sm:$0xff]  ;;  %v13890_v57 = vld [vmem:[#allocation58_spill] sm:$0xff] }
 0x1ac   : > { %1852 = vrot.lane.b32.xlu0 %v8705_v25, %s8328_s21  ;;  %7702 = vmatprep.mubr.msk.f32.mxu0 %vm1038_vm4, %v1008_v41  ;;  %v1010_v25 = vsel %vm1003_vm3, %v977_v44, %v855_v36  ;;  %v13891_v3 = vld [vmem:[#allocation34_spill] sm:$0xff]  ;;  %v13895_v44 = vld [vmem:[#allocation64_spill] sm:$0xff] }
 0x1ad   : > { %v853_v59 = vpop.permute.xlu1 %852  ;;  %v859_v38 = vpop.permute.xlu0 %858  ;;  %v13892_v36 = vld [vmem:[#allocation18_spill] sm:$0xff] }
 0x1ae   : > { %v1009_v5 = vsel %vm1003_vm3, %v976_v52, %v853_v59  ;;  %v1012_v7 = vsel %vm1003_vm3, %v979_v54, %v859_v38  ;;  %v955_v41 = vsel %vm305_vm0, %v13892_v36, %v13891_v3  ;;  %v13894_v52 = vld [vmem:[#allocation17_spill] sm:$0xff]  ;;  %v13908_v12 = vld [vmem:[#allocation70_spill] sm:$0xff]  ;;  %v13913_v3 = vld [vmem:[#allocation76_spill] sm:$0xff] }
 0x1af   : > { %1786 = vrot.lane.b32.xlu1 %v9322_v27, %s8327_s29  ;;  %7703 = vmatmul.mubr.msk.f32.gmra.mrb[4].mxu0 %vm1038_vm4, %v1009_v5  ;;  %v956_v59 = vsel %vm305_vm0, %v13894_v52, %v13893_v45  ;;  %v988_v5 = vsel %vm970_vm2, %v955_v41, %v13895_v44  ;;  %v9511_v45 = vld [vmem:[#allocation2 + $0x109] sm:$0xff]  ;;  %v13915_v52 = vld [vmem:[#allocation74_spill] sm:$0xff] }
 0x1b0   : > { %1856 = vrot.lane.b32.xlu0 %v8707_v26, %s8328_s21  ;;  %7705 = vmatprep.mubr.msk.f32.mxu0 %vm1038_vm4, %v1010_v25  ;;  %v947_v26 = vsel %vm305_vm0, %v8880_v9, %v8998_v35  ;;  %v9445_v25 = vld [vmem:[#allocation2 + $0xc1] sm:$0xff]  ;;  %v989_v34 = vsel %vm970_vm2, %v956_v59, %v13896_v4 }
 0x1b1   : > { %v857_v62 = vpop.permute.xlu1 %856  ;;  %v863_v47 = vpop.permute.xlu0 %862  ;;  %v980_v22 = vsel %vm970_vm2, %v947_v26, %v9134_v46  ;;  %v9460_v26 = vld [vmem:[#allocation2 + $0xb1] sm:$0xff]  ;;  %v13916_v4 = vld [vmem:[#allocation42_spill] sm:$0xff] }
 0x1b2   : > { %v1011_v61 = vsel %vm1003_vm3, %v978_v55, %v857_v62 }
 0x1b3   : > { %1854 = vrot.lane.b32.xlu1 %v8718_v29, %s8328_s21  ;;  %7706 = vmatmul.mubr.msk.f32.gmra.mrb[6].mxu0 %vm1038_vm4, %v1011_v61  ;;  %v981_v29 = vsel %vm970_vm2, %v948_v6, %v9127_v60  ;;  %v13897_v61 = vld [vmem:[#allocation36_spill] sm:$0xff]  ;;  %v13899_v6 = vld [vmem:[#allocation35_spill] sm:$0xff] }
 0x1b4   : > { %1860 = vrot.lane.b32.xlu0 %v8722_v30, %s8328_s21  ;;  %7708 = vmatprep.mubr.msk.f32.mxu0 %vm1038_vm4, %v1012_v7  ;;  %v1014_v9 = vsel %vm1003_vm3, %v981_v29, %v863_v47  ;;  %v949_v30 = vsel %vm305_vm0, %v8888_v11, %v9006_v39  ;;  %v13898_v47 = vld [vmem:[#allocation20_spill] sm:$0xff] }
 0x1b5   : > { %v861_v24 = vpop.permute.xlu1 %860  ;;  %v867_v63 = vpop.permute.xlu0 %866  ;;  %v982_v48 = vsel %vm970_vm2, %v949_v30, %v9146_v58  ;;  %v957_v7 = vsel %vm305_vm0, %v13898_v47, %v13897_v61  ;;  %v13901_v29 = vld [vmem:[#allocation68_spill] sm:$0xff]  ;;  %v13902_v30 = vld [vmem:[#allocation66_spill] sm:$0xff]  ;;  %v13919_v61 = vld [vmem:[#allocation25_spill] sm:$0xff] }
 0x1b6   : > { %v1013_v50 = vsel %vm1003_vm3, %v980_v22, %v861_v24  ;;  %v13900_v22 = vld [vmem:[#allocation19_spill] sm:$0xff] }
 0x1b7   : > { %1858 = vrot.lane.b32.xlu1 %v8728_v31, %s8328_s21  ;;  %7709 = vmatmul.mubr.msk.f32.gmra.mrb[8].mxu0 %vm1038_vm4, %v1013_v50  ;;  %v983_v31 = vsel %vm970_vm2, %v950_v8, %v9138_v49  ;;  %v985_v49 = vsel %vm970_vm2, %v952_v23, %v9150_v1  ;;  %v13888_v1 = vld [vmem:[#allocation16_spill] sm:$0xff]  ;;  %v958_v24 = vsel %vm305_vm0, %v13900_v22, %v13899_v6  ;;  %v13905_v23 = vld [vmem:[#allocation37_spill] sm:$0xff] }
 0x1b8   : > { %1864 = vrot.lane.b32.xlu0 %v8730_v32, %s8328_s21  ;;  %7711 = vmatprep.mubr.msk.f32.mxu0 %vm1038_vm4, %v1014_v9  ;;  %v1016_v11 = vsel %vm1003_vm3, %v983_v31, %v867_v63  ;;  %v951_v32 = vsel %vm305_vm0, %v8896_v13, %v9014_v21  ;;  %v990_v50 = vsel %vm970_vm2, %v957_v7, %v13901_v29  ;;  %v9467_v9 = vld [vmem:[#allocation2 + $0xd9] sm:$0xff]  ;;  %v13920_v7 = vld [vmem:[#allocation80_spill] sm:$0xff] }
 0x1b9   : > { %v865_v35 = vpop.permute.xlu1 %864  ;;  %v871_v60 = vpop.permute.xlu0 %870  ;;  %v991_v8 = vsel %vm970_vm2, %v958_v24, %v13902_v30  ;;  %v9533_v24 = vld [vmem:[#allocation2 + $0x121] sm:$0xff] }
 0x1ba   : > { %v1015_v46 = vsel %vm1003_vm3, %v982_v48, %v865_v35  ;;  %13921 = vst [vmem:[#allocation16_spill] sm:$0xff] %v9533_v24  ;;  %v13922_v29 = vld [vmem:[#allocation78_spill] sm:$0xff] }
 0x1bb   : > { %1862 = vrot.lane.b32.xlu1 %v8743_v37, %s8328_s21  ;;  %7712 = vmatmul.mubr.msk.f32.gmra.mrb[10].mxu0 %vm1038_vm4, %v1015_v46  ;;  %v984_v37 = vsel %vm970_vm2, %v951_v32, %v9158_v51  ;;  %v13887_v51 = vld [vmem:[#allocation32_spill] sm:$0xff]  ;;  %v13903_v46 = vld [vmem:[#allocation38_spill] sm:$0xff] }
 0x1bc   : > { %1868 = vrot.lane.b32.xlu0 %v8748_v40, %s8328_s21  ;;  %7714 = vmatprep.mubr.msk.f32.mxu0 %vm1038_vm4, %v1016_v11  ;;  %v1018_v40 = vsel %vm1003_vm3, %v985_v49, %v871_v60  ;;  %v954_v58 = vsel %vm305_vm0, %v13888_v1, %v13887_v51  ;;  %v13904_v60 = vld [vmem:[#allocation22_spill] sm:$0xff]  ;;  %v9482_v32 = vld [vmem:[#allocation2 + $0xc9] sm:$0xff]  ;;  %13914 = vst [vmem:[#allocation32_spill] sm:$0xff] %v9511_v45 }
 0x1bd   : > { %v869_v39 = vpop.permute.xlu1 %868  ;;  %v875_v21 = vpop.permute.xlu0 %874  ;;  %v987_v15 = vsel %vm970_vm2, %v954_v58, %v13890_v57  ;;  %v959_v11 = vsel %vm305_vm0, %v13904_v60, %v13903_v46  ;;  %v13907_v49 = vld [vmem:[#allocation72_spill] sm:$0xff]  ;;  %v13925_v60 = vld [vmem:[#allocation43_spill] sm:$0xff] }
 0x1be   : > { %v1017_v13 = vsel %vm1003_vm3, %v984_v37, %v869_v39  ;;  %v1020_v33 = vsel %vm1003_vm3, %v987_v15, %v875_v21  ;;  %v13906_v37 = vld [vmem:[#allocation21_spill] sm:$0xff]  ;;  %v9504_v15 = vld [vmem:[#allocation2 + $0xe1] sm:$0xff] }
 0x1bf   : > { %1866 = vrot.lane.b32.xlu1 %v9396_v10, %s8328_s21  ;;  %7715 = vmatmul.mubr.msk.f32.gmra.mrb[12].mxu0 %vm1038_vm4, %v1017_v13  ;;  %v960_v39 = vsel %vm305_vm0, %v13906_v37, %v13905_v23  ;;  %v992_v13 = vsel %vm970_vm2, %v959_v11, %v13907_v49  ;;  %v9548_v46 = vld [vmem:[#allocation2 + $0x111] sm:$0xff]  ;;  %v13926_v11 = vld [vmem:[#allocation27_spill] sm:$0xff] }
 0x1c0   : > { %1872 = vrot.lane.b32.xlu0 %v8758_v42, %s8328_s21  ;;  %7717 = vmatprep.mubr.msk.f32.mxu0 %vm1038_vm4, %v1018_v40  ;;  %v9489_v40 = vld [vmem:[#allocation2 + $0xf1] sm:$0xff]  ;;  %v993_v51 = vsel %vm970_vm2, %v960_v39, %v13908_v12  ;;  %v966_v23 = vsel %vm305_vm0, %v13926_v11, %v13925_v60 }
 0x1c1   : > { %v873_v53 = vpop.permute.xlu1 %872  ;;  %v879_v42 = vpop.permute.xlu0 %878  ;;  %v13927_v37 = vld [vmem:[#allocation84_spill] sm:$0xff] }
 0x1c2   : > { %v1019_v19 = vsel %vm1003_vm3, %v986_v0, %v873_v53  ;;  %v1022_v54 = vsel %vm1003_vm3, %v989_v34, %v879_v42  ;;  %v13909_v0 = vld [vmem:[#allocation40_spill] sm:$0xff]  ;;  %v13912_v42 = vld [vmem:[#allocation23_spill] sm:$0xff]  ;;  %v13917_v34 = vld [vmem:[#allocation26_spill] sm:$0xff] }
 0x1c3   : > { %1870 = vrot.lane.b32.xlu1 %v9416_v20, %s8328_s21  ;;  %7718 = vmatmul.mubr.msk.f32.gmra.mrb[14].mxu0 %vm1038_vm4, %v1019_v19  ;;  %v13910_v53 = vld [vmem:[#allocation24_spill] sm:$0xff]  ;;  %v13911_v19 = vld [vmem:[#allocation39_spill] sm:$0xff] }
 0x1c4   : > { %1876 = vrot.lane.b32.xlu0 %v9423_v56, %s8328_s21  ;;  %7720 = vmatprep.mubr.msk.f32.mxu0 %vm1038_vm4, %v1020_v33  ;;  %v961_v57 = vsel %vm305_vm0, %v13910_v53, %v13909_v0  ;;  %v962_v33 = vsel %vm305_vm0, %v13912_v42, %v13911_v19  ;;  %v13931_v0 = vld [vmem:[#allocation30_spill] sm:$0xff]  ;;  %v13932_v19 = vld [vmem:[#allocation45_spill] sm:$0xff] }
 0x1c5   : > { %v877_v38 = vpop.permute.xlu1 %876  ;;  %v883_v62 = vpop.permute.xlu0 %882  ;;  %v994_v36 = vsel %vm970_vm2, %v961_v57, %v13913_v3  ;;  %v995_v59 = vsel %vm970_vm2, %v962_v33, %v13915_v52  ;;  %v9570_v57 = vld [vmem:[#allocation2 + $0x129] sm:$0xff]  ;;  %v13933_v42 = vld [vmem:[#allocation29_spill] sm:$0xff] }
 0x1c6   : > { %v1021_v55 = vsel %vm1003_vm3, %v988_v5, %v877_v38  ;;  %v1024_v31 = vsel %vm1003_vm3, %v991_v8, %v883_v62  ;;  %v9526_v62 = vld [vmem:[#allocation2 + $0xf9] sm:$0xff]  ;;  %v968_v33 = vsel %vm305_vm0, %v13933_v42, %v13932_v19  ;;  %v13934_v3 = vld [vmem:[#allocation87_spill] sm:$0xff]  ;;  %v9577_v52 = vld [vmem:[#allocation2 + $0x151] sm:$0xff] }
 0x1c7   : > { %1874 = vrot.lane.b32.xlu1 %v9438_v2, %s8328_s21  ;;  %7721 = vmatmul.mubr.msk.f32.gmra.mrb[16].mxu0 %vm1038_vm4, %v1021_v55  ;;  %v963_v55 = vsel %vm305_vm0, %v13917_v34, %v13916_v4  ;;  %v13936_v34 = vld [vmem:[#allocation47_spill] sm:$0xff] }
 0x1c8   : > { %1880 = vrot.lane.b32.xlu0 %v9445_v25, %s8328_s21  ;;  %7723 = vmatprep.mubr.msk.f32.mxu0 %vm1038_vm4, %v1022_v54  ;;  %v13918_v54 = vld [vmem:[#allocation41_spill] sm:$0xff]  ;;  %v996_v6 = vsel %vm970_vm2, %v963_v55, %v13920_v7  ;;  %v13937_v55 = vld [vmem:[#allocation31_spill] sm:$0xff] }
 0x1c9   : > { %v881_v63 = vpop.permute.xlu1 %880  ;;  %v887_v35 = vpop.permute.xlu0 %886  ;;  %v964_v47 = vsel %vm305_vm0, %v13919_v61, %v13918_v54  ;;  %v969_v54 = vsel %vm305_vm0, %v13937_v55, %v13936_v34  ;;  %v9594_v61 = vld [vmem:[#allocation2 + $0x141] sm:$0xff] }
 0x1ca   : > { %v1023_v48 = vsel %vm1003_vm3, %v990_v50, %v881_v63  ;;  %v1026_v43 = vsel %vm1003_vm3, %v993_v51, %v887_v35  ;;  %v997_v50 = vsel %vm970_vm2, %v964_v47, %v13922_v29  ;;  %v13924_v35 = vld [vmem:[#allocation28_spill] sm:$0xff]  ;;  %v2173_v47 = vld [vmem:[#allocation7 + $0x10] sm:$0xff]  ;;  %v2174_v7 = vld [vmem:[#allocation7 + $0x18] sm:$0xff] }
 0x1cb   : > { %1878 = vrot.lane.b32.xlu1 %v9460_v26, %s8328_s21  ;;  %7724 = vmatmul.mubr.msk.f32.gmra.mrb[18].mxu0 %vm1038_vm4, %v1023_v48  ;;  %v13923_v48 = vld [vmem:[#allocation44_spill] sm:$0xff]  ;;  %v13945_v19 = vld [vmem:[#allocation55_spill] sm:$0xff] }
 0x1cc   : > { %1884 = vrot.lane.b32.xlu0 %v9467_v9, %s8328_s21  ;;  %7726 = vmatprep.mubr.msk.f32.mxu0 %vm1038_vm4, %v1024_v31  ;;  %v965_v31 = vsel %vm305_vm0, %v13924_v35, %v13923_v48  ;;  %v9598_v29 = vld [vmem:[#allocation2 + $0x169] sm:$0xff] }
 0x1cd   : > { %v885_v21 = vpop.permute.xlu1 %884  ;;  %v891_v58 = vpop.permute.xlu0 %890  ;;  %v998_v39 = vsel %vm970_vm2, %v965_v31, %v13927_v37  ;;  %v13938_v35 = vld [vmem:[#allocation48_spill] sm:$0xff]  ;;  %v13953_v55 = vld [vmem:[#allocation63_spill] sm:$0xff] }
 0x1ce   : > { %v1025_v1 = vsel %vm1003_vm3, %v992_v13, %v885_v21  ;;  %v1028_v38 = vsel %vm1003_vm3, %v995_v59, %v891_v58  ;;  %v9555_v13 = vld [vmem:[#allocation2 + $0x139] sm:$0xff]  ;;  %v9618_v31 = vld [vmem:[#allocation2 + $0x171] sm:$0xff] }
 0x1cf   : > { %1882 = vrot.lane.b32.xlu1 %v9482_v32, %s8328_s21  ;;  %7727 = vmatmul.mubr.msk.f32.gmra.mrb[20].mxu0 %vm1038_vm4, %v1025_v1  ;;  %13928 = vst [vmem:[#allocation60_spill] sm:$0xff] %v9555_v13  ;;  %v13929_v21 = vld [vmem:[#allocation82_spill] sm:$0xff] }
 0x1d0   : > { %1888 = vrot.lane.b32.xlu0 %v9489_v40, %s8328_s21  ;;  %7729 = vmatprep.mubr.msk.f32.mxu0 %vm1038_vm4, %v1026_v43  ;;  %v999_v12 = vsel %vm970_vm2, %v966_v23, %v13929_v21  ;;  %v13930_v43 = vld [vmem:[#allocation46_spill] sm:$0xff]  ;;  %v13941_v21 = vld [vmem:[#allocation51_spill] sm:$0xff] }
 0x1d1   : > { %v889_v41 = vpop.permute.xlu1 %888  ;;  %v895_v5 = vpop.permute.xlu0 %894  ;;  %v967_v53 = vsel %vm305_vm0, %v13931_v0, %v13930_v43  ;;  %v13935_v59 = vld [vmem:[#allocation86_spill] sm:$0xff] }
 0x1d2   : > { %v1027_v44 = vsel %vm1003_vm3, %v994_v36, %v889_v41  ;;  %v1030_v8 = vsel %vm1003_vm3, %v997_v50, %v895_v5  ;;  %v1000_v36 = vsel %vm970_vm2, %v967_v53, %v13934_v3  ;;  %v7904_v50 = vpack.c.bf16 %v2174_v7, %v2173_v47  ;;  %v13939_v23 = vld [vmem:[#allocation50_spill] sm:$0xff]  ;;  %v13946_v3 = vld [vmem:[#allocation56_spill] sm:$0xff] }
 0x1d3   : > { %1886 = vrot.lane.b32.xlu1 %v9504_v15, %s8328_s21  ;;  %7730 = vmatmul.mubr.msk.f32.gmra.mrb[22].mxu0 %vm1038_vm4, %v1027_v44  ;;  %v1001_v44 = vsel %vm970_vm2, %v968_v33, %v13935_v59  ;;  %v13944_v53 = vld [vmem:[#allocation54_spill] sm:$0xff] }
 0x1d4   : > { %1892 = vrot.lane.b32.xlu0 %v9511_v45, %s8328_s21  ;;  %7732 = vmatprep.mubr.msk.f32.mxu0 %vm1038_vm4, %v1028_v38 }
 0x1d5   : > { %v893_v22 = vpop.permute.xlu1 %892  ;;  %v899_v30 = vpop.permute.xlu0 %898  ;;  %7905 = vmatprep.subr.bf16.mxu1 %v7904_v50 }
 0x1d6   : > { %v1029_v63 = vsel %vm1003_vm3, %v996_v6, %v893_v22  ;;  %v1032_v58 = vsel %vm1003_vm3, %v999_v12, %v899_v30  ;;  %v1002_v6 = vsel %vm970_vm2, %v969_v54, %v9270_v17  ;;  %7907 = vmatpush3.bf16.msra.mxu1 %v7904_v50  ;;  %v13954_v54 = vld [vmem:[#allocation65_spill] sm:$0xff] }
 0x1d7   : > { %1890 = vrot.lane.b32.xlu1 %v9526_v62, %s8328_s21  ;;  %7733 = vmatmul.mubr.msk.f32.gmra.mrb[24].mxu0 %vm1038_vm4, %v1029_v63 }
 0x1d8   : > { %1896 = vrot.lane.b32.xlu0 %v9533_v24, %s8328_s21  ;;  %7735 = vmatprep.mubr.msk.f32.mxu0 %vm1038_vm4, %v1030_v8  ;;  %v9608_v8 = vld [vmem:[#allocation2 + $0x159] sm:$0xff] }
 0x1d9   : > { %v897_v49 = vpop.permute.xlu1 %896  ;;  %v903_v1 = vpop.permute.xlu0 %902 }
 0x1da   : > { %v1031_v51 = vsel %vm1003_vm3, %v998_v39, %v897_v49  ;;  %v1034_v4 = vsel %vm1003_vm3, %v1001_v44, %v903_v1  ;;  %v13940_v49 = vld [vmem:[#allocation49_spill] sm:$0xff]  ;;  %v13942_v1 = vld [vmem:[#allocation52_spill] sm:$0xff]  ;;  %v13949_v44 = vld [vmem:[#allocation59_spill] sm:$0xff] }
 0x1db   : > { %1894 = vrot.lane.b32.xlu1 %v9548_v46, %s8328_s21  ;;  %7736 = vmatmul.mubr.msk.f32.gmra.mrb[26].mxu0 %vm1038_vm4, %v1031_v51 }
 0x1dc   : > { %1900 = vrot.lane.b32.xlu0 %v9555_v13, %s8328_s21  ;;  %7738 = vmatprep.mubr.msk.f32.mxu0 %vm1038_vm4, %v1032_v58  ;;  %v13943_v58 = vld [vmem:[#allocation53_spill] sm:$0xff] }
 0x1dd   : > { %v901_v41 = vpop.permute.xlu1 %900  ;;  %v9582_v38 = vpop.permute.xlu0 %1724 }
 0x1de   : > { %v1033_v5 = vsel %vm1003_vm3, %v1000_v36, %v901_v41  ;;  %v13947_v36 = vld [vmem:[#allocation57_spill] sm:$0xff] }
 0x1df   : > { %1898 = vrot.lane.b32.xlu1 %v9570_v57, %s8328_s21  ;;  %7739 = vmatmul.mubr.msk.f32.gmra.mrb[28].mxu0 %vm1038_vm4, %v1033_v5  ;;  %v13950_v5 = vld [vmem:[#allocation61_spill] sm:$0xff] }
 0x1e0   : > { %1904 = vrot.lane.b32.xlu0 %v9577_v52, %s8328_s21  ;;  %7741 = vmatprep.mubr.msk.f32.mxu0 %vm1038_vm4, %v1034_v4 }
 0x1e1   : > { %v905_v22 = vpop.permute.xlu1 %904  ;;  %v9601_v30 = vpop.permute.xlu0 %1728 }
 0x1e2   : > { %v1035_v63 = vsel %vm1003_vm3, %v1002_v6, %v905_v22  ;;  %v13957_v6 = vld [vmem:[#allocation67_spill] sm:$0xff]  ;;  %v13958_v22 = vld [vmem:[#allocation69_spill] sm:$0xff] }
 0x1e3   : > { %1902 = vrot.lane.b32.xlu1 %v9594_v61, %s8328_s21  ;;  %7742 = vmatmul.mubr.msk.f32.gmra.mrb[30].mxu0 %vm1038_vm4, %v1035_v63 }
 0x1e4   : > { %1908 = vrot.lane.b32.xlu0 %v9598_v29, %s8328_s21 }
 0x1e5   : > { %v9610_v17 = vpop.permute.xlu1 %1726  ;;  %v9612_v48 = vpop.permute.xlu0 %1732 }
 0x1e7   : > { %1906 = vrot.lane.b32.xlu1 %v9608_v8, %s8328_s21 }
 0x1e8   : > { %1912 = vrot.lane.b32.xlu0 %v13938_v35, %s8328_s21  ;;  %v13961_v35 = vld [vmem:[#allocation71_spill] sm:$0xff] }
 0x1e9   : > { %v9620_v60 = vpop.permute.xlu1 %1730  ;;  %v9622_v11 = vpop.permute.xlu0 %1736 }
 0x1eb   : > { %1910 = vrot.lane.b32.xlu1 %v9618_v31, %s8328_s21 }
 0x1ec   : > { %1980 = vrot.lane.b32.xlu0 %v13939_v23, %s8329_s20  ;;  %v13962_v23 = vld [vmem:[#allocation73_spill] sm:$0xff] }
 0x1ed   : > { %v9628_v37 = vpop.permute.xlu1 %1734  ;;  %v9630_v39 = vpop.permute.xlu0 %1740 }
 0x1ef   : > { %1914 = vrot.lane.b32.xlu1 %v13940_v49, %s8328_s21 }
 0x1f0   : > { %1984 = vrot.lane.b32.xlu0 %v13941_v21, %s8329_s20 }
 0x1f1   : > { %v9636_v12 = vpop.permute.xlu1 %1738  ;;  %v9638_v51 = vpop.permute.xlu0 %1744 }
 0x1f3   : > { %1982 = vrot.lane.b32.xlu1 %v13942_v1, %s8329_s20  ;;  %v13965_v1 = vld [vmem:[#allocation75_spill] sm:$0xff] }
 0x1f4   : > { %1988 = vrot.lane.b32.xlu0 %v13943_v58, %s8329_s20  ;;  %v13966_v58 = vld [vmem:[#allocation77_spill] sm:$0xff] }
 0x1f5   : > { %v9644_v43 = vpop.permute.xlu1 %1742  ;;  %v9646_v0 = vpop.permute.xlu0 %1748 }
 0x1f7   : > { %1986 = vrot.lane.b32.xlu1 %v13944_v53, %s8329_s20 }
 0x1f8   : > { %1992 = vrot.lane.b32.xlu0 %v13945_v19, %s8329_s20 }
 0x1f9   : > { %v9652_v42 = vpop.permute.xlu1 %1746  ;;  %v9654_v33 = vpop.permute.xlu0 %1752 }
 0x1fb   : > { %1990 = vrot.lane.b32.xlu1 %v13946_v3, %s8329_s20  ;;  %v13969_v3 = vld [vmem:[#allocation79_spill] sm:$0xff] }
 0x1fc   : > { %1996 = vrot.lane.b32.xlu0 %v13947_v36, %s8329_s20  ;;  %v13970_v36 = vld [vmem:[#allocation81_spill] sm:$0xff] }
 0x1fd   : > { %v9660_v41 = vpop.permute.xlu1 %1750  ;;  %v9662_v59 = vpop.permute.xlu0 %1756 }
 0x1fe   : > { %13948 = vst [vmem:[#allocation58_spill] sm:$0xff] %v9662_v59 }
 0x1ff   : > { %1994 = vrot.lane.b32.xlu1 %v13949_v44, %s8329_s20 }
 0x200   : > { %2000 = vrot.lane.b32.xlu0 %v13950_v5, %s8329_s20 }
 0x201   : > { %v9668_v4 = vpop.permute.xlu1 %1754  ;;  %v9670_v34 = vpop.permute.xlu0 %1760 }
 0x202   : > { %13951 = vst [vmem:[#allocation34_spill] sm:$0xff] %v9668_v4  ;;  %13952 = vst [vmem:[#allocation18_spill] sm:$0xff] %v9670_v34  ;;  %v9806_v34 = vld [vmem:[#allocation2 + $0x91] sm:$0xff] }
 0x203   : > { %1998 = vrot.lane.b32.xlu1 %v13953_v55, %s8329_s20  ;;  %v13973_v55 = vld [vmem:[#allocation83_spill] sm:$0xff] }
 0x204   : > { %2004 = vrot.lane.b32.xlu0 %v13954_v54, %s8329_s20  ;;  %v13974_v54 = vld [vmem:[#allocation85_spill] sm:$0xff] }
 0x205   : > { %v9676_v47 = vpop.permute.xlu1 %1758  ;;  %v9678_v7 = vpop.permute.xlu0 %1764 }
 0x206   : > { %13955 = vst [vmem:[#allocation33_spill] sm:$0xff] %v9676_v47  ;;  %13956 = vst [vmem:[#allocation17_spill] sm:$0xff] %v9678_v7 }
 0x207   : > { %2002 = vrot.lane.b32.xlu1 %v13957_v6, %s8329_s20 }
 0x208   : > { %2008 = vrot.lane.b32.xlu0 %v13958_v22, %s8329_s20 }
 0x209   : > { %v9684_v50 = vpop.permute.xlu1 %1762  ;;  %v9686_v63 = vpop.permute.xlu0 %1768 }
 0x20a   : > { %13959 = vst [vmem:[#allocation64_spill] sm:$0xff] %v9684_v50  ;;  %13960 = vst [vmem:[#allocation62_spill] sm:$0xff] %v9686_v63 }
 0x20b   : > { %2006 = vrot.lane.b32.xlu1 %v13961_v35, %s8329_s20  ;;  %v13977_v35 = vld [vmem:[#allocation88_spill] sm:$0xff] }
 0x20c   : > { %2012 = vrot.lane.b32.xlu0 %v13962_v23, %s8329_s20 }
 0x20d   : > { %v9692_v49 = vpop.permute.xlu1 %1766  ;;  %v9694_v21 = vpop.permute.xlu0 %1772 }
 0x20e   : > { %13963 = vst [vmem:[#allocation36_spill] sm:$0xff] %v9692_v49  ;;  %13964 = vst [vmem:[#allocation20_spill] sm:$0xff] %v9694_v21  ;;  %v9796_v49 = vld [vmem:[#allocation2 + $0x79] sm:$0xff] }
 0x20f   : > { %2010 = vrot.lane.b32.xlu1 %v13965_v1, %s8329_s20 }
 0x210   : > { %2016 = vrot.lane.b32.xlu0 %v13966_v58, %s8329_s20  ;;  %v13979_v58 = vld [vmem:[#allocation89_spill] sm:$0xff] }
 0x211   : > { %v9700_v53 = vpop.permute.xlu1 %1770  ;;  %v9702_v19 = vpop.permute.xlu0 %1776 }
 0x212   : > { %13967 = vst [vmem:[#allocation35_spill] sm:$0xff] %v9700_v53  ;;  %13968 = vst [vmem:[#allocation19_spill] sm:$0xff] %v9702_v19  ;;  %v9792_v53 = vld [vmem:[#allocation2 + $0x51] sm:$0xff] }
 0x213   : > { %2014 = vrot.lane.b32.xlu1 %v13969_v3, %s8329_s20  ;;  %v13980_v3 = vld [vmem:[#allocation90_spill] sm:$0xff] }
 0x214   : > { %2020 = vrot.lane.b32.xlu0 %v13970_v36, %s8329_s20 }
 0x215   : > { %v9708_v44 = vpop.permute.xlu1 %1774  ;;  %v9710_v5 = vpop.permute.xlu0 %1780 }
 0x216   : > { %13971 = vst [vmem:[#allocation68_spill] sm:$0xff] %v9708_v44  ;;  %13972 = vst [vmem:[#allocation66_spill] sm:$0xff] %v9710_v5  ;;  %v9772_v5 = vld [vmem:[#allocation2 + $0x49] sm:$0xff]  ;;  %v9784_v44 = vld [vmem:[#allocation2 + $0x61] sm:$0xff] }
 0x217   : > { %2018 = vrot.lane.b32.xlu1 %v13973_v55, %s8329_s20 }
 0x218   : > { %2024 = vrot.lane.b32.xlu0 %v13974_v54, %s8329_s20  ;;  %v1690_v54 = vld [vmem:[#allocation2 + $0x182] sm:$0xff] }
 0x219   : > { %v9716_v6 = vpop.permute.xlu1 %1778 }
 0x21a   : > { %13975 = vst [vmem:[#allocation38_spill] sm:$0xff] %v9716_v6  ;;  %v9718_v22 = vpop.permute.xlu0 %1784 }
 0x21b   : > { %13976 = vst [vmem:[#allocation22_spill] sm:$0xff] %v9718_v22  ;;  %2022 = vrot.lane.b32.xlu1 %v9252_v16, %s8329_s20 }
 0x21c   : > { %2028 = vrot.lane.b32.xlu0 %v13977_v35, %s8329_s20 }
 0x21d   : > { %v9724_v23 = vpop.permute.xlu1 %1782 }
 0x21e   : > { %13978 = vst [vmem:[#allocation37_spill] sm:$0xff] %v9724_v23  ;;  %v9726_v1 = vpop.permute.xlu0 %1852  ;;  %v9768_v23 = vld [vmem:[#allocation2 + $0x21] sm:$0xff] }
 0x21f   : > { %2026 = vrot.lane.b32.xlu1 %v13979_v58, %s8329_s20 }
 0x220   : > { %2032 = vrot.lane.b32.xlu0 %v13980_v3, %s8329_s20 }
 0x221   : > { %v9732_v36 = vpop.permute.xlu1 %1786 }
 0x222   : > { %13981 = vst [vmem:[#allocation21_spill] sm:$0xff] %v9732_v36  ;;  %v9734_v55 = vpop.permute.xlu0 %1856  ;;  %v9751_v36 = vld [vmem:[#allocation2 + $0x19] sm:$0xff] }
 0x223   : > { %2030 = vrot.lane.b32.xlu1 %v9280_v18, %s8329_s20 }
 0x224   : > { %2036 = vrot.lane.b32.xlu0 %v9287_v14, %s8329_s20  ;;  %v1691_v14 = vld [vmem:[#allocation2 + $0x18a] sm:$0xff] }
 0x225   : > { %v9740_v16 = vpop.permute.xlu1 %1854 }
 0x226   : > { %v9742_v35 = vpop.permute.xlu0 %1860 }
 0x227   : > { %2034 = vrot.lane.b32.xlu1 %v9302_v28, %s8329_s20  ;;  %v9761_v28 = vld [vmem:[#allocation2 + $0x31] sm:$0xff] }
 0x228   : > { %2040 = vrot.lane.b32.xlu0 %v1690_v54, %s8329_s20 }
 0x229   : > { %v9747_v58 = vpop.permute.xlu1 %1858 }
 0x22a   : > { %v9749_v3 = vpop.permute.xlu0 %1864 }
 0x22b   : > { %2038 = vrot.lane.b32.xlu1 %v9322_v27, %s8329_s20 }
 0x22c   : > { %2862 = vrot.lane.b32.xlu0 %v9751_v36, %s8327_s29 }
 0x22d   : > { %v9757_v18 = vpop.permute.xlu1 %1862 }
 0x22e   : > { %v9759_v22 = vpop.permute.xlu0 %1868 }
 0x22f   : > { %2042 = vrot.lane.b32.xlu1 %v1691_v14, %s8329_s20  ;;  %v9780_v14 = vld [vmem:[#allocation2 + $0x39] sm:$0xff] }
 0x230   : > { %2866 = vrot.lane.b32.xlu0 %v9761_v28, %s8327_s29 }
 0x231   : > { %v9766_v54 = vpop.permute.xlu1 %1866 }
 0x232   : > { %v9770_v27 = vpop.permute.xlu0 %1872 }
 0x233   : > { %2864 = vrot.lane.b32.xlu1 %v9768_v23, %s8327_s29 }
 0x234   : > { %2870 = vrot.lane.b32.xlu0 %v9772_v5, %s8327_s29 }
 0x235   : > { %v9778_v6 = vpop.permute.xlu1 %1870 }
 0x236   : > { %v9782_v19 = vpop.permute.xlu0 %1876 }
 0x237   : > { %2868 = vrot.lane.b32.xlu1 %v9780_v14, %s8327_s29 }
 0x238   : > { %2874 = vrot.lane.b32.xlu0 %v9784_v44, %s8327_s29 }
 0x239   : > { %v9790_v21 = vpop.permute.xlu1 %1874 }
 0x23a   : > { %v9794_v63 = vpop.permute.xlu0 %1880 }
 0x23b   : > { %13982 = vst [vmem:[#allocation72_spill] sm:$0xff] %v9794_v63  ;;  %2872 = vrot.lane.b32.xlu1 %v9792_v53, %s8327_s29 }
 0x23c   : > { %2878 = vrot.lane.b32.xlu0 %v9796_v49, %s8327_s29 }
 0x23d   : > { %v9802_v7 = vpop.permute.xlu1 %1878 }
 0x23e   : > { %v9804_v50 = vpop.permute.xlu0 %1884 }
 0x23f   : > { %13983 = vst [vmem:[#allocation70_spill] sm:$0xff] %v9804_v50  ;;  %2876 = vrot.lane.b32.xlu1 %v9396_v10, %s8327_s29 }
 0x240   : > { %2882 = vrot.lane.b32.xlu0 %v9806_v34, %s8327_s29 }
 0x241   : > { %v9812_v47 = vpop.permute.xlu1 %1882 }
 0x242   : > { %13984 = vst [vmem:[#allocation40_spill] sm:$0xff] %v9812_v47  ;;  %v9814_v59 = vpop.permute.xlu0 %1888 }
 0x243   : > { %13985 = vst [vmem:[#allocation24_spill] sm:$0xff] %v9814_v59  ;;  %2880 = vrot.lane.b32.xlu1 %v9416_v20, %s8327_s29 }
 0x244   : > { %2886 = vrot.lane.b32.xlu0 %v9423_v56, %s8327_s29 }
 0x245   : > { %v9820_v4 = vpop.permute.xlu1 %1886 }
 0x246   : > { %13986 = vst [vmem:[#allocation39_spill] sm:$0xff] %v9820_v4  ;;  %v9822_v50 = vpop.permute.xlu0 %1892 }
 0x247   : > { %13987 = vst [vmem:[#allocation23_spill] sm:$0xff] %v9822_v50  ;;  %2884 = vrot.lane.b32.xlu1 %v9438_v2, %s8327_s29 }
 0x248   : > { %2890 = vrot.lane.b32.xlu0 %v9445_v25, %s8327_s29 }
 0x249   : > { %v9828_v63 = vpop.permute.xlu1 %1890 }
 0x24a   : > { %13988 = vst [vmem:[#allocation76_spill] sm:$0xff] %v9828_v63  ;;  %v9830_v47 = vpop.permute.xlu0 %1896 }
 0x24b   : > { %13989 = vst [vmem:[#allocation74_spill] sm:$0xff] %v9830_v47  ;;  %2888 = vrot.lane.b32.xlu1 %v9460_v26, %s8327_s29 }
 0x24c   : > { %2894 = vrot.lane.b32.xlu0 %v9467_v9, %s8327_s29 }
 0x24d   : > { %v9836_v59 = vpop.permute.xlu1 %1894 }
 0x24e   : > { %13990 = vst [vmem:[#allocation42_spill] sm:$0xff] %v9836_v59  ;;  %v9838_v4 = vpop.permute.xlu0 %1900 }
 0x24f   : > { %13991 = vst [vmem:[#allocation26_spill] sm:$0xff] %v9838_v4  ;;  %2892 = vrot.lane.b32.xlu1 %v9482_v32, %s8327_s29 }
 0x250   : > { %2898 = vrot.lane.b32.xlu0 %v9489_v40, %s8327_s29 }
 0x251   : > { %v9844_v50 = vpop.permute.xlu1 %1898 }
 0x252   : > { %13992 = vst [vmem:[#allocation41_spill] sm:$0xff] %v9844_v50  ;;  %v9846_v63 = vpop.permute.xlu0 %1904  ;;  %v1564_v50 = vld [vmem:[#allocation2 + $0x1] sm:$0xff] }
 0x253   : > { %13993 = vst [vmem:[#allocation25_spill] sm:$0xff] %v9846_v63  ;;  %2896 = vrot.lane.b32.xlu1 %v9504_v15, %s8327_s29 }
 0x254   : > { %2902 = vrot.lane.b32.xlu0 %v9511_v45, %s8327_s29 }
 0x255   : > { %v9852_v47 = vpop.permute.xlu1 %1902 }
 0x256   : > { %13994 = vst [vmem:[#allocation80_spill] sm:$0xff] %v9852_v47  ;;  %v9854_v59 = vpop.permute.xlu0 %1908 }
 0x257   : > { %13995 = vst [vmem:[#allocation78_spill] sm:$0xff] %v9854_v59  ;;  %2900 = vrot.lane.b32.xlu1 %v9526_v62, %s8327_s29  ;;  %v2076_v59 = vsel %vm305_vm0, %v1564_v50, %v9582_v38 }
 0x258   : > { %2906 = vrot.lane.b32.xlu0 %v9533_v24, %s8327_s29  ;;  %v2108_v45 = vsel %vm970_vm2, %v2076_v59, %v9726_v1 }
 0x259   : > { %v9860_v4 = vpop.permute.xlu1 %1906 }
 0x25a   : > { %13996 = vst [vmem:[#allocation44_spill] sm:$0xff] %v9860_v4  ;;  %v9862_v63 = vpop.permute.xlu0 %1912  ;;  %v1565_v4 = vld [vmem:[#allocation2 + $0x9] sm:$0xff] }
 0x25b   : > { %13997 = vst [vmem:[#allocation28_spill] sm:$0xff] %v9862_v63  ;;  %2904 = vrot.lane.b32.xlu1 %v9548_v46, %s8327_s29  ;;  %v2077_v59 = vsel %vm305_vm0, %v1565_v4, %v9610_v17  ;;  %v2080_v4 = vsel %vm305_vm0, %v9761_v28, %v9612_v48  ;;  %v2081_v48 = vsel %vm305_vm0, %v9780_v14, %v9628_v37  ;;  %v2768_v28 = vld [vmem:[#allocation2 + $0x48] sm:$0xff] }
 0x25c   : > { %2910 = vrot.lane.b32.xlu0 %v9555_v13, %s8327_s29 }
 0x25d   : > { %v9870_v47 = vpop.permute.xlu1 %1910 }
 0x25e   : > { %13998 = vst [vmem:[#allocation43_spill] sm:$0xff] %v9870_v47  ;;  %v1981_v24 = vpop.permute.xlu0 %1980 }
 0x25f   : > { %2908 = vrot.lane.b32.xlu1 %v9570_v57, %s8327_s29  ;;  %v2140_v63 = vsel %vm1003_vm3, %v2108_v45, %v1981_v24  ;;  %v2078_v45 = vsel %vm305_vm0, %v9751_v36, %v9601_v30  ;;  %v2109_v24 = vsel %vm970_vm2, %v2077_v59, %v9740_v16  ;;  %v2079_v30 = vsel %vm305_vm0, %v9768_v23, %v9620_v60  ;;  %v2766_v16 = vld [vmem:[#allocation2 + $0x30] sm:$0xff] }
 0x260   : > { %2914 = vrot.lane.b32.xlu0 %v9577_v52, %s8327_s29  ;;  %7748 = vmatprep.mubr.msk.f32.mxu1 %vm1038_vm4, %v2140_v63  ;;  %v2763_v63 = vld [vmem:[#allocation2 + $0x181] sm:$0xff]  ;;  %v2110_v1 = vsel %vm970_vm2, %v2078_v45, %v9734_v55  ;;  %v2111_v36 = vsel %vm970_vm2, %v2079_v30, %v9747_v58  ;;  %v2764_v23 = vld [vmem:[#allocation2 + $0x189] sm:$0xff] }
 0x261   : > { %v9880_v13 = vpop.permute.xlu1 %1914 }
 0x262   : > { %13999 = vst [vmem:[#allocation27_spill] sm:$0xff] %v9880_v13  ;;  %v1985_v38 = vpop.permute.xlu0 %1984 }
 0x263   : > { %2912 = vrot.lane.b32.xlu1 %v9594_v61, %s8327_s29  ;;  %v2142_v17 = vsel %vm1003_vm3, %v2110_v1, %v1985_v38 }
 0x264   : > { %2918 = vrot.lane.b32.xlu0 %v9598_v29, %s8327_s29 }
 0x265   : > { %v1983_v50 = vpop.permute.xlu1 %1982 }
 0x266   : > { %v2141_v13 = vsel %vm1003_vm3, %v2109_v24, %v1983_v50  ;;  %v1989_v47 = vpop.permute.xlu0 %1988 }
 0x267   : > { %2916 = vrot.lane.b32.xlu1 %v9608_v8, %s8327_s29  ;;  %7749 = vmatmul.mubr.msk.f32.vlgmr.msra.gmra.mrb[0].mxu1 %vm1038_vm4, %v2141_v13  ;;  %v2112_v13 = vsel %vm970_vm2, %v2080_v4, %v9742_v35  ;;  %v2082_v35 = vsel %vm305_vm0, %v9772_v5, %v9622_v11  ;;  %v2083_v11 = vsel %vm305_vm0, %v9792_v53, %v9636_v12  ;;  %v2767_v5 = vld [vmem:[#allocation2 + $0x38] sm:$0xff] }
 0x268   : > { %2922 = vrot.lane.b32.xlu0 %v2763_v63, %s8327_s29  ;;  %7751 = vmatprep.mubr.msk.f32.mxu1 %vm1038_vm4, %v2142_v17  ;;  %v2144_v60 = vsel %vm1003_vm3, %v2112_v13, %v1989_v47  ;;  %v2113_v47 = vsel %vm970_vm2, %v2081_v48, %v9757_v18  ;;  %v2114_v45 = vsel %vm970_vm2, %v2082_v35, %v9749_v3  ;;  %v2770_v63 = vld [vmem:[#allocation2 + $0x60] sm:$0xff]  ;;  %v2772_v4 = vld [vmem:[#allocation2 + $0x78] sm:$0xff]  ;;  %v2774_v13 = vld [vmem:[#allocation2 + $0x90] sm:$0xff] }
 0x269   : > { %v1987_v55 = vpop.permute.xlu1 %1986  ;;  %v2084_v3 = vsel %vm305_vm0, %v9784_v44, %v9630_v39  ;;  %v2115_v18 = vsel %vm970_vm2, %v2083_v11, %v9766_v54  ;;  %v2085_v39 = vsel %vm305_vm0, %v9396_v10, %v9644_v43  ;;  %v2769_v44 = vld [vmem:[#allocation2 + $0x50] sm:$0xff]  ;;  %v2773_v35 = vld [vmem:[#allocation2 + $0x80] sm:$0xff] }
 0x26a   : > { %v2143_v38 = vsel %vm1003_vm3, %v2111_v36, %v1987_v55  ;;  %v1993_v59 = vpop.permute.xlu0 %1992  ;;  %v2116_v1 = vsel %vm970_vm2, %v2084_v3, %v9759_v22  ;;  %v2086_v22 = vsel %vm305_vm0, %v9796_v49, %v9638_v51  ;;  %v2117_v54 = vsel %vm970_vm2, %v2085_v39, %v9778_v6  ;;  %v2771_v49 = vld [vmem:[#allocation2 + $0x68] sm:$0xff] }
 0x26b   : > { %2920 = vrot.lane.b32.xlu1 %v9618_v31, %s8327_s29  ;;  %7752 = vmatmul.mubr.msk.f32.gmra.mrb[2].mxu1 %vm1038_vm4, %v2143_v38  ;;  %v2146_v14 = vsel %vm1003_vm3, %v2114_v45, %v1993_v59  ;;  %v2118_v36 = vsel %vm970_vm2, %v2086_v22, %v9770_v27  ;;  %v2087_v51 = vsel %vm305_vm0, %v9416_v20, %v9652_v42  ;;  %v2776_v45 = vld [vmem:[#allocation2 + $0xa8] sm:$0xff] }
 0x26c   : > { %2990 = vrot.lane.b32.xlu0 %v2766_v16, %s8328_s21  ;;  %7754 = vmatprep.mubr.msk.f32.mxu1 %vm1038_vm4, %v2144_v60  ;;  %v2088_v6 = vsel %vm305_vm0, %v9806_v34, %v9646_v0  ;;  %v2119_v27 = vsel %vm970_vm2, %v2087_v51, %v9790_v21  ;;  %v2089_v34 = vsel %vm305_vm0, %v9438_v2, %v9660_v41 }
 0x26d   : > { %v1991_v58 = vpop.permute.xlu1 %1990  ;;  %v2120_v38 = vsel %vm970_vm2, %v2088_v6, %v9782_v19 }
 0x26e   : > { %v2145_v24 = vsel %vm1003_vm3, %v2113_v47, %v1991_v58  ;;  %v1997_v37 = vpop.permute.xlu0 %1996  ;;  %v2090_v47 = vsel %vm305_vm0, %v9423_v56, %v9654_v33  ;;  %v2121_v58 = vsel %vm970_vm2, %v2089_v34, %v9802_v7  ;;  %v14001_v7 = vld [vmem:[#allocation34_spill] sm:$0xff] }
 0x26f   : > { %2924 = vrot.lane.b32.xlu1 %v2764_v23, %s8327_s29  ;;  %7755 = vmatmul.mubr.msk.f32.gmra.mrb[4].mxu1 %vm1038_vm4, %v2145_v24  ;;  %v2148_v53 = vsel %vm1003_vm3, %v2116_v1, %v1997_v37  ;;  %v14000_v24 = vld [vmem:[#allocation72_spill] sm:$0xff] }
 0x270   : > { %2994 = vrot.lane.b32.xlu0 %v2768_v28, %s8328_s21  ;;  %7757 = vmatprep.mubr.msk.f32.mxu1 %vm1038_vm4, %v2146_v14  ;;  %v2122_v37 = vsel %vm970_vm2, %v2090_v47, %v14000_v24 }
 0x271   : > { %v1995_v50 = vpop.permute.xlu1 %1994 }
 0x272   : > { %v2147_v17 = vsel %vm1003_vm3, %v2115_v18, %v1995_v50  ;;  %v2001_v12 = vpop.permute.xlu0 %2000  ;;  %v2091_v50 = vsel %vm305_vm0, %v9460_v26, %v14001_v7 }
 0x273   : > { %2992 = vrot.lane.b32.xlu1 %v2767_v5, %s8328_s21  ;;  %7758 = vmatmul.mubr.msk.f32.gmra.mrb[6].mxu1 %vm1038_vm4, %v2147_v17  ;;  %v2150_v43 = vsel %vm1003_vm3, %v2118_v36, %v2001_v12  ;;  %v2775_v12 = vld [vmem:[#allocation2 + $0x98] sm:$0xff] }
 0x274   : > { %2998 = vrot.lane.b32.xlu0 %v2770_v63, %s8328_s21  ;;  %7760 = vmatprep.mubr.msk.f32.mxu1 %vm1038_vm4, %v2148_v53  ;;  %v14002_v53 = vld [vmem:[#allocation58_spill] sm:$0xff] }
 0x275   : > { %v1999_v30 = vpop.permute.xlu1 %1998  ;;  %v2092_v39 = vsel %vm305_vm0, %v9445_v25, %v14002_v53  ;;  %v14012_v53 = vld [vmem:[#allocation76_spill] sm:$0xff] }
 0x276   : > { %v2149_v55 = vsel %vm1003_vm3, %v2117_v54, %v1999_v30  ;;  %v2005_v10 = vpop.permute.xlu0 %2004  ;;  %v2778_v30 = vld [vmem:[#allocation2 + $0xc0] sm:$0xff] }
 0x277   : > { %2996 = vrot.lane.b32.xlu1 %v2769_v44, %s8328_s21  ;;  %7761 = vmatmul.mubr.msk.f32.gmra.mrb[8].mxu1 %vm1038_vm4, %v2149_v55  ;;  %v2152_v60 = vsel %vm1003_vm3, %v2120_v38, %v2005_v10  ;;  %v14003_v44 = vld [vmem:[#allocation40_spill] sm:$0xff]  ;;  %v14005_v55 = vld [vmem:[#allocation70_spill] sm:$0xff] }
 0x278   : > { %3002 = vrot.lane.b32.xlu0 %v2772_v4, %s8328_s21  ;;  %7763 = vmatprep.mubr.msk.f32.mxu1 %vm1038_vm4, %v2150_v43  ;;  %v2123_v22 = vsel %vm970_vm2, %v2091_v50, %v14003_v44  ;;  %v14004_v4 = vld [vmem:[#allocation33_spill] sm:$0xff]  ;;  %v2124_v10 = vsel %vm970_vm2, %v2092_v39, %v14005_v55  ;;  %v2779_v50 = vld [vmem:[#allocation2 + $0xc8] sm:$0xff] }
 0x279   : > { %v2003_v16 = vpop.permute.xlu1 %2002  ;;  %v2093_v36 = vsel %vm305_vm0, %v9482_v32, %v14004_v4 }
 0x27a   : > { %v2151_v59 = vsel %vm1003_vm3, %v2119_v27, %v2003_v16  ;;  %v2009_v20 = vpop.permute.xlu0 %2008  ;;  %v7698_v42 = vpop.f32.mrb[0].mxu0 }
 0x27b   : > { %1361 = vst.msk [vmem:[#allocation3 + $0x8] sm:$0xff] %vm305_vm0, %v7698_v42  ;;  %v1393_v48 = vsel %vm305_vm0, %v7698_v42, 0.0  ;;  %v1463_v23 = vmul.f32 %v7698_v42, %v7698_v42  ;;  %3000 = vrot.lane.b32.xlu1 %v2771_v49, %s8328_s21  ;;  %v1201_v0 = vpop.f32.mrb[1].mxu0  ;;  %7764 = vmatmul.mubr.msk.f32.gmra.mrb[10].mxu1 %vm1038_vm4, %v2151_v59  ;;  %v2154_v18 = vsel %vm1003_vm3, %v2122_v37, %v2009_v20 }
 0x27c   : > { %1360 = vst.msk [vmem:[#allocation3] sm:$0xff] %vm305_vm0, %v1201_v0  ;;  %v1392_v21 = vsel %vm305_vm0, %v1201_v0, 0.0  ;;  %v1462_v19 = vmul.f32 %v1201_v0, %v1201_v0  ;;  %3006 = vrot.lane.b32.xlu0 %v2774_v13, %s8328_s21  ;;  %7766 = vmatprep.mubr.msk.f32.mxu1 %vm1038_vm4, %v2152_v60  ;;  %v2777_v60 = vld [vmem:[#allocation2 + $0xb0] sm:$0xff] }
 0x27d   : > { %v1495_v28 = vsel %vm305_vm0, %v1463_v23, 0.0  ;;  %v1394_v2 = vadd.f32 %v1393_v48, %v1392_v21  ;;  %v2007_v41 = vpop.permute.xlu1 %2006  ;;  %v14006_v48 = vld [vmem:[#allocation18_spill] sm:$0xff]  ;;  %v14007_v0 = vld [vmem:[#allocation64_spill] sm:$0xff]  ;;  %v14008_v21 = vld [vmem:[#allocation39_spill] sm:$0xff] }
 0x27e   : > { %v1494_v14 = vsel %vm305_vm0, %v1462_v19, 0.0  ;;  %v2153_v11 = vsel %vm1003_vm3, %v2121_v58, %v2007_v41  ;;  %v2013_v5 = vpop.permute.xlu0 %2012  ;;  %v7701_v3 = vpop.f32.mrb[2].mxu0  ;;  %v2094_v23 = vsel %vm305_vm0, %v9467_v9, %v14006_v48  ;;  %v2095_v34 = vsel %vm305_vm0, %v9504_v15, %v14007_v0  ;;  %v2780_v58 = vld [vmem:[#allocation2 + $0xd8] sm:$0xff]  ;;  %v14017_v48 = vld [vmem:[#allocation42_spill] sm:$0xff] }
 0x27f   : > { %v1496_v56 = vadd.f32 %v1495_v28, %v1494_v14  ;;  %1363 = vst.msk [vmem:[#allocation3 + $0x18] sm:$0xff] %vm305_vm0, %v7701_v3  ;;  %3004 = vrot.lane.b32.xlu1 %v2773_v35, %s8328_s21  ;;  %v1211_v33 = vpop.f32.mrb[3].mxu0  ;;  %7767 = vmatmul.mubr.msk.f32.gmra.mrb[12].mxu1 %vm1038_vm4, %v2153_v11  ;;  %v1465_v63 = vmul.f32 %v7701_v3, %v7701_v3  ;;  %v1397_v27 = vsel %vm305_vm0, %v7701_v3, 0.0  ;;  %v14009_v28 = vld [vmem:[#allocation24_spill] sm:$0xff] }
 0x280   : > { %1362 = vst.msk [vmem:[#allocation3 + $0x10] sm:$0xff] %vm305_vm0, %v1211_v33  ;;  %v1395_v1 = vsel %vm305_vm0, %v1211_v33, 0.0  ;;  %v1464_v17 = vmul.f32 %v1211_v33, %v1211_v33  ;;  %3010 = vrot.lane.b32.xlu0 %v2776_v45, %s8328_s21  ;;  %7769 = vmatprep.mubr.msk.f32.mxu1 %vm1038_vm4, %v2154_v18  ;;  %v2156_v25 = vsel %vm1003_vm3, %v2124_v10, %v2013_v5 }
 0x281   : > { %v1396_v54 = vadd.f32 %v1395_v1, %v1394_v2  ;;  %v2011_v26 = vpop.permute.xlu1 %2010  ;;  %v1499_v38 = vsel %vm305_vm0, %v1465_v63, 0.0  ;;  %v2125_v19 = vsel %vm970_vm2, %v2093_v36, %v14008_v21  ;;  %v2126_v2 = vsel %vm970_vm2, %v2094_v23, %v14009_v28  ;;  %v14010_v63 = vld [vmem:[#allocation17_spill] sm:$0xff]  ;;  %v2784_v21 = vld [vmem:[#allocation2 + $0x108] sm:$0xff] }
 0x282   : > { %v1497_v43 = vsel %vm305_vm0, %v1464_v17, 0.0  ;;  %v2155_v51 = vsel %vm1003_vm3, %v2123_v22, %v2011_v26  ;;  %v2017_v49 = vpop.permute.xlu0 %2016  ;;  %v7704_v6 = vpop.f32.mrb[4].mxu0  ;;  %v2096_v1 = vsel %vm305_vm0, %v9489_v40, %v14010_v63  ;;  %v14011_v17 = vld [vmem:[#allocation36_spill] sm:$0xff]  ;;  %v2127_v39 = vsel %vm970_vm2, %v2095_v34, %v14012_v53  ;;  %v14013_v26 = vld [vmem:[#allocation23_spill] sm:$0xff]  ;;  %v14022_v63 = vld [vmem:[#allocation41_spill] sm:$0xff] }
 0x283   : > { %v1498_v16 = vadd.f32 %v1497_v43, %v1496_v56  ;;  %1365 = vst.msk [vmem:[#allocation3 + $0x28] sm:$0xff] %vm305_vm0, %v7704_v6  ;;  %v1467_v13 = vmul.f32 %v7704_v6, %v7704_v6  ;;  %3008 = vrot.lane.b32.xlu1 %v2775_v12, %s8328_s21  ;;  %v1221_v32 = vpop.f32.mrb[5].mxu0  ;;  %7770 = vmatmul.mubr.msk.f32.gmra.mrb[14].mxu1 %vm1038_vm4, %v2155_v51  ;;  %v1401_v15 = vsel %vm305_vm0, %v7704_v6, 0.0  ;;  %v2786_v53 = vld [vmem:[#allocation2 + $0x120] sm:$0xff] }
 0x284   : > { %1364 = vst.msk [vmem:[#allocation3 + $0x20] sm:$0xff] %vm305_vm0, %v1221_v32  ;;  %v1398_v59 = vadd.f32 %v1397_v27, %v1396_v54  ;;  %v1399_v20 = vsel %vm305_vm0, %v1221_v32, 0.0  ;;  %v1466_v42 = vmul.f32 %v1221_v32, %v1221_v32  ;;  %3014 = vrot.lane.b32.xlu0 %v2778_v30, %s8328_s21  ;;  %7772 = vmatprep.mubr.msk.f32.mxu1 %vm1038_vm4, %v2156_v25  ;;  %v2782_v54 = vld [vmem:[#allocation2 + $0xf0] sm:$0xff]  ;;  %v2781_v32 = vld [vmem:[#allocation2 + $0xe0] sm:$0xff] }
 0x285   : > { %v1500_v35 = vadd.f32 %v1499_v38, %v1498_v16  ;;  %v2015_v47 = vpop.permute.xlu1 %2014  ;;  %v2158_v14 = vsel %vm1003_vm3, %v2126_v2, %v2017_v49  ;;  %v1503_v11 = vsel %vm305_vm0, %v1467_v13, 0.0  ;;  %v2097_v12 = vsel %vm305_vm0, %v9526_v62, %v14011_v17  ;;  %v14014_v38 = vld [vmem:[#allocation62_spill] sm:$0xff] }
 0x286   : > { %v1400_v41 = vadd.f32 %v1399_v20, %v1398_v59  ;;  %v1501_v45 = vsel %vm305_vm0, %v1466_v42, 0.0  ;;  %v2157_v24 = vsel %vm1003_vm3, %v2125_v19, %v2015_v47  ;;  %v2021_v37 = vpop.permute.xlu0 %2020  ;;  %v7707_v9 = vpop.f32.mrb[6].mxu0  ;;  %v2128_v30 = vsel %vm970_vm2, %v2096_v1, %v14013_v26  ;;  %v14015_v59 = vld [vmem:[#allocation32_spill] sm:$0xff]  ;;  %v14016_v42 = vld [vmem:[#allocation35_spill] sm:$0xff]  ;;  %v14018_v19 = vld [vmem:[#allocation74_spill] sm:$0xff] }
 0x287   : > { %v1502_v5 = vadd.f32 %v1501_v45, %v1500_v35  ;;  %1367 = vst.msk [vmem:[#allocation3 + $0x38] sm:$0xff] %vm305_vm0, %v7707_v9  ;;  %3012 = vrot.lane.b32.xlu1 %v2777_v60, %s8328_s21  ;;  %v1231_v3 = vpop.f32.mrb[7].mxu0  ;;  %7773 = vmatmul.mubr.msk.f32.gmra.mrb[16].mxu1 %vm1038_vm4, %v2157_v24  ;;  %v1469_v18 = vmul.f32 %v7707_v9, %v7707_v9  ;;  %v1405_v62 = vsel %vm305_vm0, %v7707_v9, 0.0 }
 0x288   : > { %1366 = vst.msk [vmem:[#allocation3 + $0x30] sm:$0xff] %vm305_vm0, %v1231_v3  ;;  %v1402_v56 = vadd.f32 %v1401_v15, %v1400_v41  ;;  %v1403_v33 = vsel %vm305_vm0, %v1231_v3, 0.0  ;;  %v1468_v7 = vmul.f32 %v1231_v3, %v1231_v3  ;;  %3018 = vrot.lane.b32.xlu0 %v2780_v58, %s8328_s21  ;;  %7775 = vmatprep.mubr.msk.f32.mxu1 %vm1038_vm4, %v2158_v14  ;;  %v2783_v3 = vld [vmem:[#allocation2 + $0xf8] sm:$0xff] }
 0x289   : > { %v1504_v44 = vadd.f32 %v1503_v11, %v1502_v5  ;;  %v2019_v22 = vpop.permute.xlu1 %2018  ;;  %v2160_v43 = vsel %vm1003_vm3, %v2128_v30, %v2021_v37  ;;  %v1507_v25 = vsel %vm305_vm0, %v1469_v18, 0.0  ;;  %v2098_v20 = vsel %vm305_vm0, %v14015_v59, %v14014_v38  ;;  %v14019_v18 = vld [vmem:[#allocation20_spill] sm:$0xff] }
 0x28a   : > { %v1404_v4 = vadd.f32 %v1403_v33, %v1402_v56  ;;  %v1505_v36 = vsel %vm305_vm0, %v1468_v7, 0.0  ;;  %v2159_v55 = vsel %vm1003_vm3, %v2127_v39, %v2019_v22  ;;  %v2025_v10 = vpop.permute.xlu0 %2024  ;;  %v7710_v40 = vpop.f32.mrb[8].mxu0  ;;  %v2099_v60 = vsel %vm305_vm0, %v9548_v46, %v14016_v42  ;;  %v14020_v56 = vld [vmem:[#allocation16_spill] sm:$0xff]  ;;  %v14023_v39 = vld [vmem:[#allocation26_spill] sm:$0xff] }
 0x28b   : > { %v1506_v51 = vadd.f32 %v1505_v36, %v1504_v44  ;;  %1369 = vst.msk [vmem:[#allocation3 + $0x48] sm:$0xff] %vm305_vm0, %v7710_v40  ;;  %v1471_v49 = vmul.f32 %v7710_v40, %v7710_v40  ;;  %3016 = vrot.lane.b32.xlu1 %v2779_v50, %s8328_s21  ;;  %v1241_v6 = vpop.f32.mrb[9].mxu0  ;;  %7776 = vmatmul.mubr.msk.f32.gmra.mrb[18].mxu1 %vm1038_vm4, %v2159_v55  ;;  %v1409_v46 = vsel %vm305_vm0, %v7710_v40, 0.0  ;;  %v14021_v7 = vld [vmem:[#allocation68_spill] sm:$0xff] }
 0x28c   : > { %1368 = vst.msk [vmem:[#allocation3 + $0x40] sm:$0xff] %vm305_vm0, %v1241_v6  ;;  %v1406_v27 = vadd.f32 %v1405_v62, %v1404_v4  ;;  %v1407_v16 = vsel %vm305_vm0, %v1241_v6, 0.0  ;;  %v1470_v13 = vmul.f32 %v1241_v6, %v1241_v6  ;;  %3022 = vrot.lane.b32.xlu0 %v2782_v54, %s8328_s21  ;;  %7778 = vmatprep.mubr.msk.f32.mxu1 %vm1038_vm4, %v2160_v43  ;;  %v2785_v6 = vld [vmem:[#allocation2 + $0x110] sm:$0xff] }
 0x28d   : > { %v2129_v23 = vsel %vm970_vm2, %v2097_v12, %v14017_v48  ;;  %v1508_v0 = vadd.f32 %v1507_v25, %v1506_v51  ;;  %v2023_v34 = vpop.permute.xlu1 %2022  ;;  %v2130_v35 = vsel %vm970_vm2, %v2098_v20, %v14018_v19  ;;  %v1511_v24 = vsel %vm305_vm0, %v1471_v49, 0.0  ;;  %v14024_v25 = vld [vmem:[#allocation19_spill] sm:$0xff]  ;;  %v14027_v38 = vld [vmem:[#allocation80_spill] sm:$0xff]  ;;  %v14028_v48 = vld [vmem:[#allocation25_spill] sm:$0xff] }
 0x28e   : > { %v1408_v47 = vadd.f32 %v1407_v16, %v1406_v27  ;;  %v1509_v58 = vsel %vm305_vm0, %v1470_v13, 0.0  ;;  %v2161_v28 = vsel %vm1003_vm3, %v2129_v23, %v2023_v34  ;;  %v2029_v2 = vpop.permute.xlu0 %2028  ;;  %v7713_v41 = vpop.f32.mrb[10].mxu0  ;;  %v2162_v45 = vsel %vm1003_vm3, %v2130_v35, %v2025_v10  ;;  %v14025_v27 = vld [vmem:[#allocation60_spill] sm:$0xff]  ;;  %v14026_v13 = vld [vmem:[#allocation38_spill] sm:$0xff] }
 0x28f   : > { %v1510_v37 = vadd.f32 %v1509_v58, %v1508_v0  ;;  %1371 = vst.msk [vmem:[#allocation3 + $0x58] sm:$0xff] %vm305_vm0, %v7713_v41  ;;  %3020 = vrot.lane.b32.xlu1 %v2781_v32, %s8328_s21  ;;  %v1251_v9 = vpop.f32.mrb[11].mxu0  ;;  %7779 = vmatmul.mubr.msk.f32.gmra.mrb[20].mxu1 %vm1038_vm4, %v2161_v28  ;;  %v1473_v14 = vmul.f32 %v7713_v41, %v7713_v41 }
 0x290   : > { %1370 = vst.msk [vmem:[#allocation3 + $0x50] sm:$0xff] %vm305_vm0, %v1251_v9  ;;  %v1410_v15 = vadd.f32 %v1409_v46, %v1408_v47  ;;  %v1411_v11 = vsel %vm305_vm0, %v1251_v9, 0.0  ;;  %v1472_v5 = vmul.f32 %v1251_v9, %v1251_v9  ;;  %3026 = vrot.lane.b32.xlu0 %v2784_v21, %s8328_s21  ;;  %7781 = vmatprep.mubr.msk.f32.mxu1 %vm1038_vm4, %v2162_v45  ;;  %v14029_v9 = vld [vmem:[#allocation66_spill] sm:$0xff] }
 0x291   : > { %v2100_v33 = vsel %vm305_vm0, %v14020_v56, %v14019_v18  ;;  %v2101_v50 = vsel %vm305_vm0, %v9570_v57, %v14021_v7  ;;  %v2131_v1 = vsel %vm970_vm2, %v2099_v60, %v14022_v63  ;;  %v1512_v17 = vadd.f32 %v1511_v24, %v1510_v37  ;;  %v2027_v12 = vpop.permute.xlu1 %2026  ;;  %v2788_v60 = vld [vmem:[#allocation2 + $0x138] sm:$0xff]  ;;  %v2787_v37 = vld [vmem:[#allocation2 + $0x128] sm:$0xff]  ;;  %v14032_v7 = vld [vmem:[#allocation78_spill] sm:$0xff] }
 0x292   : > { %v2132_v44 = vsel %vm970_vm2, %v2100_v33, %v14023_v39  ;;  %v1412_v22 = vadd.f32 %v1411_v11, %v1410_v15  ;;  %v1513_v54 = vsel %vm305_vm0, %v1472_v5, 0.0  ;;  %v2163_v26 = vsel %vm1003_vm3, %v2131_v1, %v2027_v12  ;;  %v2033_v30 = vpop.permute.xlu0 %2032  ;;  %v7716_v4 = vpop.f32.mrb[12].mxu0  ;;  %v14030_v15 = vld [vmem:[#allocation37_spill] sm:$0xff]  ;;  %v14031_v5 = vld [vmem:[#allocation44_spill] sm:$0xff] }
 0x293   : > { %v2164_v36 = vsel %vm1003_vm3, %v2132_v44, %v2029_v2  ;;  %v1413_v57 = vsel %vm305_vm0, %v7713_v41, 0.0  ;;  %v1514_v55 = vadd.f32 %v1513_v54, %v1512_v17  ;;  %1373 = vst.msk [vmem:[#allocation3 + $0x68] sm:$0xff] %vm305_vm0, %v7716_v4  ;;  %v1475_v10 = vmul.f32 %v7716_v4, %v7716_v4  ;;  %3024 = vrot.lane.b32.xlu1 %v2783_v3, %s8328_s21  ;;  %v1261_v40 = vpop.f32.mrb[13].mxu0  ;;  %v2790_v33 = vld [vmem:[#allocation2 + $0x150] sm:$0xff] }
 0x294   : > { %7782 = vmatmul.mubr.msk.f32.gmra.mrb[22].mxu1 %vm1038_vm4, %v2163_v26  ;;  %v1515_v43 = vsel %vm305_vm0, %v1473_v14, 0.0  ;;  %1372 = vst.msk [vmem:[#allocation3 + $0x60] sm:$0xff] %vm305_vm0, %v1261_v40  ;;  %v1414_v62 = vadd.f32 %v1413_v57, %v1412_v22  ;;  %v1415_v51 = vsel %vm305_vm0, %v1261_v40, 0.0  ;;  %v1474_v49 = vmul.f32 %v1261_v40, %v1261_v40  ;;  %3030 = vrot.lane.b32.xlu0 %v2786_v53, %s8328_s21  ;;  %v14033_v57 = vld [vmem:[#allocation22_spill] sm:$0xff] }
 0x295   : > { %7784 = vmatprep.mubr.msk.f32.mxu1 %vm1038_vm4, %v2164_v36  ;;  %v2102_v16 = vsel %vm305_vm0, %v14025_v27, %v14024_v25  ;;  %v2103_v32 = vsel %vm305_vm0, %v9594_v61, %v14026_v13  ;;  %v2133_v59 = vsel %vm970_vm2, %v2101_v50, %v14027_v38  ;;  %v1516_v20 = vadd.f32 %v1515_v43, %v1514_v55  ;;  %v2031_v42 = vpop.permute.xlu1 %2030  ;;  %v2789_v36 = vld [vmem:[#allocation2 + $0x140] sm:$0xff]  ;;  %v14035_v43 = vld [vmem:[#allocation43_spill] sm:$0xff]  ;;  %v14036_v25 = vld [vmem:[#allocation28_spill] sm:$0xff] }
 0x296   : > { %v2134_v23 = vsel %vm970_vm2, %v2102_v16, %v14028_v48  ;;  %v1416_v0 = vadd.f32 %v1415_v51, %v1414_v62  ;;  %v1517_v34 = vsel %vm305_vm0, %v1474_v49, 0.0  ;;  %v2165_v21 = vsel %vm1003_vm3, %v2133_v59, %v2031_v42  ;;  %v2037_v19 = vpop.permute.xlu0 %2036  ;;  %v7719_v35 = vpop.f32.mrb[14].mxu0 }
 0x297   : > { %v2166_v47 = vsel %vm1003_vm3, %v2134_v23, %v2033_v30  ;;  %v1417_v61 = vsel %vm305_vm0, %v7716_v4, 0.0  ;;  %v1519_v58 = vsel %vm305_vm0, %v1475_v10, 0.0  ;;  %v1518_v28 = vadd.f32 %v1517_v34, %v1516_v20  ;;  %1375 = vst.msk [vmem:[#allocation3 + $0x78] sm:$0xff] %vm305_vm0, %v7719_v35  ;;  %3028 = vrot.lane.b32.xlu1 %v2785_v6, %s8328_s21  ;;  %v1271_v2 = vpop.f32.mrb[15].mxu0  ;;  %v14034_v10 = vld [vmem:[#allocation21_spill] sm:$0xff]  ;;  %v2792_v6 = vld [vmem:[#allocation2 + $0x168] sm:$0xff] }
 0x298   : > { %7785 = vmatmul.mubr.msk.f32.gmra.mrb[24].mxu1 %vm1038_vm4, %v2165_v21  ;;  %v1477_v41 = vmul.f32 %v7719_v35, %v7719_v35  ;;  %1374 = vst.msk [vmem:[#allocation3 + $0x70] sm:$0xff] %vm305_vm0, %v1271_v2  ;;  %v1418_v45 = vadd.f32 %v1417_v61, %v1416_v0  ;;  %v1419_v46 = vsel %vm305_vm0, %v1271_v2, 0.0  ;;  %v1476_v24 = vmul.f32 %v1271_v2, %v1271_v2  ;;  %v2791_v21 = vld [vmem:[#allocation2 + $0x158] sm:$0xff] }
 0x299   : > { %3034 = vrot.lane.b32.xlu0 %v2788_v60, %s8328_s21  ;;  %7787 = vmatprep.mubr.msk.f32.mxu1 %vm1038_vm4, %v2166_v47  ;;  %v2104_v14 = vsel %vm305_vm0, %v9577_v52, %v14029_v9  ;;  %v2105_v11 = vsel %vm305_vm0, %v9608_v8, %v14030_v15  ;;  %v2135_v3 = vsel %vm970_vm2, %v2103_v32, %v14031_v5  ;;  %v2035_v56 = vpop.permute.xlu1 %2034  ;;  %v1421_v8 = vsel %vm305_vm0, %v7719_v35, 0.0  ;;  %v3312_v2 = vld [vmem:[#allocation7 + $0x28] sm:$0xff] }
 0x29a   : > { %v1520_v18 = vadd.f32 %v1519_v58, %v1518_v28  ;;  %v2136_v50 = vsel %vm970_vm2, %v2104_v14, %v14032_v7  ;;  %v1420_v63 = vadd.f32 %v1419_v46, %v1418_v45  ;;  %v1521_v1 = vsel %vm305_vm0, %v1476_v24, 0.0  ;;  %v2041_v12 = vpop.permute.xlu0 %2040  ;;  %v7722_v52 = vpop.f32.mrb[16].mxu0  ;;  %v2794_v58 = vld [vmem:[#allocation2 + $0x180] sm:$0xff]  ;;  %v3311_v28 = vld [vmem:[#allocation7 + $0x20] sm:$0xff] }
 0x29b   : > { %v2167_v17 = vsel %vm1003_vm3, %v2135_v3, %v2035_v56  ;;  %v2168_v53 = vsel %vm1003_vm3, %v2136_v50, %v2037_v19  ;;  %1377 = vst.msk [vmem:[#allocation3 + $0x88] sm:$0xff] %vm305_vm0, %v7722_v52  ;;  %v1479_v44 = vmul.f32 %v7722_v52, %v7722_v52  ;;  %3032 = vrot.lane.b32.xlu1 %v2787_v37, %s8328_s21  ;;  %v1281_v22 = vpop.f32.mrb[17].mxu0  ;;  %v1523_v54 = vsel %vm305_vm0, %v1477_v41, 0.0  ;;  %v14037_v19 = vld [vmem:[#allocation27_spill] sm:$0xff]  ;;  %v2793_v7 = vld [vmem:[#allocation2 + $0x170] sm:$0xff] }
 0x29c   : > { %v1522_v39 = vadd.f32 %v1521_v1, %v1520_v18  ;;  %7788 = vmatmul.mubr.msk.f32.gmra.mrb[26].mxu1 %vm1038_vm4, %v2167_v17  ;;  %1376 = vst.msk [vmem:[#allocation3 + $0x80] sm:$0xff] %vm305_vm0, %v1281_v22  ;;  %v1422_v26 = vadd.f32 %v1421_v8, %v1420_v63  ;;  %v1423_v30 = vsel %vm305_vm0, %v1281_v22, 0.0  ;;  %v1478_v4 = vmul.f32 %v1281_v22, %v1281_v22  ;;  %v2796_v1 = vld [vmem:[#allocation2 + $0x198] sm:$0xff] }
 0x29d   : > { %3038 = vrot.lane.b32.xlu0 %v2790_v33, %s8328_s21  ;;  %7790 = vmatprep.mubr.msk.f32.mxu1 %vm1038_vm4, %v2168_v53  ;;  %v2106_v55 = vsel %vm305_vm0, %v9598_v29, %v14033_v57  ;;  %v2107_v40 = vsel %vm305_vm0, %v9618_v31, %v14034_v10  ;;  %v2137_v62 = vsel %vm970_vm2, %v2105_v11, %v14035_v43  ;;  %v2039_v49 = vpop.permute.xlu1 %2038  ;;  %v1425_v31 = vsel %vm305_vm0, %v7722_v52, 0.0  ;;  %v10217_v10 = vld [vmem:[#allocation2 + $0x31] sm:$0xff] }
 0x29e   : > { %v1524_v51 = vadd.f32 %v1523_v54, %v1522_v39  ;;  %v2138_v27 = vsel %vm970_vm2, %v2106_v55, %v14036_v25  ;;  %v1424_v16 = vadd.f32 %v1423_v30, %v1422_v26  ;;  %v1525_v13 = vsel %vm305_vm0, %v1478_v4, 0.0  ;;  %v10177_v38 = vpop.permute.xlu0 %2862  ;;  %v7725_v29 = vpop.f32.mrb[18].mxu0 }
 0x29f   : > { %v2169_v32 = vsel %vm1003_vm3, %v2137_v62, %v2039_v49  ;;  %v2170_v59 = vsel %vm1003_vm3, %v2138_v27, %v2041_v12  ;;  %v1527_v20 = vsel %vm305_vm0, %v1479_v44, 0.0  ;;  %1379 = vst.msk [vmem:[#allocation3 + $0x98] sm:$0xff] %vm305_vm0, %v7725_v29  ;;  %3036 = vrot.lane.b32.xlu1 %v2789_v36, %s8328_s21  ;;  %v1291_v60 = vpop.f32.mrb[19].mxu0  ;;  %v1481_v48 = vmul.f32 %v7725_v29, %v7725_v29  ;;  %v2795_v36 = vld [vmem:[#allocation2 + $0x188] sm:$0xff] }
 0x2a0   : > { %v1526_v42 = vadd.f32 %v1525_v13, %v1524_v51  ;;  %7791 = vmatmul.mubr.msk.f32.gmra.mrb[28].mxu1 %vm1038_vm4, %v2169_v32  ;;  %1378 = vst.msk [vmem:[#allocation3 + $0x90] sm:$0xff] %vm305_vm0, %v1291_v60  ;;  %v1426_v23 = vadd.f32 %v1425_v31, %v1424_v16  ;;  %v1427_v0 = vsel %vm305_vm0, %v1291_v60, 0.0  ;;  %v1480_v34 = vmul.f32 %v1291_v60, %v1291_v60 }
 0x2a1   : > { %3042 = vrot.lane.b32.xlu0 %v2792_v6, %s8328_s21  ;;  %7793 = vmatprep.mubr.msk.f32.mxu1 %vm1038_vm4, %v2170_v59  ;;  %v2139_v35 = vsel %vm970_vm2, %v2107_v40, %v14037_v19  ;;  %v2043_v61 = vpop.permute.xlu1 %2042  ;;  %v7908_v9 = vpack.c.bf16 %v3312_v2, %v3311_v28  ;;  %v1429_v14 = vsel %vm305_vm0, %v7725_v29, 0.0  ;;  %v1531_v3 = vsel %vm305_vm0, %v1481_v48, 0.0  ;;  %v2797_v59 = vld [vmem:[#allocation2 + $0x1a0] sm:$0xff] }
 0x2a2   : > { %v1528_v47 = vadd.f32 %v1527_v20, %v1526_v42  ;;  %v1428_v41 = vadd.f32 %v1427_v0, %v1426_v23  ;;  %v1529_v45 = vsel %vm305_vm0, %v1480_v34, 0.0  ;;  %v2171_v46 = vsel %vm1003_vm3, %v2139_v35, %v2043_v61  ;;  %v10193_v24 = vpop.permute.xlu0 %2866  ;;  %v7728_v37 = vpop.f32.mrb[20].mxu0  ;;  %v10232_v42 = vld [vmem:[#allocation2 + $0x49] sm:$0xff]  ;;  %v10245_v2 = vld [vmem:[#allocation2 + $0x39] sm:$0xff] }
 0x2a3   : > { %1381 = vst.msk [vmem:[#allocation3 + $0xa8] sm:$0xff] %vm305_vm0, %v7728_v37  ;;  %v1483_v11 = vmul.f32 %v7728_v37, %v7728_v37  ;;  %3040 = vrot.lane.b32.xlu1 %v2791_v21, %s8328_s21  ;;  %v1301_v5 = vpop.f32.mrb[21].mxu0  ;;  %7909 = vmatprep.subr.bf16.mxu0 %v7908_v9  ;;  %v1433_v8 = vsel %vm305_vm0, %v7728_v37, 0.0 }
 0x2a4   : > { %v1530_v15 = vadd.f32 %v1529_v45, %v1528_v47  ;;  %7794 = vmatmul.mubr.msk.f32.gmra.mrb[30].mxu1 %vm1038_vm4, %v2171_v46  ;;  %1380 = vst.msk [vmem:[#allocation3 + $0xa0] sm:$0xff] %vm305_vm0, %v1301_v5  ;;  %v1430_v18 = vadd.f32 %v1429_v14, %v1428_v41  ;;  %v1431_v56 = vsel %vm305_vm0, %v1301_v5, 0.0  ;;  %v1482_v33 = vmul.f32 %v1301_v5, %v1301_v5  ;;  %v10249_v46 = vld [vmem:[#allocation2 + $0x61] sm:$0xff] }
 0x2a5   : > { %3046 = vrot.lane.b32.xlu0 %v2794_v58, %s8328_s21  ;;  %v10203_v63 = vpop.permute.xlu1 %2864  ;;  %7911 = vmatpush3.bf16.msra.mxu0 %v7908_v9  ;;  %v1535_v39 = vsel %vm305_vm0, %v1483_v11, 0.0 }
 0x2a6   : > { %v1532_v50 = vadd.f32 %v1531_v3, %v1530_v15  ;;  %v1432_v17 = vadd.f32 %v1431_v56, %v1430_v18  ;;  %v1533_v12 = vsel %vm305_vm0, %v1482_v33, 0.0  ;;  %v10206_v52 = vpop.permute.xlu0 %2870  ;;  %v7731_v53 = vpop.f32.mrb[22].mxu0 }
 0x2a7   : > { %1383 = vst.msk [vmem:[#allocation3 + $0xb8] sm:$0xff] %vm305_vm0, %v7731_v53  ;;  %3044 = vrot.lane.b32.xlu1 %v2793_v7, %s8328_s21  ;;  %v1311_v22 = vpop.f32.mrb[23].mxu0  ;;  %v1485_v54 = vmul.f32 %v7731_v53, %v7731_v53  ;;  %v1437_v49 = vsel %vm305_vm0, %v7731_v53, 0.0  ;;  %v10267_v53 = vld [vmem:[#allocation2 + $0x79] sm:$0xff] }
 0x2a8   : > { %v1534_v44 = vadd.f32 %v1533_v12, %v1532_v50  ;;  %1382 = vst.msk [vmem:[#allocation3 + $0xb0] sm:$0xff] %vm305_vm0, %v1311_v22  ;;  %v1434_v26 = vadd.f32 %v1433_v8, %v1432_v17  ;;  %v1435_v30 = vsel %vm305_vm0, %v1311_v22, 0.0  ;;  %v1484_v4 = vmul.f32 %v1311_v22, %v1311_v22 }
 0x2a9   : > { %3050 = vrot.lane.b32.xlu0 %v2796_v1, %s8328_s21  ;;  %v10215_v55 = vpop.permute.xlu1 %2868  ;;  %v1539_v16 = vsel %vm305_vm0, %v1485_v54, 0.0  ;;  %v10263_v1 = vld [vmem:[#allocation2 + $0x51] sm:$0xff] }
 0x2aa   : > { %v1536_v57 = vadd.f32 %v1535_v39, %v1534_v44  ;;  %v1436_v40 = vadd.f32 %v1435_v30, %v1434_v26  ;;  %v1537_v43 = vsel %vm305_vm0, %v1484_v4, 0.0  ;;  %v10220_v62 = vpop.permute.xlu0 %2874  ;;  %v7734_v51 = vpop.f32.mrb[24].mxu0 }
 0x2ab   : > { %1385 = vst.msk [vmem:[#allocation3 + $0xc8] sm:$0xff] %vm305_vm0, %v7734_v51  ;;  %v1487_v25 = vmul.f32 %v7734_v51, %v7734_v51  ;;  %3048 = vrot.lane.b32.xlu1 %v2795_v36, %s8328_s21  ;;  %v1321_v27 = vpop.f32.mrb[25].mxu0  ;;  %v1441_v34 = vsel %vm305_vm0, %v7734_v51, 0.0  ;;  %v10281_v51 = vld [vmem:[#allocation2 + $0x69] sm:$0xff] }
 0x2ac   : > { %v1538_v6 = vadd.f32 %v1537_v43, %v1536_v57  ;;  %1384 = vst.msk [vmem:[#allocation3 + $0xc0] sm:$0xff] %vm305_vm0, %v1321_v27  ;;  %v1438_v13 = vadd.f32 %v1437_v49, %v1436_v40  ;;  %v1439_v32 = vsel %vm305_vm0, %v1321_v27, 0.0  ;;  %v1486_v29 = vmul.f32 %v1321_v27, %v1321_v27 }
 0x2ad   : > { %3118 = vrot.lane.b32.xlu0 %v10217_v10, %s8329_s20  ;;  %v10230_v20 = vpop.permute.xlu1 %2872  ;;  %v1543_v21 = vsel %vm305_vm0, %v1487_v25, 0.0  ;;  %v10285_v25 = vld [vmem:[#allocation2 + $0x91] sm:$0xff] }
 0x2ae   : > { %v1540_v31 = vadd.f32 %v1539_v16, %v1538_v6  ;;  %v1440_v60 = vadd.f32 %v1439_v32, %v1438_v13  ;;  %v1541_v48 = vsel %vm305_vm0, %v1486_v29, 0.0  ;;  %v10235_v23 = vpop.permute.xlu0 %2878  ;;  %v7737_v0 = vpop.f32.mrb[26].mxu0 }
 0x2af   : > { %1387 = vst.msk [vmem:[#allocation3 + $0xd8] sm:$0xff] %vm305_vm0, %v7737_v0  ;;  %3052 = vrot.lane.b32.xlu1 %v2797_v59, %s8328_s21  ;;  %v1331_v35 = vpop.f32.mrb[27].mxu0  ;;  %v1489_v47 = vmul.f32 %v7737_v0, %v7737_v0  ;;  %v1445_v11 = vsel %vm305_vm0, %v7737_v0, 0.0 }
 0x2b0   : > { %v1542_v19 = vadd.f32 %v1541_v48, %v1540_v31  ;;  %1386 = vst.msk [vmem:[#allocation3 + $0xd0] sm:$0xff] %vm305_vm0, %v1331_v35  ;;  %v1442_v61 = vadd.f32 %v1441_v34, %v1440_v60  ;;  %v1443_v58 = vsel %vm305_vm0, %v1331_v35, 0.0  ;;  %v1488_v28 = vmul.f32 %v1331_v35, %v1331_v35  ;;  %v10298_v60 = vld [vmem:[#allocation2 + $0x81] sm:$0xff]  ;;  %v10304_v34 = vld [vmem:[#allocation2 + $0xa9] sm:$0xff] }
 0x2b1   : > { %3122 = vrot.lane.b32.xlu0 %v10232_v42, %s8329_s20  ;;  %v10247_v45 = vpop.permute.xlu1 %2876  ;;  %v1547_v56 = vsel %vm305_vm0, %v1489_v47, 0.0  ;;  %v10316_v47 = vld [vmem:[#allocation2 + $0xc1] sm:$0xff] }
 0x2b2   : > { %v1544_v41 = vadd.f32 %v1543_v21, %v1542_v19  ;;  %v1444_v37 = vadd.f32 %v1443_v58, %v1442_v61  ;;  %v1545_v9 = vsel %vm305_vm0, %v1488_v28, 0.0  ;;  %v10252_v14 = vpop.permute.xlu0 %2882  ;;  %v7740_v15 = vpop.f32.mrb[28].mxu0  ;;  %v10312_v19 = vld [vmem:[#allocation2 + $0x99] sm:$0xff]  ;;  %v10324_v58 = vld [vmem:[#allocation2 + $0xb1] sm:$0xff] }
 0x2b3   : > { %1389 = vst.msk [vmem:[#allocation3 + $0xe8] sm:$0xff] %vm305_vm0, %v7740_v15  ;;  %v1491_v3 = vmul.f32 %v7740_v15, %v7740_v15  ;;  %3120 = vrot.lane.b32.xlu1 %v10245_v2, %s8329_s20  ;;  %v1341_v18 = vpop.f32.mrb[29].mxu0  ;;  %v1449_v54 = vsel %vm305_vm0, %v7740_v15, 0.0 }
 0x2b4   : > { %v1546_v5 = vadd.f32 %v1545_v9, %v1544_v41  ;;  %1388 = vst.msk [vmem:[#allocation3 + $0xe0] sm:$0xff] %vm305_vm0, %v1341_v18  ;;  %v1446_v33 = vadd.f32 %v1445_v11, %v1444_v37  ;;  %v1447_v7 = vsel %vm305_vm0, %v1341_v18, 0.0  ;;  %v1490_v50 = vmul.f32 %v1341_v18, %v1341_v18  ;;  %v10328_v41 = vld [vmem:[#allocation2 + $0xd9] sm:$0xff]  ;;  %v10336_v9 = vld [vmem:[#allocation2 + $0xc9] sm:$0xff]  ;;  %v10340_v11 = vld [vmem:[#allocation2 + $0xf1] sm:$0xff] }
 0x2b5   : > { %3126 = vrot.lane.b32.xlu0 %v10249_v46, %s8329_s20  ;;  %v10265_v12 = vpop.permute.xlu1 %2880  ;;  %v1551_v26 = vsel %vm305_vm0, %v1491_v3, 0.0  ;;  %14040 = vst [vmem:[#allocation46_spill] sm:$0xff] %v10328_v41  ;;  %14042 = vst [vmem:[#allocation45_spill] sm:$0xff] %v10336_v9  ;;  %v10348_v3 = vld [vmem:[#allocation2 + $0xe1] sm:$0xff] }
 0x2b6   : > { %v1548_v17 = vadd.f32 %v1547_v56, %v1546_v5  ;;  %v1448_v8 = vadd.f32 %v1447_v7, %v1446_v33  ;;  %v1549_v39 = vsel %vm305_vm0, %v1490_v50, 0.0  ;;  %v10270_v44 = vpop.permute.xlu0 %2886  ;;  %v7743_v22 = vpop.f32.mrb[30].mxu0  ;;  %14043 = vst [vmem:[#allocation29_spill] sm:$0xff] %v10340_v11  ;;  %14045 = vst [vmem:[#allocation86_spill] sm:$0xff] %v10348_v3  ;;  %v10352_v56 = vld [vmem:[#allocation2 + $0x109] sm:$0xff]  ;;  %v10360_v7 = vld [vmem:[#allocation2 + $0xf9] sm:$0xff] }
 0x2b7   : > { %1391 = vst.msk [vmem:[#allocation3 + $0xf8] sm:$0xff] %vm305_vm0, %v7743_v22  ;;  %3124 = vrot.lane.b32.xlu1 %v10263_v1, %s8329_s20  ;;  %v1351_v4 = vpop.f32.mrb[31].mxu0  ;;  %v1493_v36 = vmul.f32 %v7743_v22, %v7743_v22  ;;  %v1453_v32 = vsel %vm305_vm0, %v7743_v22, 0.0  ;;  %14047 = vst [vmem:[#allocation31_spill] sm:$0xff] %v10352_v56 }
 0x2b8   : > { %v1550_v30 = vadd.f32 %v1549_v39, %v1548_v17  ;;  %1390 = vst.msk [vmem:[#allocation3 + $0xf0] sm:$0xff] %vm305_vm0, %v1351_v4  ;;  %v1450_v57 = vadd.f32 %v1449_v54, %v1448_v8  ;;  %v1451_v40 = vsel %vm305_vm0, %v1351_v4, 0.0  ;;  %v1492_v43 = vmul.f32 %v1351_v4, %v1351_v4  ;;  %14049 = vst [vmem:[#allocation50_spill] sm:$0xff] %v10360_v7  ;;  %v10364_v17 = vld [vmem:[#allocation2 + $0x121] sm:$0xff]  ;;  %v10372_v39 = vld [vmem:[#allocation2 + $0x111] sm:$0xff] }
 0x2b9   : > { %3130 = vrot.lane.b32.xlu0 %v10267_v53, %s8329_s20  ;;  %v10283_v6 = vpop.permute.xlu1 %2884  ;;  %v1555_v59 = vsel %vm305_vm0, %v1493_v36, 0.0  ;;  %14051 = vst [vmem:[#allocation51_spill] sm:$0xff] %v10364_v17  ;;  %14053 = vst [vmem:[#allocation53_spill] sm:$0xff] %v10372_v39  ;;  %v10376_v54 = vld [vmem:[#allocation2 + $0x139] sm:$0xff]  ;;  %v10388_v36 = vld [vmem:[#allocation2 + $0x151] sm:$0xff] }
 0x2ba   : > { %v1552_v49 = vadd.f32 %v1551_v26, %v1550_v30  ;;  %v1452_v27 = vadd.f32 %v1451_v40, %v1450_v57  ;;  %v1553_v16 = vsel %vm305_vm0, %v1492_v43, 0.0  ;;  %v10288_v13 = vpop.permute.xlu0 %2890  ;;  %14055 = vst [vmem:[#allocation55_spill] sm:$0xff] %v10376_v54  ;;  %v10384_v30 = vld [vmem:[#allocation2 + $0x129] sm:$0xff]  ;;  %14059 = vst [vmem:[#allocation61_spill] sm:$0xff] %v10388_v36  ;;  %v10396_v40 = vld [vmem:[#allocation2 + $0x141] sm:$0xff] }
 0x2bb   : > { %3128 = vrot.lane.b32.xlu1 %v10281_v51, %s8329_s20  ;;  %14057 = vst [vmem:[#allocation57_spill] sm:$0xff] %v10384_v30  ;;  %14061 = vst [vmem:[#allocation65_spill] sm:$0xff] %v10396_v40 }
 0x2bc   : > { %v1554_v29 = vadd.f32 %v1553_v16, %v1552_v49  ;;  %v10294_v31 = vadd.f32 %v1453_v32, %v1452_v27  ;;  %v10400_v49 = vld [vmem:[#allocation2 + $0x169] sm:$0xff]  ;;  %v10408_v16 = vld [vmem:[#allocation2 + $0x159] sm:$0xff] }
 0x2bd   : > { %3134 = vrot.lane.b32.xlu0 %v10285_v25, %s8329_s20  ;;  %v10302_v0 = vpop.permute.xlu1 %2888  ;;  %14063 = vst [vmem:[#allocation69_spill] sm:$0xff] %v10400_v49  ;;  %14064 = vst [vmem:[#allocation71_spill] sm:$0xff] %v10408_v16 }
 0x2be   : > { %14038 = vst [vmem:[#allocation84_spill] sm:$0xff] %v10294_v31  ;;  %v10300_v48 = vadd.f32 %v1555_v59, %v1554_v29  ;;  %v10306_v21 = vpop.permute.xlu0 %2894  ;;  %v10412_v29 = vld [vmem:[#allocation2 + $0x181] sm:$0xff] }
 0x2bf   : > { %3132 = vrot.lane.b32.xlu1 %v10298_v60, %s8329_s20  ;;  %14066 = vst [vmem:[#allocation75_spill] sm:$0xff] %v10412_v29 }
 0x2c0   : > { %14039 = vst [vmem:[#allocation82_spill] sm:$0xff] %v10300_v48  ;;  %v10420_v48 = vld [vmem:[#allocation2 + $0x171] sm:$0xff] }
 0x2c1   : > { %3138 = vrot.lane.b32.xlu0 %v10304_v34, %s8329_s20  ;;  %v10314_v35 = vpop.permute.xlu1 %2892  ;;  %14067 = vst [vmem:[#allocation77_spill] sm:$0xff] %v10420_v48 }
 0x2c2   : > { %v10318_v61 = vpop.permute.xlu0 %2898 }
 0x2c3   : > { %3136 = vrot.lane.b32.xlu1 %v10312_v19, %s8329_s20 }
 0x2c5   : > { %3142 = vrot.lane.b32.xlu0 %v10316_v47, %s8329_s20  ;;  %v10326_v28 = vpop.permute.xlu1 %2896 }
 0x2c6   : > { %v10330_v37 = vpop.permute.xlu0 %2902 }
 0x2c7   : > { %14041 = vst [vmem:[#allocation30_spill] sm:$0xff] %v10330_v37  ;;  %3140 = vrot.lane.b32.xlu1 %v10324_v58, %s8329_s20 }
 0x2c9   : > { %3146 = vrot.lane.b32.xlu0 %v10328_v41, %s8329_s20  ;;  %v10338_v15 = vpop.permute.xlu1 %2900  ;;  %v4448_v41 = vld [vmem:[#allocation7 + $0x30] sm:$0xff] }
 0x2ca   : > { %v10342_v5 = vpop.permute.xlu0 %2906 }
 0x2cb   : > { %14044 = vst [vmem:[#allocation87_spill] sm:$0xff] %v10342_v5  ;;  %3144 = vrot.lane.b32.xlu1 %v10336_v9, %s8329_s20 }
 0x2cd   : > { %3150 = vrot.lane.b32.xlu0 %v10340_v11, %s8329_s20  ;;  %v10350_v18 = vpop.permute.xlu1 %2904  ;;  %v3887_v11 = vld [vmem:[#allocation2 + $0xda] sm:$0xff] }
 0x2ce   : > { %14046 = vst [vmem:[#allocation47_spill] sm:$0xff] %v10350_v18  ;;  %v10354_v33 = vpop.permute.xlu0 %2910  ;;  %v3889_v18 = vld [vmem:[#allocation2 + $0xf2] sm:$0xff] }
 0x2cf   : > { %14048 = vst [vmem:[#allocation48_spill] sm:$0xff] %v10354_v33  ;;  %3148 = vrot.lane.b32.xlu1 %v10348_v3, %s8329_s20 }
 0x2d1   : > { %3154 = vrot.lane.b32.xlu0 %v10352_v56, %s8329_s20  ;;  %v10362_v50 = vpop.permute.xlu1 %2908  ;;  %v3883_v56 = vld [vmem:[#allocation2 + $0xaa] sm:$0xff] }
 0x2d2   : > { %14050 = vst [vmem:[#allocation49_spill] sm:$0xff] %v10362_v50  ;;  %v10366_v8 = vpop.permute.xlu0 %2914  ;;  %v3885_v50 = vld [vmem:[#allocation2 + $0xc2] sm:$0xff] }
 0x2d3   : > { %14052 = vst [vmem:[#allocation52_spill] sm:$0xff] %v10366_v8  ;;  %3152 = vrot.lane.b32.xlu1 %v10360_v7, %s8329_s20  ;;  %v3879_v8 = vld [vmem:[#allocation2 + $0x7a] sm:$0xff] }
 0x2d5   : > { %3158 = vrot.lane.b32.xlu0 %v10364_v17, %s8329_s20  ;;  %v10374_v22 = vpop.permute.xlu1 %2912  ;;  %v3878_v17 = vld [vmem:[#allocation2 + $0x6a] sm:$0xff] }
 0x2d6   : > { %14054 = vst [vmem:[#allocation54_spill] sm:$0xff] %v10374_v22  ;;  %v10378_v26 = vpop.permute.xlu0 %2918  ;;  %v3881_v22 = vld [vmem:[#allocation2 + $0x92] sm:$0xff] }
 0x2d7   : > { %14056 = vst [vmem:[#allocation56_spill] sm:$0xff] %v10378_v26  ;;  %3156 = vrot.lane.b32.xlu1 %v10372_v39, %s8329_s20 }
 0x2d9   : > { %3162 = vrot.lane.b32.xlu0 %v10376_v54, %s8329_s20  ;;  %v10386_v4 = vpop.permute.xlu1 %2916  ;;  %v10462_v54 = vld [vmem:[#allocation2 + $0x3a] sm:$0xff] }
 0x2da   : > { %14058 = vst [vmem:[#allocation59_spill] sm:$0xff] %v10386_v4  ;;  %v10390_v57 = vpop.permute.xlu0 %2922  ;;  %14073 = vst [vmem:[#allocation89_spill] sm:$0xff] %v10462_v54 }
 0x2db   : > { %14060 = vst [vmem:[#allocation63_spill] sm:$0xff] %v10390_v57  ;;  %3160 = vrot.lane.b32.xlu1 %v10384_v30, %s8329_s20  ;;  %v3871_v57 = vld [vmem:[#allocation2 + $0x1a] sm:$0xff] }
 0x2dd   : > { %3166 = vrot.lane.b32.xlu0 %v10388_v36, %s8329_s20  ;;  %v10398_v43 = vpop.permute.xlu1 %2920  ;;  %v10441_v36 = vld [vmem:[#allocation2 + $0x1a1] sm:$0xff] }
 0x2de   : > { %14062 = vst [vmem:[#allocation67_spill] sm:$0xff] %v10398_v43  ;;  %v10402_v27 = vpop.permute.xlu0 %2990  ;;  %14070 = vst [vmem:[#allocation83_spill] sm:$0xff] %v10441_v36 }
 0x2df   : > { %3164 = vrot.lane.b32.xlu1 %v10396_v40, %s8329_s20  ;;  %v10424_v40 = vld [vmem:[#allocation2 + $0x199] sm:$0xff] }
 0x2e0   : > { %14068 = vst [vmem:[#allocation79_spill] sm:$0xff] %v10424_v40 }
 0x2e1   : > { %3170 = vrot.lane.b32.xlu0 %v10400_v49, %s8329_s20  ;;  %v10410_v32 = vpop.permute.xlu1 %2924 }
 0x2e2   : > { %14065 = vst [vmem:[#allocation73_spill] sm:$0xff] %v10410_v32  ;;  %v10414_v59 = vpop.permute.xlu0 %2994  ;;  %v10432_v32 = vld [vmem:[#allocation2 + $0x189] sm:$0xff] }
 0x2e3   : > { %3168 = vrot.lane.b32.xlu1 %v10408_v16, %s8329_s20  ;;  %14069 = vst [vmem:[#allocation81_spill] sm:$0xff] %v10432_v32 }
 0x2e5   : > { %3174 = vrot.lane.b32.xlu0 %v10412_v29, %s8329_s20  ;;  %v10422_v31 = vpop.permute.xlu1 %2992 }
 0x2e6   : > { %v10426_v49 = vpop.permute.xlu0 %2998 }
 0x2e7   : > { %3172 = vrot.lane.b32.xlu1 %v10420_v48, %s8329_s20  ;;  %v10445_v48 = vld [vmem:[#allocation2 + $0x32] sm:$0xff] }
 0x2e8   : > { %14071 = vst [vmem:[#allocation85_spill] sm:$0xff] %v10445_v48 }
 0x2e9   : > { %3178 = vrot.lane.b32.xlu0 %v10424_v40, %s8329_s20  ;;  %v10434_v16 = vpop.permute.xlu1 %2996  ;;  %v3872_v40 = vld [vmem:[#allocation2 + $0x22] sm:$0xff] }
 0x2ea   : > { %v10436_v29 = vpop.permute.xlu0 %3002 }
 0x2eb   : > { %3176 = vrot.lane.b32.xlu1 %v10432_v32, %s8329_s20  ;;  %v10455_v32 = vld [vmem:[#allocation2 + $0x4a] sm:$0xff] }
 0x2ec   : > { %14072 = vst [vmem:[#allocation88_spill] sm:$0xff] %v10455_v32 }
 0x2ed   : > { %3999 = vrot.lane.b32.xlu0 %v3871_v57, %s8327_s29  ;;  %v10443_v30 = vpop.permute.xlu1 %3000 }
 0x2ee   : > { %v10447_v43 = vpop.permute.xlu0 %3006 }
 0x2ef   : > { %3180 = vrot.lane.b32.xlu1 %v10441_v36, %s8329_s20  ;;  %v10466_v36 = vld [vmem:[#allocation2 + $0x62] sm:$0xff] }
 0x2f0   : > { %14074 = vst [vmem:[#allocation90_spill] sm:$0xff] %v10466_v36 }
 0x2f1   : > { %4003 = vrot.lane.b32.xlu0 %v10445_v48, %s8327_s29  ;;  %v10453_v26 = vpop.permute.xlu1 %3004  ;;  %v10474_v48 = vld [vmem:[#allocation2 + $0x52] sm:$0xff] }
 0x2f2   : > { %v10457_v57 = vpop.permute.xlu0 %3010  ;;  %14075 = vst [vmem:[#allocation72_spill] sm:$0xff] %v10474_v48 }
 0x2f3   : > { %4001 = vrot.lane.b32.xlu1 %v3872_v40, %s8327_s29 }
 0x2f5   : > { %4007 = vrot.lane.b32.xlu0 %v10455_v32, %s8327_s29  ;;  %v10464_v39 = vpop.permute.xlu1 %3008 }
 0x2f6   : > { %v10468_v4 = vpop.permute.xlu0 %3014 }
 0x2f7   : > { %4005 = vrot.lane.b32.xlu1 %v10462_v54, %s8327_s29 }
 0x2f9   : > { %4011 = vrot.lane.b32.xlu0 %v10466_v36, %s8327_s29  ;;  %v10476_v40 = vpop.permute.xlu1 %3012  ;;  %v3880_v36 = vld [vmem:[#allocation2 + $0x82] sm:$0xff] }
 0x2fa   : > { %v10478_v32 = vpop.permute.xlu0 %3018 }
 0x2fb   : > { %4009 = vrot.lane.b32.xlu1 %v10474_v48, %s8327_s29 }
 0x2fd   : > { %4015 = vrot.lane.b32.xlu0 %v3879_v8, %s8327_s29  ;;  %v10483_v7 = vpop.permute.xlu1 %3016  ;;  %v3882_v8 = vld [vmem:[#allocation2 + $0x9a] sm:$0xff] }
 0x2fe   : > { %v10485_v54 = vpop.permute.xlu0 %3022 }
 0x2ff   : > { %4013 = vrot.lane.b32.xlu1 %v3878_v17, %s8327_s29  ;;  %v3884_v17 = vld [vmem:[#allocation2 + $0xb2] sm:$0xff] }
 0x301   : > { %4019 = vrot.lane.b32.xlu0 %v3881_v22, %s8327_s29  ;;  %v10489_v33 = vpop.permute.xlu1 %3020 }
 0x302   : > { %v10491_v3 = vpop.permute.xlu0 %3026 }
 0x303   : > { %4017 = vrot.lane.b32.xlu1 %v3880_v36, %s8327_s29 }
 0x305   : > { %4023 = vrot.lane.b32.xlu0 %v3883_v56, %s8327_s29  ;;  %v10495_v48 = vpop.permute.xlu1 %3024  ;;  %v3886_v56 = vld [vmem:[#allocation2 + $0xca] sm:$0xff] }
 0x306   : > { %v10497_v5 = vpop.permute.xlu0 %3030 }
 0x307   : > { %14076 = vst [vmem:[#allocation34_spill] sm:$0xff] %v10497_v5  ;;  %4021 = vrot.lane.b32.xlu1 %v3882_v8, %s8327_s29  ;;  %v3891_v5 = vld [vmem:[#allocation2 + $0x10a] sm:$0xff] }
 0x309   : > { %4027 = vrot.lane.b32.xlu0 %v3885_v50, %s8327_s29  ;;  %v10501_v22 = vpop.permute.xlu1 %3028  ;;  %v3888_v50 = vld [vmem:[#allocation2 + $0xe2] sm:$0xff] }
 0x30a   : > { %14077 = vst [vmem:[#allocation58_spill] sm:$0xff] %v10501_v22 }
 0x30b   : > { %v10503_v9 = vpop.permute.xlu0 %3034  ;;  %4025 = vrot.lane.b32.xlu1 %v3884_v17, %s8327_s29 }
 0x30c   : > { %14078 = vst [vmem:[#allocation40_spill] sm:$0xff] %v10503_v9  ;;  %v3893_v9 = vld [vmem:[#allocation2 + $0x122] sm:$0xff] }
 0x30d   : > { %4031 = vrot.lane.b32.xlu0 %v3887_v11, %s8327_s29  ;;  %v10507_v36 = vpop.permute.xlu1 %3032  ;;  %v3890_v11 = vld [vmem:[#allocation2 + $0xfa] sm:$0xff] }
 0x30e   : > { %14079 = vst [vmem:[#allocation33_spill] sm:$0xff] %v10507_v36 }
 0x30f   : > { %v10509_v37 = vpop.permute.xlu0 %3038  ;;  %4029 = vrot.lane.b32.xlu1 %v3886_v56, %s8327_s29 }
 0x310   : > { %14080 = vst [vmem:[#allocation70_spill] sm:$0xff] %v10509_v37  ;;  %v3895_v37 = vld [vmem:[#allocation2 + $0x13a] sm:$0xff] }
 0x311   : > { %4035 = vrot.lane.b32.xlu0 %v3889_v18, %s8327_s29  ;;  %v10513_v8 = vpop.permute.xlu1 %3036  ;;  %v3892_v18 = vld [vmem:[#allocation2 + $0x112] sm:$0xff] }
 0x312   : > { %14081 = vst [vmem:[#allocation18_spill] sm:$0xff] %v10513_v8  ;;  %v2701_v8 = vld [vmem:[#allocation2 + $0x18] sm:$0xff] }
 0x313   : > { %v10515_v22 = vpop.permute.xlu0 %3042  ;;  %4033 = vrot.lane.b32.xlu1 %v3888_v50, %s8327_s29  ;;  %v3214_v50 = vsel %vm305_vm0, %v2701_v8, %v10177_v38  ;;  %v3899_v38 = vld [vmem:[#allocation2 + $0x16a] sm:$0xff] }
 0x314   : > { %14082 = vst [vmem:[#allocation64_spill] sm:$0xff] %v10515_v22 }
 0x315   : > { %4039 = vrot.lane.b32.xlu0 %v3891_v5, %s8327_s29  ;;  %v10519_v17 = vpop.permute.xlu1 %3040  ;;  %v3894_v5 = vld [vmem:[#allocation2 + $0x12a] sm:$0xff] }
 0x316   : > { %14083 = vst [vmem:[#allocation39_spill] sm:$0xff] %v10519_v17 }
 0x317   : > { %v10521_v36 = vpop.permute.xlu0 %3046  ;;  %4037 = vrot.lane.b32.xlu1 %v3890_v11, %s8327_s29  ;;  %v3897_v11 = vld [vmem:[#allocation2 + $0x152] sm:$0xff] }
 0x318   : > { %14084 = vst [vmem:[#allocation24_spill] sm:$0xff] %v10521_v36 }
 0x319   : > { %4043 = vrot.lane.b32.xlu0 %v3893_v9, %s8327_s29  ;;  %v10525_v56 = vpop.permute.xlu1 %3044  ;;  %v3246_v9 = vsel %vm970_vm2, %v3214_v50, %v10402_v27  ;;  %v7994_v50 = vld [vmem:[#allocation2 + $0x30] sm:$0xff] }
 0x31a   : > { %14085 = vst [vmem:[#allocation17_spill] sm:$0xff] %v10525_v56 }
 0x31b   : > { %v10527_v22 = vpop.permute.xlu0 %3050  ;;  %4041 = vrot.lane.b32.xlu1 %v3892_v18, %s8327_s29  ;;  %v2702_v18 = vld [vmem:[#allocation2 + $0x20] sm:$0xff] }
 0x31c   : > { %14086 = vst [vmem:[#allocation36_spill] sm:$0xff] %v10527_v22  ;;  %v3215_v27 = vsel %vm305_vm0, %v2702_v18, %v10203_v63  ;;  %v4449_v63 = vld [vmem:[#allocation7 + $0x38] sm:$0xff] }
 0x31d   : > { %4047 = vrot.lane.b32.xlu0 %v3895_v37, %s8327_s29  ;;  %v10533_v36 = vpop.permute.xlu1 %3048  ;;  %v3896_v37 = vld [vmem:[#allocation2 + $0x142] sm:$0xff] }
 0x31e   : > { %14087 = vst [vmem:[#allocation76_spill] sm:$0xff] %v10533_v36 }
 0x31f   : > { %v3119_v17 = vpop.permute.xlu0 %3118  ;;  %4045 = vrot.lane.b32.xlu1 %v3894_v5, %s8327_s29  ;;  %v3216_v5 = vsel %vm305_vm0, %v7994_v50, %v10193_v24  ;;  %v7912_v24 = vpack.c.bf16 %v4449_v63, %v4448_v41 }
 0x320   : > { %v3278_v56 = vsel %vm1003_vm3, %v3246_v9, %v3119_v17  ;;  %v3898_v17 = vld [vmem:[#allocation2 + $0x15a] sm:$0xff]  ;;  %v3901_v9 = vld [vmem:[#allocation2 + $0x182] sm:$0xff] }
 0x321   : > { %4051 = vrot.lane.b32.xlu0 %v3897_v11, %s8327_s29  ;;  %7800 = vmatprep.mubr.msk.f32.mxu0 %vm1038_vm4, %v3278_v56  ;;  %v10541_v22 = vpop.permute.xlu1 %3052  ;;  %v3247_v56 = vsel %vm970_vm2, %v3215_v27, %v10422_v31  ;;  %v7996_v27 = vld [vmem:[#allocation2 + $0x48] sm:$0xff] }
 0x322   : > { %14088 = vst [vmem:[#allocation23_spill] sm:$0xff] %v10541_v22  ;;  %v3248_v22 = vsel %vm970_vm2, %v3216_v5, %v10414_v59  ;;  %v3900_v59 = vld [vmem:[#allocation2 + $0x172] sm:$0xff]  ;;  %v3218_v50 = vsel %vm305_vm0, %v7996_v27, %v10206_v52  ;;  %7913 = vmatprep.subr.bf16.mxu1 %v7912_v24 }
 0x323   : > { %v3123_v8 = vpop.permute.xlu0 %3122  ;;  %4049 = vrot.lane.b32.xlu1 %v3896_v37, %s8327_s29  ;;  %v3250_v41 = vsel %vm970_vm2, %v3218_v50, %v10426_v49  ;;  %7915 = vmatpush3.bf16.msra.mxu1 %v7912_v24  ;;  %v3902_v49 = vld [vmem:[#allocation2 + $0x18a] sm:$0xff] }
 0x324   : > { %v3280_v18 = vsel %vm1003_vm3, %v3248_v22, %v3123_v8 }
 0x325   : > { %4055 = vrot.lane.b32.xlu0 %v3899_v38, %s8327_s29  ;;  %v3121_v11 = vpop.permute.xlu1 %3120  ;;  %v7995_v38 = vld [vmem:[#allocation2 + $0x38] sm:$0xff] }
 0x326   : > { %v3279_v37 = vsel %vm1003_vm3, %v3247_v56, %v3121_v11  ;;  %v3217_v31 = vsel %vm305_vm0, %v7995_v38, %v10215_v55  ;;  %v7997_v56 = vld [vmem:[#allocation2 + $0x50] sm:$0xff] }
 0x327   : > { %v3127_v36 = vpop.permute.xlu0 %3126  ;;  %4053 = vrot.lane.b32.xlu1 %v3898_v17, %s8327_s29  ;;  %7801 = vmatmul.mubr.msk.f32.vlgmr.msra.gmra.mrb[32].mxu0 %vm1038_vm4, %v3279_v37  ;;  %v3249_v22 = vsel %vm970_vm2, %v3217_v31, %v10434_v16  ;;  %v3219_v52 = vsel %vm305_vm0, %v7997_v56, %v10230_v20  ;;  %v7998_v16 = vld [vmem:[#allocation2 + $0x60] sm:$0xff] }
 0x328   : > { %7803 = vmatprep.mubr.msk.f32.mxu0 %vm1038_vm4, %v3280_v18  ;;  %v3282_v5 = vsel %vm1003_vm3, %v3250_v41, %v3127_v36  ;;  %v3220_v11 = vsel %vm305_vm0, %v7998_v16, %v10220_v62  ;;  %v3251_v36 = vsel %vm970_vm2, %v3219_v52, %v10443_v30  ;;  %v8000_v30 = vld [vmem:[#allocation2 + $0x78] sm:$0xff] }
 0x329   : > { %4059 = vrot.lane.b32.xlu0 %v3901_v9, %s8327_s29  ;;  %v3125_v8 = vpop.permute.xlu1 %3124  ;;  %v3252_v37 = vsel %vm970_vm2, %v3220_v11, %v10436_v29  ;;  %v3222_v29 = vsel %vm305_vm0, %v8000_v30, %v10235_v23 }
 0x32a   : > { %v3281_v17 = vsel %vm1003_vm3, %v3249_v22, %v3125_v8  ;;  %v3254_v31 = vsel %vm970_vm2, %v3222_v29, %v10447_v43 }
 0x32b   : > { %v3131_v55 = vpop.permute.xlu0 %3130  ;;  %4057 = vrot.lane.b32.xlu1 %v3900_v59, %s8327_s29  ;;  %7804 = vmatmul.mubr.msk.f32.gmra.mrb[34].mxu0 %vm1038_vm4, %v3281_v17 }
 0x32c   : > { %7806 = vmatprep.mubr.msk.f32.mxu0 %vm1038_vm4, %v3282_v5  ;;  %v3284_v18 = vsel %vm1003_vm3, %v3252_v37, %v3131_v55 }
 0x32d   : > { %4127 = vrot.lane.b32.xlu0 %v10217_v10, %s8328_s21  ;;  %v3129_v9 = vpop.permute.xlu1 %3128  ;;  %v7999_v10 = vld [vmem:[#allocation2 + $0x68] sm:$0xff] }
 0x32e   : > { %v3283_v63 = vsel %vm1003_vm3, %v3251_v36, %v3129_v9  ;;  %v3221_v62 = vsel %vm305_vm0, %v7999_v10, %v10247_v45  ;;  %v8006_v36 = vld [vmem:[#allocation2 + $0xc0] sm:$0xff] }
 0x32f   : > { %v3135_v20 = vpop.permute.xlu0 %3134  ;;  %4061 = vrot.lane.b32.xlu1 %v3902_v49, %s8327_s29  ;;  %7807 = vmatmul.mubr.msk.f32.gmra.mrb[36].mxu0 %vm1038_vm4, %v3283_v63  ;;  %v3253_v24 = vsel %vm970_vm2, %v3221_v62, %v10453_v26  ;;  %v8002_v26 = vld [vmem:[#allocation2 + $0x90] sm:$0xff] }
 0x330   : > { %7809 = vmatprep.mubr.msk.f32.mxu0 %vm1038_vm4, %v3284_v18  ;;  %v3286_v45 = vsel %vm1003_vm3, %v3254_v31, %v3135_v20  ;;  %v3224_v43 = vsel %vm305_vm0, %v8002_v26, %v10252_v14 }
 0x331   : > { %4131 = vrot.lane.b32.xlu0 %v10232_v42, %s8328_s21  ;;  %v3133_v38 = vpop.permute.xlu1 %3132  ;;  %v8001_v42 = vld [vmem:[#allocation2 + $0x80] sm:$0xff] }
 0x332   : > { %v3285_v59 = vsel %vm1003_vm3, %v3253_v24, %v3133_v38  ;;  %v3223_v23 = vsel %vm305_vm0, %v8001_v42, %v10265_v12  ;;  %v8009_v42 = vld [vmem:[#allocation2 + $0xe0] sm:$0xff] }
 0x333   : > { %v3139_v27 = vpop.permute.xlu0 %3138  ;;  %4129 = vrot.lane.b32.xlu1 %v10245_v2, %s8328_s21  ;;  %7810 = vmatmul.mubr.msk.f32.gmra.mrb[38].mxu0 %vm1038_vm4, %v3285_v59  ;;  %v3255_v50 = vsel %vm970_vm2, %v3223_v23, %v10464_v39  ;;  %v3256_v2 = vsel %vm970_vm2, %v3224_v43, %v10457_v57  ;;  %v8004_v39 = vld [vmem:[#allocation2 + $0xa8] sm:$0xff]  ;;  %v8008_v59 = vld [vmem:[#allocation2 + $0xd8] sm:$0xff]  ;;  %v3231_v23 = vsel %vm305_vm0, %v8009_v42, %v10326_v28 }
 0x334   : > { %7812 = vmatprep.mubr.msk.f32.mxu0 %vm1038_vm4, %v3286_v45  ;;  %v3288_v12 = vsel %vm1003_vm3, %v3256_v2, %v3139_v27  ;;  %v3226_v57 = vsel %vm305_vm0, %v8004_v39, %v10270_v44  ;;  %v8011_v39 = vld [vmem:[#allocation2 + $0xf8] sm:$0xff] }
 0x335   : > { %4135 = vrot.lane.b32.xlu0 %v10249_v46, %s8328_s21  ;;  %v3137_v22 = vpop.permute.xlu1 %3136  ;;  %v8003_v46 = vld [vmem:[#allocation2 + $0x98] sm:$0xff] }
 0x336   : > { %v3287_v8 = vsel %vm1003_vm3, %v3255_v50, %v3137_v22  ;;  %v3225_v14 = vsel %vm305_vm0, %v8003_v46, %v10283_v6 }
 0x337   : > { %v3143_v41 = vpop.permute.xlu0 %3142  ;;  %4133 = vrot.lane.b32.xlu1 %v10263_v1, %s8328_s21  ;;  %7813 = vmatmul.mubr.msk.f32.gmra.mrb[40].mxu0 %vm1038_vm4, %v3287_v8  ;;  %v3257_v17 = vsel %vm970_vm2, %v3225_v14, %v10476_v40  ;;  %v3258_v1 = vsel %vm970_vm2, %v3226_v57, %v10468_v4  ;;  %v8005_v40 = vld [vmem:[#allocation2 + $0xb0] sm:$0xff]  ;;  %v3233_v57 = vsel %vm305_vm0, %v8011_v39, %v10338_v15 }
 0x338   : > { %7815 = vmatprep.mubr.msk.f32.mxu0 %vm1038_vm4, %v3288_v12  ;;  %v3290_v52 = vsel %vm1003_vm3, %v3258_v1, %v3143_v41  ;;  %v3227_v4 = vsel %vm305_vm0, %v8005_v40, %v10302_v0  ;;  %v8010_v14 = vld [vmem:[#allocation2 + $0xf0] sm:$0xff] }
 0x339   : > { %4139 = vrot.lane.b32.xlu0 %v10267_v53, %s8328_s21  ;;  %v3141_v55 = vpop.permute.xlu1 %3140  ;;  %v3259_v9 = vsel %vm970_vm2, %v3227_v4, %v10483_v7  ;;  %v8007_v7 = vld [vmem:[#allocation2 + $0xc8] sm:$0xff] }
 0x33a   : > { %v3289_v5 = vsel %vm1003_vm3, %v3257_v17, %v3141_v55  ;;  %v7750_v56 = vpop.f32.mrb[0].mxu1  ;;  %v3263_v17 = vsel %vm970_vm2, %v3231_v23, %v10495_v48 }
 0x33b   : > { %v3147_v6 = vpop.permute.xlu0 %3146  ;;  %2498 = vst.msk [vmem:[#allocation3 + $0x108] sm:$0xff] %vm305_vm0, %v7750_v56  ;;  %v2530_v53 = vsel %vm305_vm0, %v7750_v56, 0.0  ;;  %v2600_v49 = vmul.f32 %v7750_v56, %v7750_v56  ;;  %4137 = vrot.lane.b32.xlu1 %v10281_v51, %s8328_s21  ;;  %v2337_v44 = vpop.f32.mrb[1].mxu1  ;;  %7816 = vmatmul.mubr.msk.f32.gmra.mrb[42].mxu0 %vm1038_vm4, %v3289_v5  ;;  %v3228_v51 = vsel %vm305_vm0, %v8006_v36, %v10288_v13  ;;  %v8012_v36 = vld [vmem:[#allocation2 + $0x108] sm:$0xff] }
 0x33c   : > { %2497 = vst.msk [vmem:[#allocation3 + $0x100] sm:$0xff] %vm305_vm0, %v2337_v44  ;;  %v2529_v16 = vsel %vm305_vm0, %v2337_v44, 0.0  ;;  %v2599_v11 = vmul.f32 %v2337_v44, %v2337_v44  ;;  %7818 = vmatprep.mubr.msk.f32.mxu0 %vm1038_vm4, %v3290_v52  ;;  %v3260_v20 = vsel %vm970_vm2, %v3228_v51, %v10478_v32  ;;  %v3229_v32 = vsel %vm305_vm0, %v8007_v7, %v10314_v35  ;;  %v14090_v51 = vld [vmem:[#allocation30_spill] sm:$0xff] }
 0x33d   : > { %4143 = vrot.lane.b32.xlu0 %v10285_v25, %s8328_s21  ;;  %v2632_v37 = vsel %vm305_vm0, %v2600_v49, 0.0  ;;  %v2531_v0 = vadd.f32 %v2530_v53, %v2529_v16  ;;  %v3145_v63 = vpop.permute.xlu1 %3144  ;;  %v3292_v30 = vsel %vm1003_vm3, %v3260_v20, %v3147_v6  ;;  %v3261_v27 = vsel %vm970_vm2, %v3229_v32, %v10489_v33 }
 0x33e   : > { %v2631_v18 = vsel %vm305_vm0, %v2599_v11, 0.0  ;;  %v3291_v25 = vsel %vm1003_vm3, %v3259_v9, %v3145_v63  ;;  %v7753_v10 = vpop.f32.mrb[2].mxu1  ;;  %v14089_v11 = vld [vmem:[#allocation46_spill] sm:$0xff]  ;;  %v3234_v9 = vsel %vm305_vm0, %v8012_v36, %v14090_v51 }
 0x33f   : > { %v3151_v62 = vpop.permute.xlu0 %3150  ;;  %v2633_v29 = vadd.f32 %v2632_v37, %v2631_v18  ;;  %2500 = vst.msk [vmem:[#allocation3 + $0x118] sm:$0xff] %vm305_vm0, %v7753_v10  ;;  %4141 = vrot.lane.b32.xlu1 %v10298_v60, %s8328_s21  ;;  %v2347_v13 = vpop.f32.mrb[3].mxu1  ;;  %7819 = vmatmul.mubr.msk.f32.gmra.mrb[44].mxu0 %vm1038_vm4, %v3291_v25  ;;  %v2602_v24 = vmul.f32 %v7753_v10, %v7753_v10  ;;  %v14091_v37 = vld [vmem:[#allocation47_spill] sm:$0xff]  ;;  %v14092_v63 = vld [vmem:[#allocation58_spill] sm:$0xff] }
 0x340   : > { %2499 = vst.msk [vmem:[#allocation3 + $0x110] sm:$0xff] %vm305_vm0, %v2347_v13  ;;  %v2532_v38 = vsel %vm305_vm0, %v2347_v13, 0.0  ;;  %v2601_v31 = vmul.f32 %v2347_v13, %v2347_v13  ;;  %7821 = vmatprep.mubr.msk.f32.mxu0 %vm1038_vm4, %v3292_v30  ;;  %v3230_v60 = vsel %vm305_vm0, %v8008_v59, %v10306_v21  ;;  %v2534_v21 = vsel %vm305_vm0, %v7753_v10, 0.0  ;;  %v14093_v10 = vld [vmem:[#allocation34_spill] sm:$0xff] }
 0x341   : > { %4147 = vrot.lane.b32.xlu0 %v10304_v34, %s8328_s21  ;;  %v2533_v45 = vadd.f32 %v2532_v38, %v2531_v0  ;;  %v3149_v35 = vpop.permute.xlu1 %3148  ;;  %v3262_v26 = vsel %vm970_vm2, %v3230_v60, %v10485_v54  ;;  %v2636_v54 = vsel %vm305_vm0, %v2602_v24, 0.0  ;;  %v3265_v20 = vsel %vm970_vm2, %v3233_v57, %v14092_v63  ;;  %v14094_v60 = vld [vmem:[#allocation45_spill] sm:$0xff] }
 0x342   : > { %v2634_v34 = vsel %vm305_vm0, %v2601_v31, 0.0  ;;  %v3293_v43 = vsel %vm1003_vm3, %v3261_v27, %v3149_v35  ;;  %v7756_v50 = vpop.f32.mrb[4].mxu1  ;;  %v3294_v2 = vsel %vm1003_vm3, %v3262_v26, %v3151_v62  ;;  %v3266_v62 = vsel %vm970_vm2, %v3234_v9, %v14093_v10  ;;  %v14095_v26 = vld [vmem:[#allocation29_spill] sm:$0xff]  ;;  %v14105_v9 = vld [vmem:[#allocation70_spill] sm:$0xff] }
 0x343   : > { %v3155_v22 = vpop.permute.xlu0 %3154  ;;  %v2635_v33 = vadd.f32 %v2634_v34, %v2633_v29  ;;  %2502 = vst.msk [vmem:[#allocation3 + $0x128] sm:$0xff] %vm305_vm0, %v7756_v50  ;;  %v2604_v8 = vmul.f32 %v7756_v50, %v7756_v50  ;;  %4145 = vrot.lane.b32.xlu1 %v10312_v19, %s8328_s21  ;;  %v2357_v28 = vpop.f32.mrb[5].mxu1  ;;  %7822 = vmatmul.mubr.msk.f32.gmra.mrb[46].mxu0 %vm1038_vm4, %v3293_v43  ;;  %v8014_v34 = vld [vmem:[#allocation2 + $0x120] sm:$0xff]  ;;  %v14096_v43 = vld [vmem:[#allocation87_spill] sm:$0xff] }
 0x344   : > { %2501 = vst.msk [vmem:[#allocation3 + $0x120] sm:$0xff] %vm305_vm0, %v2357_v28  ;;  %v2535_v41 = vadd.f32 %v2534_v21, %v2533_v45  ;;  %v2536_v12 = vsel %vm305_vm0, %v2357_v28, 0.0  ;;  %v2603_v46 = vmul.f32 %v2357_v28, %v2357_v28  ;;  %7824 = vmatprep.mubr.msk.f32.mxu0 %vm1038_vm4, %v3294_v2  ;;  %v3232_v19 = vsel %vm305_vm0, %v8010_v14, %v10318_v61  ;;  %v14097_v21 = vld [vmem:[#allocation49_spill] sm:$0xff] }
 0x345   : > { %4151 = vrot.lane.b32.xlu0 %v10316_v47, %s8328_s21  ;;  %v2637_v55 = vadd.f32 %v2636_v54, %v2635_v33  ;;  %v3153_v1 = vpop.permute.xlu1 %3152  ;;  %v3264_v5 = vsel %vm970_vm2, %v3232_v19, %v10491_v3  ;;  %v2538_v61 = vsel %vm305_vm0, %v7756_v50, 0.0  ;;  %v2640_v49 = vsel %vm305_vm0, %v2604_v8, 0.0  ;;  %v14098_v33 = vld [vmem:[#allocation33_spill] sm:$0xff] }
 0x346   : > { %v2537_v56 = vadd.f32 %v2536_v12, %v2535_v41  ;;  %v2638_v47 = vsel %vm305_vm0, %v2603_v46, 0.0  ;;  %v3295_v6 = vsel %vm1003_vm3, %v3263_v17, %v3153_v1  ;;  %v7759_v52 = vpop.f32.mrb[6].mxu1  ;;  %v3296_v15 = vsel %vm1003_vm3, %v3264_v5, %v3155_v22  ;;  %v8015_v22 = vld [vmem:[#allocation2 + $0x128] sm:$0xff]  ;;  %v14099_v41 = vld [vmem:[#allocation40_spill] sm:$0xff] }
 0x347   : > { %v3159_v53 = vpop.permute.xlu0 %3158  ;;  %v2639_v44 = vadd.f32 %v2638_v47, %v2637_v55  ;;  %2504 = vst.msk [vmem:[#allocation3 + $0x138] sm:$0xff] %vm305_vm0, %v7759_v52  ;;  %4149 = vrot.lane.b32.xlu1 %v10324_v58, %s8328_s21  ;;  %v2367_v48 = vpop.f32.mrb[7].mxu1  ;;  %7825 = vmatmul.mubr.msk.f32.gmra.mrb[48].mxu0 %vm1038_vm4, %v3295_v6  ;;  %v2606_v3 = vmul.f32 %v7759_v52, %v7759_v52  ;;  %v8013_v58 = vld [vmem:[#allocation2 + $0x110] sm:$0xff]  ;;  %v2542_v24 = vsel %vm305_vm0, %v7759_v52, 0.0 }
 0x348   : > { %2503 = vst.msk [vmem:[#allocation3 + $0x130] sm:$0xff] %vm305_vm0, %v2367_v48  ;;  %v2539_v40 = vadd.f32 %v2538_v61, %v2537_v56  ;;  %v2540_v4 = vsel %vm305_vm0, %v2367_v48, 0.0  ;;  %v2605_v16 = vmul.f32 %v2367_v48, %v2367_v48  ;;  %7827 = vmatprep.mubr.msk.f32.mxu0 %vm1038_vm4, %v3296_v15  ;;  %v3235_v0 = vsel %vm305_vm0, %v8013_v58, %v14091_v37  ;;  %v14100_v56 = vld [vmem:[#allocation86_spill] sm:$0xff]  ;;  %v8016_v15 = vld [vmem:[#allocation2 + $0x138] sm:$0xff] }
 0x349   : > { %4155 = vrot.lane.b32.xlu0 %v14089_v11, %s8328_s21  ;;  %v2641_v18 = vadd.f32 %v2640_v49, %v2639_v44  ;;  %v3157_v25 = vpop.permute.xlu1 %3156  ;;  %v3298_v38 = vsel %vm1003_vm3, %v3266_v62, %v3159_v53  ;;  %v2644_v45 = vsel %vm305_vm0, %v2606_v3, 0.0  ;;  %v3236_v50 = vsel %vm305_vm0, %v8014_v34, %v14096_v43  ;;  %v14101_v49 = vld [vmem:[#allocation31_spill] sm:$0xff]  ;;  %v14102_v44 = vld [vmem:[#allocation48_spill] sm:$0xff]  ;;  %v8017_v3 = vld [vmem:[#allocation2 + $0x140] sm:$0xff] }
 0x34a   : > { %v2541_v30 = vadd.f32 %v2540_v4, %v2539_v40  ;;  %v2642_v29 = vsel %vm305_vm0, %v2605_v16, 0.0  ;;  %v3297_v13 = vsel %vm1003_vm3, %v3265_v20, %v3157_v25  ;;  %v7762_v7 = vpop.f32.mrb[8].mxu1  ;;  %v3237_v2 = vsel %vm305_vm0, %v8015_v22, %v14097_v21  ;;  %v14103_v40 = vld [vmem:[#allocation54_spill] sm:$0xff] }
 0x34b   : > { %v3163_v32 = vpop.permute.xlu0 %3162  ;;  %v2643_v31 = vadd.f32 %v2642_v29, %v2641_v18  ;;  %2506 = vst.msk [vmem:[#allocation3 + $0x148] sm:$0xff] %vm305_vm0, %v7762_v7  ;;  %v2608_v59 = vmul.f32 %v7762_v7, %v7762_v7  ;;  %4153 = vrot.lane.b32.xlu1 %v14094_v60, %s8328_s21  ;;  %v2377_v27 = vpop.f32.mrb[9].mxu1  ;;  %7828 = vmatmul.mubr.msk.f32.gmra.mrb[50].mxu0 %vm1038_vm4, %v3297_v13  ;;  %v2546_v17 = vsel %vm305_vm0, %v7762_v7, 0.0  ;;  %v14104_v16 = vld [vmem:[#allocation18_spill] sm:$0xff]  ;;  %v14108_v60 = vld [vmem:[#allocation52_spill] sm:$0xff] }
 0x34c   : > { %2505 = vst.msk [vmem:[#allocation3 + $0x140] sm:$0xff] %vm305_vm0, %v2377_v27  ;;  %v2543_v35 = vadd.f32 %v2542_v24, %v2541_v30  ;;  %v2544_v42 = vsel %vm305_vm0, %v2377_v27, 0.0  ;;  %v2607_v23 = vmul.f32 %v2377_v27, %v2377_v27  ;;  %7830 = vmatprep.mubr.msk.f32.mxu0 %vm1038_vm4, %v3298_v38  ;;  %v3267_v8 = vsel %vm970_vm2, %v3235_v0, %v14098_v33  ;;  %v14106_v29 = vld [vmem:[#allocation50_spill] sm:$0xff] }
 0x34d   : > { %4159 = vrot.lane.b32.xlu0 %v14095_v26, %s8328_s21  ;;  %v2645_v28 = vadd.f32 %v2644_v45, %v2643_v31  ;;  %v3161_v54 = vpop.permute.xlu1 %3160  ;;  %v3268_v12 = vsel %vm970_vm2, %v3236_v50, %v14099_v41  ;;  %v2648_v55 = vsel %vm305_vm0, %v2608_v59, 0.0  ;;  %v3238_v48 = vsel %vm305_vm0, %v8016_v15, %v14102_v44  ;;  %v14107_v31 = vld [vmem:[#allocation51_spill] sm:$0xff]  ;;  %v8018_v59 = vld [vmem:[#allocation2 + $0x150] sm:$0xff]  ;;  %v8019_v45 = vld [vmem:[#allocation2 + $0x158] sm:$0xff] }
 0x34e   : > { %v2545_v46 = vadd.f32 %v2544_v42, %v2543_v35  ;;  %v2646_v14 = vsel %vm305_vm0, %v2607_v23, 0.0  ;;  %v3299_v19 = vsel %vm1003_vm3, %v3267_v8, %v3161_v54  ;;  %v7765_v39 = vpop.f32.mrb[10].mxu1  ;;  %v3300_v1 = vsel %vm1003_vm3, %v3268_v12, %v3163_v32  ;;  %v14109_v35 = vld [vmem:[#allocation59_spill] sm:$0xff]  ;;  %v14111_v50 = vld [vmem:[#allocation64_spill] sm:$0xff] }
 0x34f   : > { %v3167_v57 = vpop.permute.xlu0 %3166  ;;  %v2647_v5 = vadd.f32 %v2646_v14, %v2645_v28  ;;  %2508 = vst.msk [vmem:[#allocation3 + $0x158] sm:$0xff] %vm305_vm0, %v7765_v39  ;;  %4157 = vrot.lane.b32.xlu1 %v14100_v56, %s8328_s21  ;;  %v2387_v47 = vpop.f32.mrb[11].mxu1  ;;  %7831 = vmatmul.mubr.msk.f32.gmra.mrb[52].mxu0 %vm1038_vm4, %v3299_v19  ;;  %v2610_v6 = vmul.f32 %v7765_v39, %v7765_v39  ;;  %v2550_v25 = vsel %vm305_vm0, %v7765_v39, 0.0  ;;  %v14110_v23 = vld [vmem:[#allocation39_spill] sm:$0xff]  ;;  %v14112_v14 = vld [vmem:[#allocation53_spill] sm:$0xff]  ;;  %v14114_v56 = vld [vmem:[#allocation56_spill] sm:$0xff] }
 0x350   : > { %2507 = vst.msk [vmem:[#allocation3 + $0x150] sm:$0xff] %vm305_vm0, %v2387_v47  ;;  %v2547_v52 = vadd.f32 %v2546_v17, %v2545_v46  ;;  %v2548_v53 = vsel %vm305_vm0, %v2387_v47, 0.0  ;;  %v2609_v61 = vmul.f32 %v2387_v47, %v2387_v47  ;;  %7833 = vmatprep.mubr.msk.f32.mxu0 %vm1038_vm4, %v3300_v1  ;;  %v3239_v4 = vsel %vm305_vm0, %v8017_v3, %v14103_v40  ;;  %v14113_v1 = vld [vmem:[#allocation55_spill] sm:$0xff] }
 0x351   : > { %4163 = vrot.lane.b32.xlu0 %v14101_v49, %s8328_s21  ;;  %v3269_v11 = vsel %vm970_vm2, %v3237_v2, %v14104_v16  ;;  %v2649_v36 = vadd.f32 %v2648_v55, %v2647_v5  ;;  %v3165_v51 = vpop.permute.xlu1 %3164  ;;  %v3270_v58 = vsel %vm970_vm2, %v3238_v48, %v14105_v9  ;;  %v2652_v7 = vsel %vm305_vm0, %v2610_v6, 0.0  ;;  %v8020_v5 = vld [vmem:[#allocation2 + $0x168] sm:$0xff]  ;;  %v8021_v6 = vld [vmem:[#allocation2 + $0x170] sm:$0xff] }
 0x352   : > { %v2549_v37 = vadd.f32 %v2548_v53, %v2547_v52  ;;  %v2650_v0 = vsel %vm305_vm0, %v2609_v61, 0.0  ;;  %v3301_v63 = vsel %vm1003_vm3, %v3269_v11, %v3165_v51  ;;  %v7768_v20 = vpop.f32.mrb[12].mxu1  ;;  %v3302_v10 = vsel %vm1003_vm3, %v3270_v58, %v3167_v57  ;;  %v14115_v52 = vld [vmem:[#allocation67_spill] sm:$0xff]  ;;  %v14116_v61 = vld [vmem:[#allocation17_spill] sm:$0xff]  ;;  %v14117_v48 = vld [vmem:[#allocation24_spill] sm:$0xff] }
 0x353   : > { %v3171_v18 = vpop.permute.xlu0 %3170  ;;  %v2651_v62 = vadd.f32 %v2650_v0, %v2649_v36  ;;  %2510 = vst.msk [vmem:[#allocation3 + $0x168] sm:$0xff] %vm305_vm0, %v7768_v20  ;;  %v2612_v30 = vmul.f32 %v7768_v20, %v7768_v20  ;;  %4161 = vrot.lane.b32.xlu1 %v14106_v29, %s8328_s21  ;;  %v2397_v13 = vpop.f32.mrb[13].mxu1  ;;  %7834 = vmatmul.mubr.msk.f32.gmra.mrb[54].mxu0 %vm1038_vm4, %v3301_v63  ;;  %v2554_v54 = vsel %vm305_vm0, %v7768_v20, 0.0  ;;  %v14118_v0 = vld [vmem:[#allocation57_spill] sm:$0xff]  ;;  %v14120_v29 = vld [vmem:[#allocation63_spill] sm:$0xff] }
 0x354   : > { %2509 = vst.msk [vmem:[#allocation3 + $0x160] sm:$0xff] %vm305_vm0, %v2397_v13  ;;  %v2551_v32 = vadd.f32 %v2550_v25, %v2549_v37  ;;  %v2552_v24 = vsel %vm305_vm0, %v2397_v13, 0.0  ;;  %v2611_v38 = vmul.f32 %v2397_v13, %v2397_v13  ;;  %7836 = vmatprep.mubr.msk.f32.mxu0 %vm1038_vm4, %v3302_v10  ;;  %v3240_v27 = vsel %vm305_vm0, %v8018_v59, %v14108_v60 }
 0x355   : > { %4167 = vrot.lane.b32.xlu0 %v14107_v31, %s8328_s21  ;;  %v3241_v42 = vsel %vm305_vm0, %v8019_v45, %v14109_v35  ;;  %v3271_v26 = vsel %vm970_vm2, %v3239_v4, %v14110_v23  ;;  %v2653_v34 = vadd.f32 %v2652_v7, %v2651_v62  ;;  %v3169_v43 = vpop.permute.xlu1 %3168  ;;  %v3272_v22 = vsel %vm970_vm2, %v3240_v27, %v14111_v50  ;;  %v14119_v62 = vld [vmem:[#allocation61_spill] sm:$0xff]  ;;  %v8023_v7 = vld [vmem:[#allocation2 + $0x188] sm:$0xff]  ;;  %v14123_v27 = vld [vmem:[#allocation36_spill] sm:$0xff] }
 0x356   : > { %v2553_v21 = vadd.f32 %v2552_v24, %v2551_v32  ;;  %v2654_v2 = vsel %vm305_vm0, %v2611_v38, 0.0  ;;  %v3303_v33 = vsel %vm1003_vm3, %v3271_v26, %v3169_v43  ;;  %v7771_v8 = vpop.f32.mrb[14].mxu1  ;;  %v2656_v41 = vsel %vm305_vm0, %v2612_v30, 0.0  ;;  %v8022_v30 = vld [vmem:[#allocation2 + $0x180] sm:$0xff]  ;;  %v14121_v32 = vld [vmem:[#allocation73_spill] sm:$0xff]  ;;  %v14122_v38 = vld [vmem:[#allocation76_spill] sm:$0xff] }
 0x357   : > { %v3175_v28 = vpop.permute.xlu0 %3174  ;;  %v3304_v12 = vsel %vm1003_vm3, %v3272_v22, %v3171_v18  ;;  %v2655_v46 = vadd.f32 %v2654_v2, %v2653_v34  ;;  %2512 = vst.msk [vmem:[#allocation3 + $0x178] sm:$0xff] %vm305_vm0, %v7771_v8  ;;  %4165 = vrot.lane.b32.xlu1 %v14112_v14, %s8328_s21  ;;  %v2407_v19 = vpop.f32.mrb[15].mxu1  ;;  %7837 = vmatmul.mubr.msk.f32.gmra.mrb[56].mxu0 %vm1038_vm4, %v3303_v33  ;;  %v2558_v51 = vsel %vm305_vm0, %v7771_v8, 0.0  ;;  %v14124_v2 = vld [vmem:[#allocation65_spill] sm:$0xff] }
 0x358   : > { %v2614_v39 = vmul.f32 %v7771_v8, %v7771_v8  ;;  %2511 = vst.msk [vmem:[#allocation3 + $0x170] sm:$0xff] %vm305_vm0, %v2407_v19  ;;  %v2555_v57 = vadd.f32 %v2554_v54, %v2553_v21  ;;  %v2556_v17 = vsel %vm305_vm0, %v2407_v19, 0.0  ;;  %v2613_v55 = vmul.f32 %v2407_v19, %v2407_v19  ;;  %7839 = vmatprep.mubr.msk.f32.mxu0 %vm1038_vm4, %v3304_v12  ;;  %v14125_v12 = vld [vmem:[#allocation69_spill] sm:$0xff] }
 0x359   : > { %4171 = vrot.lane.b32.xlu0 %v14113_v1, %s8328_s21  ;;  %v3242_v47 = vsel %vm305_vm0, %v8020_v5, %v14114_v56  ;;  %v3243_v53 = vsel %vm305_vm0, %v8021_v6, %v14115_v52  ;;  %v3273_v49 = vsel %vm970_vm2, %v3241_v42, %v14116_v61  ;;  %v2657_v15 = vadd.f32 %v2656_v41, %v2655_v46  ;;  %v3173_v44 = vpop.permute.xlu1 %3172  ;;  %v14126_v46 = vld [vmem:[#allocation23_spill] sm:$0xff] }
 0x35a   : > { %v3274_v3 = vsel %vm970_vm2, %v3242_v47, %v14117_v48  ;;  %v2557_v40 = vadd.f32 %v2556_v17, %v2555_v57  ;;  %v2658_v4 = vsel %vm305_vm0, %v2613_v55, 0.0  ;;  %v3305_v16 = vsel %vm1003_vm3, %v3273_v49, %v3173_v44  ;;  %v7774_v11 = vpop.f32.mrb[16].mxu1  ;;  %v14127_v52 = vld [vmem:[#allocation71_spill] sm:$0xff] }
 0x35b   : > { %v3179_v36 = vpop.permute.xlu0 %3178  ;;  %v3306_v9 = vsel %vm1003_vm3, %v3274_v3, %v3175_v28  ;;  %v2659_v58 = vadd.f32 %v2658_v4, %v2657_v15  ;;  %2514 = vst.msk [vmem:[#allocation3 + $0x188] sm:$0xff] %vm305_vm0, %v7774_v11  ;;  %v2616_v37 = vmul.f32 %v7774_v11, %v7774_v11  ;;  %4169 = vrot.lane.b32.xlu1 %v14118_v0, %s8328_s21  ;;  %v2417_v63 = vpop.f32.mrb[17].mxu1  ;;  %v2660_v20 = vsel %vm305_vm0, %v2614_v39, 0.0  ;;  %v14128_v48 = vld [vmem:[#allocation75_spill] sm:$0xff] }
 0x35c   : > { %7840 = vmatmul.mubr.msk.f32.gmra.mrb[58].mxu0 %vm1038_vm4, %v3305_v16  ;;  %2513 = vst.msk [vmem:[#allocation3 + $0x180] sm:$0xff] %vm305_vm0, %v2417_v63  ;;  %v2559_v18 = vadd.f32 %v2558_v51, %v2557_v40  ;;  %v2560_v25 = vsel %vm305_vm0, %v2417_v63, 0.0  ;;  %v2615_v10 = vmul.f32 %v2417_v63, %v2417_v63  ;;  %v3244_v13 = vsel %vm305_vm0, %v8022_v30, %v14120_v29 }
 0x35d   : > { %4175 = vrot.lane.b32.xlu0 %v14119_v62, %s8328_s21  ;;  %7842 = vmatprep.mubr.msk.f32.mxu0 %vm1038_vm4, %v3306_v9  ;;  %v3245_v24 = vsel %vm305_vm0, %v8023_v7, %v14121_v32  ;;  %v3275_v31 = vsel %vm970_vm2, %v3243_v53, %v14122_v38  ;;  %v2661_v59 = vadd.f32 %v2660_v20, %v2659_v58  ;;  %v3177_v60 = vpop.permute.xlu1 %3176  ;;  %v2562_v43 = vsel %vm305_vm0, %v7774_v11, 0.0 }
 0x35e   : > { %v3276_v45 = vsel %vm970_vm2, %v3244_v13, %v14123_v27  ;;  %v2561_v35 = vadd.f32 %v2560_v25, %v2559_v18  ;;  %v2662_v42 = vsel %vm305_vm0, %v2615_v10, 0.0  ;;  %v3307_v23 = vsel %vm1003_vm3, %v3275_v31, %v3177_v60  ;;  %v7777_v26 = vpop.f32.mrb[18].mxu1  ;;  %v14130_v10 = vld [vmem:[#allocation79_spill] sm:$0xff] }
 0x35f   : > { %v10828_v34 = vpop.permute.xlu0 %3999  ;;  %v2664_v50 = vsel %vm305_vm0, %v2616_v37, 0.0  ;;  %v3308_v22 = vsel %vm1003_vm3, %v3276_v45, %v3179_v36  ;;  %v2663_v21 = vadd.f32 %v2662_v42, %v2661_v59  ;;  %2516 = vst.msk [vmem:[#allocation3 + $0x198] sm:$0xff] %vm305_vm0, %v7777_v26  ;;  %4173 = vrot.lane.b32.xlu1 %v14124_v2, %s8328_s21  ;;  %v2427_v33 = vpop.f32.mrb[19].mxu1  ;;  %v2618_v8 = vmul.f32 %v7777_v26, %v7777_v26  ;;  %v14129_v37 = vld [vmem:[#allocation77_spill] sm:$0xff] }
 0x360   : > { %7843 = vmatmul.mubr.msk.f32.gmra.mrb[60].mxu0 %vm1038_vm4, %v3307_v23  ;;  %2515 = vst.msk [vmem:[#allocation3 + $0x190] sm:$0xff] %vm305_vm0, %v2427_v33  ;;  %v2563_v28 = vadd.f32 %v2562_v43, %v2561_v35  ;;  %v2564_v54 = vsel %vm305_vm0, %v2427_v33, 0.0  ;;  %v2617_v41 = vmul.f32 %v2427_v33, %v2427_v33  ;;  %v3277_v14 = vsel %vm970_vm2, %v3245_v24, %v14126_v46  ;;  %v14131_v59 = vld [vmem:[#allocation81_spill] sm:$0xff] }
 0x361   : > { %4179 = vrot.lane.b32.xlu0 %v14125_v12, %s8328_s21  ;;  %7845 = vmatprep.mubr.msk.f32.mxu0 %vm1038_vm4, %v3308_v22  ;;  %v2665_v19 = vadd.f32 %v2664_v50, %v2663_v21  ;;  %v3181_v39 = vpop.permute.xlu1 %3180  ;;  %v2566_v56 = vsel %vm305_vm0, %v7777_v26, 0.0  ;;  %v2668_v61 = vsel %vm305_vm0, %v2618_v8, 0.0  ;;  %v14132_v23 = vld [vmem:[#allocation85_spill] sm:$0xff] }
 0x362   : > { %v2565_v57 = vadd.f32 %v2564_v54, %v2563_v28  ;;  %v2666_v17 = vsel %vm305_vm0, %v2617_v41, 0.0  ;;  %v3309_v55 = vsel %vm1003_vm3, %v3277_v14, %v3181_v39  ;;  %v7780_v1 = vpop.f32.mrb[20].mxu1  ;;  %v14133_v54 = vld [vmem:[#allocation83_spill] sm:$0xff]  ;;  %v14134_v39 = vld [vmem:[#allocation88_spill] sm:$0xff] }
 0x363   : > { %v10846_v5 = vpop.permute.xlu0 %4003  ;;  %v2667_v47 = vadd.f32 %v2666_v17, %v2665_v19  ;;  %2518 = vst.msk [vmem:[#allocation3 + $0x1a8] sm:$0xff] %vm305_vm0, %v7780_v1  ;;  %v2620_v6 = vmul.f32 %v7780_v1, %v7780_v1  ;;  %4177 = vrot.lane.b32.xlu1 %v14127_v52, %s8328_s21  ;;  %v2437_v53 = vpop.f32.mrb[21].mxu1  ;;  %v2570_v51 = vsel %vm305_vm0, %v7780_v1, 0.0 }
 0x364   : > { %7846 = vmatmul.mubr.msk.f32.gmra.mrb[62].mxu0 %vm1038_vm4, %v3309_v55  ;;  %2517 = vst.msk [vmem:[#allocation3 + $0x1a0] sm:$0xff] %vm305_vm0, %v2437_v53  ;;  %v2567_v49 = vadd.f32 %v2566_v56, %v2565_v57  ;;  %v2568_v15 = vsel %vm305_vm0, %v2437_v53, 0.0  ;;  %v2619_v44 = vmul.f32 %v2437_v53, %v2437_v53 }
 0x365   : > { %4183 = vrot.lane.b32.xlu0 %v14128_v48, %s8328_s21  ;;  %v2669_v3 = vadd.f32 %v2668_v61, %v2667_v47  ;;  %v10858_v40 = vpop.permute.xlu1 %4001  ;;  %v2672_v9 = vsel %vm305_vm0, %v2620_v6, 0.0  ;;  %v14135_v6 = vld [vmem:[#allocation84_spill] sm:$0xff] }
 0x366   : > { %v2569_v4 = vadd.f32 %v2568_v15, %v2567_v49  ;;  %v2670_v16 = vsel %vm305_vm0, %v2619_v44, 0.0  ;;  %v1455_v52 = vrot.slane %v14135_v6, 4  ;;  %v14136_v15 = vld [vmem:[#allocation89_spill] sm:$0xff] }
 0x367   : > { %v7783_v11 = vpop.f32.mrb[22].mxu1  ;;  %v10861_v36 = vpop.permute.xlu0 %4007  ;;  %v2671_v58 = vadd.f32 %v2670_v16, %v2669_v3  ;;  %4181 = vrot.lane.b32.xlu1 %v14129_v37, %s8328_s21 }
 0x368   : > { %2520 = vst.msk [vmem:[#allocation3 + $0x1b8] sm:$0xff] %vm305_vm0, %v7783_v11  ;;  %v2447_v0 = vpop.f32.mrb[23].mxu1  ;;  %v2622_v63 = vmul.f32 %v7783_v11, %v7783_v11  ;;  %v2571_v20 = vadd.f32 %v2570_v51, %v2569_v4  ;;  %v2574_v24 = vsel %vm305_vm0, %v7783_v11, 0.0  ;;  %v14137_v11 = vld [vmem:[#allocation90_spill] sm:$0xff] }
 0x369   : > { %2519 = vst.msk [vmem:[#allocation3 + $0x1b0] sm:$0xff] %vm305_vm0, %v2447_v0  ;;  %v2572_v18 = vsel %vm305_vm0, %v2447_v0, 0.0  ;;  %v2621_v25 = vmul.f32 %v2447_v0, %v2447_v0  ;;  %4187 = vrot.lane.b32.xlu0 %v14130_v10, %s8328_s21  ;;  %v2673_v62 = vadd.f32 %v2672_v9, %v2671_v58  ;;  %v10872_v30 = vpop.permute.xlu1 %4005  ;;  %v14138_v51 = vld [vmem:[#allocation82_spill] sm:$0xff]  ;;  %v1456_v10 = vadd.f32 %v1455_v52, %v14135_v6 }
 0x36a   : > { %v2573_v29 = vadd.f32 %v2572_v18, %v2571_v20  ;;  %v2676_v27 = vsel %vm305_vm0, %v2622_v63, 0.0  ;;  %v1557_v9 = vrot.slane %v14138_v51, 4  ;;  %v3941_v0 = vld [vmem:[#allocation2 + $0x7a] sm:$0xff] }
 0x36b   : > { %v2674_v13 = vsel %vm305_vm0, %v2621_v25, 0.0  ;;  %v7786_v7 = vpop.f32.mrb[24].mxu1  ;;  %v10875_v32 = vpop.permute.xlu0 %4011  ;;  %4185 = vrot.lane.b32.xlu1 %v14131_v59, %s8328_s21  ;;  %v3944_v6 = vld [vmem:[#allocation2 + $0x9a] sm:$0xff] }
 0x36c   : > { %v2675_v38 = vadd.f32 %v2674_v13, %v2673_v62  ;;  %2522 = vst.msk [vmem:[#allocation3 + $0x1c8] sm:$0xff] %vm305_vm0, %v7786_v7  ;;  %v2624_v31 = vmul.f32 %v7786_v7, %v7786_v7  ;;  %v2457_v60 = vpop.f32.mrb[25].mxu1  ;;  %v2575_v45 = vadd.f32 %v2574_v24, %v2573_v29  ;;  %v2578_v33 = vsel %vm305_vm0, %v7786_v7, 0.0  ;;  %v14139_v7 = vld [vmem:[#allocation72_spill] sm:$0xff] }
 0x36d   : > { %2521 = vst.msk [vmem:[#allocation3 + $0x1c0] sm:$0xff] %vm305_vm0, %v2457_v60  ;;  %v2576_v35 = vsel %vm305_vm0, %v2457_v60, 0.0  ;;  %v2623_v42 = vmul.f32 %v2457_v60, %v2457_v60  ;;  %4255 = vrot.lane.b32.xlu0 %v14132_v23, %s8329_s20  ;;  %v10886_v43 = vpop.permute.xlu1 %4009  ;;  %v3943_v23 = vld [vmem:[#allocation2 + $0x92] sm:$0xff] }
 0x36e   : > { %v2677_v26 = vadd.f32 %v2676_v27, %v2675_v38  ;;  %v2577_v50 = vadd.f32 %v2576_v35, %v2575_v45  ;;  %v2680_v8 = vsel %vm305_vm0, %v2624_v31, 0.0  ;;  %v3940_v27 = vld [vmem:[#allocation2 + $0x6a] sm:$0xff]  ;;  %v1558_v45 = vadd.f32 %v1557_v9, %v14138_v51 }
 0x36f   : > { %v2678_v22 = vsel %vm305_vm0, %v2623_v42, 0.0  ;;  %v7789_v21 = vpop.f32.mrb[26].mxu1  ;;  %v10889_v2 = vpop.permute.xlu0 %4015  ;;  %4189 = vrot.lane.b32.xlu1 %v14133_v54, %s8328_s21 }
 0x370   : > { %v2679_v28 = vadd.f32 %v2678_v22, %v2677_v26  ;;  %2524 = vst.msk [vmem:[#allocation3 + $0x1d8] sm:$0xff] %vm305_vm0, %v7789_v21  ;;  %v2467_v41 = vpop.f32.mrb[27].mxu1  ;;  %v2626_v12 = vmul.f32 %v7789_v21, %v7789_v21  ;;  %v2579_v46 = vadd.f32 %v2578_v33, %v2577_v50  ;;  %v2582_v53 = vsel %vm305_vm0, %v7789_v21, 0.0 }
 0x371   : > { %2523 = vst.msk [vmem:[#allocation3 + $0x1d0] sm:$0xff] %vm305_vm0, %v2467_v41  ;;  %v2580_v14 = vsel %vm305_vm0, %v2467_v41, 0.0  ;;  %v2625_v19 = vmul.f32 %v2467_v41, %v2467_v41  ;;  %4259 = vrot.lane.b32.xlu0 %v14134_v39, %s8329_s20  ;;  %v10900_v17 = vpop.permute.xlu1 %4013  ;;  %v3942_v41 = vld [vmem:[#allocation2 + $0x82] sm:$0xff] }
 0x372   : > { %v2681_v57 = vadd.f32 %v2680_v8, %v2679_v28  ;;  %v2581_v55 = vadd.f32 %v2580_v14, %v2579_v46  ;;  %v2684_v48 = vsel %vm305_vm0, %v2626_v12, 0.0  ;;  %v1457_v8 = vrot.slane %v1456_v10, 2 }
 0x373   : > { %v2682_v1 = vsel %vm305_vm0, %v2625_v19, 0.0  ;;  %v7792_v56 = vpop.f32.mrb[28].mxu1  ;;  %v10903_v47 = vpop.permute.xlu0 %4019  ;;  %4257 = vrot.lane.b32.xlu1 %v14136_v15, %s8329_s20  ;;  %v1559_v12 = vrot.slane %v1558_v45, 2  ;;  %v3945_v19 = vld [vmem:[#allocation2 + $0xaa] sm:$0xff] }
 0x374   : > { %v2683_v61 = vadd.f32 %v2682_v1, %v2681_v57  ;;  %2526 = vst.msk [vmem:[#allocation3 + $0x1e8] sm:$0xff] %vm305_vm0, %v7792_v56  ;;  %v2628_v49 = vmul.f32 %v7792_v56, %v7792_v56  ;;  %v2477_v44 = vpop.f32.mrb[29].mxu1  ;;  %v2583_v3 = vadd.f32 %v2582_v53, %v2581_v55  ;;  %v2586_v62 = vsel %vm305_vm0, %v7792_v56, 0.0 }
 0x375   : > { %2525 = vst.msk [vmem:[#allocation3 + $0x1e0] sm:$0xff] %vm305_vm0, %v2477_v44  ;;  %v2584_v4 = vsel %vm305_vm0, %v2477_v44, 0.0  ;;  %v2627_v16 = vmul.f32 %v2477_v44, %v2477_v44  ;;  %4263 = vrot.lane.b32.xlu0 %v14137_v11, %s8329_s20  ;;  %v10916_v37 = vpop.permute.xlu1 %4017  ;;  %v1458_v1 = vadd.f32 %v1457_v8, %v1456_v10  ;;  %v1560_v52 = vadd.f32 %v1559_v12, %v1558_v45  ;;  %v3953_v45 = vld [vmem:[#allocation2 + $0x10a] sm:$0xff] }
 0x376   : > { %v2685_v58 = vadd.f32 %v2684_v48, %v2683_v61  ;;  %v2585_v63 = vadd.f32 %v2584_v4, %v2583_v3  ;;  %v2688_v29 = vsel %vm305_vm0, %v2628_v49, 0.0  ;;  %v3947_v49 = vld [vmem:[#allocation2 + $0xc2] sm:$0xff] }
 0x377   : > { %v2686_v20 = vsel %vm305_vm0, %v2627_v16, 0.0  ;;  %v7795_v18 = vpop.f32.mrb[30].mxu1  ;;  %v10919_v25 = vpop.permute.xlu0 %4023  ;;  %4261 = vrot.lane.b32.xlu1 %v14139_v7, %s8329_s20  ;;  %v1459_v3 = vrot.slane %v1458_v1, 1  ;;  %v3946_v16 = vld [vmem:[#allocation2 + $0xb2] sm:$0xff]  ;;  %v1561_v11 = vrot.slane %v1560_v52, 1 }
 0x378   : > { %v2687_v13 = vadd.f32 %v2686_v20, %v2685_v58  ;;  %2528 = vst.msk [vmem:[#allocation3 + $0x1f8] sm:$0xff] %vm305_vm0, %v7795_v18  ;;  %v2487_v24 = vpop.f32.mrb[31].mxu1  ;;  %v2630_v38 = vmul.f32 %v7795_v18, %v7795_v18  ;;  %v2587_v31 = vadd.f32 %v2586_v62, %v2585_v63  ;;  %v2590_v21 = vsel %vm305_vm0, %v7795_v18, 0.0  ;;  %v3949_v58 = vld [vmem:[#allocation2 + $0xda] sm:$0xff]  ;;  %v3948_v62 = vld [vmem:[#allocation2 + $0xca] sm:$0xff] }
 0x379   : > { %2527 = vst.msk [vmem:[#allocation3 + $0x1f0] sm:$0xff] %vm305_vm0, %v2487_v24  ;;  %v2588_v59 = vsel %vm305_vm0, %v2487_v24, 0.0  ;;  %v2629_v60 = vmul.f32 %v2487_v24, %v2487_v24  ;;  %4267 = vrot.lane.b32.xlu0 %v3941_v0, %s8329_s20  ;;  %v10931_v42 = vpop.permute.xlu1 %4021  ;;  %v1460_v18 = vadd.f32 %v1459_v3, %v1458_v1  ;;  %v3951_v24 = vld [vmem:[#allocation2 + $0xf2] sm:$0xff]  ;;  %v3961_v1 = vld [vmem:[#allocation2 + $0x16a] sm:$0xff]  ;;  %v3965_v3 = vld [vmem:[#allocation2 + $0x19a] sm:$0xff] }
 0x37a   : > { %v2689_v35 = vadd.f32 %v2688_v29, %v2687_v13  ;;  %v2589_v26 = vadd.f32 %v2588_v59, %v2587_v31  ;;  %v2692_v28 = vsel %vm305_vm0, %v2630_v38, 0.0  ;;  %v1562_v29 = vadd.f32 %v1561_v11, %v1560_v52 }
 0x37b   : > { %v2690_v50 = vsel %vm305_vm0, %v2629_v60, 0.0  ;;  %v10934_v22 = vpop.permute.xlu0 %4027  ;;  %4265 = vrot.lane.b32.xlu1 %v3940_v27, %s8329_s20  ;;  %v3950_v60 = vld [vmem:[#allocation2 + $0xe2] sm:$0xff] }
 0x37c   : > { %v2691_v33 = vadd.f32 %v2690_v50, %v2689_v35  ;;  %v2591_v54 = vadd.f32 %v2590_v21, %v2589_v26  ;;  %v3955_v50 = vld [vmem:[#allocation2 + $0x122] sm:$0xff] }
 0x37d   : > { %4271 = vrot.lane.b32.xlu0 %v3943_v23, %s8329_s20  ;;  %v10940_v14 = vpop.permute.xlu1 %4025  ;;  %v3952_v23 = vld [vmem:[#allocation2 + $0xfa] sm:$0xff] }
 0x37e   : > { %v2693_v46 = vadd.f32 %v2692_v28, %v2691_v33  ;;  %v2592_v39 = vrot.slane %v2591_v54, 4  ;;  %v3954_v33 = vld [vmem:[#allocation2 + $0x112] sm:$0xff]  ;;  %v3957_v28 = vld [vmem:[#allocation2 + $0x13a] sm:$0xff] }
 0x37f   : > { %v10942_v57 = vpop.permute.xlu0 %4031  ;;  %4269 = vrot.lane.b32.xlu1 %v3942_v41, %s8329_s20  ;;  %v3956_v41 = vld [vmem:[#allocation2 + $0x12a] sm:$0xff] }
 0x380   : > { %v2694_v55 = vrot.slane %v2693_v46, 4  ;;  %v2593_v56 = vadd.f32 %v2592_v39, %v2591_v54  ;;  %v3958_v39 = vld [vmem:[#allocation2 + $0x142] sm:$0xff] }
 0x381   : > { %4275 = vrot.lane.b32.xlu0 %v3945_v19, %s8329_s20  ;;  %v10946_v61 = vpop.permute.xlu1 %4029 }
 0x382   : > { %v2695_v53 = vadd.f32 %v2694_v55, %v2693_v46  ;;  %v2594_v15 = vrot.slane %v2593_v56, 2  ;;  %v3959_v46 = vld [vmem:[#allocation2 + $0x152] sm:$0xff] }
 0x383   : > { %v10948_v44 = vpop.permute.xlu0 %4035  ;;  %4273 = vrot.lane.b32.xlu1 %v3944_v6, %s8329_s20  ;;  %v3960_v6 = vld [vmem:[#allocation2 + $0x15a] sm:$0xff] }
 0x384   : > { %v2696_v48 = vrot.slane %v2695_v53, 2  ;;  %v2595_v4 = vadd.f32 %v2594_v15, %v2593_v56  ;;  %v3962_v15 = vld [vmem:[#allocation2 + $0x172] sm:$0xff] }
 0x385   : > { %4279 = vrot.lane.b32.xlu0 %v3947_v49, %s8329_s20  ;;  %v10952_v9 = vpop.permute.xlu1 %4033 }
 0x386   : > { %v2697_v51 = vadd.f32 %v2696_v48, %v2695_v53  ;;  %v2596_v0 = vrot.slane %v2595_v4, 1  ;;  %v3963_v53 = vld [vmem:[#allocation2 + $0x182] sm:$0xff] }
 0x387   : > { %v10954_v63 = vpop.permute.xlu0 %4039  ;;  %4277 = vrot.lane.b32.xlu1 %v3946_v16, %s8329_s20  ;;  %v3964_v16 = vld [vmem:[#allocation2 + $0x18a] sm:$0xff] }
 0x388   : > { %v2698_v20 = vrot.slane %v2697_v51, 1  ;;  %v2597_v10 = vadd.f32 %v2596_v0, %v2595_v4 }
 0x389   : > { %4283 = vrot.lane.b32.xlu0 %v3949_v58, %s8329_s20  ;;  %v10958_v7 = vpop.permute.xlu1 %4037  ;;  %v3966_v58 = vld [vmem:[#allocation2 + $0x1a2] sm:$0xff] }
 0x38a   : > { %v2699_v13 = vadd.f32 %v2698_v20, %v2697_v51  ;;  %v10960_v38 = vadd.f32 %v2597_v10, %v1460_v18 }
 0x38b   : > { %v10962_v31 = vpop.permute.xlu0 %4043  ;;  %4281 = vrot.lane.b32.xlu1 %v3948_v62, %s8329_s20 }
 0x38c   : > { %14140 = vst [vmem:[#allocation62_spill] sm:$0xff] %v10960_v38  ;;  %v10964_v59 = vadd.f32 %v2699_v13, %v1562_v29  ;;  %v4985_v13 = vld [vmem:[%s8602_s5 + $0x8] sm:$0xff] }
 0x38d   : > { %4287 = vrot.lane.b32.xlu0 %v3951_v24, %s8329_s20  ;;  %v10968_v27 = vpop.permute.xlu1 %4041  ;;  %v4984_v24 = vld [vmem:[%s8602_s5] sm:$0xff] }
 0x38e   : > { %14141 = vst [vmem:[#allocation32_spill] sm:$0xff] %v10964_v59 }
 0x38f   : > { %v10970_v35 = vpop.permute.xlu0 %4047  ;;  %4285 = vrot.lane.b32.xlu1 %v3950_v60, %s8329_s20 }
 0x391   : > { %4291 = vrot.lane.b32.xlu0 %v3953_v45, %s8329_s20  ;;  %v10974_v26 = vpop.permute.xlu1 %4045 }
 0x393   : > { %v10976_v21 = vpop.permute.xlu0 %4051  ;;  %4289 = vrot.lane.b32.xlu1 %v3952_v23, %s8329_s20  ;;  %v4987_v23 = vld [vmem:[%s8602_s5 + $0x28] sm:$0xff] }
 0x395   : > { %4295 = vrot.lane.b32.xlu0 %v3955_v50, %s8329_s20  ;;  %v10980_v8 = vpop.permute.xlu1 %4049  ;;  %v4986_v50 = vld [vmem:[%s8602_s5 + $0x20] sm:$0xff] }
 0x397   : > { %v10982_v54 = vpop.permute.xlu0 %4055  ;;  %4293 = vrot.lane.b32.xlu1 %v3954_v33, %s8329_s20 }
 0x398   : > { %14142 = vst [vmem:[#allocation35_spill] sm:$0xff] %v10982_v54 }
 0x399   : > { %4299 = vrot.lane.b32.xlu0 %v3957_v28, %s8329_s20  ;;  %v10986_v12 = vpop.permute.xlu1 %4053 }
 0x39a   : > { %14143 = vst [vmem:[#allocation42_spill] sm:$0xff] %v10986_v12 }
 0x39b   : > { %v10988_v19 = vpop.permute.xlu0 %4059  ;;  %4297 = vrot.lane.b32.xlu1 %v3956_v41, %s8329_s20  ;;  %v4989_v41 = vld [vmem:[%s8602_s5 + $0x48] sm:$0xff] }
 0x39c   : > { %14144 = vst [vmem:[#allocation74_spill] sm:$0xff] %v10988_v19 }
 0x39d   : > { %4303 = vrot.lane.b32.xlu0 %v3959_v46, %s8329_s20  ;;  %v10992_v55 = vpop.permute.xlu1 %4057  ;;  %v4988_v46 = vld [vmem:[%s8602_s5 + $0x40] sm:$0xff] }
 0x39e   : > { %14145 = vst [vmem:[#allocation20_spill] sm:$0xff] %v10992_v55 }
 0x39f   : > { %v10994_v56 = vpop.permute.xlu0 %4127  ;;  %4301 = vrot.lane.b32.xlu1 %v3958_v39, %s8329_s20 }
 0x3a1   : > { %4307 = vrot.lane.b32.xlu0 %v3961_v1, %s8329_s20  ;;  %v10998_v52 = vpop.permute.xlu1 %4061 }
 0x3a2   : > { %14146 = vst [vmem:[#allocation16_spill] sm:$0xff] %v10998_v52 }
 0x3a3   : > { %v11000_v49 = vpop.permute.xlu0 %4131  ;;  %4305 = vrot.lane.b32.xlu1 %v3960_v6, %s8329_s20  ;;  %v4991_v6 = vld [vmem:[%s8602_s5 + $0x68] sm:$0xff] }
 0x3a5   : > { %4311 = vrot.lane.b32.xlu0 %v3963_v53, %s8329_s20  ;;  %v11004_v48 = vpop.permute.xlu1 %4129  ;;  %v4990_v53 = vld [vmem:[%s8602_s5 + $0x60] sm:$0xff] }
 0x3a7   : > { %v11006_v4 = vpop.permute.xlu0 %4135  ;;  %4309 = vrot.lane.b32.xlu1 %v3962_v15, %s8329_s20 }
 0x3a9   : > { %4315 = vrot.lane.b32.xlu0 %v3965_v3, %s8329_s20  ;;  %v11010_v11 = vpop.permute.xlu1 %4133 }
 0x3ab   : > { %v11012_v51 = vpop.permute.xlu0 %4139  ;;  %4313 = vrot.lane.b32.xlu1 %v3964_v16, %s8329_s20  ;;  %v4993_v16 = vld [vmem:[%s8602_s5 + $0x88] sm:$0xff] }
 0x3ad   : > { %v11015_v0 = vpop.permute.xlu1 %4137  ;;  %5336 = vrot.lane.b32.xlu0 %v4984_v24, %s8327_s29 }
 0x3af   : > { %v11017_v20 = vpop.permute.xlu0 %4143  ;;  %4317 = vrot.lane.b32.xlu1 %v3966_v58, %s8329_s20  ;;  %v4992_v58 = vld [vmem:[%s8602_s5 + $0x80] sm:$0xff] }
 0x3b1   : > { %v11020_v18 = vpop.permute.xlu1 %4141  ;;  %5340 = vrot.lane.b32.xlu0 %v4986_v50, %s8327_s29  ;;  %v4994_v50 = vld [vmem:[%s8602_s5 + $0xa0] sm:$0xff] }
 0x3b3   : > { %v11022_v10 = vpop.permute.xlu0 %4147  ;;  %5338 = vrot.lane.b32.xlu1 %v4985_v13, %s8327_s29 }
 0x3b5   : > { %v11024_v62 = vpop.permute.xlu1 %4145  ;;  %5344 = vrot.lane.b32.xlu0 %v4988_v46, %s8327_s29  ;;  %v4996_v46 = vld [vmem:[%s8602_s5 + $0xc0] sm:$0xff] }
 0x3b7   : > { %v11026_v29 = vpop.permute.xlu0 %4151  ;;  %5342 = vrot.lane.b32.xlu1 %v4987_v23, %s8327_s29  ;;  %v4995_v23 = vld [vmem:[%s8602_s5 + $0xa8] sm:$0xff] }
 0x3b9   : > { %v11032_v60 = vpop.permute.xlu1 %4149  ;;  %5348 = vrot.lane.b32.xlu0 %v4990_v53, %s8327_s29 }
 0x3bb   : > { %v11034_v45 = vpop.permute.xlu0 %4155  ;;  %5346 = vrot.lane.b32.xlu1 %v4989_v41, %s8327_s29  ;;  %v4997_v41 = vld [vmem:[%s8602_s5 + $0xc8] sm:$0xff] }
 0x3bd   : > { %v11040_v33 = vpop.permute.xlu1 %4153  ;;  %5352 = vrot.lane.b32.xlu0 %v4992_v58, %s8327_s29  ;;  %v4998_v58 = vld [vmem:[%s8602_s5 + $0xe0] sm:$0xff] }
 0x3bf   : > { %v11042_v28 = vpop.permute.xlu0 %4159  ;;  %5350 = vrot.lane.b32.xlu1 %v4991_v6, %s8327_s29 }
 0x3c1   : > { %v11048_v39 = vpop.permute.xlu1 %4157  ;;  %5356 = vrot.lane.b32.xlu0 %v4994_v50, %s8327_s29  ;;  %v5000_v50 = vld [vmem:[%s8602_s5 + $0x100] sm:$0xff] }
 0x3c3   : > { %v11050_v1 = vpop.permute.xlu0 %4163  ;;  %5354 = vrot.lane.b32.xlu1 %v4993_v16, %s8327_s29  ;;  %v4999_v16 = vld [vmem:[%s8602_s5 + $0xe8] sm:$0xff] }
 0x3c5   : > { %v11056_v15 = vpop.permute.xlu1 %4161  ;;  %5360 = vrot.lane.b32.xlu0 %v4996_v46, %s8327_s29  ;;  %v5002_v46 = vld [vmem:[%s8602_s5 + $0x120] sm:$0xff] }
 0x3c7   : > { %v11058_v3 = vpop.permute.xlu0 %4167  ;;  %5358 = vrot.lane.b32.xlu1 %v4995_v23, %s8327_s29  ;;  %v5001_v23 = vld [vmem:[%s8602_s5 + $0x108] sm:$0xff] }
 0x3c9   : > { %v11064_v13 = vpop.permute.xlu1 %4165  ;;  %5364 = vrot.lane.b32.xlu0 %v4998_v58, %s8327_s29  ;;  %v5005_v58 = vld [vmem:[%s8602_s5 + $0x148] sm:$0xff] }
 0x3cb   : > { %v11066_v24 = vpop.permute.xlu0 %4171  ;;  %5362 = vrot.lane.b32.xlu1 %v4997_v41, %s8327_s29  ;;  %v5003_v41 = vld [vmem:[%s8602_s5 + $0x128] sm:$0xff] }
 0x3cd   : > { %v11074_v6 = vpop.permute.xlu1 %4169  ;;  %5368 = vrot.lane.b32.xlu0 %v5000_v50, %s8327_s29 }
 0x3cf   : > { %v11076_v53 = vpop.permute.xlu0 %4175  ;;  %5366 = vrot.lane.b32.xlu1 %v4999_v16, %s8327_s29  ;;  %v3839_v16 = vld [vmem:[#allocation2 + $0x19] sm:$0xff] }
 0x3d1   : > { %v11082_v59 = vpop.permute.xlu1 %4173  ;;  %5372 = vrot.lane.b32.xlu0 %v5002_v46, %s8327_s29  ;;  %v5006_v46 = vld [vmem:[%s8602_s5 + $0x160] sm:$0xff] }
 0x3d3   : > { %v11084_v38 = vpop.permute.xlu0 %4179  ;;  %5370 = vrot.lane.b32.xlu1 %v5001_v23, %s8327_s29  ;;  %v4351_v23 = vsel %vm305_vm0, %v3839_v16, %v10828_v34  ;;  %v3841_v16 = vld [vmem:[#allocation2 + $0x31] sm:$0xff] }
 0x3d4   : > { %14147 = vst [vmem:[#allocation68_spill] sm:$0xff] %v11084_v38  ;;  %v5004_v38 = vld [vmem:[%s8602_s5 + $0x140] sm:$0xff]  ;;  %v4383_v50 = vsel %vm970_vm2, %v4351_v23, %v10994_v56  ;;  %v5009_v56 = vld [vmem:[%s8602_s5 + $0x188] sm:$0xff] }
 0x3d5   : > { %v11090_v52 = vpop.permute.xlu1 %4177  ;;  %5376 = vrot.lane.b32.xlu0 %v5004_v38, %s8327_s29  ;;  %v4353_v38 = vsel %vm305_vm0, %v3841_v16, %v10846_v5 }
 0x3d6   : > { %14148 = vst [vmem:[#allocation41_spill] sm:$0xff] %v11090_v52 }
 0x3d7   : > { %v11092_v19 = vpop.permute.xlu0 %4183  ;;  %5374 = vrot.lane.b32.xlu1 %v5003_v41, %s8327_s29  ;;  %v5007_v41 = vld [vmem:[%s8602_s5 + $0x168] sm:$0xff] }
 0x3d8   : > { %14149 = vst [vmem:[#allocation26_spill] sm:$0xff] %v11092_v19 }
 0x3d9   : > { %v11098_v55 = vpop.permute.xlu1 %4181  ;;  %5380 = vrot.lane.b32.xlu0 %v5006_v46, %s8327_s29 }
 0x3da   : > { %14150 = vst [vmem:[#allocation19_spill] sm:$0xff] %v11098_v55 }
 0x3db   : > { %v11100_v54 = vpop.permute.xlu0 %4187  ;;  %5378 = vrot.lane.b32.xlu1 %v5005_v58, %s8327_s29 }
 0x3dc   : > { %14151 = vst [vmem:[#allocation60_spill] sm:$0xff] %v11100_v54  ;;  %v3840_v54 = vld [vmem:[#allocation2 + $0x21] sm:$0xff] }
 0x3dd   : > { %v11108_v19 = vpop.permute.xlu1 %4185 }
 0x3de   : > { %14152 = vst [vmem:[#allocation38_spill] sm:$0xff] %v11108_v19 }
 0x3df   : > { %v4256_v55 = vpop.permute.xlu0 %4255  ;;  %5382 = vrot.lane.b32.xlu1 %v5007_v41, %s8327_s29  ;;  %v4385_v41 = vsel %vm970_vm2, %v4353_v38, %v11000_v49 }
 0x3e0   : > { %v4415_v52 = vsel %vm1003_vm3, %v4383_v50, %v4256_v55  ;;  %v4352_v55 = vsel %vm305_vm0, %v3840_v54, %v10858_v40  ;;  %v5008_v50 = vld [vmem:[%s8602_s5 + $0x180] sm:$0xff]  ;;  %v5011_v54 = vld [vmem:[%s8602_s5 + $0x1a8] sm:$0xff] }
 0x3e1   : > { %7852 = vmatprep.mubr.msk.f32.mxu1 %vm1038_vm4, %v4415_v52  ;;  %v11118_v34 = vpop.permute.xlu1 %4189  ;;  %v3842_v52 = vld [vmem:[#allocation2 + $0x39] sm:$0xff]  ;;  %v4384_v58 = vsel %vm970_vm2, %v4352_v55, %v11004_v48  ;;  %5384 = vrot.lane.b32.xlu0 %v5008_v50, %s8327_s29  ;;  %v3844_v48 = vld [vmem:[#allocation2 + $0x51] sm:$0xff] }
 0x3e2   : > { %14153 = vst [vmem:[#allocation80_spill] sm:$0xff] %v11118_v34  ;;  %v3843_v34 = vld [vmem:[#allocation2 + $0x49] sm:$0xff]  ;;  %v4354_v5 = vsel %vm305_vm0, %v3842_v52, %v10872_v30 }
 0x3e3   : > { %v4260_v19 = vpop.permute.xlu0 %4259  ;;  %5386 = vrot.lane.b32.xlu1 %v5009_v56, %s8327_s29  ;;  %v4355_v49 = vsel %vm305_vm0, %v3843_v34, %v10861_v36  ;;  %v5010_v55 = vld [vmem:[%s8602_s5 + $0x1a0] sm:$0xff]  ;;  %v3845_v56 = vld [vmem:[#allocation2 + $0x61] sm:$0xff]  ;;  %v4356_v36 = vsel %vm305_vm0, %v3844_v48, %v10886_v43 }
 0x3e4   : > { %v4417_v40 = vsel %vm1003_vm3, %v4385_v41, %v4260_v19  ;;  %v4386_v19 = vsel %vm970_vm2, %v4354_v5, %v11010_v11  ;;  %v4387_v30 = vsel %vm970_vm2, %v4355_v49, %v11006_v4  ;;  %v5013_v11 = vld [vmem:[%s8602_s5 + $0x1c8] sm:$0xff]  ;;  %v4357_v4 = vsel %vm305_vm0, %v3845_v56, %v10875_v32  ;;  %v3846_v34 = vld [vmem:[#allocation2 + $0x69] sm:$0xff] }
 0x3e5   : > { %v4258_v23 = vpop.permute.xlu1 %4257  ;;  %5388 = vrot.lane.b32.xlu0 %v5010_v55, %s8327_s29  ;;  %v5012_v50 = vld [vmem:[%s8602_s5 + $0x1c0] sm:$0xff]  ;;  %v3847_v41 = vld [vmem:[#allocation2 + $0x79] sm:$0xff]  ;;  %v4389_v43 = vsel %vm970_vm2, %v4357_v4, %v11012_v51  ;;  %v4358_v32 = vsel %vm305_vm0, %v3846_v34, %v10900_v17 }
 0x3e6   : > { %v4416_v46 = vsel %vm1003_vm3, %v4384_v58, %v4258_v23  ;;  %v4359_v51 = vsel %vm305_vm0, %v3847_v41, %v10889_v2  ;;  %v4390_v49 = vsel %vm970_vm2, %v4358_v32, %v11020_v18 }
 0x3e7   : > { %v4264_v12 = vpop.permute.xlu0 %4263  ;;  %7853 = vmatmul.mubr.msk.f32.vlgmr.msra.gmra.mrb[32].mxu1 %vm1038_vm4, %v4416_v46  ;;  %5390 = vrot.lane.b32.xlu1 %v5011_v54, %s8327_s29  ;;  %v3848_v54 = vld [vmem:[#allocation2 + $0x81] sm:$0xff]  ;;  %v4391_v55 = vsel %vm970_vm2, %v4359_v51, %v11017_v20  ;;  %v5017_v20 = vld [vmem:[%s11189_s28 + $0x8] sm:$0xff] }
 0x3e8   : > { %7855 = vmatprep.mubr.msk.f32.mxu1 %vm1038_vm4, %v4417_v40  ;;  %v4419_v58 = vsel %vm1003_vm3, %v4387_v30, %v4264_v12  ;;  %v4388_v12 = vsel %vm970_vm2, %v4356_v36, %v11015_v0  ;;  %v5015_v0 = vld [vmem:[%s8602_s5 + $0x1e8] sm:$0xff]  ;;  %v4360_v2 = vsel %vm305_vm0, %v3848_v54, %v10916_v37  ;;  %v5016_v36 = vld [vmem:[%s11189_s28] sm:$0xff] }
 0x3e9   : > { %v4262_v16 = vpop.permute.xlu1 %4261  ;;  %5392 = vrot.lane.b32.xlu0 %v5012_v50, %s8327_s29  ;;  %v3851_v37 = vld [vmem:[#allocation2 + $0xa9] sm:$0xff] }
 0x3ea   : > { %v4418_v38 = vsel %vm1003_vm3, %v4386_v19, %v4262_v16  ;;  %v5014_v19 = vld [vmem:[%s8602_s5 + $0x1e0] sm:$0xff] }
 0x3eb   : > { %v4268_v52 = vpop.permute.xlu0 %4267  ;;  %7856 = vmatmul.mubr.msk.f32.gmra.mrb[34].mxu1 %vm1038_vm4, %v4418_v38  ;;  %5394 = vrot.lane.b32.xlu1 %v5013_v11, %s8327_s29  ;;  %v3849_v16 = vld [vmem:[#allocation2 + $0x91] sm:$0xff]  ;;  %v3850_v38 = vld [vmem:[#allocation2 + $0x99] sm:$0xff] }
 0x3ec   : > { %7858 = vmatprep.mubr.msk.f32.mxu1 %vm1038_vm4, %v4419_v58  ;;  %v4421_v5 = vsel %vm1003_vm3, %v4389_v43, %v4268_v52  ;;  %v4361_v18 = vsel %vm305_vm0, %v3849_v16, %v10903_v47  ;;  %v4392_v52 = vsel %vm970_vm2, %v4360_v2, %v11024_v62  ;;  %v4362_v47 = vsel %vm305_vm0, %v3850_v38, %v10931_v42  ;;  %v5019_v62 = vld [vmem:[%s11189_s28 + $0x28] sm:$0xff]  ;;  %v5018_v43 = vld [vmem:[%s11189_s28 + $0x20] sm:$0xff] }
 0x3ed   : > { %v4266_v23 = vpop.permute.xlu1 %4265  ;;  %5396 = vrot.lane.b32.xlu0 %v5014_v19, %s8327_s29  ;;  %v4393_v11 = vsel %vm970_vm2, %v4361_v18, %v11022_v10  ;;  %v4363_v10 = vsel %vm305_vm0, %v3851_v37, %v10919_v25  ;;  %v4394_v50 = vsel %vm970_vm2, %v4362_v47, %v11032_v60  ;;  %v3854_v16 = vld [vmem:[#allocation2 + $0xc9] sm:$0xff]  ;;  %v3855_v2 = vld [vmem:[#allocation2 + $0xd9] sm:$0xff] }
 0x3ee   : > { %v4420_v46 = vsel %vm1003_vm3, %v4388_v12, %v4266_v23  ;;  %v3852_v23 = vld [vmem:[#allocation2 + $0xb1] sm:$0xff]  ;;  %v4367_v47 = vsel %vm305_vm0, %v3855_v2, %v10942_v57 }
 0x3ef   : > { %v4272_v40 = vpop.permute.xlu0 %4271  ;;  %7859 = vmatmul.mubr.msk.f32.gmra.mrb[36].mxu1 %vm1038_vm4, %v4420_v46  ;;  %5398 = vrot.lane.b32.xlu1 %v5015_v0, %s8327_s29  ;;  %v3853_v46 = vld [vmem:[#allocation2 + $0xc1] sm:$0xff] }
 0x3f0   : > { %7861 = vmatprep.mubr.msk.f32.mxu1 %vm1038_vm4, %v4421_v5  ;;  %v4423_v30 = vsel %vm1003_vm3, %v4391_v55, %v4272_v40  ;;  %v4395_v40 = vsel %vm970_vm2, %v4363_v10, %v11026_v29  ;;  %v4364_v29 = vsel %vm305_vm0, %v3852_v23, %v10940_v14  ;;  %v4365_v19 = vsel %vm305_vm0, %v3853_v46, %v10934_v22 }
 0x3f1   : > { %v4270_v48 = vpop.permute.xlu1 %4269  ;;  %5464 = vrot.lane.b32.xlu0 %v5016_v36, %s8328_s21  ;;  %v4396_v55 = vsel %vm970_vm2, %v4364_v29, %v11040_v33  ;;  %v4399_v46 = vsel %vm970_vm2, %v4367_v47, %v11042_v28 }
 0x3f2   : > { %v4422_v17 = vsel %vm1003_vm3, %v4390_v49, %v4270_v48  ;;  %v5021_v48 = vld [vmem:[%s11189_s28 + $0x48] sm:$0xff] }
 0x3f3   : > { %v4276_v56 = vpop.permute.xlu0 %4275  ;;  %7862 = vmatmul.mubr.msk.f32.gmra.mrb[38].mxu1 %vm1038_vm4, %v4422_v17  ;;  %5466 = vrot.lane.b32.xlu1 %v5017_v20, %s8328_s21  ;;  %v4397_v20 = vsel %vm970_vm2, %v4365_v19, %v11034_v45  ;;  %v4366_v45 = vsel %vm305_vm0, %v3854_v16, %v10946_v61  ;;  %v5022_v61 = vld [vmem:[%s11189_s28 + $0x60] sm:$0xff] }
 0x3f4   : > { %7864 = vmatprep.mubr.msk.f32.mxu1 %vm1038_vm4, %v4423_v30  ;;  %v4425_v12 = vsel %vm1003_vm3, %v4393_v11, %v4276_v56  ;;  %v5020_v30 = vld [vmem:[%s11189_s28 + $0x40] sm:$0xff] }
 0x3f5   : > { %v4274_v58 = vpop.permute.xlu1 %4273  ;;  %5468 = vrot.lane.b32.xlu0 %v5018_v43, %s8328_s21  ;;  %v3858_v43 = vld [vmem:[#allocation2 + $0xf9] sm:$0xff] }
 0x3f6   : > { %v4424_v4 = vsel %vm1003_vm3, %v4392_v52, %v4274_v58  ;;  %v3856_v58 = vld [vmem:[#allocation2 + $0xe1] sm:$0xff] }
 0x3f7   : > { %v4280_v34 = vpop.permute.xlu0 %4279  ;;  %7865 = vmatmul.mubr.msk.f32.gmra.mrb[40].mxu1 %vm1038_vm4, %v4424_v4  ;;  %5470 = vrot.lane.b32.xlu1 %v5019_v62, %s8328_s21  ;;  %v4398_v62 = vsel %vm970_vm2, %v4366_v45, %v11048_v39  ;;  %v5027_v45 = vld [vmem:[%s11189_s28 + $0xa8] sm:$0xff] }
 0x3f8   : > { %7867 = vmatprep.mubr.msk.f32.mxu1 %vm1038_vm4, %v4425_v12  ;;  %v4427_v0 = vsel %vm1003_vm3, %v4395_v40, %v4280_v34  ;;  %v5023_v12 = vld [vmem:[%s11189_s28 + $0x68] sm:$0xff] }
 0x3f9   : > { %v4278_v41 = vpop.permute.xlu1 %4277  ;;  %5472 = vrot.lane.b32.xlu0 %v5020_v30, %s8328_s21 }
 0x3fa   : > { %v4426_v42 = vsel %vm1003_vm3, %v4394_v50, %v4278_v41  ;;  %v7802_v32 = vpop.f32.mrb[32].mxu0  ;;  %v3857_v50 = vld [vmem:[#allocation2 + $0xf1] sm:$0xff]  ;;  %v4368_v41 = vsel %vm305_vm0, %v3856_v58, %v10952_v9 }
 0x3fb   : > { %v4284_v5 = vpop.permute.xlu0 %4283  ;;  %3636 = vst.msk [vmem:[#allocation3 + $0x208] sm:$0xff] %vm305_vm0, %v7802_v32  ;;  %v3668_v25 = vsel %vm305_vm0, %v7802_v32, 0.0  ;;  %v3738_v51 = vmul.f32 %v7802_v32, %v7802_v32  ;;  %v3475_v54 = vpop.f32.mrb[33].mxu0  ;;  %7868 = vmatmul.mubr.msk.f32.gmra.mrb[42].mxu1 %vm1038_vm4, %v4426_v42  ;;  %5474 = vrot.lane.b32.xlu1 %v5021_v48, %s8328_s21  ;;  %v4370_v48 = vsel %vm305_vm0, %v3858_v43, %v10958_v7 }
 0x3fc   : > { %3635 = vst.msk [vmem:[#allocation3 + $0x200] sm:$0xff] %vm305_vm0, %v3475_v54  ;;  %v3667_v60 = vsel %vm305_vm0, %v3475_v54, 0.0  ;;  %v3737_v49 = vmul.f32 %v3475_v54, %v3475_v54  ;;  %7870 = vmatprep.mubr.msk.f32.mxu1 %vm1038_vm4, %v4427_v0  ;;  %v4429_v36 = vsel %vm1003_vm3, %v4397_v20, %v4284_v5  ;;  %v4400_v19 = vsel %vm970_vm2, %v4368_v41, %v11056_v15 }
 0x3fd   : > { %v3770_v17 = vsel %vm305_vm0, %v3738_v51, 0.0  ;;  %v3669_v14 = vadd.f32 %v3668_v25, %v3667_v60  ;;  %v4282_v56 = vpop.permute.xlu1 %4281  ;;  %5476 = vrot.lane.b32.xlu0 %v5022_v61, %s8328_s21  ;;  %v5025_v60 = vld [vmem:[%s11189_s28 + $0x88] sm:$0xff] }
 0x3fe   : > { %v3769_v18 = vsel %vm305_vm0, %v3737_v49, 0.0  ;;  %v4428_v38 = vsel %vm1003_vm3, %v4396_v55, %v4282_v56  ;;  %v7805_v22 = vpop.f32.mrb[34].mxu0  ;;  %v4369_v49 = vsel %vm305_vm0, %v3857_v50, %v10948_v44  ;;  %v3860_v56 = vld [vmem:[#allocation2 + $0x111] sm:$0xff] }
 0x3ff   : > { %v4288_v52 = vpop.permute.xlu0 %4287  ;;  %v3771_v33 = vadd.f32 %v3770_v17, %v3769_v18  ;;  %3638 = vst.msk [vmem:[#allocation3 + $0x218] sm:$0xff] %vm305_vm0, %v7805_v22  ;;  %v3485_v37 = vpop.f32.mrb[35].mxu0  ;;  %7871 = vmatmul.mubr.msk.f32.gmra.mrb[44].mxu1 %vm1038_vm4, %v4428_v38  ;;  %v3740_v11 = vmul.f32 %v7805_v22, %v7805_v22  ;;  %v3672_v32 = vsel %vm305_vm0, %v7805_v22, 0.0  ;;  %5478 = vrot.lane.b32.xlu1 %v5023_v12, %s8328_s21  ;;  %v5024_v17 = vld [vmem:[%s11189_s28 + $0x80] sm:$0xff] }
 0x400   : > { %3637 = vst.msk [vmem:[#allocation3 + $0x210] sm:$0xff] %vm305_vm0, %v3485_v37  ;;  %v3670_v4 = vsel %vm305_vm0, %v3485_v37, 0.0  ;;  %v3739_v34 = vmul.f32 %v3485_v37, %v3485_v37  ;;  %7873 = vmatprep.mubr.msk.f32.mxu1 %vm1038_vm4, %v4429_v36  ;;  %v4431_v39 = vsel %vm1003_vm3, %v4399_v46, %v4288_v52  ;;  %v4401_v30 = vsel %vm970_vm2, %v4369_v49, %v11050_v1  ;;  %v3864_v49 = vld [vmem:[#allocation2 + $0x141] sm:$0xff] }
 0x401   : > { %v3671_v10 = vadd.f32 %v3670_v4, %v3669_v14  ;;  %v4286_v23 = vpop.permute.xlu1 %4285  ;;  %v3774_v28 = vsel %vm305_vm0, %v3740_v11, 0.0  ;;  %v3859_v14 = vld [vmem:[#allocation2 + $0x109] sm:$0xff]  ;;  %5480 = vrot.lane.b32.xlu0 %v5024_v17, %s8328_s21  ;;  %v4372_v4 = vsel %vm305_vm0, %v3860_v56, %v10968_v27 }
 0x402   : > { %v3772_v40 = vsel %vm305_vm0, %v3739_v34, 0.0  ;;  %v4430_v42 = vsel %vm1003_vm3, %v4398_v62, %v4286_v23  ;;  %v7808_v57 = vpop.f32.mrb[36].mxu0  ;;  %v4371_v11 = vsel %vm305_vm0, %v3859_v14, %v10954_v63  ;;  %v4402_v34 = vsel %vm970_vm2, %v4370_v48, %v11064_v13  ;;  %v5026_v62 = vld [vmem:[%s11189_s28 + $0xa0] sm:$0xff] }
 0x403   : > { %v4292_v5 = vpop.permute.xlu0 %4291  ;;  %v3773_v0 = vadd.f32 %v3772_v40, %v3771_v33  ;;  %3640 = vst.msk [vmem:[#allocation3 + $0x228] sm:$0xff] %vm305_vm0, %v7808_v57  ;;  %v3742_v25 = vmul.f32 %v7808_v57, %v7808_v57  ;;  %v3495_v9 = vpop.f32.mrb[37].mxu0  ;;  %7874 = vmatmul.mubr.msk.f32.gmra.mrb[46].mxu1 %vm1038_vm4, %v4430_v42  ;;  %v3673_v51 = vadd.f32 %v3672_v32, %v3671_v10  ;;  %v3676_v15 = vsel %vm305_vm0, %v7808_v57, 0.0  ;;  %v3861_v10 = vld [vmem:[#allocation2 + $0x121] sm:$0xff]  ;;  %v3862_v23 = vld [vmem:[#allocation2 + $0x129] sm:$0xff] }
 0x404   : > { %3639 = vst.msk [vmem:[#allocation3 + $0x220] sm:$0xff] %vm305_vm0, %v3495_v9  ;;  %v3674_v54 = vsel %vm305_vm0, %v3495_v9, 0.0  ;;  %v3741_v29 = vmul.f32 %v3495_v9, %v3495_v9  ;;  %7876 = vmatprep.mubr.msk.f32.mxu1 %vm1038_vm4, %v4431_v39  ;;  %v4433_v7 = vsel %vm1003_vm3, %v4401_v30, %v4292_v5  ;;  %5482 = vrot.lane.b32.xlu1 %v5025_v60, %s8328_s21  ;;  %v3863_v60 = vld [vmem:[#allocation2 + $0x139] sm:$0xff] }
 0x405   : > { %v3775_v16 = vadd.f32 %v3774_v28, %v3773_v0  ;;  %v4290_v55 = vpop.permute.xlu1 %4289  ;;  %v3675_v2 = vadd.f32 %v3674_v54, %v3673_v51  ;;  %v3778_v52 = vsel %vm305_vm0, %v3742_v25, 0.0  ;;  %v4403_v61 = vsel %vm970_vm2, %v4371_v11, %v11058_v3  ;;  %5484 = vrot.lane.b32.xlu0 %v5026_v62, %s8328_s21  ;;  %v5029_v0 = vld [vmem:[%s11189_s28 + $0xc8] sm:$0xff] }
 0x406   : > { %v3776_v20 = vsel %vm305_vm0, %v3741_v29, 0.0  ;;  %v4432_v18 = vsel %vm1003_vm3, %v4400_v19, %v4290_v55  ;;  %v7811_v38 = vpop.f32.mrb[38].mxu0  ;;  %v4373_v25 = vsel %vm305_vm0, %v3861_v10, %v10962_v31  ;;  %v4374_v9 = vsel %vm305_vm0, %v3862_v23, %v10974_v26  ;;  %v5028_v29 = vld [vmem:[%s11189_s28 + $0xc0] sm:$0xff] }
 0x407   : > { %v4296_v44 = vpop.permute.xlu0 %4295  ;;  %v3777_v22 = vadd.f32 %v3776_v20, %v3775_v16  ;;  %3642 = vst.msk [vmem:[#allocation3 + $0x238] sm:$0xff] %vm305_vm0, %v7811_v38  ;;  %v3505_v58 = vpop.f32.mrb[39].mxu0  ;;  %7877 = vmatmul.mubr.msk.f32.gmra.mrb[48].mxu1 %vm1038_vm4, %v4432_v18  ;;  %v3744_v1 = vmul.f32 %v7811_v38, %v7811_v38  ;;  %v3677_v36 = vadd.f32 %v3676_v15, %v3675_v2  ;;  %v3680_v13 = vsel %vm305_vm0, %v7811_v38, 0.0 }
 0x408   : > { %3641 = vst.msk [vmem:[#allocation3 + $0x230] sm:$0xff] %vm305_vm0, %v3505_v58  ;;  %v3678_v33 = vsel %vm305_vm0, %v3505_v58, 0.0  ;;  %v3743_v37 = vmul.f32 %v3505_v58, %v3505_v58  ;;  %7879 = vmatprep.mubr.msk.f32.mxu1 %vm1038_vm4, %v4433_v7  ;;  %v4435_v27 = vsel %vm1003_vm3, %v4403_v61, %v4296_v44  ;;  %5486 = vrot.lane.b32.xlu1 %v5027_v45, %s8328_s21  ;;  %v5031_v44 = vld [vmem:[%s11189_s28 + $0xe8] sm:$0xff]  ;;  %v5030_v58 = vld [vmem:[%s11189_s28 + $0xe0] sm:$0xff] }
 0x409   : > { %v3779_v12 = vadd.f32 %v3778_v52, %v3777_v22  ;;  %v4294_v47 = vpop.permute.xlu1 %4293  ;;  %v3679_v50 = vadd.f32 %v3678_v33, %v3677_v36  ;;  %v3782_v3 = vsel %vm305_vm0, %v3744_v1, 0.0  ;;  %v4404_v28 = vsel %vm970_vm2, %v4372_v4, %v11074_v6  ;;  %5488 = vrot.lane.b32.xlu0 %v5028_v29, %s8328_s21  ;;  %v3865_v1 = vld [vmem:[#allocation2 + $0x151] sm:$0xff]  ;;  %v3866_v36 = vld [vmem:[#allocation2 + $0x159] sm:$0xff] }
 0x40a   : > { %v3780_v41 = vsel %vm305_vm0, %v3743_v37, 0.0  ;;  %v4434_v43 = vsel %vm1003_vm3, %v4402_v34, %v4294_v47  ;;  %v7814_v46 = vpop.f32.mrb[40].mxu0  ;;  %v4405_v48 = vsel %vm970_vm2, %v4373_v25, %v11066_v24  ;;  %v4375_v38 = vsel %vm305_vm0, %v3863_v60, %v10970_v35  ;;  %v5033_v61 = vld [vmem:[%s11189_s28 + $0x108] sm:$0xff] }
 0x40b   : > { %v4300_v63 = vpop.permute.xlu0 %4299  ;;  %v3781_v40 = vadd.f32 %v3780_v41, %v3779_v12  ;;  %3644 = vst.msk [vmem:[#allocation3 + $0x248] sm:$0xff] %vm305_vm0, %v7814_v46  ;;  %v3746_v42 = vmul.f32 %v7814_v46, %v7814_v46  ;;  %v3515_v5 = vpop.f32.mrb[41].mxu0  ;;  %7880 = vmatmul.mubr.msk.f32.gmra.mrb[50].mxu1 %vm1038_vm4, %v4434_v43  ;;  %v3681_v57 = vadd.f32 %v3680_v13, %v3679_v50  ;;  %v3684_v6 = vsel %vm305_vm0, %v7814_v46, 0.0  ;;  %v14154_v41 = vld [vmem:[#allocation42_spill] sm:$0xff] }
 0x40c   : > { %3643 = vst.msk [vmem:[#allocation3 + $0x240] sm:$0xff] %vm305_vm0, %v3515_v5  ;;  %v3682_v39 = vsel %vm305_vm0, %v3515_v5, 0.0  ;;  %v3745_v32 = vmul.f32 %v3515_v5, %v3515_v5  ;;  %7882 = vmatprep.mubr.msk.f32.mxu1 %vm1038_vm4, %v4435_v27  ;;  %v4437_v26 = vsel %vm1003_vm3, %v4405_v48, %v4300_v63  ;;  %5490 = vrot.lane.b32.xlu1 %v5029_v0, %s8328_s21  ;;  %v14155_v63 = vld [vmem:[#allocation41_spill] sm:$0xff] }
 0x40d   : > { %v3783_v51 = vadd.f32 %v3782_v3, %v3781_v40  ;;  %v4298_v54 = vpop.permute.xlu1 %4297  ;;  %v3683_v19 = vadd.f32 %v3682_v39, %v3681_v57  ;;  %v3786_v14 = vsel %vm305_vm0, %v3746_v42, 0.0  ;;  %v4376_v7 = vsel %vm305_vm0, %v3864_v49, %v10980_v8  ;;  %5492 = vrot.lane.b32.xlu0 %v5030_v58, %s8328_s21  ;;  %v5032_v40 = vld [vmem:[%s11189_s28 + $0x100] sm:$0xff] }
 0x40e   : > { %v3784_v16 = vsel %vm305_vm0, %v3745_v32, 0.0  ;;  %v4436_v55 = vsel %vm1003_vm3, %v4404_v28, %v4298_v54  ;;  %v7817_v17 = vpop.f32.mrb[42].mxu0  ;;  %v4406_v15 = vsel %vm970_vm2, %v4374_v9, %v11082_v59  ;;  %v4407_v33 = vsel %vm970_vm2, %v4375_v38, %v11076_v53  ;;  %v3867_v42 = vld [vmem:[#allocation2 + $0x169] sm:$0xff]  ;;  %v3868_v5 = vld [vmem:[#allocation2 + $0x171] sm:$0xff] }
 0x40f   : > { %v4304_v31 = vpop.permute.xlu0 %4303  ;;  %v3785_v56 = vadd.f32 %v3784_v16, %v3783_v51  ;;  %3646 = vst.msk [vmem:[#allocation3 + $0x258] sm:$0xff] %vm305_vm0, %v7817_v17  ;;  %v3525_v30 = vpop.f32.mrb[43].mxu0  ;;  %7883 = vmatmul.mubr.msk.f32.gmra.mrb[52].mxu1 %vm1038_vm4, %v4436_v55  ;;  %v3748_v24 = vmul.f32 %v7817_v17, %v7817_v17  ;;  %v3685_v2 = vadd.f32 %v3684_v6, %v3683_v19  ;;  %v3688_v59 = vsel %vm305_vm0, %v7817_v17, 0.0  ;;  %v14156_v3 = vld [vmem:[#allocation68_spill] sm:$0xff]  ;;  %v5035_v16 = vld [vmem:[%s11189_s28 + $0x128] sm:$0xff]  ;;  %v14157_v55 = vld [vmem:[#allocation35_spill] sm:$0xff] }
 0x410   : > { %3645 = vst.msk [vmem:[#allocation3 + $0x250] sm:$0xff] %vm305_vm0, %v3525_v30  ;;  %v3686_v20 = vsel %vm305_vm0, %v3525_v30, 0.0  ;;  %v3747_v18 = vmul.f32 %v3525_v30, %v3525_v30  ;;  %7885 = vmatprep.mubr.msk.f32.mxu1 %vm1038_vm4, %v4437_v26  ;;  %v4439_v8 = vsel %vm1003_vm3, %v4407_v33, %v4304_v31  ;;  %5494 = vrot.lane.b32.xlu1 %v5031_v44, %s8328_s21  ;;  %v14158_v17 = vld [vmem:[#allocation20_spill] sm:$0xff]  ;;  %v14159_v6 = vld [vmem:[#allocation19_spill] sm:$0xff] }
 0x411   : > { %v3787_v52 = vadd.f32 %v3786_v14, %v3785_v56  ;;  %v4302_v22 = vpop.permute.xlu1 %4301  ;;  %v3687_v37 = vadd.f32 %v3686_v20, %v3685_v2  ;;  %v3790_v53 = vsel %vm305_vm0, %v3748_v24, 0.0  ;;  %v4377_v50 = vsel %vm305_vm0, %v3865_v1, %v10976_v21  ;;  %5496 = vrot.lane.b32.xlu0 %v5032_v40, %s8328_s21  ;;  %v5034_v24 = vld [vmem:[%s11189_s28 + $0x120] sm:$0xff]  ;;  %v3869_v2 = vld [vmem:[#allocation2 + $0x181] sm:$0xff] }
 0x412   : > { %v3788_v45 = vsel %vm305_vm0, %v3747_v18, 0.0  ;;  %v4438_v11 = vsel %vm1003_vm3, %v4406_v15, %v4302_v22  ;;  %v7820_v4 = vpop.f32.mrb[44].mxu0  ;;  %v4378_v43 = vsel %vm305_vm0, %v3866_v36, %v14154_v41  ;;  %v4408_v46 = vsel %vm970_vm2, %v4376_v7, %v14155_v63  ;;  %v3870_v20 = vld [vmem:[#allocation2 + $0x189] sm:$0xff]  ;;  %v14160_v18 = vld [vmem:[#allocation26_spill] sm:$0xff] }
 0x413   : > { %v4308_v35 = vpop.permute.xlu0 %4307  ;;  %v3789_v34 = vadd.f32 %v3788_v45, %v3787_v52  ;;  %3648 = vst.msk [vmem:[#allocation3 + $0x268] sm:$0xff] %vm305_vm0, %v7820_v4  ;;  %v3750_v12 = vmul.f32 %v7820_v4, %v7820_v4  ;;  %v3535_v47 = vpop.f32.mrb[45].mxu0  ;;  %7886 = vmatmul.mubr.msk.f32.gmra.mrb[54].mxu1 %vm1038_vm4, %v4438_v11  ;;  %v3689_v62 = vadd.f32 %v3688_v59, %v3687_v37  ;;  %v3692_v28 = vsel %vm305_vm0, %v7820_v4, 0.0  ;;  %v14161_v59 = vld [vmem:[#allocation74_spill] sm:$0xff] }
 0x414   : > { %3647 = vst.msk [vmem:[#allocation3 + $0x260] sm:$0xff] %vm305_vm0, %v3535_v47  ;;  %v3690_v10 = vsel %vm305_vm0, %v3535_v47, 0.0  ;;  %v3749_v23 = vmul.f32 %v3535_v47, %v3535_v47  ;;  %7888 = vmatprep.mubr.msk.f32.mxu1 %vm1038_vm4, %v4439_v8  ;;  %v4409_v57 = vsel %vm970_vm2, %v4377_v50, %v14156_v3  ;;  %5498 = vrot.lane.b32.xlu1 %v5033_v61, %s8328_s21  ;;  %v5037_v8 = vld [vmem:[%s11189_s28 + $0x148] sm:$0xff]  ;;  %v5036_v61 = vld [vmem:[%s11189_s28 + $0x140] sm:$0xff] }
 0x415   : > { %v3791_v27 = vadd.f32 %v3790_v53, %v3789_v34  ;;  %v4306_v13 = vpop.permute.xlu1 %4305  ;;  %v3691_v39 = vadd.f32 %v3690_v10, %v3689_v62  ;;  %v4441_v9 = vsel %vm1003_vm3, %v4409_v57, %v4308_v35  ;;  %v3794_v51 = vsel %vm305_vm0, %v3750_v12, 0.0  ;;  %5500 = vrot.lane.b32.xlu0 %v5034_v24, %s8328_s21  ;;  %v14162_v12 = vld [vmem:[#allocation16_spill] sm:$0xff]  ;;  %v14163_v53 = vld [vmem:[#allocation38_spill] sm:$0xff] }
 0x416   : > { %v3792_v32 = vsel %vm305_vm0, %v3749_v23, 0.0  ;;  %v4440_v0 = vsel %vm1003_vm3, %v4408_v46, %v4306_v13  ;;  %v7823_v25 = vpop.f32.mrb[46].mxu0  ;;  %v4379_v31 = vsel %vm305_vm0, %v3867_v42, %v14157_v55  ;;  %v4380_v26 = vsel %vm305_vm0, %v3868_v5, %v14158_v17  ;;  %v14164_v50 = vld [vmem:[#allocation60_spill] sm:$0xff] }
 0x417   : > { %v4312_v21 = vpop.permute.xlu0 %4311  ;;  %v3793_v54 = vadd.f32 %v3792_v32, %v3791_v27  ;;  %3650 = vst.msk [vmem:[#allocation3 + $0x278] sm:$0xff] %vm305_vm0, %v7823_v25  ;;  %v3545_v29 = vpop.f32.mrb[47].mxu0  ;;  %7889 = vmatmul.mubr.msk.f32.gmra.mrb[56].mxu1 %vm1038_vm4, %v4440_v0  ;;  %v3752_v60 = vmul.f32 %v7823_v25, %v7823_v25  ;;  %v3693_v49 = vadd.f32 %v3692_v28, %v3691_v39  ;;  %v3696_v58 = vsel %vm305_vm0, %v7823_v25, 0.0  ;;  %v14165_v25 = vld [vmem:[#allocation80_spill] sm:$0xff] }
 0x418   : > { %3649 = vst.msk [vmem:[#allocation3 + $0x270] sm:$0xff] %vm305_vm0, %v3545_v29  ;;  %v3694_v48 = vsel %vm305_vm0, %v3545_v29, 0.0  ;;  %v3751_v19 = vmul.f32 %v3545_v29, %v3545_v29  ;;  %7891 = vmatprep.mubr.msk.f32.mxu1 %vm1038_vm4, %v4441_v9  ;;  %v4410_v14 = vsel %vm970_vm2, %v4378_v43, %v14159_v6  ;;  %v4411_v44 = vsel %vm970_vm2, %v4379_v31, %v14160_v18  ;;  %v5040_v24 = vld [vmem:[%s11189_s28 + $0x180] sm:$0xff] }
 0x419   : > { %v3795_v56 = vadd.f32 %v3794_v51, %v3793_v54  ;;  %v4310_v30 = vpop.permute.xlu1 %4309  ;;  %v3695_v38 = vadd.f32 %v3694_v48, %v3693_v49  ;;  %v4443_v22 = vsel %vm1003_vm3, %v4411_v44, %v4312_v21  ;;  %5502 = vrot.lane.b32.xlu1 %v5035_v16, %s8328_s21  ;;  %v3798_v37 = vsel %vm305_vm0, %v3752_v60, 0.0  ;;  %5504 = vrot.lane.b32.xlu0 %v5036_v61, %s8328_s21  ;;  %v5039_v21 = vld [vmem:[%s11189_s28 + $0x168] sm:$0xff]  ;;  %v5038_v54 = vld [vmem:[%s11189_s28 + $0x160] sm:$0xff] }
 0x41a   : > { %v3796_v7 = vsel %vm305_vm0, %v3751_v19, 0.0  ;;  %v4442_v15 = vsel %vm1003_vm3, %v4410_v14, %v4310_v30  ;;  %v7826_v52 = vpop.f32.mrb[48].mxu0  ;;  %v4381_v34 = vsel %vm305_vm0, %v3869_v2, %v14161_v59  ;;  %v4382_v47 = vsel %vm305_vm0, %v3870_v20, %v14162_v12  ;;  %v5044_v61 = vld [vmem:[%s11189_s28 + $0x1c0] sm:$0xff] }
 0x41b   : > { %v3797_v1 = vadd.f32 %v3796_v7, %v3795_v56  ;;  %3652 = vst.msk [vmem:[#allocation3 + $0x288] sm:$0xff] %vm305_vm0, %v7826_v52  ;;  %v3754_v36 = vmul.f32 %v7826_v52, %v7826_v52  ;;  %v3555_v33 = vpop.f32.mrb[49].mxu0  ;;  %7892 = vmatmul.mubr.msk.f32.gmra.mrb[58].mxu1 %vm1038_vm4, %v4442_v15  ;;  %v4316_v45 = vpop.permute.xlu0 %4315  ;;  %v3697_v11 = vadd.f32 %v3696_v58, %v3695_v38  ;;  %v3700_v40 = vsel %vm305_vm0, %v7826_v52, 0.0  ;;  %v5041_v56 = vld [vmem:[%s11189_s28 + $0x188] sm:$0xff] }
 0x41c   : > { %3651 = vst.msk [vmem:[#allocation3 + $0x280] sm:$0xff] %vm305_vm0, %v3555_v33  ;;  %v3698_v35 = vsel %vm305_vm0, %v3555_v33, 0.0  ;;  %v3753_v4 = vmul.f32 %v3555_v33, %v3555_v33  ;;  %7894 = vmatprep.mubr.msk.f32.mxu1 %vm1038_vm4, %v4443_v22  ;;  %v4412_v62 = vsel %vm970_vm2, %v4380_v26, %v14163_v53  ;;  %v4413_v41 = vsel %vm970_vm2, %v4381_v34, %v14164_v50 }
 0x41d   : > { %v3799_v10 = vadd.f32 %v3798_v37, %v3797_v1  ;;  %v4314_v23 = vpop.permute.xlu1 %4313  ;;  %v3699_v43 = vadd.f32 %v3698_v35, %v3697_v11  ;;  %v4445_v13 = vsel %vm1003_vm3, %v4413_v41, %v4316_v45  ;;  %v3802_v42 = vsel %vm305_vm0, %v3754_v36, 0.0  ;;  %5506 = vrot.lane.b32.xlu1 %v5037_v8, %s8328_s21  ;;  %5508 = vrot.lane.b32.xlu0 %v5038_v54, %s8328_s21  ;;  %v5043_v36 = vld [vmem:[%s11189_s28 + $0x1a8] sm:$0xff]  ;;  %v5042_v37 = vld [vmem:[%s11189_s28 + $0x1a0] sm:$0xff] }
 0x41e   : > { %v3800_v63 = vsel %vm305_vm0, %v3753_v4, 0.0  ;;  %v4444_v46 = vsel %vm1003_vm3, %v4412_v62, %v4314_v23  ;;  %v7829_v27 = vpop.f32.mrb[50].mxu0  ;;  %v4414_v9 = vsel %vm970_vm2, %v4382_v47, %v14165_v25 }
 0x41f   : > { %v3801_v5 = vadd.f32 %v3800_v63, %v3799_v10  ;;  %3654 = vst.msk [vmem:[#allocation3 + $0x298] sm:$0xff] %vm305_vm0, %v7829_v27  ;;  %v3565_v3 = vpop.f32.mrb[51].mxu0  ;;  %7895 = vmatmul.mubr.msk.f32.gmra.mrb[60].mxu1 %vm1038_vm4, %v4444_v46  ;;  %v3756_v57 = vmul.f32 %v7829_v27, %v7829_v27  ;;  %v3701_v39 = vadd.f32 %v3700_v40, %v3699_v43  ;;  %v3704_v19 = vsel %vm305_vm0, %v7829_v27, 0.0  ;;  %v5045_v10 = vld [vmem:[%s11189_s28 + $0x1c8] sm:$0xff] }
 0x420   : > { %3653 = vst.msk [vmem:[#allocation3 + $0x290] sm:$0xff] %vm305_vm0, %v3565_v3  ;;  %v3702_v32 = vsel %vm305_vm0, %v3565_v3, 0.0  ;;  %v3755_v0 = vmul.f32 %v3565_v3, %v3565_v3  ;;  %7897 = vmatprep.mubr.msk.f32.mxu1 %vm1038_vm4, %v4445_v13 }
 0x421   : > { %v3803_v28 = vadd.f32 %v3802_v42, %v3801_v5  ;;  %v4318_v51 = vpop.permute.xlu1 %4317  ;;  %v3703_v29 = vadd.f32 %v3702_v32, %v3701_v39  ;;  %5510 = vrot.lane.b32.xlu1 %v5039_v21, %s8328_s21  ;;  %v3806_v17 = vsel %vm305_vm0, %v3756_v57, 0.0  ;;  %5512 = vrot.lane.b32.xlu0 %v5040_v24, %s8328_s21  ;;  %v5047_v57 = vld [vmem:[%s11189_s28 + $0x1e8] sm:$0xff]  ;;  %v5046_v32 = vld [vmem:[%s11189_s28 + $0x1e0] sm:$0xff] }
 0x422   : > { %v3804_v60 = vsel %vm305_vm0, %v3755_v0, 0.0  ;;  %v4446_v49 = vsel %vm1003_vm3, %v4414_v9, %v4318_v51  ;;  %v7832_v48 = vpop.f32.mrb[52].mxu0 }
 0x423   : > { %v3805_v16 = vadd.f32 %v3804_v60, %v3803_v28  ;;  %3656 = vst.msk [vmem:[#allocation3 + $0x2a8] sm:$0xff] %vm305_vm0, %v7832_v48  ;;  %v3758_v55 = vmul.f32 %v7832_v48, %v7832_v48  ;;  %v3575_v31 = vpop.f32.mrb[53].mxu0  ;;  %7898 = vmatmul.mubr.msk.f32.gmra.mrb[62].mxu1 %vm1038_vm4, %v4446_v49  ;;  %v3705_v26 = vadd.f32 %v3704_v19, %v3703_v29  ;;  %v3708_v44 = vsel %vm305_vm0, %v7832_v48, 0.0 }
 0x424   : > { %3655 = vst.msk [vmem:[#allocation3 + $0x2a0] sm:$0xff] %vm305_vm0, %v3575_v31  ;;  %v3706_v6 = vsel %vm305_vm0, %v3575_v31, 0.0  ;;  %v3757_v14 = vmul.f32 %v3575_v31, %v3575_v31 }
 0x425   : > { %v3807_v30 = vadd.f32 %v3806_v17, %v3805_v16  ;;  %v3707_v2 = vadd.f32 %v3706_v6, %v3705_v26  ;;  %v3810_v38 = vsel %vm305_vm0, %v3758_v55, 0.0  ;;  %5514 = vrot.lane.b32.xlu1 %v5041_v56, %s8328_s21  ;;  %5516 = vrot.lane.b32.xlu0 %v5042_v37, %s8328_s21 }
 0x426   : > { %v3808_v20 = vsel %vm305_vm0, %v3757_v14, 0.0  ;;  %v7835_v18 = vpop.f32.mrb[54].mxu0 }
 0x427   : > { %v3809_v7 = vadd.f32 %v3808_v20, %v3807_v30  ;;  %3658 = vst.msk [vmem:[#allocation3 + $0x2b8] sm:$0xff] %vm305_vm0, %v7835_v18  ;;  %v3585_v15 = vpop.f32.mrb[55].mxu0  ;;  %v3760_v52 = vmul.f32 %v7835_v18, %v7835_v18  ;;  %v3709_v22 = vadd.f32 %v3708_v44, %v3707_v2  ;;  %v3712_v4 = vsel %vm305_vm0, %v7835_v18, 0.0 }
 0x428   : > { %3657 = vst.msk [vmem:[#allocation3 + $0x2b0] sm:$0xff] %vm305_vm0, %v3585_v15  ;;  %v3710_v58 = vsel %vm305_vm0, %v3585_v15, 0.0  ;;  %v3759_v1 = vmul.f32 %v3585_v15, %v3585_v15 }
 0x429   : > { %v3811_v33 = vadd.f32 %v3810_v38, %v3809_v7  ;;  %v3711_v45 = vadd.f32 %v3710_v58, %v3709_v22  ;;  %5518 = vrot.lane.b32.xlu1 %v5043_v36, %s8328_s21  ;;  %v3814_v12 = vsel %vm305_vm0, %v3760_v52, 0.0  ;;  %5520 = vrot.lane.b32.xlu0 %v5044_v61, %s8328_s21 }
 0x42a   : > { %v3812_v11 = vsel %vm305_vm0, %v3759_v1, 0.0  ;;  %v7838_v35 = vpop.f32.mrb[56].mxu0 }
 0x42b   : > { %v3813_v8 = vadd.f32 %v3812_v11, %v3811_v33  ;;  %3660 = vst.msk [vmem:[#allocation3 + $0x2c8] sm:$0xff] %vm305_vm0, %v7838_v35  ;;  %v3762_v59 = vmul.f32 %v7838_v35, %v7838_v35  ;;  %v3595_v34 = vpop.f32.mrb[57].mxu0  ;;  %v3713_v47 = vadd.f32 %v3712_v4, %v3711_v45  ;;  %v3716_v63 = vsel %vm305_vm0, %v7838_v35, 0.0 }
 0x42c   : > { %3659 = vst.msk [vmem:[#allocation3 + $0x2c0] sm:$0xff] %vm305_vm0, %v3595_v34  ;;  %v3714_v53 = vsel %vm305_vm0, %v3595_v34, 0.0  ;;  %v3761_v62 = vmul.f32 %v3595_v34, %v3595_v34 }
 0x42d   : > { %v3815_v23 = vadd.f32 %v3814_v12, %v3813_v8  ;;  %v3715_v50 = vadd.f32 %v3714_v53, %v3713_v47  ;;  %v3818_v46 = vsel %vm305_vm0, %v3762_v59, 0.0  ;;  %5522 = vrot.lane.b32.xlu1 %v5045_v10, %s8328_s21  ;;  %5524 = vrot.lane.b32.xlu0 %v5046_v32, %s8328_s21  ;;  %v14166_v12 = vld [vmem:[#allocation62_spill] sm:$0xff]  ;;  %v14167_v53 = vld [vmem:[#allocation32_spill] sm:$0xff] }
 0x42e   : > { %v3816_v41 = vsel %vm305_vm0, %v3761_v62, 0.0 }
 0x42f   : > { %v7841_v43 = vpop.f32.mrb[58].mxu0  ;;  %v3817_v27 = vadd.f32 %v3816_v41, %v3815_v23  ;;  %v3717_v42 = vadd.f32 %v3716_v63, %v3715_v50 }
 0x430   : > { %3662 = vst.msk [vmem:[#allocation3 + $0x2d8] sm:$0xff] %vm305_vm0, %v7841_v43  ;;  %v3605_v13 = vpop.f32.mrb[59].mxu0  ;;  %v3764_v40 = vmul.f32 %v7841_v43, %v7841_v43  ;;  %v3720_v9 = vsel %vm305_vm0, %v7841_v43, 0.0 }
 0x431   : > { %3661 = vst.msk [vmem:[#allocation3 + $0x2d0] sm:$0xff] %vm305_vm0, %v3605_v13  ;;  %v3718_v5 = vsel %vm305_vm0, %v3605_v13, 0.0  ;;  %v3763_v3 = vmul.f32 %v3605_v13, %v3605_v13  ;;  %v3819_v39 = vadd.f32 %v3818_v46, %v3817_v27  ;;  %5526 = vrot.lane.b32.xlu1 %v5047_v57, %s8328_s21 }
 0x432   : > { %v3719_v0 = vadd.f32 %v3718_v5, %v3717_v42  ;;  %v3822_v29 = vsel %vm305_vm0, %v3764_v40, 0.0 }
 0x433   : > { %v3820_v21 = vsel %vm305_vm0, %v3763_v3, 0.0  ;;  %v7844_v25 = vpop.f32.mrb[60].mxu0 }
 0x434   : > { %v3821_v28 = vadd.f32 %v3820_v21, %v3819_v39  ;;  %3664 = vst.msk [vmem:[#allocation3 + $0x2e8] sm:$0xff] %vm305_vm0, %v7844_v25  ;;  %v3766_v51 = vmul.f32 %v7844_v25, %v7844_v25  ;;  %v3615_v54 = vpop.f32.mrb[61].mxu0  ;;  %v3721_v60 = vadd.f32 %v3720_v9, %v3719_v0  ;;  %v3724_v17 = vsel %vm305_vm0, %v7844_v25, 0.0 }
 0x435   : > { %3663 = vst.msk [vmem:[#allocation3 + $0x2e0] sm:$0xff] %vm305_vm0, %v3615_v54  ;;  %v3722_v49 = vsel %vm305_vm0, %v3615_v54, 0.0  ;;  %v3765_v48 = vmul.f32 %v3615_v54, %v3615_v54 }
 0x436   : > { %v3823_v19 = vadd.f32 %v3822_v29, %v3821_v28  ;;  %v3723_v16 = vadd.f32 %v3722_v49, %v3721_v60  ;;  %v3826_v26 = vsel %vm305_vm0, %v3766_v51, 0.0 }
 0x437   : > { %v3824_v55 = vsel %vm305_vm0, %v3765_v48, 0.0  ;;  %v7847_v31 = vpop.f32.mrb[62].mxu0 }
 0x438   : > { %v3825_v6 = vadd.f32 %v3824_v55, %v3823_v19  ;;  %3666 = vst.msk [vmem:[#allocation3 + $0x2f8] sm:$0xff] %vm305_vm0, %v7847_v31  ;;  %v3625_v14 = vpop.f32.mrb[63].mxu0  ;;  %v3768_v56 = vmul.f32 %v7847_v31, %v7847_v31  ;;  %v3725_v30 = vadd.f32 %v3724_v17, %v3723_v16  ;;  %v3728_v38 = vsel %vm305_vm0, %v7847_v31, 0.0 }
 0x439   : > { %3665 = vst.msk [vmem:[#allocation3 + $0x2f0] sm:$0xff] %vm305_vm0, %v3625_v14  ;;  %v3726_v24 = vsel %vm305_vm0, %v3625_v14, 0.0  ;;  %v3767_v2 = vmul.f32 %v3625_v14, %v3625_v14 }
 0x43a   : > { %v3827_v20 = vadd.f32 %v3826_v26, %v3825_v6  ;;  %v3727_v18 = vadd.f32 %v3726_v24, %v3725_v30  ;;  %v3830_v15 = vsel %vm305_vm0, %v3768_v56, 0.0 }
 0x43b   : > { %v3828_v44 = vsel %vm305_vm0, %v3767_v2, 0.0 }
 0x43c   : > { %v3829_v7 = vadd.f32 %v3828_v44, %v3827_v20  ;;  %v3729_v52 = vadd.f32 %v3728_v38, %v3727_v18 }
 0x43e   : > { %v3831_v22 = vadd.f32 %v3830_v15, %v3829_v7  ;;  %v3730_v58 = vrot.slane %v3729_v52, 4 }
 0x440   : > { %v3832_v1 = vrot.slane %v3831_v22, 4  ;;  %v3731_v36 = vadd.f32 %v3730_v58, %v3729_v52 }
 0x442   : > { %v3833_v33 = vadd.f32 %v3832_v1, %v3831_v22  ;;  %v3732_v37 = vrot.slane %v3731_v36, 2 }
 0x444   : > { %v3834_v45 = vrot.slane %v3833_v33, 2  ;;  %v3733_v11 = vadd.f32 %v3732_v37, %v3731_v36 }
 0x446   : > { %v3835_v35 = vadd.f32 %v3834_v45, %v3833_v33  ;;  %v3734_v4 = vrot.slane %v3733_v11, 1 }
 0x448   : > { %v3836_v8 = vrot.slane %v3835_v35, 1  ;;  %v3735_v59 = vadd.f32 %v3734_v4, %v3733_v11 }
 0x44a   : > { %v3837_v34 = vadd.f32 %v3836_v8, %v3835_v35  ;;  %v11488_v47 = vadd.f32 %v3735_v59, %v14166_v12 }
 0x44c   : > { %v11491_v62 = vadd.f32 %v3837_v34, %v14167_v53 }
 0x4ba   : > { %v7854_v10 = vpop.f32.mrb[32].mxu1 }
 0x4bb   : > { %4773 = vst.msk [vmem:[#allocation3 + $0x308] sm:$0xff] %vm305_vm0, %v7854_v10  ;;  %v4805_v23 = vsel %vm305_vm0, %v7854_v10, 0.0  ;;  %v4875_v61 = vmul.f32 %v7854_v10, %v7854_v10  ;;  %v4612_v50 = vpop.f32.mrb[33].mxu1 }
 0x4bc   : > { %4772 = vst.msk [vmem:[#allocation3 + $0x300] sm:$0xff] %vm305_vm0, %v4612_v50  ;;  %v4804_v41 = vsel %vm305_vm0, %v4612_v50, 0.0  ;;  %v4874_v43 = vmul.f32 %v4612_v50, %v4612_v50 }
 0x4bd   : > { %v4907_v63 = vsel %vm305_vm0, %v4875_v61, 0.0  ;;  %v4806_v46 = vadd.f32 %v4805_v23, %v4804_v41 }
 0x4be   : > { %v4906_v27 = vsel %vm305_vm0, %v4874_v43, 0.0  ;;  %v7857_v13 = vpop.f32.mrb[34].mxu1 }
 0x4bf   : > { %v4908_v40 = vadd.f32 %v4907_v63, %v4906_v27  ;;  %4775 = vst.msk [vmem:[#allocation3 + $0x318] sm:$0xff] %vm305_vm0, %v7857_v13  ;;  %v4622_v42 = vpop.f32.mrb[35].mxu1  ;;  %v4877_v5 = vmul.f32 %v7857_v13, %v7857_v13  ;;  %v4809_v32 = vsel %vm305_vm0, %v7857_v13, 0.0 }
 0x4c0   : > { %4774 = vst.msk [vmem:[#allocation3 + $0x310] sm:$0xff] %vm305_vm0, %v4622_v42  ;;  %v4807_v3 = vsel %vm305_vm0, %v4622_v42, 0.0  ;;  %v4876_v57 = vmul.f32 %v4622_v42, %v4622_v42 }
 0x4c1   : > { %v4808_v39 = vadd.f32 %v4807_v3, %v4806_v46  ;;  %v4911_v51 = vsel %vm305_vm0, %v4877_v5, 0.0 }
 0x4c2   : > { %v4909_v0 = vsel %vm305_vm0, %v4876_v57, 0.0  ;;  %v7860_v21 = vpop.f32.mrb[36].mxu1 }
 0x4c3   : > { %v4910_v25 = vadd.f32 %v4909_v0, %v4908_v40  ;;  %4777 = vst.msk [vmem:[#allocation3 + $0x328] sm:$0xff] %vm305_vm0, %v7860_v21  ;;  %v4632_v9 = vpop.f32.mrb[37].mxu1  ;;  %v4810_v28 = vadd.f32 %v4809_v32, %v4808_v39  ;;  %v4879_v54 = vmul.f32 %v7860_v21, %v7860_v21  ;;  %v4813_v19 = vsel %vm305_vm0, %v7860_v21, 0.0 }
 0x4c4   : > { %4776 = vst.msk [vmem:[#allocation3 + $0x320] sm:$0xff] %vm305_vm0, %v4632_v9  ;;  %v4811_v29 = vsel %vm305_vm0, %v4632_v9, 0.0  ;;  %v4878_v60 = vmul.f32 %v4632_v9, %v4632_v9 }
 0x4c5   : > { %v4812_v49 = vadd.f32 %v4811_v29, %v4810_v28  ;;  %v4912_v48 = vadd.f32 %v4911_v51, %v4910_v25  ;;  %v4915_v6 = vsel %vm305_vm0, %v4879_v54, 0.0 }
 0x4c6   : > { %v4913_v16 = vsel %vm305_vm0, %v4878_v60, 0.0  ;;  %v7863_v55 = vpop.f32.mrb[38].mxu1 }
 0x4c7   : > { %v4914_v31 = vadd.f32 %v4913_v16, %v4912_v48  ;;  %4779 = vst.msk [vmem:[#allocation3 + $0x338] sm:$0xff] %vm305_vm0, %v7863_v55  ;;  %v4642_v17 = vpop.f32.mrb[39].mxu1  ;;  %v4814_v26 = vadd.f32 %v4813_v19, %v4812_v49  ;;  %v4881_v14 = vmul.f32 %v7863_v55, %v7863_v55  ;;  %v4817_v20 = vsel %vm305_vm0, %v7863_v55, 0.0 }
 0x4c8   : > { %4778 = vst.msk [vmem:[#allocation3 + $0x330] sm:$0xff] %vm305_vm0, %v4642_v17  ;;  %v4815_v56 = vsel %vm305_vm0, %v4642_v17, 0.0  ;;  %v4880_v30 = vmul.f32 %v4642_v17, %v4642_v17 }
 0x4c9   : > { %v4816_v24 = vadd.f32 %v4815_v56, %v4814_v26  ;;  %v4916_v2 = vadd.f32 %v4915_v6, %v4914_v31  ;;  %v4919_v52 = vsel %vm305_vm0, %v4881_v14, 0.0 }
 0x4ca   : > { %v4917_v18 = vsel %vm305_vm0, %v4880_v30, 0.0  ;;  %v7866_v44 = vpop.f32.mrb[40].mxu1 }
 0x4cb   : > { %v4918_v38 = vadd.f32 %v4917_v18, %v4916_v2  ;;  %4781 = vst.msk [vmem:[#allocation3 + $0x348] sm:$0xff] %vm305_vm0, %v7866_v44  ;;  %v4652_v7 = vpop.f32.mrb[41].mxu1  ;;  %v4818_v15 = vadd.f32 %v4817_v20, %v4816_v24  ;;  %v4883_v22 = vmul.f32 %v7866_v44, %v7866_v44  ;;  %v4821_v37 = vsel %vm305_vm0, %v7866_v44, 0.0 }
 0x4cc   : > { %4780 = vst.msk [vmem:[#allocation3 + $0x340] sm:$0xff] %vm305_vm0, %v4652_v7  ;;  %v4819_v58 = vsel %vm305_vm0, %v4652_v7, 0.0  ;;  %v4882_v1 = vmul.f32 %v4652_v7, %v4652_v7 }
 0x4cd   : > { %v4820_v36 = vadd.f32 %v4819_v58, %v4818_v15  ;;  %v4920_v33 = vadd.f32 %v4919_v52, %v4918_v38  ;;  %v4923_v59 = vsel %vm305_vm0, %v4883_v22, 0.0 }
 0x4ce   : > { %v4921_v45 = vsel %vm305_vm0, %v4882_v1, 0.0  ;;  %v7869_v11 = vpop.f32.mrb[42].mxu1 }
 0x4cf   : > { %v4922_v35 = vadd.f32 %v4921_v45, %v4920_v33  ;;  %4783 = vst.msk [vmem:[#allocation3 + $0x358] sm:$0xff] %vm305_vm0, %v7869_v11  ;;  %v4662_v4 = vpop.f32.mrb[43].mxu1  ;;  %v4822_v8 = vadd.f32 %v4821_v37, %v4820_v36  ;;  %v4885_v34 = vmul.f32 %v7869_v11, %v7869_v11  ;;  %v4825_v61 = vsel %vm305_vm0, %v7869_v11, 0.0 }
 0x4d0   : > { %4782 = vst.msk [vmem:[#allocation3 + $0x350] sm:$0xff] %vm305_vm0, %v4662_v4  ;;  %v4823_v12 = vsel %vm305_vm0, %v4662_v4, 0.0  ;;  %v4884_v53 = vmul.f32 %v4662_v4, %v4662_v4 }
 0x4d1   : > { %v4824_v10 = vadd.f32 %v4823_v12, %v4822_v8  ;;  %v4924_v23 = vadd.f32 %v4923_v59, %v4922_v35  ;;  %v4927_v27 = vsel %vm305_vm0, %v4885_v34, 0.0 }
 0x4d2   : > { %v4925_v50 = vsel %vm305_vm0, %v4884_v53, 0.0  ;;  %v7872_v41 = vpop.f32.mrb[44].mxu1 }
 0x4d3   : > { %v4926_v43 = vadd.f32 %v4925_v50, %v4924_v23  ;;  %4785 = vst.msk [vmem:[#allocation3 + $0x368] sm:$0xff] %vm305_vm0, %v7872_v41  ;;  %v4672_v63 = vpop.f32.mrb[45].mxu1  ;;  %v4826_v46 = vadd.f32 %v4825_v61, %v4824_v10  ;;  %v4887_v13 = vmul.f32 %v7872_v41, %v7872_v41  ;;  %v4829_v57 = vsel %vm305_vm0, %v7872_v41, 0.0 }
 0x4d4   : > { %4784 = vst.msk [vmem:[#allocation3 + $0x360] sm:$0xff] %vm305_vm0, %v4672_v63  ;;  %v4827_v40 = vsel %vm305_vm0, %v4672_v63, 0.0  ;;  %v4886_v42 = vmul.f32 %v4672_v63, %v4672_v63 }
 0x4d5   : > { %v4828_v5 = vadd.f32 %v4827_v40, %v4826_v46  ;;  %v4928_v3 = vadd.f32 %v4927_v27, %v4926_v43  ;;  %v4931_v9 = vsel %vm305_vm0, %v4887_v13, 0.0 }
 0x4d6   : > { %v4929_v39 = vsel %vm305_vm0, %v4886_v42, 0.0  ;;  %v7875_v32 = vpop.f32.mrb[46].mxu1 }
 0x4d7   : > { %v4930_v0 = vadd.f32 %v4929_v39, %v4928_v3  ;;  %4787 = vst.msk [vmem:[#allocation3 + $0x378] sm:$0xff] %vm305_vm0, %v7875_v32  ;;  %v4682_v21 = vpop.f32.mrb[47].mxu1  ;;  %v4830_v25 = vadd.f32 %v4829_v57, %v4828_v5  ;;  %v4889_v28 = vmul.f32 %v7875_v32, %v7875_v32  ;;  %v4833_v49 = vsel %vm305_vm0, %v7875_v32, 0.0 }
 0x4d8   : > { %4786 = vst.msk [vmem:[#allocation3 + $0x370] sm:$0xff] %vm305_vm0, %v4682_v21  ;;  %v4831_v51 = vsel %vm305_vm0, %v4682_v21, 0.0  ;;  %v4888_v54 = vmul.f32 %v4682_v21, %v4682_v21 }
 0x4d9   : > { %v4832_v29 = vadd.f32 %v4831_v51, %v4830_v25  ;;  %v4932_v60 = vadd.f32 %v4931_v9, %v4930_v0  ;;  %v4935_v17 = vsel %vm305_vm0, %v4889_v28, 0.0 }
 0x4da   : > { %v4933_v48 = vsel %vm305_vm0, %v4888_v54, 0.0  ;;  %v7878_v19 = vpop.f32.mrb[48].mxu1 }
 0x4db   : > { %v4934_v16 = vadd.f32 %v4933_v48, %v4932_v60  ;;  %4789 = vst.msk [vmem:[#allocation3 + $0x388] sm:$0xff] %vm305_vm0, %v7878_v19  ;;  %v4692_v55 = vpop.f32.mrb[49].mxu1  ;;  %v4834_v31 = vadd.f32 %v4833_v49, %v4832_v29  ;;  %v4891_v26 = vmul.f32 %v7878_v19, %v7878_v19  ;;  %v4837_v24 = vsel %vm305_vm0, %v7878_v19, 0.0 }
 0x4dc   : > { %4788 = vst.msk [vmem:[#allocation3 + $0x380] sm:$0xff] %vm305_vm0, %v4692_v55  ;;  %v4835_v6 = vsel %vm305_vm0, %v4692_v55, 0.0  ;;  %v4890_v14 = vmul.f32 %v4692_v55, %v4692_v55 }
 0x4dd   : > { %v4836_v56 = vadd.f32 %v4835_v6, %v4834_v31  ;;  %v4936_v30 = vadd.f32 %v4935_v17, %v4934_v16  ;;  %v4939_v7 = vsel %vm305_vm0, %v4891_v26, 0.0 }
 0x4de   : > { %v4937_v2 = vsel %vm305_vm0, %v4890_v14, 0.0  ;;  %v7881_v20 = vpop.f32.mrb[50].mxu1 }
 0x4df   : > { %v4938_v18 = vadd.f32 %v4937_v2, %v4936_v30  ;;  %4791 = vst.msk [vmem:[#allocation3 + $0x398] sm:$0xff] %vm305_vm0, %v7881_v20  ;;  %v4702_v44 = vpop.f32.mrb[51].mxu1  ;;  %v4838_v38 = vadd.f32 %v4837_v24, %v4836_v56  ;;  %v4893_v15 = vmul.f32 %v7881_v20, %v7881_v20  ;;  %v4841_v36 = vsel %vm305_vm0, %v7881_v20, 0.0 }
 0x4e0   : > { %4790 = vst.msk [vmem:[#allocation3 + $0x390] sm:$0xff] %vm305_vm0, %v4702_v44  ;;  %v4839_v52 = vsel %vm305_vm0, %v4702_v44, 0.0  ;;  %v4892_v22 = vmul.f32 %v4702_v44, %v4702_v44 }
 0x4e1   : > { %v4840_v58 = vadd.f32 %v4839_v52, %v4838_v38  ;;  %v4940_v1 = vadd.f32 %v4939_v7, %v4938_v18  ;;  %v4943_v4 = vsel %vm305_vm0, %v4893_v15, 0.0 }
 0x4e2   : > { %v4941_v33 = vsel %vm305_vm0, %v4892_v22, 0.0  ;;  %v7884_v37 = vpop.f32.mrb[52].mxu1 }
 0x4e3   : > { %v4942_v45 = vadd.f32 %v4941_v33, %v4940_v1  ;;  %4793 = vst.msk [vmem:[#allocation3 + $0x3a8] sm:$0xff] %vm305_vm0, %v7884_v37  ;;  %v4712_v11 = vpop.f32.mrb[53].mxu1  ;;  %v4842_v35 = vadd.f32 %v4841_v36, %v4840_v58  ;;  %v4895_v8 = vmul.f32 %v7884_v37, %v7884_v37  ;;  %v4845_v10 = vsel %vm305_vm0, %v7884_v37, 0.0 }
 0x4e4   : > { %4792 = vst.msk [vmem:[#allocation3 + $0x3a0] sm:$0xff] %vm305_vm0, %v4712_v11  ;;  %v4843_v59 = vsel %vm305_vm0, %v4712_v11, 0.0  ;;  %v4894_v34 = vmul.f32 %v4712_v11, %v4712_v11  ;;  %v11583_v11 = vpop.permute.xlu1 %5338 }
 0x4e5   : > { %v4844_v12 = vadd.f32 %v4843_v59, %v4842_v35  ;;  %v4944_v53 = vadd.f32 %v4943_v4, %v4942_v45  ;;  %v4947_v63 = vsel %vm305_vm0, %v4895_v8, 0.0  ;;  %v11585_v35 = vpop.permute.xlu0 %5336 }
 0x4e6   : > { %v4945_v23 = vsel %vm305_vm0, %v4894_v34, 0.0  ;;  %v7887_v61 = vpop.f32.mrb[54].mxu1 }
 0x4e7   : > { %v4946_v50 = vadd.f32 %v4945_v23, %v4944_v53  ;;  %4795 = vst.msk [vmem:[#allocation3 + $0x3b8] sm:$0xff] %vm305_vm0, %v7887_v61  ;;  %v4722_v41 = vpop.f32.mrb[55].mxu1  ;;  %v4846_v43 = vadd.f32 %v4845_v10, %v4844_v12  ;;  %v4897_v46 = vmul.f32 %v7887_v61, %v7887_v61  ;;  %v4849_v5 = vsel %vm305_vm0, %v7887_v61, 0.0 }
 0x4e8   : > { %4794 = vst.msk [vmem:[#allocation3 + $0x3b0] sm:$0xff] %vm305_vm0, %v4722_v41  ;;  %v4847_v27 = vsel %vm305_vm0, %v4722_v41, 0.0  ;;  %v4896_v13 = vmul.f32 %v4722_v41, %v4722_v41 }
 0x4e9   : > { %v4848_v40 = vadd.f32 %v4847_v27, %v4846_v43  ;;  %v4948_v42 = vadd.f32 %v4947_v63, %v4946_v50  ;;  %v4951_v21 = vsel %vm305_vm0, %v4897_v46, 0.0  ;;  %v11593_v46 = vpop.permute.xlu1 %5342  ;;  %v11595_v27 = vpop.permute.xlu0 %5340 }
 0x4ea   : > { %v4949_v3 = vsel %vm305_vm0, %v4896_v13, 0.0  ;;  %v7890_v57 = vpop.f32.mrb[56].mxu1 }
 0x4eb   : > { %v4950_v39 = vadd.f32 %v4949_v3, %v4948_v42  ;;  %4797 = vst.msk [vmem:[#allocation3 + $0x3c8] sm:$0xff] %vm305_vm0, %v7890_v57  ;;  %v4732_v32 = vpop.f32.mrb[57].mxu1  ;;  %v4850_v0 = vadd.f32 %v4849_v5, %v4848_v40  ;;  %v4899_v25 = vmul.f32 %v7890_v57, %v7890_v57  ;;  %v4853_v29 = vsel %vm305_vm0, %v7890_v57, 0.0 }
 0x4ec   : > { %4796 = vst.msk [vmem:[#allocation3 + $0x3c0] sm:$0xff] %vm305_vm0, %v4732_v32  ;;  %v4851_v9 = vsel %vm305_vm0, %v4732_v32, 0.0  ;;  %v4898_v28 = vmul.f32 %v4732_v32, %v4732_v32 }
 0x4ed   : > { %v4852_v51 = vadd.f32 %v4851_v9, %v4850_v0  ;;  %v4952_v54 = vadd.f32 %v4951_v21, %v4950_v39  ;;  %v4955_v55 = vsel %vm305_vm0, %v4899_v25, 0.0  ;;  %v11597_v39 = vpop.permute.xlu1 %5346  ;;  %v11599_v32 = vpop.permute.xlu0 %5344 }
 0x4ee   : > { %v4953_v60 = vsel %vm305_vm0, %v4898_v28, 0.0  ;;  %v7893_v49 = vpop.f32.mrb[58].mxu1 }
 0x4ef   : > { %v4954_v48 = vadd.f32 %v4953_v60, %v4952_v54  ;;  %4799 = vst.msk [vmem:[#allocation3 + $0x3d8] sm:$0xff] %vm305_vm0, %v7893_v49  ;;  %v4742_v19 = vpop.f32.mrb[59].mxu1  ;;  %v4854_v16 = vadd.f32 %v4853_v29, %v4852_v51  ;;  %v4901_v31 = vmul.f32 %v7893_v49, %v7893_v49  ;;  %v4857_v56 = vsel %vm305_vm0, %v7893_v49, 0.0 }
 0x4f0   : > { %4798 = vst.msk [vmem:[#allocation3 + $0x3d0] sm:$0xff] %vm305_vm0, %v4742_v19  ;;  %v4855_v17 = vsel %vm305_vm0, %v4742_v19, 0.0  ;;  %v4900_v26 = vmul.f32 %v4742_v19, %v4742_v19 }
 0x4f1   : > { %v4856_v6 = vadd.f32 %v4855_v17, %v4854_v16  ;;  %v4956_v14 = vadd.f32 %v4955_v55, %v4954_v48  ;;  %v4959_v44 = vsel %vm305_vm0, %v4901_v31, 0.0  ;;  %v11602_v54 = vpop.permute.xlu1 %5350  ;;  %v11604_v29 = vpop.permute.xlu0 %5348 }
 0x4f2   : > { %v4957_v30 = vsel %vm305_vm0, %v4900_v26, 0.0  ;;  %v7896_v24 = vpop.f32.mrb[60].mxu1 }
 0x4f3   : > { %v4958_v2 = vadd.f32 %v4957_v30, %v4956_v14  ;;  %4801 = vst.msk [vmem:[#allocation3 + $0x3e8] sm:$0xff] %vm305_vm0, %v7896_v24  ;;  %v4752_v20 = vpop.f32.mrb[61].mxu1  ;;  %v4858_v18 = vadd.f32 %v4857_v56, %v4856_v6  ;;  %v4903_v38 = vmul.f32 %v7896_v24, %v7896_v24  ;;  %v4861_v58 = vsel %vm305_vm0, %v7896_v24, 0.0 }
 0x4f4   : > { %4800 = vst.msk [vmem:[#allocation3 + $0x3e0] sm:$0xff] %vm305_vm0, %v4752_v20  ;;  %v4859_v7 = vsel %vm305_vm0, %v4752_v20, 0.0  ;;  %v4902_v15 = vmul.f32 %v4752_v20, %v4752_v20 }
 0x4f5   : > { %v4860_v52 = vadd.f32 %v4859_v7, %v4858_v18  ;;  %v4960_v22 = vadd.f32 %v4959_v44, %v4958_v2  ;;  %v4963_v4 = vsel %vm305_vm0, %v4903_v38, 0.0  ;;  %v11607_v49 = vpop.permute.xlu1 %5354  ;;  %v11609_v48 = vpop.permute.xlu0 %5352 }
 0x4f6   : > { %v4961_v1 = vsel %vm305_vm0, %v4902_v15, 0.0  ;;  %v7899_v36 = vpop.f32.mrb[62].mxu1 }
 0x4f7   : > { %v4962_v33 = vadd.f32 %v4961_v1, %v4960_v22  ;;  %4803 = vst.msk [vmem:[#allocation3 + $0x3f8] sm:$0xff] %vm305_vm0, %v7899_v36  ;;  %v4762_v37 = vpop.f32.mrb[63].mxu1  ;;  %v4862_v45 = vadd.f32 %v4861_v58, %v4860_v52  ;;  %v4905_v8 = vmul.f32 %v7899_v36, %v7899_v36  ;;  %v4865_v10 = vsel %vm305_vm0, %v7899_v36, 0.0  ;;  %v5177_v22 = vld [vmem:[#allocation3 + $0x108] sm:$0xff]  ;;  %v5176_v58 = vld [vmem:[#allocation3 + $0x100] sm:$0xff] }
 0x4f8   : > { %4802 = vst.msk [vmem:[#allocation3 + $0x3f0] sm:$0xff] %vm305_vm0, %v4762_v37  ;;  %v4863_v59 = vsel %vm305_vm0, %v4762_v37, 0.0  ;;  %v4904_v34 = vmul.f32 %v4762_v37, %v4762_v37  ;;  %v5178_v37 = vld [vmem:[#allocation3 + $0x110] sm:$0xff] }
 0x4f9   : > { %v4864_v12 = vadd.f32 %v4863_v59, %v4862_v45  ;;  %v4964_v53 = vadd.f32 %v4963_v4, %v4962_v33  ;;  %v4967_v41 = vsel %vm305_vm0, %v4905_v8, 0.0  ;;  %v11611_v19 = vpop.permute.xlu1 %5358  ;;  %v11613_v16 = vpop.permute.xlu0 %5356  ;;  %v5179_v33 = vld [vmem:[#allocation3 + $0x118] sm:$0xff] }
 0x4fa   : > { %v4965_v23 = vsel %vm305_vm0, %v4904_v34, 0.0 }
 0x4fb   : > { %v4866_v61 = vadd.f32 %v4865_v10, %v4864_v12  ;;  %v4966_v50 = vadd.f32 %v4965_v23, %v4964_v53 }
 0x4fd   : > { %v4867_v43 = vrot.slane %v4866_v61, 4  ;;  %v4968_v63 = vadd.f32 %v4967_v41, %v4966_v50  ;;  %v11615_v55 = vpop.permute.xlu1 %5362  ;;  %v11617_v31 = vpop.permute.xlu0 %5360  ;;  %v5181_v50 = vld [vmem:[#allocation3 + $0x128] sm:$0xff]  ;;  %v5180_v41 = vld [vmem:[#allocation3 + $0x120] sm:$0xff] }
 0x4fe   : > { %14168 = vst [vmem:[#allocation25_spill] sm:$0xff] %v11615_v55  ;;  %14169 = vst [vmem:[#allocation66_spill] sm:$0xff] %v11617_v31  ;;  %v7474_v55 = vld [vmem:[%s8602_s5 + $0x178] sm:$0xff] }
 0x4ff   : > { %v4868_v13 = vadd.f32 %v4867_v43, %v4866_v61  ;;  %v4969_v40 = vrot.slane %v4968_v63, 4 }
 0x501   : > { %v4869_v42 = vrot.slane %v4868_v13, 2  ;;  %v4970_v5 = vadd.f32 %v4969_v40, %v4968_v63  ;;  %v11621_v17 = vpop.permute.xlu1 %5366  ;;  %v11623_v26 = vpop.permute.xlu0 %5364 }
 0x502   : > { %14170 = vst [vmem:[#allocation37_spill] sm:$0xff] %v11621_v17  ;;  %14171 = vst [vmem:[#allocation44_spill] sm:$0xff] %v11623_v26 }
 0x503   : > { %v4870_v3 = vadd.f32 %v4869_v42, %v4868_v13  ;;  %v4971_v57 = vrot.slane %v4970_v5, 2 }
 0x505   : > { %v4871_v0 = vrot.slane %v4870_v3, 1  ;;  %v4972_v21 = vadd.f32 %v4971_v57, %v4970_v5  ;;  %v11627_v56 = vpop.permute.xlu1 %5370  ;;  %v11629_v30 = vpop.permute.xlu0 %5368 }
 0x506   : > { %14172 = vst [vmem:[#allocation78_spill] sm:$0xff] %v11627_v56  ;;  %14173 = vst [vmem:[#allocation22_spill] sm:$0xff] %v11629_v30  ;;  %v7455_v30 = vld [vmem:[%s8602_s5 + $0x50] sm:$0xff] }
 0x507   : > { %v4872_v25 = vadd.f32 %v4871_v0, %v4870_v3  ;;  %v4973_v9 = vrot.slane %v4972_v21, 1  ;;  %v5183_v0 = vld [vmem:[#allocation3 + $0x138] sm:$0xff] }
 0x509   : > { %v4873_v28 = vadd.f32 %v4872_v25, %v11488_v47  ;;  %v4974_v51 = vadd.f32 %v4973_v9, %v4972_v21  ;;  %v11631_v2 = vpop.permute.xlu1 %5374  ;;  %v11633_v20 = vpop.permute.xlu0 %5372  ;;  %v5182_v21 = vld [vmem:[#allocation3 + $0x130] sm:$0xff] }
 0x50a   : > { %14174 = vst [vmem:[#allocation21_spill] sm:$0xff] %v11631_v2  ;;  %14175 = vst [vmem:[#allocation43_spill] sm:$0xff] %v11633_v20 }
 0x50b   : > { %v4975_v60 = vadd.f32 %v4974_v51, %v11491_v62  ;;  %v11619_v47 = vmul.f32 0.0009765625, %v4873_v28 }
 0x50d   : > { %v4978_v6 = vmul.f32 0.0009765625, %v4975_v60  ;;  %v4979_v62 = vmul.f32 %v11619_v47, %v11619_v47  ;;  %v11635_v44 = vpop.permute.xlu1 %5378  ;;  %v11637_v38 = vpop.permute.xlu0 %5376  ;;  %v5209_v1 = vsub.f32 %v5177_v22, %v11619_v47  ;;  %v5208_v36 = vsub.f32 %v5176_v58, %v11619_v47 }
 0x50e   : > { %14176 = vst [vmem:[#allocation28_spill] sm:$0xff] %v11635_v44  ;;  %14177 = vst [vmem:[#allocation27_spill] sm:$0xff] %v11637_v38  ;;  %v5211_v34 = vsub.f32 %v5179_v33, %v11619_v47  ;;  %v5210_v12 = vsub.f32 %v5178_v37, %v11619_v47  ;;  %v5213_v43 = vsub.f32 %v5181_v50, %v11619_v47  ;;  %v8066_v38 = vld [vmem:[%s11189_s28 + $0xa8] sm:$0xff] }
 0x50f   : > { %v4980_v14 = vsub.f32 %v4978_v6, %v4979_v62  ;;  %v5212_v63 = vsub.f32 %v5180_v41, %v11619_v47  ;;  %v5215_v25 = vsub.f32 %v5183_v0, %v11619_v47  ;;  %v5214_v9 = vsub.f32 %v5182_v21, %v11619_v47  ;;  %v5185_v62 = vld [vmem:[#allocation3 + $0x148] sm:$0xff] }
 0x510   : > { %v5217_v22 = vsub.f32 %v5185_v62, %v11619_v47 }
 0x511   : > { %v4981_v24 = vmax.f32 %v4980_v14, 0.0  ;;  %v11639_v7 = vpop.permute.xlu1 %5382  ;;  %v11641_v15 = vpop.permute.xlu0 %5380  ;;  %v5184_v14 = vld [vmem:[#allocation3 + $0x140] sm:$0xff] }
 0x512   : > { %14178 = vst [vmem:[#allocation46_spill] sm:$0xff] %v11639_v7  ;;  %14179 = vst [vmem:[#allocation30_spill] sm:$0xff] %v11641_v15  ;;  %v5216_v58 = vsub.f32 %v5184_v14, %v11619_v47  ;;  %v8062_v15 = vld [vmem:[%s11189_s28 + $0x68] sm:$0xff] }
 0x513   : > { %v4982_v18 = vadd.f32 1e-05, %v4981_v24 }
 0x515   : > { %7992 = vrsqrt.f32 %v4982_v18  ;;  %v11647_v45 = vpop.permute.xlu1 %5386  ;;  %v11649_v4 = vpop.permute.xlu0 %5384 }
 0x516   : > { %14180 = vst [vmem:[#allocation47_spill] sm:$0xff] %v11647_v45  ;;  %14181 = vst [vmem:[#allocation58_spill] sm:$0xff] %v11649_v4  ;;  %v8059_v4 = vld [vmem:[%s11189_s28 + $0x20] sm:$0xff] }
 0x519   : > { %v11661_v13 = vpop.permute.xlu1 %5390  ;;  %v11663_v40 = vpop.permute.xlu0 %5388 }
 0x51a   : > { %14182 = vst [vmem:[#allocation34_spill] sm:$0xff] %v11661_v13  ;;  %14183 = vst [vmem:[#allocation45_spill] sm:$0xff] %v11663_v40 }
 0x51d   : > { %v11673_v24 = vpop.permute.xlu1 %5394  ;;  %v11675_v18 = vpop.permute.xlu0 %5392 }
 0x51e   : > { %14184 = vst [vmem:[#allocation29_spill] sm:$0xff] %v11673_v24  ;;  %14185 = vst [vmem:[#allocation87_spill] sm:$0xff] %v11675_v18  ;;  %v8042_v24 = vld [vmem:[%s8602_s5 + $0x128] sm:$0xff] }
 0x51f   : > { %v11643_v52 = vpop.eup %7992 }
 0x520   : > { %v5241_v8 = vmul.f32 %v11643_v52, %v5209_v1  ;;  %v5240_v59 = vmul.f32 %v11643_v52, %v5208_v36  ;;  %v5243_v23 = vmul.f32 %v11643_v52, %v5211_v34  ;;  %v5242_v61 = vmul.f32 %v11643_v52, %v5210_v12 }
 0x521   : > { %v5245_v3 = vmul.f32 %v11643_v52, %v5213_v43  ;;  %v5244_v57 = vmul.f32 %v11643_v52, %v5212_v63  ;;  %v5247_v60 = vmul.f32 %v11643_v52, %v5215_v25  ;;  %v5246_v6 = vmul.f32 %v11643_v52, %v5214_v9  ;;  %v5189_v43 = vld [vmem:[#allocation3 + $0x168] sm:$0xff]  ;;  %v5188_v63 = vld [vmem:[#allocation3 + $0x160] sm:$0xff]  ;;  %v5191_v25 = vld [vmem:[#allocation3 + $0x178] sm:$0xff] }
 0x522   : > { %v5273_v53 = vmax.f32 %v5241_v8, 0.0  ;;  %v5272_v10 = vmax.f32 %v5240_v59, 0.0  ;;  %v5275_v42 = vmax.f32 %v5243_v23, 0.0  ;;  %v5274_v5 = vmax.f32 %v5242_v61, 0.0  ;;  %v5187_v8 = vld [vmem:[#allocation3 + $0x158] sm:$0xff]  ;;  %v5186_v59 = vld [vmem:[#allocation3 + $0x150] sm:$0xff] }
 0x523   : > { %v5277_v28 = vmax.f32 %v5245_v3, 0.0  ;;  %v5276_v51 = vmax.f32 %v5244_v57, 0.0  ;;  %v5279_v1 = vmax.f32 %v5247_v60, 0.0  ;;  %v5278_v36 = vmax.f32 %v5246_v6, 0.0  ;;  %v5190_v9 = vld [vmem:[#allocation3 + $0x170] sm:$0xff] }
 0x524   : > { %5594 = vrot.lane.b32.xlu1 %v5273_v53, %s8330_s23  ;;  %5592 = vrot.lane.b32.xlu0 %v5272_v10, %s8330_s23  ;;  %v5249_v33 = vmul.f32 %v11643_v52, %v5217_v22  ;;  %v5248_v37 = vmul.f32 %v11643_v52, %v5216_v58  ;;  %v5219_v34 = vsub.f32 %v5187_v8, %v11619_v47  ;;  %v11687_v53 = vpop.permute.xlu1 %5398  ;;  %v11689_v10 = vpop.permute.xlu0 %5396 }
 0x525   : > { %v5218_v12 = vsub.f32 %v5186_v59, %v11619_v47  ;;  %14186 = vst [vmem:[#allocation49_spill] sm:$0xff] %v11687_v53  ;;  %14187 = vst [vmem:[#allocation33_spill] sm:$0xff] %v11689_v10  ;;  %v5223_v60 = vsub.f32 %v5191_v25, %v11619_v47  ;;  %v5222_v6 = vsub.f32 %v5190_v9, %v11619_v47  ;;  %v8040_v53 = vld [vmem:[%s8602_s5 + $0x108] sm:$0xff] }
 0x526   : > { %v5281_v23 = vmax.f32 %v5249_v33, 0.0  ;;  %v5280_v61 = vmax.f32 %v5248_v37, 0.0  ;;  %v5251_v50 = vmul.f32 %v11643_v52, %v5219_v34 }
 0x527   : > { %v5250_v41 = vmul.f32 %v11643_v52, %v5218_v12  ;;  %v5255_v22 = vmul.f32 %v11643_v52, %v5223_v60  ;;  %v5254_v58 = vmul.f32 %v11643_v52, %v5222_v6 }
 0x528   : > { %5598 = vrot.lane.b32.xlu1 %v5275_v42, %s8330_s23  ;;  %5596 = vrot.lane.b32.xlu0 %v5274_v5, %s8330_s23  ;;  %v5221_v42 = vsub.f32 %v5189_v43, %v11619_v47  ;;  %v5220_v5 = vsub.f32 %v5188_v63, %v11619_v47  ;;  %v5283_v3 = vmax.f32 %v5251_v50, 0.0  ;;  %v5195_v50 = vld [vmem:[#allocation3 + $0x198] sm:$0xff] }
 0x529   : > { %v5282_v57 = vmax.f32 %v5250_v41, 0.0  ;;  %v5287_v34 = vmax.f32 %v5255_v22, 0.0  ;;  %v5286_v12 = vmax.f32 %v5254_v58, 0.0  ;;  %v5194_v41 = vld [vmem:[#allocation3 + $0x190] sm:$0xff]  ;;  %v5227_v43 = vsub.f32 %v5195_v50, %v11619_v47 }
 0x52a   : > { %v5253_v0 = vmul.f32 %v11643_v52, %v5221_v42  ;;  %v5252_v21 = vmul.f32 %v11643_v52, %v5220_v5  ;;  %v5226_v63 = vsub.f32 %v5194_v41, %v11619_v47 }
 0x52c   : > { %5602 = vrot.lane.b32.xlu1 %v5277_v28, %s8330_s23  ;;  %5600 = vrot.lane.b32.xlu0 %v5276_v51, %s8330_s23  ;;  %v11699_v28 = vpop.permute.xlu1 %5466  ;;  %v11701_v51 = vpop.permute.xlu0 %5464  ;;  %v5285_v62 = vmax.f32 %v5253_v0, 0.0  ;;  %v5284_v14 = vmax.f32 %v5252_v21, 0.0  ;;  %v5197_v0 = vld [vmem:[#allocation3 + $0x1a8] sm:$0xff]  ;;  %v5196_v21 = vld [vmem:[#allocation3 + $0x1a0] sm:$0xff] }
 0x52d   : > { %v5229_v60 = vsub.f32 %v5197_v0, %v11619_v47  ;;  %v5228_v6 = vsub.f32 %v5196_v21, %v11619_v47 }
 0x52f   : > { %v5261_v22 = vmul.f32 %v11643_v52, %v5229_v60  ;;  %v5260_v58 = vmul.f32 %v11643_v52, %v5228_v6  ;;  %v5203_v60 = vld [vmem:[#allocation3 + $0x1d8] sm:$0xff]  ;;  %v5202_v6 = vld [vmem:[#allocation3 + $0x1d0] sm:$0xff] }
 0x530   : > { %5606 = vrot.lane.b32.xlu1 %v5279_v1, %s8330_s23  ;;  %5604 = vrot.lane.b32.xlu0 %v5278_v36, %s8330_s23  ;;  %v5193_v1 = vld [vmem:[#allocation3 + $0x188] sm:$0xff]  ;;  %v5192_v36 = vld [vmem:[#allocation3 + $0x180] sm:$0xff]  ;;  %v11713_v8 = vpop.permute.xlu1 %5470  ;;  %v11715_v59 = vpop.permute.xlu0 %5468 }
 0x531   : > { %v5225_v33 = vsub.f32 %v5193_v1, %v11619_v47  ;;  %v5224_v37 = vsub.f32 %v5192_v36, %v11619_v47  ;;  %v5199_v1 = vld [vmem:[#allocation3 + $0x1b8] sm:$0xff]  ;;  %v5198_v36 = vld [vmem:[#allocation3 + $0x1b0] sm:$0xff] }
 0x534   : > { %5610 = vrot.lane.b32.xlu1 %v5281_v23, %s8330_s23  ;;  %5608 = vrot.lane.b32.xlu0 %v5280_v61, %s8330_s23  ;;  %v5257_v23 = vmul.f32 %v11643_v52, %v5225_v33  ;;  %v5256_v61 = vmul.f32 %v11643_v52, %v5224_v37  ;;  %v11725_v25 = vpop.permute.xlu1 %5474  ;;  %v11727_v9 = vpop.permute.xlu0 %5472  ;;  %v5231_v33 = vsub.f32 %v5199_v1, %v11619_v47 }
 0x535   : > { %v5230_v37 = vsub.f32 %v5198_v36, %v11619_v47 }
 0x536   : > { %v5289_v42 = vmax.f32 %v5257_v23, 0.0  ;;  %v5288_v5 = vmax.f32 %v5256_v61, 0.0  ;;  %v5293_v23 = vmax.f32 %v5261_v22, 0.0  ;;  %v5292_v61 = vmax.f32 %v5260_v58, 0.0 }
 0x537   : > { %v5263_v50 = vmul.f32 %v11643_v52, %v5231_v33  ;;  %v5262_v41 = vmul.f32 %v11643_v52, %v5230_v37  ;;  %v5235_v22 = vsub.f32 %v5203_v60, %v11619_v47  ;;  %v5234_v58 = vsub.f32 %v5202_v6, %v11619_v47 }
 0x538   : > { %5614 = vrot.lane.b32.xlu1 %v5283_v3, %s8330_s23  ;;  %5612 = vrot.lane.b32.xlu0 %v5282_v57, %s8330_s23  ;;  %v5259_v3 = vmul.f32 %v11643_v52, %v5227_v43  ;;  %v5258_v57 = vmul.f32 %v11643_v52, %v5226_v63  ;;  %v5201_v43 = vld [vmem:[#allocation3 + $0x1c8] sm:$0xff]  ;;  %v5200_v63 = vld [vmem:[#allocation3 + $0x1c0] sm:$0xff] }
 0x539   : > { %v5267_v33 = vmul.f32 %v11643_v52, %v5235_v22  ;;  %v5266_v37 = vmul.f32 %v11643_v52, %v5234_v58 }
 0x53c   : > { %5618 = vrot.lane.b32.xlu1 %v5285_v62, %s8330_s23  ;;  %5616 = vrot.lane.b32.xlu0 %v5284_v14, %s8330_s23  ;;  %v5291_v62 = vmax.f32 %v5259_v3, 0.0  ;;  %v5290_v14 = vmax.f32 %v5258_v57, 0.0  ;;  %v5295_v3 = vmax.f32 %v5263_v50, 0.0  ;;  %v5294_v57 = vmax.f32 %v5262_v41, 0.0 }
 0x540   : > { %5622 = vrot.lane.b32.xlu1 %v5287_v34, %s8330_s23  ;;  %5620 = vrot.lane.b32.xlu0 %v5286_v12, %s8330_s23  ;;  %v11739_v34 = vpop.permute.xlu1 %5478  ;;  %v11741_v12 = vpop.permute.xlu0 %5476 }
 0x544   : > { %5626 = vrot.lane.b32.xlu1 %v5289_v42, %s8330_s23  ;;  %5624 = vrot.lane.b32.xlu0 %v5288_v5, %s8330_s23  ;;  %v5233_v42 = vsub.f32 %v5201_v43, %v11619_v47  ;;  %v5232_v5 = vsub.f32 %v5200_v63, %v11619_v47 }
 0x546   : > { %v5265_v0 = vmul.f32 %v11643_v52, %v5233_v42  ;;  %v5264_v21 = vmul.f32 %v11643_v52, %v5232_v5  ;;  %v5299_v42 = vmax.f32 %v5267_v33, 0.0  ;;  %v5298_v5 = vmax.f32 %v5266_v37, 0.0 }
 0x548   : > { %5630 = vrot.lane.b32.xlu1 %v5291_v62, %s8330_s23  ;;  %5628 = vrot.lane.b32.xlu0 %v5290_v14, %s8330_s23  ;;  %v11751_v62 = vpop.permute.xlu1 %5482  ;;  %v11753_v14 = vpop.permute.xlu0 %5480  ;;  %v5297_v1 = vmax.f32 %v5265_v0, 0.0  ;;  %v5296_v36 = vmax.f32 %v5264_v21, 0.0  ;;  %v5207_v0 = vld [vmem:[#allocation3 + $0x1f8] sm:$0xff]  ;;  %v5206_v21 = vld [vmem:[#allocation3 + $0x1f0] sm:$0xff] }
 0x549   : > { %v5239_v60 = vsub.f32 %v5207_v0, %v11619_v47  ;;  %v5238_v6 = vsub.f32 %v5206_v21, %v11619_v47  ;;  %v8026_v0 = vld [vmem:[%s8602_s5 + $0x28] sm:$0xff]  ;;  %v8027_v21 = vld [vmem:[%s8602_s5 + $0x20] sm:$0xff] }
 0x54c   : > { %5634 = vrot.lane.b32.xlu1 %v5293_v23, %s8330_s23  ;;  %5632 = vrot.lane.b32.xlu0 %v5292_v61, %s8330_s23  ;;  %v5205_v23 = vld [vmem:[#allocation3 + $0x1e8] sm:$0xff]  ;;  %v5204_v61 = vld [vmem:[#allocation3 + $0x1e0] sm:$0xff]  ;;  %v11765_v43 = vpop.permute.xlu1 %5486  ;;  %v11767_v63 = vpop.permute.xlu0 %5484 }
 0x54d   : > { %v5237_v50 = vsub.f32 %v5205_v23, %v11619_v47  ;;  %v5236_v41 = vsub.f32 %v5204_v61, %v11619_v47  ;;  %14188 = vst [vmem:[#allocation40_spill] sm:$0xff] %v11765_v43  ;;  %14189 = vst [vmem:[#allocation86_spill] sm:$0xff] %v11767_v63  ;;  %v5055_v63 = vld [vmem:[#allocation3 + $0x38] sm:$0xff] }
 0x550   : > { %5638 = vrot.lane.b32.xlu1 %v5295_v3, %s8330_s23  ;;  %5636 = vrot.lane.b32.xlu0 %v5294_v57, %s8330_s23  ;;  %v5269_v3 = vmul.f32 %v11643_v52, %v5237_v50  ;;  %v5268_v57 = vmul.f32 %v11643_v52, %v5236_v41  ;;  %v11777_v33 = vpop.permute.xlu1 %5490  ;;  %v11779_v37 = vpop.permute.xlu0 %5488 }
 0x551   : > { %14190 = vst [vmem:[#allocation31_spill] sm:$0xff] %v11777_v33  ;;  %14191 = vst [vmem:[#allocation48_spill] sm:$0xff] %v11779_v37  ;;  %v7472_v33 = vld [vmem:[%s8602_s5 + $0x158] sm:$0xff] }
 0x552   : > { %v5301_v22 = vmax.f32 %v5269_v3, 0.0  ;;  %v5300_v58 = vmax.f32 %v5268_v57, 0.0 }
 0x554   : > { %5642 = vrot.lane.b32.xlu1 %v5297_v1, %s8330_s23  ;;  %5640 = vrot.lane.b32.xlu0 %v5296_v36, %s8330_s23  ;;  %v5271_v1 = vmul.f32 %v11643_v52, %v5239_v60  ;;  %v5270_v36 = vmul.f32 %v11643_v52, %v5238_v6  ;;  %v11785_v50 = vpop.permute.xlu1 %5494  ;;  %v11787_v41 = vpop.permute.xlu0 %5492  ;;  %v8028_v60 = vld [vmem:[%s8602_s5 + $0x48] sm:$0xff]  ;;  %v8029_v6 = vld [vmem:[%s8602_s5 + $0x40] sm:$0xff] }
 0x555   : > { %14192 = vst [vmem:[#allocation54_spill] sm:$0xff] %v11785_v50  ;;  %14193 = vst [vmem:[#allocation18_spill] sm:$0xff] %v11787_v41  ;;  %v7457_v50 = vld [vmem:[%s8602_s5 + $0x70] sm:$0xff] }
 0x556   : > { %v5303_v23 = vmax.f32 %v5271_v1, 0.0  ;;  %v5302_v61 = vmax.f32 %v5270_v36, 0.0  ;;  %v8030_v1 = vld [vmem:[%s8602_s5 + $0x68] sm:$0xff]  ;;  %v8031_v36 = vld [vmem:[%s8602_s5 + $0x60] sm:$0xff] }
 0x558   : > { %5646 = vrot.lane.b32.xlu1 %v5299_v42, %s8330_s23  ;;  %5644 = vrot.lane.b32.xlu0 %v5298_v5, %s8330_s23  ;;  %v8024_v42 = vld [vmem:[%s8602_s5 + $0x8] sm:$0xff]  ;;  %v8025_v5 = vld [vmem:[%s8602_s5] sm:$0xff]  ;;  %v11793_v3 = vpop.permute.xlu1 %5498  ;;  %v11795_v57 = vpop.permute.xlu0 %5496 }
 0x559   : > { %14194 = vst [vmem:[#allocation70_spill] sm:$0xff] %v11793_v3  ;;  %14195 = vst [vmem:[#allocation50_spill] sm:$0xff] %v11795_v57  ;;  %v7452_v57 = vld [vmem:[%s8602_s5 + $0x18] sm:$0xff]  ;;  %v7451_v3 = vld [vmem:[%s8602_s5 + $0x10] sm:$0xff] }
 0x55c   : > { %5650 = vrot.lane.b32.xlu1 %v5301_v22, %s8330_s23  ;;  %5648 = vrot.lane.b32.xlu0 %v5300_v58, %s8330_s23  ;;  %v11805_v22 = vpop.permute.xlu1 %5502  ;;  %v11807_v58 = vpop.permute.xlu0 %5500 }
 0x55d   : > { %14196 = vst [vmem:[#allocation51_spill] sm:$0xff] %v11805_v22  ;;  %14197 = vst [vmem:[#allocation52_spill] sm:$0xff] %v11807_v58  ;;  %v8068_v22 = vld [vmem:[%s11189_s28 + $0xc8] sm:$0xff] }
 0x560   : > { %5654 = vrot.lane.b32.xlu1 %v5303_v23, %s8330_s23  ;;  %5652 = vrot.lane.b32.xlu0 %v5302_v61, %s8330_s23  ;;  %v11813_v23 = vpop.permute.xlu1 %5506  ;;  %v11815_v61 = vpop.permute.xlu0 %5504 }
 0x561   : > { %14198 = vst [vmem:[#allocation59_spill] sm:$0xff] %v11813_v23  ;;  %14199 = vst [vmem:[#allocation39_spill] sm:$0xff] %v11815_v61  ;;  %v8064_v23 = vld [vmem:[%s11189_s28 + $0x88] sm:$0xff] }
 0x564   : > { %5690 = vrot.lane.b32.xlu1 %v8024_v42, %s8330_s23  ;;  %5688 = vrot.lane.b32.xlu0 %v8025_v5, %s8330_s23  ;;  %v8032_v42 = vld [vmem:[%s8602_s5 + $0x88] sm:$0xff]  ;;  %v8033_v5 = vld [vmem:[%s8602_s5 + $0x80] sm:$0xff] }
 0x568   : > { %5694 = vrot.lane.b32.xlu1 %v8026_v0, %s8330_s23  ;;  %5692 = vrot.lane.b32.xlu0 %v8027_v21, %s8330_s23  ;;  %v8034_v0 = vld [vmem:[%s8602_s5 + $0xa8] sm:$0xff]  ;;  %v8035_v21 = vld [vmem:[%s8602_s5 + $0xa0] sm:$0xff] }
 0x56c   : > { %5698 = vrot.lane.b32.xlu1 %v8028_v60, %s8330_s23  ;;  %5696 = vrot.lane.b32.xlu0 %v8029_v6, %s8330_s23  ;;  %v11825_v60 = vpop.permute.xlu1 %5510  ;;  %v11827_v6 = vpop.permute.xlu0 %5508 }
 0x56d   : > { %14200 = vst [vmem:[#allocation64_spill] sm:$0xff] %v11825_v60  ;;  %14201 = vst [vmem:[#allocation53_spill] sm:$0xff] %v11827_v6  ;;  %v8060_v60 = vld [vmem:[%s11189_s28 + $0x48] sm:$0xff] }
 0x570   : > { %5702 = vrot.lane.b32.xlu1 %v8030_v1, %s8330_s23  ;;  %5700 = vrot.lane.b32.xlu0 %v8031_v36, %s8330_s23  ;;  %v8036_v1 = vld [vmem:[%s8602_s5 + $0xc8] sm:$0xff]  ;;  %v8037_v36 = vld [vmem:[%s8602_s5 + $0xc0] sm:$0xff] }
 0x574   : > { %5706 = vrot.lane.b32.xlu1 %v8032_v42, %s8330_s23  ;;  %5704 = vrot.lane.b32.xlu0 %v8033_v5, %s8330_s23  ;;  %v11833_v42 = vpop.permute.xlu1 %5514  ;;  %v11835_v5 = vpop.permute.xlu0 %5512 }
 0x575   : > { %14202 = vst [vmem:[#allocation55_spill] sm:$0xff] %v11833_v42  ;;  %14203 = vst [vmem:[#allocation56_spill] sm:$0xff] %v11835_v5 }
 0x578   : > { %5710 = vrot.lane.b32.xlu1 %v8034_v0, %s8330_s23  ;;  %5708 = vrot.lane.b32.xlu0 %v8035_v21, %s8330_s23  ;;  %v8038_v0 = vld [vmem:[%s8602_s5 + $0xe8] sm:$0xff]  ;;  %v8039_v21 = vld [vmem:[%s8602_s5 + $0xe0] sm:$0xff]  ;;  %v11847_v10 = vpop.permute.xlu0 %5516 }
 0x579   : > { %14205 = vst [vmem:[#allocation17_spill] sm:$0xff] %v11847_v10  ;;  %v8046_v10 = vld [vmem:[%s8602_s5 + $0x168] sm:$0xff] }
 0x57c   : > { %5714 = vrot.lane.b32.xlu1 %v8036_v1, %s8330_s23  ;;  %5712 = vrot.lane.b32.xlu0 %v8037_v36, %s8330_s23  ;;  %v8041_v1 = vld [vmem:[%s8602_s5 + $0x100] sm:$0xff]  ;;  %v11845_v36 = vpop.permute.xlu1 %5518  ;;  %v11855_v18 = vpop.permute.xlu0 %5520 }
 0x57d   : > { %14204 = vst [vmem:[#allocation67_spill] sm:$0xff] %v11845_v36  ;;  %14207 = vst [vmem:[#allocation57_spill] sm:$0xff] %v11855_v18  ;;  %v8048_v18 = vld [vmem:[%s8602_s5 + $0x188] sm:$0xff] }
 0x57e   : > { %v8050_v36 = vld [vmem:[%s8602_s5 + $0x1a8] sm:$0xff] }
 0x580   : > { %5718 = vrot.lane.b32.xlu1 %v8038_v0, %s8330_s23  ;;  %5716 = vrot.lane.b32.xlu0 %v8039_v21, %s8330_s23  ;;  %v8043_v0 = vld [vmem:[%s8602_s5 + $0x120] sm:$0xff]  ;;  %v11853_v21 = vpop.permute.xlu1 %5522 }
 0x581   : > { %14206 = vst [vmem:[#allocation24_spill] sm:$0xff] %v11853_v21  ;;  %v11867_v21 = vpop.permute.xlu0 %5524 }
 0x582   : > { %14209 = vst [vmem:[#allocation63_spill] sm:$0xff] %v11867_v21 }
 0x584   : > { %5722 = vrot.lane.b32.xlu1 %v8040_v53, %s8330_s23  ;;  %5720 = vrot.lane.b32.xlu0 %v8041_v1, %s8330_s23  ;;  %v8044_v53 = vld [vmem:[%s8602_s5 + $0x148] sm:$0xff]  ;;  %v8045_v1 = vld [vmem:[%s8602_s5 + $0x140] sm:$0xff] }
 0x588   : > { %5726 = vrot.lane.b32.xlu1 %v8042_v24, %s8330_s23  ;;  %5724 = vrot.lane.b32.xlu0 %v8043_v0, %s8330_s23  ;;  %v8047_v24 = vld [vmem:[%s8602_s5 + $0x160] sm:$0xff]  ;;  %v11865_v0 = vpop.permute.xlu1 %5526 }
 0x589   : > { %14208 = vst [vmem:[#allocation61_spill] sm:$0xff] %v11865_v0 }
 0x58c   : > { %5730 = vrot.lane.b32.xlu1 %v8044_v53, %s8330_s23  ;;  %5728 = vrot.lane.b32.xlu0 %v8045_v1, %s8330_s23  ;;  %v8049_v53 = vld [vmem:[%s8602_s5 + $0x180] sm:$0xff] }
 0x590   : > { %5734 = vrot.lane.b32.xlu1 %v8046_v10, %s8330_s23  ;;  %5732 = vrot.lane.b32.xlu0 %v8047_v24, %s8330_s23  ;;  %v8051_v24 = vld [vmem:[%s8602_s5 + $0x1a0] sm:$0xff] }
 0x594   : > { %5738 = vrot.lane.b32.xlu1 %v8048_v18, %s8330_s23  ;;  %5736 = vrot.lane.b32.xlu0 %v8049_v53, %s8330_s23  ;;  %v8052_v18 = vld [vmem:[%s8602_s5 + $0x1c8] sm:$0xff]  ;;  %v8053_v53 = vld [vmem:[%s8602_s5 + $0x1c0] sm:$0xff] }
 0x596   : > { %v11873_v1 = vpop.permute.xlu1 %5594  ;;  %v11875_v10 = vpop.permute.xlu0 %5592 }
 0x598   : > { %5742 = vrot.lane.b32.xlu1 %v8050_v36, %s8330_s23  ;;  %5740 = vrot.lane.b32.xlu0 %v8051_v24, %s8330_s23  ;;  %v8054_v36 = vld [vmem:[%s8602_s5 + $0x1e8] sm:$0xff]  ;;  %v8055_v24 = vld [vmem:[%s8602_s5 + $0x1e0] sm:$0xff] }
 0x59a   : > { %v11881_v21 = vpop.permute.xlu1 %5598  ;;  %v11883_v0 = vpop.permute.xlu0 %5596 }
 0x59c   : > { %5746 = vrot.lane.b32.xlu1 %v8052_v18, %s8330_s23  ;;  %5744 = vrot.lane.b32.xlu0 %v8053_v53, %s8330_s23  ;;  %v8056_v18 = vld [vmem:[%s11189_s28 + $0x8] sm:$0xff]  ;;  %v8057_v53 = vld [vmem:[%s11189_s28] sm:$0xff] }
 0x59e   : > { %v11889_v13 = vpop.permute.xlu1 %5602  ;;  %v11891_v40 = vpop.permute.xlu0 %5600 }
 0x5a0   : > { %5750 = vrot.lane.b32.xlu1 %v8054_v36, %s8330_s23  ;;  %5748 = vrot.lane.b32.xlu0 %v8055_v24, %s8330_s23  ;;  %v8058_v24 = vld [vmem:[%s11189_s28 + $0x28] sm:$0xff] }
 0x5a2   : > { %v11897_v5 = vpop.permute.xlu1 %5606  ;;  %v11899_v42 = vpop.permute.xlu0 %5604 }
 0x5a4   : > { %5786 = vrot.lane.b32.xlu1 %v8056_v18, %s8331_s6  ;;  %5784 = vrot.lane.b32.xlu0 %v8057_v53, %s8331_s6  ;;  %v8061_v53 = vld [vmem:[%s11189_s28 + $0x40] sm:$0xff] }
 0x5a6   : > { %v11905_v45 = vpop.permute.xlu1 %5610  ;;  %v11907_v36 = vpop.permute.xlu0 %5608 }
 0x5a8   : > { %5790 = vrot.lane.b32.xlu1 %v8058_v24, %s8331_s6  ;;  %5788 = vrot.lane.b32.xlu0 %v8059_v4, %s8331_s6  ;;  %v8063_v4 = vld [vmem:[%s11189_s28 + $0x60] sm:$0xff] }
 0x5aa   : > { %v11913_v6 = vpop.permute.xlu1 %5614  ;;  %v11915_v18 = vpop.permute.xlu0 %5612 }
 0x5ab   : > { %14210 = vst [vmem:[#allocation73_spill] sm:$0xff] %v11913_v6  ;;  %14211 = vst [vmem:[#allocation76_spill] sm:$0xff] %v11915_v18 }
 0x5ac   : > { %5794 = vrot.lane.b32.xlu1 %v8060_v60, %s8331_s6  ;;  %5792 = vrot.lane.b32.xlu0 %v8061_v53, %s8331_s6  ;;  %v8065_v53 = vld [vmem:[%s11189_s28 + $0x80] sm:$0xff] }
 0x5ae   : > { %v11921_v7 = vpop.permute.xlu1 %5618  ;;  %v11923_v24 = vpop.permute.xlu0 %5616 }
 0x5af   : > { %14212 = vst [vmem:[#allocation36_spill] sm:$0xff] %v11921_v7  ;;  %14213 = vst [vmem:[#allocation65_spill] sm:$0xff] %v11923_v24  ;;  %v7459_v7 = vld [vmem:[%s8602_s5 + $0x90] sm:$0xff] }
 0x5b0   : > { %5798 = vrot.lane.b32.xlu1 %v8062_v15, %s8331_s6  ;;  %5796 = vrot.lane.b32.xlu0 %v8063_v4, %s8331_s6  ;;  %v8067_v4 = vld [vmem:[%s11189_s28 + $0xa0] sm:$0xff] }
 0x5b2   : > { %v11929_v61 = vpop.permute.xlu1 %5622  ;;  %v11931_v60 = vpop.permute.xlu0 %5620 }
 0x5b3   : > { %14214 = vst [vmem:[#allocation69_spill] sm:$0xff] %v11929_v61  ;;  %14215 = vst [vmem:[#allocation23_spill] sm:$0xff] %v11931_v60  ;;  %v7453_v61 = vld [vmem:[%s8602_s5 + $0x30] sm:$0xff] }
 0x5b4   : > { %5802 = vrot.lane.b32.xlu1 %v8064_v23, %s8331_s6  ;;  %5800 = vrot.lane.b32.xlu0 %v8065_v53, %s8331_s6  ;;  %v8069_v53 = vld [vmem:[%s11189_s28 + $0xc0] sm:$0xff] }
 0x5b6   : > { %v11937_v44 = vpop.permute.xlu1 %5626  ;;  %v11939_v15 = vpop.permute.xlu0 %5624 }
 0x5b7   : > { %14216 = vst [vmem:[#allocation71_spill] sm:$0xff] %v11937_v44  ;;  %14217 = vst [vmem:[#allocation75_spill] sm:$0xff] %v11939_v15  ;;  %v8070_v44 = vld [vmem:[%s11189_s28 + $0xe8] sm:$0xff] }
 0x5b8   : > { %5806 = vrot.lane.b32.xlu1 %v8066_v38, %s8331_s6  ;;  %5804 = vrot.lane.b32.xlu0 %v8067_v4, %s8331_s6  ;;  %v8071_v4 = vld [vmem:[%s11189_s28 + $0xe0] sm:$0xff] }
 0x5ba   : > { %v11945_v58 = vpop.permute.xlu1 %5630  ;;  %v11947_v23 = vpop.permute.xlu0 %5628 }
 0x5bb   : > { %14218 = vst [vmem:[#allocation77_spill] sm:$0xff] %v11945_v58  ;;  %14219 = vst [vmem:[#allocation79_spill] sm:$0xff] %v11947_v23  ;;  %v8072_v58 = vld [vmem:[%s11189_s28 + $0x108] sm:$0xff] }
 0x5bc   : > { %5810 = vrot.lane.b32.xlu1 %v8068_v22, %s8331_s6  ;;  %5808 = vrot.lane.b32.xlu0 %v8069_v53, %s8331_s6  ;;  %v8073_v53 = vld [vmem:[%s11189_s28 + $0x100] sm:$0xff] }
 0x5be   : > { %v11953_v15 = vpop.permute.xlu1 %5634  ;;  %v11955_v38 = vpop.permute.xlu0 %5632 }
 0x5bf   : > { %14220 = vst [vmem:[#allocation81_spill] sm:$0xff] %v11953_v15  ;;  %14221 = vst [vmem:[#allocation85_spill] sm:$0xff] %v11955_v38  ;;  %v8074_v15 = vld [vmem:[%s11189_s28 + $0x128] sm:$0xff] }
 0x5c0   : > { %5814 = vrot.lane.b32.xlu1 %v8070_v44, %s8331_s6  ;;  %5812 = vrot.lane.b32.xlu0 %v8071_v4, %s8331_s6  ;;  %v8075_v4 = vld [vmem:[%s11189_s28 + $0x120] sm:$0xff] }
 0x5c2   : > { %v11961_v23 = vpop.permute.xlu1 %5638  ;;  %v11963_v22 = vpop.permute.xlu0 %5636 }
 0x5c3   : > { %14222 = vst [vmem:[#allocation83_spill] sm:$0xff] %v11961_v23  ;;  %14223 = vst [vmem:[#allocation88_spill] sm:$0xff] %v11963_v22  ;;  %v8076_v23 = vld [vmem:[%s11189_s28 + $0x148] sm:$0xff] }
 0x5c4   : > { %5818 = vrot.lane.b32.xlu1 %v8072_v58, %s8331_s6  ;;  %5816 = vrot.lane.b32.xlu0 %v8073_v53, %s8331_s6  ;;  %v8077_v53 = vld [vmem:[%s11189_s28 + $0x140] sm:$0xff] }
 0x5c6   : > { %v11969_v38 = vpop.permute.xlu1 %5642  ;;  %v11971_v44 = vpop.permute.xlu0 %5640 }
 0x5c7   : > { %14224 = vst [vmem:[#allocation84_spill] sm:$0xff] %v11969_v38  ;;  %14225 = vst [vmem:[#allocation89_spill] sm:$0xff] %v11971_v44  ;;  %v8078_v38 = vld [vmem:[%s11189_s28 + $0x168] sm:$0xff] }
 0x5c8   : > { %5822 = vrot.lane.b32.xlu1 %v8074_v15, %s8331_s6  ;;  %5820 = vrot.lane.b32.xlu0 %v8075_v4, %s8331_s6  ;;  %v8079_v4 = vld [vmem:[%s11189_s28 + $0x160] sm:$0xff] }
 0x5ca   : > { %v11977_v22 = vpop.permute.xlu1 %5646  ;;  %v11979_v58 = vpop.permute.xlu0 %5644 }
 0x5cb   : > { %14226 = vst [vmem:[#allocation90_spill] sm:$0xff] %v11977_v22  ;;  %14227 = vst [vmem:[#allocation82_spill] sm:$0xff] %v11979_v58  ;;  %v8080_v22 = vld [vmem:[%s11189_s28 + $0x188] sm:$0xff] }
 0x5cc   : > { %5826 = vrot.lane.b32.xlu1 %v8076_v23, %s8331_s6  ;;  %5824 = vrot.lane.b32.xlu0 %v8077_v53, %s8331_s6  ;;  %v8081_v53 = vld [vmem:[%s11189_s28 + $0x180] sm:$0xff] }
 0x5ce   : > { %v11985_v44 = vpop.permute.xlu1 %5650  ;;  %v11987_v15 = vpop.permute.xlu0 %5648 }
 0x5cf   : > { %14228 = vst [vmem:[#allocation72_spill] sm:$0xff] %v11985_v44  ;;  %14229 = vst [vmem:[#allocation42_spill] sm:$0xff] %v11987_v15  ;;  %v8082_v44 = vld [vmem:[%s11189_s28 + $0x1a8] sm:$0xff] }
 0x5d0   : > { %5830 = vrot.lane.b32.xlu1 %v8078_v38, %s8331_s6  ;;  %5828 = vrot.lane.b32.xlu0 %v8079_v4, %s8331_s6  ;;  %v8083_v4 = vld [vmem:[%s11189_s28 + $0x1a0] sm:$0xff] }
 0x5d2   : > { %v11993_v58 = vpop.permute.xlu1 %5654  ;;  %v11995_v23 = vpop.permute.xlu0 %5652 }
 0x5d3   : > { %14230 = vst [vmem:[#allocation41_spill] sm:$0xff] %v11993_v58  ;;  %14231 = vst [vmem:[#allocation68_spill] sm:$0xff] %v11995_v23  ;;  %v8084_v58 = vld [vmem:[%s11189_s28 + $0x1c8] sm:$0xff] }
 0x5d4   : > { %5834 = vrot.lane.b32.xlu1 %v8080_v22, %s8331_s6  ;;  %5832 = vrot.lane.b32.xlu0 %v8081_v53, %s8331_s6  ;;  %v8085_v53 = vld [vmem:[%s11189_s28 + $0x1c0] sm:$0xff] }
 0x5d6   : > { %v12001_v15 = vpop.permute.xlu1 %5690  ;;  %v12003_v38 = vpop.permute.xlu0 %5688 }
 0x5d8   : > { %5838 = vrot.lane.b32.xlu1 %v8082_v44, %s8331_s6  ;;  %5836 = vrot.lane.b32.xlu0 %v8083_v4, %s8331_s6  ;;  %v8086_v44 = vld [vmem:[%s11189_s28 + $0x1e8] sm:$0xff]  ;;  %v8087_v4 = vld [vmem:[%s11189_s28 + $0x1e0] sm:$0xff] }
 0x5da   : > { %v12009_v23 = vpop.permute.xlu1 %5694  ;;  %v12011_v22 = vpop.permute.xlu0 %5692 }
 0x5dc   : > { %5842 = vrot.lane.b32.xlu1 %v8084_v58, %s8331_s6  ;;  %5840 = vrot.lane.b32.xlu0 %v8085_v53, %s8331_s6  ;;  %v7454_v53 = vld [vmem:[%s8602_s5 + $0x38] sm:$0xff] }
 0x5de   : > { %v12017_v2 = vpop.permute.xlu1 %5698  ;;  %v12019_v20 = vpop.permute.xlu0 %5696 }
 0x5e0   : > { %5846 = vrot.lane.b32.xlu1 %v8086_v44, %s8331_s6  ;;  %5844 = vrot.lane.b32.xlu0 %v8087_v4, %s8331_s6  ;;  %v7456_v4 = vld [vmem:[%s8602_s5 + $0x58] sm:$0xff] }
 0x5e2   : > { %v12027_v60 = vpop.permute.xlu1 %5702  ;;  %v12029_v58 = vpop.permute.xlu0 %5700 }
 0x5e4   : > { %6432 = vrot.lane.b32.xlu1 %v7452_v57, %s8327_s29  ;;  %6430 = vrot.lane.b32.xlu0 %v7451_v3, %s8327_s29  ;;  %v7458_v3 = vld [vmem:[%s8602_s5 + $0x78] sm:$0xff] }
 0x5e6   : > { %v12035_v56 = vpop.permute.xlu1 %5706  ;;  %v12037_v44 = vpop.permute.xlu0 %5704 }
 0x5e7   : > { %14232 = vst [vmem:[#allocation35_spill] sm:$0xff] %v12037_v44  ;;  %v7476_v44 = vld [vmem:[%s8602_s5 + $0x198] sm:$0xff] }
 0x5e8   : > { %6436 = vrot.lane.b32.xlu1 %v7454_v53, %s8327_s29  ;;  %6434 = vrot.lane.b32.xlu0 %v7453_v61, %s8327_s29  ;;  %v7460_v61 = vld [vmem:[%s8602_s5 + $0x98] sm:$0xff] }
 0x5ea   : > { %v12043_v41 = vpop.permute.xlu1 %5710  ;;  %v12045_v57 = vpop.permute.xlu0 %5708 }
 0x5eb   : > { %14233 = vst [vmem:[#allocation20_spill] sm:$0xff] %v12043_v41  ;;  %14234 = vst [vmem:[#allocation19_spill] sm:$0xff] %v12045_v57  ;;  %v7471_v57 = vld [vmem:[%s8602_s5 + $0x150] sm:$0xff]  ;;  %v5051_v41 = vld [vmem:[#allocation3 + $0x18] sm:$0xff] }
 0x5ec   : > { %6440 = vrot.lane.b32.xlu1 %v7456_v4, %s8327_s29  ;;  %6438 = vrot.lane.b32.xlu0 %v7455_v30, %s8327_s29  ;;  %v7462_v30 = vld [vmem:[%s8602_s5 + $0xb8] sm:$0xff] }
 0x5ee   : > { %v12051_v24 = vpop.permute.xlu1 %5714  ;;  %v12053_v53 = vpop.permute.xlu0 %5712 }
 0x5ef   : > { %14235 = vst [vmem:[#allocation26_spill] sm:$0xff] %v12051_v24  ;;  %14236 = vst [vmem:[#allocation74_spill] sm:$0xff] %v12053_v53  ;;  %v7461_v24 = vld [vmem:[%s8602_s5 + $0xb0] sm:$0xff] }
 0x5f0   : > { %6444 = vrot.lane.b32.xlu1 %v7458_v3, %s8327_s29  ;;  %6442 = vrot.lane.b32.xlu0 %v7457_v50, %s8327_s29  ;;  %v7464_v50 = vld [vmem:[%s8602_s5 + $0xd8] sm:$0xff] }
 0x5f2   : > { %v12059_v17 = vpop.permute.xlu1 %5718  ;;  %v12061_v4 = vpop.permute.xlu0 %5716 }
 0x5f3   : > { %14237 = vst [vmem:[#allocation16_spill] sm:$0xff] %v12059_v17  ;;  %14238 = vst [vmem:[#allocation38_spill] sm:$0xff] %v12061_v4  ;;  %v7463_v17 = vld [vmem:[%s8602_s5 + $0xd0] sm:$0xff] }
 0x5f4   : > { %6448 = vrot.lane.b32.xlu1 %v7460_v61, %s8327_s29  ;;  %6446 = vrot.lane.b32.xlu0 %v7459_v7, %s8327_s29  ;;  %v7466_v7 = vld [vmem:[%s8602_s5 + $0xf8] sm:$0xff] }
 0x5f6   : > { %v12067_v53 = vpop.permute.xlu1 %5722  ;;  %v12069_v3 = vpop.permute.xlu0 %5720 }
 0x5f7   : > { %14239 = vst [vmem:[#allocation60_spill] sm:$0xff] %v12067_v53  ;;  %14240 = vst [vmem:[#allocation80_spill] sm:$0xff] %v12069_v3  ;;  %v7465_v53 = vld [vmem:[%s8602_s5 + $0xf0] sm:$0xff] }
 0x5f8   : > { %6452 = vrot.lane.b32.xlu1 %v7462_v30, %s8327_s29  ;;  %6450 = vrot.lane.b32.xlu0 %v7461_v24, %s8327_s29  ;;  %v7468_v24 = vld [vmem:[%s8602_s5 + $0x118] sm:$0xff]  ;;  %v7467_v30 = vld [vmem:[%s8602_s5 + $0x110] sm:$0xff] }
 0x5fa   : > { %v12075_v4 = vpop.permute.xlu1 %5726  ;;  %v12077_v61 = vpop.permute.xlu0 %5724 }
 0x5fb   : > { %14241 = vst [vmem:[#allocation62_spill] sm:$0xff] %v12075_v4  ;;  %14242 = vst [vmem:[#allocation32_spill] sm:$0xff] %v12077_v61 }
 0x5fc   : > { %6456 = vrot.lane.b32.xlu1 %v7464_v50, %s8327_s29  ;;  %6454 = vrot.lane.b32.xlu0 %v7463_v17, %s8327_s29  ;;  %v7470_v17 = vld [vmem:[%s8602_s5 + $0x138] sm:$0xff]  ;;  %v7469_v50 = vld [vmem:[%s8602_s5 + $0x130] sm:$0xff] }
 0x5fe   : > { %v12083_v3 = vpop.permute.xlu1 %5730  ;;  %v12085_v26 = vpop.permute.xlu0 %5728 }
 0x5ff   : > { %14243 = vst [vmem:[#allocation91_spill] sm:$0xff] %v12083_v3  ;;  %14244 = vst [vmem:[#allocation92_spill] sm:$0xff] %v12085_v26  ;;  %v5049_v3 = vld [vmem:[#allocation3 + $0x8] sm:$0xff]  ;;  %v5048_v26 = vld [vmem:[#allocation3] sm:$0xff] }
 0x600   : > { %6460 = vrot.lane.b32.xlu1 %v7466_v7, %s8327_s29  ;;  %6458 = vrot.lane.b32.xlu0 %v7465_v53, %s8327_s29  ;;  %v5080_v53 = vsub.f32 %v5048_v26, %v11619_v47 }
 0x602   : > { %v12091_v4 = vpop.permute.xlu1 %5734  ;;  %v12093_v61 = vpop.permute.xlu0 %5732 }
 0x603   : > { %14245 = vst [vmem:[#allocation93_spill] sm:$0xff] %v12091_v4  ;;  %14246 = vst [vmem:[#allocation94_spill] sm:$0xff] %v12093_v61  ;;  %v5081_v4 = vsub.f32 %v5049_v3, %v11619_v47  ;;  %v5112_v61 = vmul.f32 %v11643_v52, %v5080_v53  ;;  %v5052_v3 = vld [vmem:[#allocation3 + $0x20] sm:$0xff] }
 0x604   : > { %6464 = vrot.lane.b32.xlu1 %v7468_v24, %s8327_s29  ;;  %6462 = vrot.lane.b32.xlu0 %v7467_v30, %s8327_s29  ;;  %v5050_v24 = vld [vmem:[#allocation3 + $0x10] sm:$0xff]  ;;  %v5084_v18 = vsub.f32 %v5052_v3, %v11619_v47 }
 0x605   : > { %v5113_v30 = vmul.f32 %v11643_v52, %v5081_v4  ;;  %v5144_v6 = vmax.f32 %v5112_v61, 0.0  ;;  %v5054_v3 = vld [vmem:[#allocation3 + $0x30] sm:$0xff] }
 0x606   : > { %v12099_v37 = vpop.permute.xlu1 %5738  ;;  %v12101_v7 = vpop.permute.xlu0 %5736  ;;  %v5086_v61 = vsub.f32 %v5054_v3, %v11619_v47  ;;  %v7475_v3 = vld [vmem:[%s8602_s5 + $0x190] sm:$0xff] }
 0x607   : > { %14247 = vst [vmem:[#allocation95_spill] sm:$0xff] %v12099_v37  ;;  %14248 = vst [vmem:[#allocation96_spill] sm:$0xff] %v12101_v7  ;;  %v5082_v7 = vsub.f32 %v5050_v24, %v11619_v47 }
 0x608   : > { %6468 = vrot.lane.b32.xlu1 %v7470_v17, %s8327_s29  ;;  %6466 = vrot.lane.b32.xlu0 %v7469_v50, %s8327_s29  ;;  %v5083_v17 = vsub.f32 %v5051_v41, %v11619_v47  ;;  %v5053_v50 = vld [vmem:[#allocation3 + $0x28] sm:$0xff] }
 0x609   : > { %v5114_v53 = vmul.f32 %v11643_v52, %v5082_v7  ;;  %v5085_v4 = vsub.f32 %v5053_v50, %v11619_v47  ;;  %v5057_v7 = vld [vmem:[#allocation3 + $0x48] sm:$0xff] }
 0x60a   : > { %v12112_v37 = vpop.permute.xlu1 %5742  ;;  %v12114_v26 = vpop.permute.xlu0 %5740  ;;  %v5115_v24 = vmul.f32 %v11643_v52, %v5083_v17  ;;  %v5056_v17 = vld [vmem:[#allocation3 + $0x40] sm:$0xff] }
 0x60b   : > { %14249 = vst [vmem:[#allocation97_spill] sm:$0xff] %v12112_v37  ;;  %14250 = vst [vmem:[#allocation98_spill] sm:$0xff] %v12114_v26  ;;  %v5145_v37 = vmax.f32 %v5113_v30, 0.0  ;;  %v7473_v26 = vld [vmem:[%s8602_s5 + $0x170] sm:$0xff]  ;;  %v5087_v30 = vsub.f32 %v5055_v63, %v11619_v47  ;;  %v5146_v50 = vmax.f32 %v5114_v53, 0.0  ;;  %v5089_v63 = vsub.f32 %v5057_v7, %v11619_v47 }
 0x60c   : > { %6472 = vrot.lane.b32.xlu1 %v7472_v33, %s8327_s29  ;;  %6470 = vrot.lane.b32.xlu0 %v7471_v57, %s8327_s29  ;;  %v12130_v33 = vmul.f32 %v11643_v52, %v5084_v18  ;;  %v12133_v57 = vmul.f32 %v11643_v52, %v5085_v4  ;;  %v5147_v18 = vmax.f32 %v5115_v24, 0.0  ;;  %v5880_v4 = vsel %vm305_vm0, %v5144_v6, %v11585_v35  ;;  %v5059_v6 = vld [vmem:[#allocation3 + $0x58] sm:$0xff] }
 0x60d   : > { %v5881_v43 = vsel %vm305_vm0, %v5145_v37, %v11583_v11  ;;  %v12159_v35 = vmul.f32 %v11643_v52, %v5087_v30  ;;  %v5912_v7 = vsel %vm970_vm2, %v5880_v4, %v11701_v51  ;;  %v7478_v51 = vld [vmem:[%s8602_s5 + $0x1b8] sm:$0xff]  ;;  %v7477_v30 = vld [vmem:[%s8602_s5 + $0x1b0] sm:$0xff] }
 0x60e   : > { %v12125_v31 = vpop.permute.xlu1 %5746  ;;  %v12127_v41 = vpop.permute.xlu0 %5744  ;;  %v5148_v11 = vmax.f32 %v12130_v33, 0.0  ;;  %v5149_v37 = vmax.f32 %v12133_v57, 0.0  ;;  %v5060_v33 = vld [vmem:[#allocation3 + $0x60] sm:$0xff]  ;;  %v5883_v57 = vsel %vm305_vm0, %v5147_v18, %v11593_v46 }
 0x60f   : > { %14251 = vst [vmem:[#allocation99_spill] sm:$0xff] %v12125_v31  ;;  %14252 = vst [vmem:[#allocation100_spill] sm:$0xff] %v12127_v41  ;;  %v12139_v41 = vld [vmem:[#allocation3 + $0x50] sm:$0xff]  ;;  %v5088_v31 = vsub.f32 %v5056_v17, %v11619_v47  ;;  %v5913_v17 = vsel %vm970_vm2, %v5881_v43, %v11699_v28  ;;  %v5091_v28 = vsub.f32 %v5059_v6, %v11619_v47  ;;  %v5061_v6 = vld [vmem:[#allocation3 + $0x68] sm:$0xff] }
 0x610   : > { %6476 = vrot.lane.b32.xlu1 %v7474_v55, %s8327_s29  ;;  %6474 = vrot.lane.b32.xlu0 %v7473_v26, %s8327_s29  ;;  %v5090_v55 = vsub.f32 %v12139_v41, %v11619_v47  ;;  %v12152_v26 = vmul.f32 %v11643_v52, %v5086_v61  ;;  %v5882_v41 = vsel %vm305_vm0, %v5146_v50, %v11595_v27 }
 0x611   : > { %v5946_v61 = vsel %vm5944_vm5, %v5913_v17, %v11873_v1  ;;  %v5945_v27 = vsel %vm5944_vm5, %v5912_v7, %v11875_v10  ;;  %v5092_v43 = vsub.f32 %v5060_v33, %v11619_v47  ;;  %v5121_v1 = vmul.f32 %v11643_v52, %v5089_v63 }
 0x612   : > { %v12154_v53 = vpop.permute.xlu1 %5750  ;;  %v12156_v24 = vpop.permute.xlu0 %5748  ;;  %v5978_v46 = vsel %vm5977_vm6, %v5945_v27, %v12003_v38  ;;  %v5120_v10 = vmul.f32 %v11643_v52, %v5088_v31  ;;  %v5150_v7 = vmax.f32 %v12152_v26, 0.0  ;;  %v5914_v38 = vsel %vm970_vm2, %v5882_v41, %v11715_v59  ;;  %v12204_v31 = vld [vmem:[#allocation3 + $0x70] sm:$0xff] }
 0x613   : > { %v5915_v17 = vsel %vm970_vm2, %v5883_v57, %v11713_v8  ;;  %v5884_v59 = vsel %vm305_vm0, %v5148_v11, %v11599_v32  ;;  %v5885_v8 = vsel %vm305_vm0, %v5149_v37, %v11597_v39  ;;  %v5947_v26 = vsel %vm5944_vm5, %v5914_v38, %v11883_v0  ;;  %v7479_v41 = vld [vmem:[%s8602_s5 + $0x1d0] sm:$0xff] }
 0x614   : > { %6480 = vrot.lane.b32.xlu1 %v7476_v44, %s8327_s29  ;;  %6478 = vrot.lane.b32.xlu0 %v7475_v3, %s8327_s29  ;;  %v5979_v44 = vsel %vm5977_vm6, %v5946_v61, %v12001_v15  ;;  %v5151_v15 = vmax.f32 %v12159_v35, 0.0  ;;  %v5948_v63 = vsel %vm5944_vm5, %v5915_v17, %v11881_v21  ;;  %v7480_v35 = vld [vmem:[%s8602_s5 + $0x1d8] sm:$0xff]  ;;  %v5093_v33 = vsub.f32 %v5061_v6, %v11619_v47  ;;  %v5065_v6 = vld [vmem:[#allocation3 + $0x88] sm:$0xff] }
 0x615   : > { %v5094_v57 = vsub.f32 %v12204_v31, %v11619_v47  ;;  %v5981_v32 = vsel %vm5977_vm6, %v5948_v63, %v12009_v23  ;;  %v5980_v39 = vsel %vm5977_vm6, %v5947_v26, %v12011_v22  ;;  %v5153_v37 = vmax.f32 %v5121_v1, 0.0  ;;  %v7484_v17 = vld [vmem:[%s11189_s28 + $0x18] sm:$0xff] }
 0x616   : > { %v5787_v50 = vpop.permute.xlu1 %5786  ;;  %v5785_v18 = vpop.permute.xlu0 %5784  ;;  %v12224_v0 = vmul.f32 %v11643_v52, %v5090_v55  ;;  %v5916_v23 = vsel %vm970_vm2, %v5884_v59, %v11727_v9  ;;  %v5917_v22 = vsel %vm970_vm2, %v5885_v8, %v11725_v25  ;;  %v5063_v55 = vld [vmem:[#allocation3 + $0x78] sm:$0xff]  ;;  %v12251_v1 = vmul.f32 %v11643_v52, %v5092_v43 }
 0x617   : > { %v6012_v4 = vsel %vm6010_vm7, %v5979_v44, %v5787_v50  ;;  %v6011_v3 = vsel %vm6010_vm7, %v5978_v46, %v5785_v18  ;;  %v5886_v44 = vsel %vm305_vm0, %v5150_v7, %v11604_v29  ;;  %v5950_v9 = vsel %vm5944_vm5, %v5917_v22, %v11889_v13  ;;  %v7482_v46 = vld [vmem:[%s8602_s5 + $0x1f8] sm:$0xff]  ;;  %v7481_v50 = vld [vmem:[%s8602_s5 + $0x1f0] sm:$0xff] }
 0x618   : > { %6045 = vst.msk [vmem:[%s12196_s26 + $0x8] sm:$0xff] %vm6043_vm8, %v6012_v4  ;;  %6044 = vst.msk [vmem:[%s12196_s26] sm:$0xff] %vm6043_vm8, %v6011_v3  ;;  %6484 = vrot.lane.b32.xlu1 %v7478_v51, %s8327_s29  ;;  %6482 = vrot.lane.b32.xlu0 %v7477_v30, %s8327_s29  ;;  %v5123_v51 = vmul.f32 %v11643_v52, %v5091_v28  ;;  %v5152_v30 = vmax.f32 %v5120_v10, 0.0  ;;  %v5887_v28 = vsel %vm305_vm0, %v5151_v15, %v11602_v54 }
 0x619   : > { %v5949_v25 = vsel %vm5944_vm5, %v5916_v23, %v11891_v40  ;;  %v5095_v18 = vsub.f32 %v5063_v55, %v11619_v47  ;;  %v5983_v29 = vsel %vm5977_vm6, %v5950_v9, %v12017_v2  ;;  %v5889_v40 = vsel %vm305_vm0, %v5153_v37, %v11607_v49  ;;  %v5064_v49 = vld [vmem:[#allocation3 + $0x80] sm:$0xff] }
 0x61a   : > { %v5791_v11 = vpop.permute.xlu1 %5790  ;;  %v5789_v21 = vpop.permute.xlu0 %5788  ;;  %v5982_v54 = vsel %vm5977_vm6, %v5949_v25, %v12019_v20  ;;  %v12260_v4 = vmul.f32 %v11643_v52, %v5093_v33  ;;  %v5888_v2 = vsel %vm305_vm0, %v5152_v30, %v11609_v48  ;;  %v5918_v20 = vsel %vm970_vm2, %v5886_v44, %v11741_v12  ;;  %v14253_v30 = vld [vmem:[#allocation35_spill] sm:$0xff]  ;;  %v14254_v25 = vld [vmem:[#allocation40_spill] sm:$0xff] }
 0x61b   : > { %v6014_v61 = vsel %vm6010_vm7, %v5981_v32, %v5791_v11  ;;  %v6013_v27 = vsel %vm6010_vm7, %v5980_v39, %v5789_v21  ;;  %v5919_v7 = vsel %vm970_vm2, %v5887_v28, %v11739_v34  ;;  %v5154_v15 = vmax.f32 %v12224_v0, 0.0  ;;  %v7483_v34 = vld [vmem:[%s11189_s28 + $0x10] sm:$0xff]  ;;  %v5067_v32 = vld [vmem:[#allocation3 + $0x98] sm:$0xff]  ;;  %v5069_v28 = vld [vmem:[#allocation3 + $0xa8] sm:$0xff] }
 0x61c   : > { %6047 = vst.msk [vmem:[%s12196_s26 + $0x28] sm:$0xff] %vm6043_vm8, %v6014_v61  ;;  %6046 = vst.msk [vmem:[%s12196_s26 + $0x20] sm:$0xff] %vm6043_vm8, %v6013_v27  ;;  %6488 = vrot.lane.b32.xlu1 %v7480_v35, %s8327_s29  ;;  %6486 = vrot.lane.b32.xlu0 %v7479_v41, %s8327_s29  ;;  %v5155_v38 = vmax.f32 %v5123_v51, 0.0  ;;  %v5952_v48 = vsel %vm5944_vm5, %v5919_v7, %v11897_v5  ;;  %v5951_v12 = vsel %vm5944_vm5, %v5918_v20, %v11899_v42  ;;  %v5066_v11 = vld [vmem:[#allocation3 + $0x90] sm:$0xff] }
 0x61d   : > { %v5096_v31 = vsub.f32 %v5064_v49, %v11619_v47  ;;  %v5097_v59 = vsub.f32 %v5065_v6, %v11619_v47  ;;  %v5985_v8 = vsel %vm5977_vm6, %v5952_v48, %v12027_v60  ;;  %v5984_v63 = vsel %vm5977_vm6, %v5951_v12, %v12029_v58  ;;  %v7486_v0 = vld [vmem:[%s11189_s28 + $0x38] sm:$0xff]  ;;  %v7485_v61 = vld [vmem:[%s11189_s28 + $0x30] sm:$0xff]  ;;  %v14260_v49 = vld [vmem:[#allocation20_spill] sm:$0xff] }
 0x61e   : > { %v5795_v10 = vpop.permute.xlu1 %5794  ;;  %v5793_v13 = vpop.permute.xlu0 %5792  ;;  %v12290_v5 = vmul.f32 %v11643_v52, %v5094_v57  ;;  %v12293_v42 = vmul.f32 %v11643_v52, %v5095_v18  ;;  %v5921_v60 = vsel %vm970_vm2, %v5889_v40, %v11751_v62  ;;  %v5920_v58 = vsel %vm970_vm2, %v5888_v2, %v11753_v14  ;;  %v14258_v40 = vld [vmem:[#allocation73_spill] sm:$0xff]  ;;  %v7488_v6 = vld [vmem:[%s11189_s28 + $0x58] sm:$0xff]  ;;  %v7487_v2 = vld [vmem:[%s11189_s28 + $0x50] sm:$0xff] }
 0x61f   : > { %v6016_v3 = vsel %vm6010_vm7, %v5983_v29, %v5795_v10  ;;  %v6015_v43 = vsel %vm6010_vm7, %v5982_v54, %v5793_v13  ;;  %v5156_v39 = vmax.f32 %v12251_v1, 0.0  ;;  %v5157_v57 = vmax.f32 %v12260_v4, 0.0  ;;  %v5068_v1 = vld [vmem:[#allocation3 + $0xa0] sm:$0xff]  ;;  %v14256_v29 = vld [vmem:[#allocation66_spill] sm:$0xff]  ;;  %v14257_v10 = vld [vmem:[#allocation25_spill] sm:$0xff] }
 0x620   : > { %6049 = vst.msk [vmem:[%s12196_s26 + $0x48] sm:$0xff] %vm6043_vm8, %v6016_v3  ;;  %6048 = vst.msk [vmem:[%s12196_s26 + $0x40] sm:$0xff] %vm6043_vm8, %v6015_v43  ;;  %6492 = vrot.lane.b32.xlu1 %v7482_v46, %s8327_s29  ;;  %6490 = vrot.lane.b32.xlu0 %v7481_v50, %s8327_s29  ;;  %v5891_v21 = vsel %vm305_vm0, %v5155_v38, %v11611_v19  ;;  %v5890_v62 = vsel %vm305_vm0, %v5154_v15, %v11613_v16  ;;  %v5159_v9 = vmax.f32 %v12293_v42, 0.0  ;;  %v14255_v50 = vld [vmem:[#allocation86_spill] sm:$0xff]  ;;  %v14259_v3 = vld [vmem:[#allocation76_spill] sm:$0xff] }
 0x621   : > { %v5954_v14 = vsel %vm5944_vm5, %v5921_v60, %v11905_v45  ;;  %v5953_v37 = vsel %vm5944_vm5, %v5920_v58, %v11907_v36  ;;  %v5098_v27 = vsub.f32 %v5066_v11, %v11619_v47  ;;  %v5099_v51 = vsub.f32 %v5067_v32, %v11619_v47  ;;  %v14261_v38 = vld [vmem:[#allocation19_spill] sm:$0xff]  ;;  %v5070_v32 = vld [vmem:[#allocation3 + $0xb0] sm:$0xff]  ;;  %v14264_v60 = vld [vmem:[#allocation44_spill] sm:$0xff] }
 0x622   : > { %v5799_v26 = vpop.permute.xlu1 %5798  ;;  %v5797_v35 = vpop.permute.xlu0 %5796  ;;  %v5987_v19 = vsel %vm5977_vm6, %v5954_v14, %v12035_v56  ;;  %v5986_v16 = vsel %vm5977_vm6, %v5953_v37, %v14253_v30  ;;  %v12326_v45 = vmul.f32 %v11643_v52, %v5096_v31  ;;  %v12329_v36 = vmul.f32 %v11643_v52, %v5097_v59  ;;  %v14266_v11 = vld [vmem:[#allocation36_spill] sm:$0xff]  ;;  %v12390_v37 = vld [vmem:[%s11189_s28 + $0x78] sm:$0xff]  ;;  %v14269_v30 = vld [vmem:[#allocation74_spill] sm:$0xff] }
 0x623   : > { %v6018_v41 = vsel %vm6010_vm7, %v5985_v8, %v5799_v26  ;;  %v6017_v33 = vsel %vm6010_vm7, %v5984_v63, %v5797_v35  ;;  %v5158_v56 = vmax.f32 %v12290_v5, 0.0  ;;  %v5923_v46 = vsel %vm970_vm2, %v5891_v21, %v14254_v25  ;;  %v5071_v63 = vld [vmem:[#allocation3 + $0xb8] sm:$0xff]  ;;  %v14270_v25 = vld [vmem:[#allocation54_spill] sm:$0xff] }
 0x624   : > { %6051 = vst.msk [vmem:[%s12196_s26 + $0x68] sm:$0xff] %vm6043_vm8, %v6018_v41  ;;  %6050 = vst.msk [vmem:[%s12196_s26 + $0x60] sm:$0xff] %vm6043_vm8, %v6017_v33  ;;  %6560 = vrot.lane.b32.xlu1 %v7484_v17, %s8328_s21  ;;  %6558 = vrot.lane.b32.xlu0 %v7483_v34, %s8328_s21  ;;  %v5922_v18 = vsel %vm970_vm2, %v5890_v62, %v14255_v50  ;;  %v5892_v54 = vsel %vm305_vm0, %v5156_v39, %v14256_v29  ;;  %v5160_v26 = vmax.f32 %v12326_v45, 0.0  ;;  %v14262_v5 = vld [vmem:[#allocation31_spill] sm:$0xff]  ;;  %v14263_v41 = vld [vmem:[#allocation48_spill] sm:$0xff] }
 0x625   : > { %v5893_v13 = vsel %vm305_vm0, %v5157_v57, %v14257_v10  ;;  %v5956_v4 = vsel %vm5944_vm5, %v5923_v46, %v14258_v40  ;;  %v5955_v43 = vsel %vm5944_vm5, %v5922_v18, %v14259_v3  ;;  %v5100_v20 = vsub.f32 %v5068_v1, %v11619_v47  ;;  %v14265_v39 = vld [vmem:[#allocation37_spill] sm:$0xff]  ;;  %v14271_v50 = vld [vmem:[#allocation18_spill] sm:$0xff]  ;;  %v5072_v1 = vld [vmem:[#allocation3 + $0xc0] sm:$0xff] }
 0x626   : > { %v5803_v23 = vpop.permute.xlu1 %5802  ;;  %v5801_v22 = vpop.permute.xlu0 %5800  ;;  %v5101_v7 = vsub.f32 %v5069_v28, %v11619_v47  ;;  %v5989_v15 = vsel %vm5977_vm6, %v5956_v4, %v14260_v49  ;;  %v5988_v48 = vsel %vm5977_vm6, %v5955_v43, %v14261_v38  ;;  %v12362_v34 = vmul.f32 %v11643_v52, %v5098_v27  ;;  %v14267_v62 = vld [vmem:[#allocation65_spill] sm:$0xff]  ;;  %v14272_v29 = vld [vmem:[#allocation22_spill] sm:$0xff]  ;;  %v14275_v3 = vld [vmem:[#allocation23_spill] sm:$0xff] }
 0x627   : > { %v6020_v55 = vsel %vm6010_vm7, %v5987_v19, %v5803_v23  ;;  %v6019_v44 = vsel %vm6010_vm7, %v5986_v16, %v5801_v22  ;;  %v12365_v31 = vmul.f32 %v11643_v52, %v5099_v51  ;;  %v5161_v35 = vmax.f32 %v12329_v36, 0.0  ;;  %v14268_v51 = vld [vmem:[#allocation26_spill] sm:$0xff]  ;;  %v5073_v28 = vld [vmem:[#allocation3 + $0xc8] sm:$0xff]  ;;  %v14276_v49 = vld [vmem:[#allocation16_spill] sm:$0xff] }
 0x628   : > { %6053 = vst.msk [vmem:[%s12196_s26 + $0x88] sm:$0xff] %vm6043_vm8, %v6020_v55  ;;  %6052 = vst.msk [vmem:[%s12196_s26 + $0x80] sm:$0xff] %vm6043_vm8, %v6019_v44  ;;  %6564 = vrot.lane.b32.xlu1 %v7486_v0, %s8328_s21  ;;  %6562 = vrot.lane.b32.xlu0 %v7485_v61, %s8328_s21  ;;  %v5925_v42 = vsel %vm970_vm2, %v5893_v13, %v14262_v5  ;;  %v5924_v33 = vsel %vm970_vm2, %v5892_v54, %v14263_v41  ;;  %v14273_v10 = vld [vmem:[#allocation78_spill] sm:$0xff]  ;;  %v14274_v40 = vld [vmem:[#allocation69_spill] sm:$0xff] }
 0x629   : > { %v5894_v58 = vsel %vm305_vm0, %v5158_v56, %v14264_v60  ;;  %v5895_v57 = vsel %vm305_vm0, %v5159_v9, %v14265_v39  ;;  %v5958_v21 = vsel %vm5944_vm5, %v5925_v42, %v14266_v11  ;;  %v5957_v14 = vsel %vm5944_vm5, %v5924_v33, %v14267_v62  ;;  %v12393_v0 = vld [vmem:[%s11189_s28 + $0x70] sm:$0xff]  ;;  %v14280_v60 = vld [vmem:[#allocation43_spill] sm:$0xff]  ;;  %v14281_v39 = vld [vmem:[#allocation21_spill] sm:$0xff] }
 0x62a   : > { %v5807_v12 = vpop.permute.xlu1 %5806  ;;  %v5805_v17 = vpop.permute.xlu0 %5804  ;;  %v5102_v61 = vsub.f32 %v5070_v32, %v11619_v47  ;;  %v5103_v27 = vsub.f32 %v5071_v63, %v11619_v47  ;;  %v5991_v19 = vsel %vm5977_vm6, %v5958_v21, %v14268_v51  ;;  %v5990_v16 = vsel %vm5977_vm6, %v5957_v14, %v14269_v30  ;;  %v14277_v38 = vld [vmem:[#allocation38_spill] sm:$0xff]  ;;  %v5075_v63 = vld [vmem:[#allocation3 + $0xd8] sm:$0xff]  ;;  %v14284_v30 = vld [vmem:[#allocation60_spill] sm:$0xff] }
 0x62b   : > { %v6022_v59 = vsel %vm6010_vm7, %v5989_v15, %v5807_v12  ;;  %v6021_v8 = vsel %vm6010_vm7, %v5988_v48, %v5805_v17  ;;  %v12402_v45 = vmul.f32 %v11643_v52, %v5100_v20  ;;  %v12405_v36 = vmul.f32 %v11643_v52, %v5101_v7  ;;  %v14278_v5 = vld [vmem:[#allocation70_spill] sm:$0xff]  ;;  %v14282_v11 = vld [vmem:[#allocation71_spill] sm:$0xff] }
 0x62c   : > { %6055 = vst.msk [vmem:[%s12196_s26 + $0xa8] sm:$0xff] %vm6043_vm8, %v6022_v59  ;;  %6054 = vst.msk [vmem:[%s12196_s26 + $0xa0] sm:$0xff] %vm6043_vm8, %v6021_v8  ;;  %6568 = vrot.lane.b32.xlu1 %v7488_v6, %s8328_s21  ;;  %6566 = vrot.lane.b32.xlu0 %v7487_v2, %s8328_s21  ;;  %v5162_v56 = vmax.f32 %v12362_v34, 0.0  ;;  %v5163_v9 = vmax.f32 %v12365_v31, 0.0  ;;  %v5927_v46 = vsel %vm970_vm2, %v5895_v57, %v14270_v25  ;;  %v14279_v41 = vld [vmem:[#allocation50_spill] sm:$0xff]  ;;  %v14283_v62 = vld [vmem:[#allocation75_spill] sm:$0xff] }
 0x62d   : > { %v5926_v18 = vsel %vm970_vm2, %v5894_v58, %v14271_v50  ;;  %v5896_v54 = vsel %vm305_vm0, %v5160_v26, %v14272_v29  ;;  %v5897_v13 = vsel %vm305_vm0, %v5161_v35, %v14273_v10  ;;  %v5960_v4 = vsel %vm5944_vm5, %v5927_v46, %v14274_v40  ;;  %v12432_v6 = vld [vmem:[%s11189_s28 + $0x98] sm:$0xff]  ;;  %v12435_v2 = vld [vmem:[%s11189_s28 + $0x90] sm:$0xff]  ;;  %v14289_v40 = vld [vmem:[#allocation28_spill] sm:$0xff] }
 0x62e   : > { %v5811_v23 = vpop.permute.xlu1 %5810  ;;  %v5809_v22 = vpop.permute.xlu0 %5808  ;;  %v5959_v43 = vsel %vm5944_vm5, %v5926_v18, %v14275_v3  ;;  %v5104_v20 = vsub.f32 %v5072_v1, %v11619_v47  ;;  %v5105_v7 = vsub.f32 %v5073_v28, %v11619_v47  ;;  %v5993_v15 = vsel %vm5977_vm6, %v5960_v4, %v14276_v49  ;;  %v5074_v32 = vld [vmem:[#allocation3 + $0xd0] sm:$0xff]  ;;  %v14286_v50 = vld [vmem:[#allocation51_spill] sm:$0xff]  ;;  %v14287_v1 = vld [vmem:[#allocation52_spill] sm:$0xff] }
 0x62f   : > { %v6024_v55 = vsel %vm6010_vm7, %v5991_v19, %v5811_v23  ;;  %v6023_v44 = vsel %vm6010_vm7, %v5990_v16, %v5809_v22  ;;  %v5992_v48 = vsel %vm5977_vm6, %v5959_v43, %v14277_v38  ;;  %v12444_v34 = vmul.f32 %v11643_v52, %v5102_v61  ;;  %v12474_v61 = vld [vmem:[%s11189_s28 + $0xb8] sm:$0xff]  ;;  %v14285_v23 = vld [vmem:[#allocation80_spill] sm:$0xff]  ;;  %v14290_v3 = vld [vmem:[#allocation77_spill] sm:$0xff] }
 0x630   : > { %6057 = vst.msk [vmem:[%s12196_s26 + $0xc8] sm:$0xff] %vm6043_vm8, %v6024_v55  ;;  %6056 = vst.msk [vmem:[%s12196_s26 + $0xc0] sm:$0xff] %vm6043_vm8, %v6023_v44  ;;  %6572 = vrot.lane.b32.xlu1 %v12390_v37, %s8328_s21  ;;  %6570 = vrot.lane.b32.xlu0 %v12393_v0, %s8328_s21  ;;  %v12447_v31 = vmul.f32 %v11643_v52, %v5103_v27  ;;  %v5164_v26 = vmax.f32 %v12402_v45, 0.0  ;;  %v5165_v35 = vmax.f32 %v12405_v36, 0.0  ;;  %v14288_v10 = vld [vmem:[#allocation27_spill] sm:$0xff] }
 0x631   : > { %v5929_v42 = vsel %vm970_vm2, %v5897_v13, %v14278_v5  ;;  %v5928_v33 = vsel %vm970_vm2, %v5896_v54, %v14279_v41  ;;  %v5898_v58 = vsel %vm305_vm0, %v5162_v56, %v14280_v60  ;;  %v5899_v57 = vsel %vm305_vm0, %v5163_v9, %v14281_v39  ;;  %v12477_v27 = vld [vmem:[%s11189_s28 + $0xb0] sm:$0xff]  ;;  %v5077_v9 = vld [vmem:[#allocation3 + $0xe8] sm:$0xff]  ;;  %v5076_v54 = vld [vmem:[#allocation3 + $0xe0] sm:$0xff] }
 0x632   : > { %v5815_v12 = vpop.permute.xlu1 %5814  ;;  %v5813_v17 = vpop.permute.xlu0 %5812  ;;  %v5962_v21 = vsel %vm5944_vm5, %v5929_v42, %v14282_v11  ;;  %v5961_v14 = vsel %vm5944_vm5, %v5928_v33, %v14283_v62  ;;  %v5106_v51 = vsub.f32 %v5074_v32, %v11619_v47  ;;  %v5107_v19 = vsub.f32 %v5075_v63, %v11619_v47  ;;  %v12516_v49 = vld [vmem:[%s11189_s28 + $0xd8] sm:$0xff]  ;;  %v14296_v11 = vld [vmem:[#allocation30_spill] sm:$0xff] }
 0x633   : > { %v6026_v59 = vsel %vm6010_vm7, %v5993_v15, %v5815_v12  ;;  %v6025_v8 = vsel %vm6010_vm7, %v5992_v48, %v5813_v17  ;;  %v5995_v16 = vsel %vm5977_vm6, %v5962_v21, %v14284_v30  ;;  %v5994_v22 = vsel %vm5977_vm6, %v5961_v14, %v14285_v23  ;;  %v12519_v15 = vld [vmem:[%s11189_s28 + $0xd0] sm:$0xff]  ;;  %v5079_v42 = vld [vmem:[#allocation3 + $0xf8] sm:$0xff]  ;;  %v14299_v30 = vld [vmem:[#allocation85_spill] sm:$0xff] }
 0x634   : > { %6059 = vst.msk [vmem:[%s12196_s26 + $0xe8] sm:$0xff] %vm6043_vm8, %v6026_v59  ;;  %6058 = vst.msk [vmem:[%s12196_s26 + $0xe0] sm:$0xff] %vm6043_vm8, %v6025_v8  ;;  %6576 = vrot.lane.b32.xlu1 %v12432_v6, %s8328_s21  ;;  %6574 = vrot.lane.b32.xlu0 %v12435_v2, %s8328_s21  ;;  %v12486_v55 = vmul.f32 %v11643_v52, %v5104_v20  ;;  %v12489_v44 = vmul.f32 %v11643_v52, %v5105_v7  ;;  %v5166_v25 = vmax.f32 %v12444_v34, 0.0  ;;  %v14291_v20 = vld [vmem:[#allocation79_spill] sm:$0xff]  ;;  %v14292_v12 = vld [vmem:[#allocation62_spill] sm:$0xff] }
 0x635   : > { %v5167_v46 = vmax.f32 %v12447_v31, 0.0  ;;  %v5931_v18 = vsel %vm970_vm2, %v5899_v57, %v14286_v50  ;;  %v5930_v29 = vsel %vm970_vm2, %v5898_v58, %v14287_v1  ;;  %v5900_v13 = vsel %vm305_vm0, %v5164_v26, %v14288_v10  ;;  %v14293_v34 = vld [vmem:[#allocation32_spill] sm:$0xff]  ;;  %v14294_v32 = vld [vmem:[#allocation59_spill] sm:$0xff]  ;;  %v5078_v57 = vld [vmem:[#allocation3 + $0xf0] sm:$0xff] }
 0x636   : > { %v5819_v45 = vpop.permute.xlu1 %5818  ;;  %v5817_v36 = vpop.permute.xlu0 %5816  ;;  %v5901_v4 = vsel %vm305_vm0, %v5165_v35, %v14289_v40  ;;  %v5964_v43 = vsel %vm5944_vm5, %v5931_v18, %v14290_v3  ;;  %v5963_v7 = vsel %vm5944_vm5, %v5930_v29, %v14291_v20  ;;  %v5108_v38 = vsub.f32 %v5076_v54, %v11619_v47  ;;  %v14295_v58 = vld [vmem:[#allocation39_spill] sm:$0xff]  ;;  %v14297_v62 = vld [vmem:[#allocation46_spill] sm:$0xff]  ;;  %v14302_v10 = vld [vmem:[#allocation64_spill] sm:$0xff] }
 0x637   : > { %v6028_v28 = vsel %vm6010_vm7, %v5995_v16, %v5819_v45  ;;  %v6027_v56 = vsel %vm6010_vm7, %v5994_v22, %v5817_v36  ;;  %v5109_v48 = vsub.f32 %v5077_v9, %v11619_v47  ;;  %v5997_v17 = vsel %vm5977_vm6, %v5964_v43, %v14292_v12  ;;  %v12554_v23 = vld [vmem:[%s11189_s28 + $0xf8] sm:$0xff]  ;;  %v12557_v22 = vld [vmem:[%s11189_s28 + $0xf0] sm:$0xff]  ;;  %v14303_v40 = vld [vmem:[#allocation53_spill] sm:$0xff] }
 0x638   : > { %6061 = vst.msk [vmem:[%s12196_s26 + $0x108] sm:$0xff] %vm6043_vm8, %v6028_v28  ;;  %6060 = vst.msk [vmem:[%s12196_s26 + $0x100] sm:$0xff] %vm6043_vm8, %v6027_v56  ;;  %6580 = vrot.lane.b32.xlu1 %v12474_v61, %s8328_s21  ;;  %6578 = vrot.lane.b32.xlu0 %v12477_v27, %s8328_s21  ;;  %v5996_v31 = vsel %vm5977_vm6, %v5963_v7, %v14293_v34  ;;  %v5138_v63 = vmul.f32 %v11643_v52, %v5106_v51  ;;  %v5168_v41 = vmax.f32 %v12486_v55, 0.0  ;;  %v14298_v51 = vld [vmem:[#allocation81_spill] sm:$0xff]  ;;  %v14300_v55 = vld [vmem:[#allocation91_spill] sm:$0xff] }
 0x639   : > { %v5139_v26 = vmul.f32 %v11643_v52, %v5107_v19  ;;  %v5169_v33 = vmax.f32 %v12489_v44, 0.0  ;;  %v5933_v60 = vsel %vm970_vm2, %v5901_v4, %v14294_v32  ;;  %v5932_v39 = vsel %vm970_vm2, %v5900_v13, %v14295_v58  ;;  %v14301_v28 = vld [vmem:[#allocation92_spill] sm:$0xff]  ;;  %v14304_v3 = vld [vmem:[#allocation58_spill] sm:$0xff]  ;;  %v14305_v20 = vld [vmem:[#allocation47_spill] sm:$0xff] }
 0x63a   : > { %v5823_v59 = vpop.permute.xlu1 %5822  ;;  %v5821_v8 = vpop.permute.xlu0 %5820  ;;  %v5902_v21 = vsel %vm305_vm0, %v5166_v25, %v14296_v11  ;;  %v5903_v14 = vsel %vm305_vm0, %v5167_v46, %v14297_v62  ;;  %v5966_v19 = vsel %vm5944_vm5, %v5933_v60, %v14298_v51  ;;  %v5965_v16 = vsel %vm5944_vm5, %v5932_v39, %v14299_v30  ;;  %v14307_v12 = vld [vmem:[#allocation88_spill] sm:$0xff]  ;;  %v12590_v34 = vld [vmem:[%s11189_s28 + $0x118] sm:$0xff]  ;;  %v14312_v62 = vld [vmem:[#allocation45_spill] sm:$0xff] }
 0x63b   : > { %v6030_v35 = vsel %vm6010_vm7, %v5997_v17, %v5823_v59  ;;  %v6029_v5 = vsel %vm6010_vm7, %v5996_v31, %v5821_v8  ;;  %v5110_v45 = vsub.f32 %v5078_v57, %v11619_v47  ;;  %v5111_v36 = vsub.f32 %v5079_v42, %v11619_v47  ;;  %v12593_v31 = vld [vmem:[%s11189_s28 + $0x110] sm:$0xff]  ;;  %v14308_v59 = vld [vmem:[#allocation93_spill] sm:$0xff]  ;;  %v14310_v39 = vld [vmem:[#allocation55_spill] sm:$0xff] }
 0x63c   : > { %6063 = vst.msk [vmem:[%s12196_s26 + $0x128] sm:$0xff] %vm6043_vm8, %v6030_v35  ;;  %6062 = vst.msk [vmem:[%s12196_s26 + $0x120] sm:$0xff] %vm6043_vm8, %v6029_v5  ;;  %6584 = vrot.lane.b32.xlu1 %v12516_v49, %s8328_s21  ;;  %6582 = vrot.lane.b32.xlu0 %v12519_v15, %s8328_s21  ;;  %v5999_v44 = vsel %vm5977_vm6, %v5966_v19, %v14300_v55  ;;  %v5998_v56 = vsel %vm5977_vm6, %v5965_v16, %v14301_v28  ;;  %v5170_v29 = vmax.f32 %v5138_v63, 0.0  ;;  %v14309_v63 = vld [vmem:[#allocation94_spill] sm:$0xff]  ;;  %v14311_v11 = vld [vmem:[#allocation56_spill] sm:$0xff] }
 0x63d   : > { %v5140_v46 = vmul.f32 %v11643_v52, %v5108_v38  ;;  %v5141_v50 = vmul.f32 %v11643_v52, %v5109_v48  ;;  %v5171_v54 = vmax.f32 %v5139_v26, 0.0  ;;  %v5935_v13 = vsel %vm970_vm2, %v5903_v14, %v14302_v10  ;;  %v14306_v38 = vld [vmem:[#allocation83_spill] sm:$0xff]  ;;  %v14313_v51 = vld [vmem:[#allocation34_spill] sm:$0xff]  ;;  %v14314_v30 = vld [vmem:[#allocation84_spill] sm:$0xff] }
 0x63e   : > { %v5827_v9 = vpop.permute.xlu1 %5826  ;;  %v5825_v25 = vpop.permute.xlu0 %5824  ;;  %v5934_v4 = vsel %vm970_vm2, %v5902_v21, %v14303_v40  ;;  %v5904_v43 = vsel %vm305_vm0, %v5168_v41, %v14304_v3  ;;  %v5905_v7 = vsel %vm305_vm0, %v5169_v33, %v14305_v20  ;;  %v5968_v48 = vsel %vm5944_vm5, %v5935_v13, %v14306_v38  ;;  %v12624_v55 = vld [vmem:[%s11189_s28 + $0x138] sm:$0xff]  ;;  %v14319_v40 = vld [vmem:[#allocation17_spill] sm:$0xff]  ;;  %v14322_v38 = vld [vmem:[#allocation90_spill] sm:$0xff] }
 0x63f   : > { %v6032_v18 = vsel %vm6010_vm7, %v5999_v44, %v5827_v9  ;;  %v6031_v1 = vsel %vm6010_vm7, %v5998_v56, %v5825_v25  ;;  %v5967_v17 = vsel %vm5944_vm5, %v5934_v4, %v14307_v12  ;;  %v6001_v8 = vsel %vm5977_vm6, %v5968_v48, %v14308_v59  ;;  %v12627_v44 = vld [vmem:[%s11189_s28 + $0x130] sm:$0xff]  ;;  %v14316_v28 = vld [vmem:[#allocation95_spill] sm:$0xff]  ;;  %v14317_v9 = vld [vmem:[#allocation96_spill] sm:$0xff] }
 0x640   : > { %6065 = vst.msk [vmem:[%s12196_s26 + $0x148] sm:$0xff] %vm6043_vm8, %v6032_v18  ;;  %6064 = vst.msk [vmem:[%s12196_s26 + $0x140] sm:$0xff] %vm6043_vm8, %v6031_v1  ;;  %6588 = vrot.lane.b32.xlu1 %v12554_v23, %s8328_s21  ;;  %6586 = vrot.lane.b32.xlu0 %v12557_v22, %s8328_s21  ;;  %v6000_v26 = vsel %vm5977_vm6, %v5967_v17, %v14309_v63  ;;  %v5142_v42 = vmul.f32 %v11643_v52, %v5110_v45  ;;  %v5172_v60 = vmax.f32 %v5140_v46, 0.0  ;;  %v14315_v45 = vld [vmem:[#allocation89_spill] sm:$0xff]  ;;  %v14318_v10 = vld [vmem:[#allocation67_spill] sm:$0xff] }
 0x641   : > { %v5143_v41 = vmul.f32 %v11643_v52, %v5111_v36  ;;  %v5173_v58 = vmax.f32 %v5141_v50, 0.0  ;;  %v5937_v57 = vsel %vm970_vm2, %v5905_v7, %v14310_v39  ;;  %v5936_v21 = vsel %vm970_vm2, %v5904_v43, %v14311_v11  ;;  %v14320_v3 = vld [vmem:[#allocation87_spill] sm:$0xff]  ;;  %v14321_v20 = vld [vmem:[#allocation29_spill] sm:$0xff]  ;;  %v14323_v12 = vld [vmem:[#allocation82_spill] sm:$0xff] }
 0x642   : > { %v5831_v35 = vpop.permute.xlu1 %5830  ;;  %v5829_v5 = vpop.permute.xlu0 %5828  ;;  %v5906_v14 = vsel %vm305_vm0, %v5170_v29, %v14312_v62  ;;  %v5907_v19 = vsel %vm305_vm0, %v5171_v54, %v14313_v51  ;;  %v5970_v16 = vsel %vm5944_vm5, %v5937_v57, %v14314_v30  ;;  %v5969_v36 = vsel %vm5944_vm5, %v5936_v21, %v14315_v45  ;;  %v12656_v59 = vld [vmem:[%s11189_s28 + $0x158] sm:$0xff]  ;;  %v14324_v63 = vld [vmem:[#allocation97_spill] sm:$0xff]  ;;  %v14330_v51 = vld [vmem:[#allocation72_spill] sm:$0xff] }
 0x643   : > { %v6034_v33 = vsel %vm6010_vm7, %v6001_v8, %v5831_v35  ;;  %v6033_v32 = vsel %vm6010_vm7, %v6000_v26, %v5829_v5  ;;  %v6003_v56 = vsel %vm5977_vm6, %v5970_v16, %v14316_v28  ;;  %v6002_v25 = vsel %vm5977_vm6, %v5969_v36, %v14317_v9  ;;  %v12659_v8 = vld [vmem:[%s11189_s28 + $0x150] sm:$0xff]  ;;  %v14327_v39 = vld [vmem:[#allocation57_spill] sm:$0xff]  ;;  %v12688_v45 = vld [vmem:[%s11189_s28 + $0x178] sm:$0xff] }
 0x644   : > { %6067 = vst.msk [vmem:[%s12196_s26 + $0x168] sm:$0xff] %vm6043_vm8, %v6034_v33  ;;  %6066 = vst.msk [vmem:[%s12196_s26 + $0x160] sm:$0xff] %vm6043_vm8, %v6033_v32  ;;  %6592 = vrot.lane.b32.xlu1 %v12590_v34, %s8328_s21  ;;  %6590 = vrot.lane.b32.xlu0 %v12593_v31, %s8328_s21  ;;  %v5174_v29 = vmax.f32 %v5142_v42, 0.0  ;;  %v5175_v54 = vmax.f32 %v5143_v41, 0.0  ;;  %v5939_v13 = vsel %vm970_vm2, %v5907_v19, %v14318_v10  ;;  %v14325_v35 = vld [vmem:[#allocation98_spill] sm:$0xff]  ;;  %v14328_v11 = vld [vmem:[#allocation33_spill] sm:$0xff] }
 0x645   : > { %v5938_v4 = vsel %vm970_vm2, %v5906_v14, %v14319_v40  ;;  %v5908_v43 = vsel %vm305_vm0, %v5172_v60, %v14320_v3  ;;  %v5909_v7 = vsel %vm305_vm0, %v5173_v58, %v14321_v20  ;;  %v5972_v48 = vsel %vm5944_vm5, %v5939_v13, %v14322_v38  ;;  %v14326_v60 = vld [vmem:[#allocation24_spill] sm:$0xff]  ;;  %v14329_v62 = vld [vmem:[#allocation49_spill] sm:$0xff]  ;;  %v14331_v30 = vld [vmem:[#allocation42_spill] sm:$0xff] }
 0x646   : > { %v5835_v46 = vpop.permute.xlu1 %5834  ;;  %v5833_v50 = vpop.permute.xlu0 %5832  ;;  %v5971_v17 = vsel %vm5944_vm5, %v5938_v4, %v14323_v12  ;;  %v6005_v26 = vsel %vm5977_vm6, %v5972_v48, %v14324_v63  ;;  %v5941_v58 = vsel %vm970_vm2, %v5909_v7, %v14326_v60  ;;  %v5940_v57 = vsel %vm970_vm2, %v5908_v43, %v14327_v39  ;;  %v12691_v36 = vld [vmem:[%s11189_s28 + $0x170] sm:$0xff]  ;;  %v14332_v28 = vld [vmem:[#allocation99_spill] sm:$0xff]  ;;  %v14333_v9 = vld [vmem:[#allocation100_spill] sm:$0xff] }
 0x647   : > { %v6036_v18 = vsel %vm6010_vm7, %v6003_v56, %v5835_v46  ;;  %v6035_v1 = vsel %vm6010_vm7, %v6002_v25, %v5833_v50  ;;  %v6004_v5 = vsel %vm5977_vm6, %v5971_v17, %v14325_v35  ;;  %v5910_v21 = vsel %vm305_vm0, %v5174_v29, %v14328_v11  ;;  %v14334_v29 = vld [vmem:[#allocation61_spill] sm:$0xff]  ;;  %v14335_v10 = vld [vmem:[#allocation63_spill] sm:$0xff]  ;;  %v14337_v3 = vld [vmem:[#allocation68_spill] sm:$0xff] }
 0x648   : > { %6069 = vst.msk [vmem:[%s12196_s26 + $0x188] sm:$0xff] %vm6043_vm8, %v6036_v18  ;;  %6068 = vst.msk [vmem:[%s12196_s26 + $0x180] sm:$0xff] %vm6043_vm8, %v6035_v1  ;;  %6596 = vrot.lane.b32.xlu1 %v12624_v55, %s8328_s21  ;;  %6594 = vrot.lane.b32.xlu0 %v12627_v44, %s8328_s21  ;;  %v5911_v14 = vsel %vm305_vm0, %v5175_v54, %v14329_v62  ;;  %v5974_v19 = vsel %vm5944_vm5, %v5941_v58, %v14330_v51  ;;  %v14336_v40 = vld [vmem:[#allocation41_spill] sm:$0xff]  ;;  %v6270_v58 = vld [vmem:[#allocation3 + $0x300] sm:$0xff] }
 0x649   : > { %v5973_v16 = vsel %vm5944_vm5, %v5940_v57, %v14331_v30  ;;  %v6007_v56 = vsel %vm5977_vm6, %v5974_v19, %v14332_v28  ;;  %v5943_v54 = vsel %vm970_vm2, %v5911_v14, %v14334_v29  ;;  %v5942_v13 = vsel %vm970_vm2, %v5910_v21, %v14335_v10  ;;  %v12716_v20 = vld [vmem:[%s11189_s28 + $0x198] sm:$0xff]  ;;  %v12719_v7 = vld [vmem:[%s11189_s28 + $0x190] sm:$0xff]  ;;  %v6271_v60 = vld [vmem:[#allocation3 + $0x308] sm:$0xff] }
 0x64a   : > { %v5839_v42 = vpop.permute.xlu1 %5838  ;;  %v5837_v41 = vpop.permute.xlu0 %5836  ;;  %v6006_v25 = vsel %vm5977_vm6, %v5973_v16, %v14333_v9  ;;  %v5976_v4 = vsel %vm5944_vm5, %v5943_v54, %v14336_v40  ;;  %v5975_v43 = vsel %vm5944_vm5, %v5942_v13, %v14337_v3  ;;  %v6303_v39 = vsub.f32 %v6271_v60, %v11619_v47  ;;  %v12766_v11 = vld [vmem:[%s11189_s28 + $0x1f8] sm:$0xff]  ;;  %v12769_v21 = vld [vmem:[%s11189_s28 + $0x1f0] sm:$0xff]  ;;  %v6275_v29 = vld [vmem:[#allocation3 + $0x328] sm:$0xff] }
 0x64b   : > { %v6038_v33 = vsel %vm6010_vm7, %v6005_v26, %v5839_v42  ;;  %v6037_v32 = vsel %vm6010_vm7, %v6004_v5, %v5837_v41  ;;  %v6009_v38 = vsel %vm5977_vm6, %v5976_v4, %v12154_v53  ;;  %v6008_v48 = vsel %vm5977_vm6, %v5975_v43, %v12156_v24  ;;  %v12736_v53 = vld [vmem:[%s11189_s28 + $0x1b8] sm:$0xff]  ;;  %v12739_v24 = vld [vmem:[%s11189_s28 + $0x1b0] sm:$0xff]  ;;  %v6274_v54 = vld [vmem:[#allocation3 + $0x320] sm:$0xff] }
 0x64c   : > { %6071 = vst.msk [vmem:[%s12196_s26 + $0x1a8] sm:$0xff] %vm6043_vm8, %v6038_v33  ;;  %6070 = vst.msk [vmem:[%s12196_s26 + $0x1a0] sm:$0xff] %vm6043_vm8, %v6037_v32  ;;  %6600 = vrot.lane.b32.xlu1 %v12656_v59, %s8328_s21  ;;  %6598 = vrot.lane.b32.xlu0 %v12659_v8, %s8328_s21  ;;  %v6302_v57 = vsub.f32 %v6270_v58, %v11619_v47  ;;  %v6335_v51 = vmul.f32 %v11643_v52, %v6303_v39  ;;  %v6273_v30 = vld [vmem:[#allocation3 + $0x318] sm:$0xff]  ;;  %v6272_v16 = vld [vmem:[#allocation3 + $0x310] sm:$0xff] }
 0x64d   : > { %v12750_v42 = vld [vmem:[%s11189_s28 + $0x1d8] sm:$0xff]  ;;  %v12753_v41 = vld [vmem:[%s11189_s28 + $0x1d0] sm:$0xff]  ;;  %v6305_v28 = vsub.f32 %v6273_v30, %v11619_v47  ;;  %v6307_v10 = vsub.f32 %v6275_v29, %v11619_v47  ;;  %v6306_v13 = vsub.f32 %v6274_v54, %v11619_v47  ;;  %v6279_v30 = vld [vmem:[#allocation3 + $0x348] sm:$0xff] }
 0x64e   : > { %v5843_v46 = vpop.permute.xlu1 %5842  ;;  %v5841_v50 = vpop.permute.xlu0 %5840  ;;  %v6334_v19 = vmul.f32 %v11643_v52, %v6302_v57 }
 0x64f   : > { %v6040_v18 = vsel %vm6010_vm7, %v6007_v56, %v5843_v46  ;;  %v6039_v1 = vsel %vm6010_vm7, %v6006_v25, %v5841_v50  ;;  %v6304_v56 = vsub.f32 %v6272_v16, %v11619_v47  ;;  %v6367_v46 = vmax.f32 %v6335_v51, 0.0  ;;  %v6278_v16 = vld [vmem:[#allocation3 + $0x340] sm:$0xff] }
 0x650   : > { %6073 = vst.msk [vmem:[%s12196_s26 + $0x1c8] sm:$0xff] %vm6043_vm8, %v6040_v18  ;;  %6072 = vst.msk [vmem:[%s12196_s26 + $0x1c0] sm:$0xff] %vm6043_vm8, %v6039_v1  ;;  %6604 = vrot.lane.b32.xlu1 %v12688_v45, %s8328_s21  ;;  %6602 = vrot.lane.b32.xlu0 %v12691_v36, %s8328_s21  ;;  %v6366_v50 = vmax.f32 %v6334_v19, 0.0  ;;  %v6337_v18 = vmul.f32 %v11643_v52, %v6305_v28  ;;  %v6311_v28 = vsub.f32 %v6279_v30, %v11619_v47 }
 0x651   : > { %v6336_v1 = vmul.f32 %v11643_v52, %v6304_v56  ;;  %v6310_v56 = vsub.f32 %v6278_v16, %v11619_v47 }
 0x652   : > { %v5847_v12 = vpop.permute.xlu1 %5846  ;;  %v5845_v17 = vpop.permute.xlu0 %5844  ;;  %v6369_v3 = vmax.f32 %v6337_v18, 0.0  ;;  %v6343_v29 = vmul.f32 %v11643_v52, %v6311_v28 }
 0x653   : > { %v6042_v63 = vsel %vm6010_vm7, %v6009_v38, %v5847_v12  ;;  %v6041_v26 = vsel %vm6010_vm7, %v6008_v48, %v5845_v17  ;;  %v6368_v43 = vmax.f32 %v6336_v1, 0.0  ;;  %v6339_v38 = vmul.f32 %v11643_v52, %v6307_v10  ;;  %v6277_v12 = vld [vmem:[#allocation3 + $0x338] sm:$0xff]  ;;  %v6276_v17 = vld [vmem:[#allocation3 + $0x330] sm:$0xff] }
 0x654   : > { %6075 = vst.msk [vmem:[%s12196_s26 + $0x1e8] sm:$0xff] %vm6043_vm8, %v6042_v63  ;;  %6074 = vst.msk [vmem:[%s12196_s26 + $0x1e0] sm:$0xff] %vm6043_vm8, %v6041_v26  ;;  %6608 = vrot.lane.b32.xlu1 %v12716_v20, %s8328_s21  ;;  %6606 = vrot.lane.b32.xlu0 %v12719_v7, %s8328_s21  ;;  %v6338_v48 = vmul.f32 %v11643_v52, %v6306_v13  ;;  %v6309_v63 = vsub.f32 %v6277_v12, %v11619_v47  ;;  %v6281_v10 = vld [vmem:[#allocation3 + $0x358] sm:$0xff]  ;;  %v6280_v13 = vld [vmem:[#allocation3 + $0x350] sm:$0xff]  ;;  %v6375_v12 = vmax.f32 %v6343_v29, 0.0 }
 0x655   : > { %v6308_v26 = vsub.f32 %v6276_v17, %v11619_v47  ;;  %v6371_v39 = vmax.f32 %v6339_v38, 0.0  ;;  %v6342_v54 = vmul.f32 %v11643_v52, %v6310_v56  ;;  %v6285_v29 = vld [vmem:[#allocation3 + $0x378] sm:$0xff] }
 0x656   : > { %v12741_v35 = vpop.permute.xlu1 %6432  ;;  %v12743_v5 = vpop.permute.xlu0 %6430  ;;  %v6370_v57 = vmax.f32 %v6338_v48, 0.0  ;;  %v6341_v51 = vmul.f32 %v11643_v52, %v6309_v63 }
 0x657   : > { %v6340_v19 = vmul.f32 %v11643_v52, %v6308_v26  ;;  %v6374_v17 = vmax.f32 %v6342_v54, 0.0  ;;  %v6284_v54 = vld [vmem:[#allocation3 + $0x370] sm:$0xff] }
 0x658   : > { %6612 = vrot.lane.b32.xlu1 %v12736_v53, %s8328_s21  ;;  %6610 = vrot.lane.b32.xlu0 %v12739_v24, %s8328_s21  ;;  %v6373_v18 = vmax.f32 %v6341_v51, 0.0 }
 0x659   : > { %v6372_v1 = vmax.f32 %v6340_v19, 0.0 }
 0x65a   : > { %v12755_v33 = vpop.permute.xlu1 %6436  ;;  %v12757_v32 = vpop.permute.xlu0 %6434 }
 0x65c   : > { %6616 = vrot.lane.b32.xlu1 %v12750_v42, %s8328_s21  ;;  %6614 = vrot.lane.b32.xlu0 %v12753_v41, %s8328_s21 }
 0x65e   : > { %v12771_v62 = vpop.permute.xlu1 %6440  ;;  %v12773_v14 = vpop.permute.xlu0 %6438 }
 0x660   : > { %6620 = vrot.lane.b32.xlu1 %v12766_v11, %s8328_s21  ;;  %6618 = vrot.lane.b32.xlu0 %v12769_v21, %s8328_s21 }
 0x662   : > { %v12783_v9 = vpop.permute.xlu1 %6444  ;;  %v12785_v25 = vpop.permute.xlu0 %6442 }
 0x664   : > { %6688 = vrot.lane.b32.xlu1 %v6367_v46, %s8330_s23  ;;  %6686 = vrot.lane.b32.xlu0 %v6366_v50, %s8330_s23 }
 0x666   : > { %v12793_v40 = vpop.permute.xlu1 %6448  ;;  %v12795_v4 = vpop.permute.xlu0 %6446 }
 0x667   : > { %14338 = vst [vmem:[#allocation35_spill] sm:$0xff] %v12793_v40  ;;  %14339 = vst [vmem:[#allocation40_spill] sm:$0xff] %v12795_v4  ;;  %v8123_v4 = vld [vmem:[%s11189_s28 + $0x30] sm:$0xff] }
 0x668   : > { %6692 = vrot.lane.b32.xlu1 %v6369_v3, %s8330_s23  ;;  %6690 = vrot.lane.b32.xlu0 %v6368_v43, %s8330_s23  ;;  %v6313_v3 = vsub.f32 %v6281_v10, %v11619_v47  ;;  %v6312_v43 = vsub.f32 %v6280_v13, %v11619_v47  ;;  %v6317_v10 = vsub.f32 %v6285_v29, %v11619_v47 }
 0x669   : > { %v6316_v13 = vsub.f32 %v6284_v54, %v11619_v47 }
 0x66a   : > { %v12803_v60 = vpop.permute.xlu1 %6452  ;;  %v12805_v58 = vpop.permute.xlu0 %6450  ;;  %v6345_v63 = vmul.f32 %v11643_v52, %v6313_v3  ;;  %v6344_v26 = vmul.f32 %v11643_v52, %v6312_v43 }
 0x66b   : > { %14340 = vst [vmem:[#allocation86_spill] sm:$0xff] %v12803_v60  ;;  %14341 = vst [vmem:[#allocation66_spill] sm:$0xff] %v12805_v58  ;;  %v8120_v60 = vld [vmem:[%s11189_s28 + $0x18] sm:$0xff] }
 0x66c   : > { %6696 = vrot.lane.b32.xlu1 %v6371_v39, %s8330_s23  ;;  %6694 = vrot.lane.b32.xlu0 %v6370_v57, %s8330_s23  ;;  %v6283_v39 = vld [vmem:[#allocation3 + $0x368] sm:$0xff]  ;;  %v6282_v57 = vld [vmem:[#allocation3 + $0x360] sm:$0xff]  ;;  %v6377_v28 = vmax.f32 %v6345_v63, 0.0  ;;  %v6376_v56 = vmax.f32 %v6344_v26, 0.0  ;;  %v6349_v63 = vmul.f32 %v11643_v52, %v6317_v10  ;;  %v6348_v26 = vmul.f32 %v11643_v52, %v6316_v13  ;;  %v6289_v10 = vld [vmem:[#allocation3 + $0x398] sm:$0xff] }
 0x66d   : > { %v6315_v51 = vsub.f32 %v6283_v39, %v11619_v47  ;;  %v6314_v19 = vsub.f32 %v6282_v57, %v11619_v47  ;;  %v6287_v39 = vld [vmem:[#allocation3 + $0x388] sm:$0xff]  ;;  %v6286_v57 = vld [vmem:[#allocation3 + $0x380] sm:$0xff]  ;;  %v6288_v13 = vld [vmem:[#allocation3 + $0x390] sm:$0xff] }
 0x66e   : > { %v12813_v46 = vpop.permute.xlu1 %6456  ;;  %v12815_v50 = vpop.permute.xlu0 %6454 }
 0x66f   : > { %14342 = vst [vmem:[#allocation25_spill] sm:$0xff] %v12813_v46  ;;  %14343 = vst [vmem:[#allocation73_spill] sm:$0xff] %v12815_v50  ;;  %v8116_v46 = vld [vmem:[%s8602_s5 + $0x1d8] sm:$0xff] }
 0x670   : > { %6700 = vrot.lane.b32.xlu1 %v6373_v18, %s8330_s23  ;;  %6698 = vrot.lane.b32.xlu0 %v6372_v1, %s8330_s23  ;;  %v6347_v18 = vmul.f32 %v11643_v52, %v6315_v51  ;;  %v6346_v1 = vmul.f32 %v11643_v52, %v6314_v19  ;;  %v6319_v51 = vsub.f32 %v6287_v39, %v11619_v47 }
 0x671   : > { %v6318_v19 = vsub.f32 %v6286_v57, %v11619_v47 }
 0x672   : > { %v12823_v38 = vpop.permute.xlu1 %6460  ;;  %v12825_v48 = vpop.permute.xlu0 %6458  ;;  %v6351_v29 = vmul.f32 %v11643_v52, %v6319_v51 }
 0x673   : > { %14344 = vst [vmem:[#allocation76_spill] sm:$0xff] %v12823_v38  ;;  %14345 = vst [vmem:[#allocation20_spill] sm:$0xff] %v12825_v48  ;;  %v6350_v54 = vmul.f32 %v11643_v52, %v6318_v19  ;;  %v8096_v38 = vld [vmem:[%s8602_s5 + $0x98] sm:$0xff] }
 0x674   : > { %6704 = vrot.lane.b32.xlu1 %v6375_v12, %s8330_s23  ;;  %6702 = vrot.lane.b32.xlu0 %v6374_v17, %s8330_s23  ;;  %v6379_v12 = vmax.f32 %v6347_v18, 0.0  ;;  %v6378_v17 = vmax.f32 %v6346_v1, 0.0  ;;  %v6381_v18 = vmax.f32 %v6349_v63, 0.0  ;;  %v6380_v1 = vmax.f32 %v6348_v26, 0.0 }
 0x675   : > { %v6383_v63 = vmax.f32 %v6351_v29, 0.0  ;;  %v6382_v26 = vmax.f32 %v6350_v54, 0.0 }
 0x676   : > { %v12833_v30 = vpop.permute.xlu1 %6464  ;;  %v12835_v16 = vpop.permute.xlu0 %6462 }
 0x677   : > { %14346 = vst [vmem:[#allocation19_spill] sm:$0xff] %v12833_v30  ;;  %14347 = vst [vmem:[#allocation31_spill] sm:$0xff] %v12835_v16  ;;  %v8094_v30 = vld [vmem:[%s8602_s5 + $0x78] sm:$0xff] }
 0x678   : > { %6708 = vrot.lane.b32.xlu1 %v6377_v28, %s8330_s23  ;;  %6706 = vrot.lane.b32.xlu0 %v6376_v56, %s8330_s23 }
 0x67a   : > { %v12843_v3 = vpop.permute.xlu1 %6468  ;;  %v12845_v43 = vpop.permute.xlu0 %6466 }
 0x67b   : > { %14348 = vst [vmem:[#allocation48_spill] sm:$0xff] %v12843_v3  ;;  %14349 = vst [vmem:[#allocation44_spill] sm:$0xff] %v12845_v43  ;;  %v6301_v43 = vld [vmem:[#allocation3 + $0x3f8] sm:$0xff]  ;;  %v6300_v3 = vld [vmem:[#allocation3 + $0x3f0] sm:$0xff] }
 0x67c   : > { %6712 = vrot.lane.b32.xlu1 %v6379_v12, %s8330_s23  ;;  %6710 = vrot.lane.b32.xlu0 %v6378_v17, %s8330_s23  ;;  %v6321_v12 = vsub.f32 %v6289_v10, %v11619_v47  ;;  %v6320_v17 = vsub.f32 %v6288_v13, %v11619_v47 }
 0x67e   : > { %v12853_v28 = vpop.permute.xlu1 %6472  ;;  %v12855_v56 = vpop.permute.xlu0 %6470  ;;  %v6353_v51 = vmul.f32 %v11643_v52, %v6321_v12  ;;  %v6352_v19 = vmul.f32 %v11643_v52, %v6320_v17 }
 0x67f   : > { %14350 = vst [vmem:[#allocation37_spill] sm:$0xff] %v12853_v28  ;;  %14351 = vst [vmem:[#allocation36_spill] sm:$0xff] %v12855_v56  ;;  %v6291_v56 = vld [vmem:[#allocation3 + $0x3a8] sm:$0xff]  ;;  %v6290_v28 = vld [vmem:[#allocation3 + $0x3a0] sm:$0xff] }
 0x680   : > { %6716 = vrot.lane.b32.xlu1 %v6381_v18, %s8330_s23  ;;  %6714 = vrot.lane.b32.xlu0 %v6380_v1, %s8330_s23  ;;  %v6323_v18 = vsub.f32 %v6291_v56, %v11619_v47  ;;  %v6322_v1 = vsub.f32 %v6290_v28, %v11619_v47  ;;  %v6385_v29 = vmax.f32 %v6353_v51, 0.0  ;;  %v6384_v54 = vmax.f32 %v6352_v19, 0.0 }
 0x682   : > { %v12863_v39 = vpop.permute.xlu1 %6476  ;;  %v12865_v57 = vpop.permute.xlu0 %6474  ;;  %v6355_v12 = vmul.f32 %v11643_v52, %v6323_v18  ;;  %v6354_v17 = vmul.f32 %v11643_v52, %v6322_v1 }
 0x683   : > { %14352 = vst [vmem:[#allocation65_spill] sm:$0xff] %v12863_v39  ;;  %14353 = vst [vmem:[#allocation26_spill] sm:$0xff] %v12865_v57  ;;  %v6293_v57 = vld [vmem:[#allocation3 + $0x3b8] sm:$0xff]  ;;  %v6292_v39 = vld [vmem:[#allocation3 + $0x3b0] sm:$0xff] }
 0x684   : > { %6720 = vrot.lane.b32.xlu1 %v6383_v63, %s8330_s23  ;;  %6718 = vrot.lane.b32.xlu0 %v6382_v26, %s8330_s23  ;;  %v6325_v56 = vsub.f32 %v6293_v57, %v11619_v47  ;;  %v6324_v28 = vsub.f32 %v6292_v39, %v11619_v47  ;;  %v6387_v51 = vmax.f32 %v6355_v12, 0.0  ;;  %v6386_v19 = vmax.f32 %v6354_v17, 0.0 }
 0x686   : > { %v12873_v10 = vpop.permute.xlu1 %6480  ;;  %v12875_v13 = vpop.permute.xlu0 %6478  ;;  %v6357_v18 = vmul.f32 %v11643_v52, %v6325_v56  ;;  %v6356_v1 = vmul.f32 %v11643_v52, %v6324_v28 }
 0x687   : > { %14354 = vst [vmem:[#allocation74_spill] sm:$0xff] %v12873_v10  ;;  %14355 = vst [vmem:[#allocation54_spill] sm:$0xff] %v12875_v13  ;;  %v6295_v13 = vld [vmem:[#allocation3 + $0x3c8] sm:$0xff]  ;;  %v6294_v10 = vld [vmem:[#allocation3 + $0x3c0] sm:$0xff] }
 0x688   : > { %6724 = vrot.lane.b32.xlu1 %v6385_v29, %s8330_s23  ;;  %6722 = vrot.lane.b32.xlu0 %v6384_v54, %s8330_s23  ;;  %v6327_v57 = vsub.f32 %v6295_v13, %v11619_v47  ;;  %v6326_v39 = vsub.f32 %v6294_v10, %v11619_v47  ;;  %v6389_v12 = vmax.f32 %v6357_v18, 0.0  ;;  %v6388_v17 = vmax.f32 %v6356_v1, 0.0 }
 0x68a   : > { %v12883_v63 = vpop.permute.xlu1 %6484  ;;  %v12885_v26 = vpop.permute.xlu0 %6482  ;;  %v6359_v56 = vmul.f32 %v11643_v52, %v6327_v57  ;;  %v6358_v28 = vmul.f32 %v11643_v52, %v6326_v39 }
 0x68b   : > { %14356 = vst [vmem:[#allocation18_spill] sm:$0xff] %v12883_v63  ;;  %14357 = vst [vmem:[#allocation22_spill] sm:$0xff] %v12885_v26  ;;  %v6297_v26 = vld [vmem:[#allocation3 + $0x3d8] sm:$0xff]  ;;  %v6296_v63 = vld [vmem:[#allocation3 + $0x3d0] sm:$0xff] }
 0x68c   : > { %6728 = vrot.lane.b32.xlu1 %v6387_v51, %s8330_s23  ;;  %6726 = vrot.lane.b32.xlu0 %v6386_v19, %s8330_s23  ;;  %v6329_v13 = vsub.f32 %v6297_v26, %v11619_v47  ;;  %v6328_v10 = vsub.f32 %v6296_v63, %v11619_v47  ;;  %v6391_v18 = vmax.f32 %v6359_v56, 0.0  ;;  %v6390_v1 = vmax.f32 %v6358_v28, 0.0 }
 0x68e   : > { %v12893_v29 = vpop.permute.xlu1 %6488  ;;  %v12895_v54 = vpop.permute.xlu0 %6486  ;;  %v6361_v57 = vmul.f32 %v11643_v52, %v6329_v13  ;;  %v6360_v39 = vmul.f32 %v11643_v52, %v6328_v10 }
 0x68f   : > { %14358 = vst [vmem:[#allocation78_spill] sm:$0xff] %v12893_v29  ;;  %14359 = vst [vmem:[#allocation69_spill] sm:$0xff] %v12895_v54  ;;  %v6299_v54 = vld [vmem:[#allocation3 + $0x3e8] sm:$0xff]  ;;  %v6298_v29 = vld [vmem:[#allocation3 + $0x3e0] sm:$0xff] }
 0x690   : > { %6732 = vrot.lane.b32.xlu1 %v6389_v12, %s8330_s23  ;;  %6730 = vrot.lane.b32.xlu0 %v6388_v17, %s8330_s23  ;;  %v6331_v26 = vsub.f32 %v6299_v54, %v11619_v47  ;;  %v6330_v63 = vsub.f32 %v6298_v29, %v11619_v47  ;;  %v6393_v56 = vmax.f32 %v6361_v57, 0.0  ;;  %v6392_v28 = vmax.f32 %v6360_v39, 0.0 }
 0x691   : > { %v6333_v54 = vsub.f32 %v6301_v43, %v11619_v47  ;;  %v6332_v29 = vsub.f32 %v6300_v3, %v11619_v47 }
 0x692   : > { %v12903_v51 = vpop.permute.xlu1 %6492  ;;  %v12905_v19 = vpop.permute.xlu0 %6490  ;;  %v6363_v13 = vmul.f32 %v11643_v52, %v6331_v26  ;;  %v6362_v10 = vmul.f32 %v11643_v52, %v6330_v63 }
 0x693   : > { %v6365_v26 = vmul.f32 %v11643_v52, %v6333_v54  ;;  %v6364_v63 = vmul.f32 %v11643_v52, %v6332_v29  ;;  %v8088_v54 = vld [vmem:[%s8602_s5 + $0x18] sm:$0xff]  ;;  %v8089_v29 = vld [vmem:[%s8602_s5 + $0x10] sm:$0xff] }
 0x694   : > { %6736 = vrot.lane.b32.xlu1 %v6391_v18, %s8330_s23  ;;  %6734 = vrot.lane.b32.xlu0 %v6390_v1, %s8330_s23  ;;  %v6395_v57 = vmax.f32 %v6363_v13, 0.0  ;;  %v6394_v39 = vmax.f32 %v6362_v10, 0.0 }
 0x696   : > { %v12913_v12 = vpop.permute.xlu1 %6560  ;;  %v12915_v17 = vpop.permute.xlu0 %6558 }
 0x698   : > { %6740 = vrot.lane.b32.xlu1 %v6393_v56, %s8330_s23  ;;  %6738 = vrot.lane.b32.xlu0 %v6392_v28, %s8330_s23  ;;  %v6397_v56 = vmax.f32 %v6365_v26, 0.0  ;;  %v6396_v28 = vmax.f32 %v6364_v63, 0.0  ;;  %v8090_v26 = vld [vmem:[%s8602_s5 + $0x38] sm:$0xff]  ;;  %v8091_v63 = vld [vmem:[%s8602_s5 + $0x30] sm:$0xff] }
 0x69a   : > { %v12923_v18 = vpop.permute.xlu1 %6564  ;;  %v12925_v1 = vpop.permute.xlu0 %6562 }
 0x69c   : > { %6744 = vrot.lane.b32.xlu1 %v6395_v57, %s8330_s23  ;;  %6742 = vrot.lane.b32.xlu0 %v6394_v39, %s8330_s23 }
 0x69e   : > { %v12931_v43 = vpop.permute.xlu1 %6568  ;;  %v12933_v3 = vpop.permute.xlu0 %6566 }
 0x6a0   : > { %6748 = vrot.lane.b32.xlu1 %v6397_v56, %s8330_s23  ;;  %6746 = vrot.lane.b32.xlu0 %v6396_v28, %s8330_s23 }
 0x6a2   : > { %v12937_v13 = vpop.permute.xlu1 %6572  ;;  %v12939_v10 = vpop.permute.xlu0 %6570 }
 0x6a4   : > { %6784 = vrot.lane.b32.xlu1 %v8088_v54, %s8330_s23  ;;  %6782 = vrot.lane.b32.xlu0 %v8089_v29, %s8330_s23  ;;  %v8092_v54 = vld [vmem:[%s8602_s5 + $0x58] sm:$0xff]  ;;  %v8093_v29 = vld [vmem:[%s8602_s5 + $0x50] sm:$0xff] }
 0x6a6   : > { %v12945_v57 = vpop.permute.xlu1 %6576  ;;  %v12947_v39 = vpop.permute.xlu0 %6574 }
 0x6a7   : > { %14360 = vst [vmem:[#allocation23_spill] sm:$0xff] %v12945_v57  ;;  %14361 = vst [vmem:[#allocation16_spill] sm:$0xff] %v12947_v39 }
 0x6a8   : > { %6788 = vrot.lane.b32.xlu1 %v8090_v26, %s8330_s23  ;;  %6786 = vrot.lane.b32.xlu0 %v8091_v63, %s8330_s23  ;;  %v8095_v63 = vld [vmem:[%s8602_s5 + $0x70] sm:$0xff] }
 0x6aa   : > { %v12953_v56 = vpop.permute.xlu1 %6580  ;;  %v12955_v28 = vpop.permute.xlu0 %6578 }
 0x6ab   : > { %14362 = vst [vmem:[#allocation38_spill] sm:$0xff] %v12953_v56  ;;  %14363 = vst [vmem:[#allocation70_spill] sm:$0xff] %v12955_v28  ;;  %v8118_v56 = vld [vmem:[%s8602_s5 + $0x1f8] sm:$0xff] }
 0x6ac   : > { %6792 = vrot.lane.b32.xlu1 %v8092_v54, %s8330_s23  ;;  %6790 = vrot.lane.b32.xlu0 %v8093_v29, %s8330_s23  ;;  %v8097_v29 = vld [vmem:[%s8602_s5 + $0x90] sm:$0xff] }
 0x6ae   : > { %v12961_v16 = vpop.permute.xlu1 %6584  ;;  %v12963_v26 = vpop.permute.xlu0 %6582 }
 0x6af   : > { %14364 = vst [vmem:[#allocation50_spill] sm:$0xff] %v12961_v16  ;;  %14365 = vst [vmem:[#allocation43_spill] sm:$0xff] %v12963_v26  ;;  %v8098_v16 = vld [vmem:[%s8602_s5 + $0xb8] sm:$0xff] }
 0x6b0   : > { %6796 = vrot.lane.b32.xlu1 %v8094_v30, %s8330_s23  ;;  %6794 = vrot.lane.b32.xlu0 %v8095_v63, %s8330_s23  ;;  %v8099_v63 = vld [vmem:[%s8602_s5 + $0xb0] sm:$0xff] }
 0x6b2   : > { %v12969_v48 = vpop.permute.xlu1 %6588  ;;  %v12971_v54 = vpop.permute.xlu0 %6586 }
 0x6b3   : > { %14366 = vst [vmem:[#allocation21_spill] sm:$0xff] %v12969_v48  ;;  %14367 = vst [vmem:[#allocation71_spill] sm:$0xff] %v12971_v54  ;;  %v8100_v48 = vld [vmem:[%s8602_s5 + $0xd8] sm:$0xff] }
 0x6b4   : > { %6800 = vrot.lane.b32.xlu1 %v8096_v38, %s8330_s23  ;;  %6798 = vrot.lane.b32.xlu0 %v8097_v29, %s8330_s23  ;;  %v8101_v29 = vld [vmem:[%s8602_s5 + $0xd0] sm:$0xff] }
 0x6b6   : > { %v12977_v26 = vpop.permute.xlu1 %6592  ;;  %v12979_v30 = vpop.permute.xlu0 %6590 }
 0x6b7   : > { %14368 = vst [vmem:[#allocation75_spill] sm:$0xff] %v12977_v26  ;;  %14369 = vst [vmem:[#allocation60_spill] sm:$0xff] %v12979_v30  ;;  %v8102_v26 = vld [vmem:[%s8602_s5 + $0xf8] sm:$0xff] }
 0x6b8   : > { %6804 = vrot.lane.b32.xlu1 %v8098_v16, %s8330_s23  ;;  %6802 = vrot.lane.b32.xlu0 %v8099_v63, %s8330_s23  ;;  %v8103_v63 = vld [vmem:[%s8602_s5 + $0xf0] sm:$0xff] }
 0x6ba   : > { %v12985_v54 = vpop.permute.xlu1 %6596  ;;  %v12987_v38 = vpop.permute.xlu0 %6594 }
 0x6bb   : > { %14370 = vst [vmem:[#allocation80_spill] sm:$0xff] %v12985_v54  ;;  %14371 = vst [vmem:[#allocation51_spill] sm:$0xff] %v12987_v38  ;;  %v8104_v54 = vld [vmem:[%s8602_s5 + $0x118] sm:$0xff] }
 0x6bc   : > { %6808 = vrot.lane.b32.xlu1 %v8100_v48, %s8330_s23  ;;  %6806 = vrot.lane.b32.xlu0 %v8101_v29, %s8330_s23  ;;  %v8105_v29 = vld [vmem:[%s8602_s5 + $0x110] sm:$0xff] }
 0x6be   : > { %v12993_v30 = vpop.permute.xlu1 %6600  ;;  %v12995_v16 = vpop.permute.xlu0 %6598 }
 0x6bf   : > { %14372 = vst [vmem:[#allocation52_spill] sm:$0xff] %v12993_v30  ;;  %14373 = vst [vmem:[#allocation27_spill] sm:$0xff] %v12995_v16  ;;  %v8106_v30 = vld [vmem:[%s8602_s5 + $0x138] sm:$0xff] }
 0x6c0   : > { %6812 = vrot.lane.b32.xlu1 %v8102_v26, %s8330_s23  ;;  %6810 = vrot.lane.b32.xlu0 %v8103_v63, %s8330_s23  ;;  %v8107_v63 = vld [vmem:[%s8602_s5 + $0x130] sm:$0xff] }
 0x6c2   : > { %v13001_v38 = vpop.permute.xlu1 %6604  ;;  %v13003_v48 = vpop.permute.xlu0 %6602 }
 0x6c3   : > { %14374 = vst [vmem:[#allocation28_spill] sm:$0xff] %v13001_v38  ;;  %14375 = vst [vmem:[#allocation77_spill] sm:$0xff] %v13003_v48  ;;  %v8108_v38 = vld [vmem:[%s8602_s5 + $0x158] sm:$0xff] }
 0x6c4   : > { %6816 = vrot.lane.b32.xlu1 %v8104_v54, %s8330_s23  ;;  %6814 = vrot.lane.b32.xlu0 %v8105_v29, %s8330_s23  ;;  %v8109_v29 = vld [vmem:[%s8602_s5 + $0x150] sm:$0xff] }
 0x6c6   : > { %v13009_v16 = vpop.permute.xlu1 %6608  ;;  %v13011_v26 = vpop.permute.xlu0 %6606 }
 0x6c7   : > { %14376 = vst [vmem:[#allocation79_spill] sm:$0xff] %v13009_v16  ;;  %14377 = vst [vmem:[#allocation62_spill] sm:$0xff] %v13011_v26  ;;  %v8110_v16 = vld [vmem:[%s8602_s5 + $0x178] sm:$0xff] }
 0x6c8   : > { %6820 = vrot.lane.b32.xlu1 %v8106_v30, %s8330_s23  ;;  %6818 = vrot.lane.b32.xlu0 %v8107_v63, %s8330_s23  ;;  %v8111_v63 = vld [vmem:[%s8602_s5 + $0x170] sm:$0xff] }
 0x6ca   : > { %v13017_v48 = vpop.permute.xlu1 %6612  ;;  %v13019_v54 = vpop.permute.xlu0 %6610 }
 0x6cb   : > { %14378 = vst [vmem:[#allocation32_spill] sm:$0xff] %v13017_v48  ;;  %14379 = vst [vmem:[#allocation59_spill] sm:$0xff] %v13019_v54  ;;  %v8112_v48 = vld [vmem:[%s8602_s5 + $0x198] sm:$0xff] }
 0x6cc   : > { %6824 = vrot.lane.b32.xlu1 %v8108_v38, %s8330_s23  ;;  %6822 = vrot.lane.b32.xlu0 %v8109_v29, %s8330_s23  ;;  %v8113_v29 = vld [vmem:[%s8602_s5 + $0x190] sm:$0xff] }
 0x6ce   : > { %v13025_v26 = vpop.permute.xlu1 %6616  ;;  %v13027_v30 = vpop.permute.xlu0 %6614 }
 0x6cf   : > { %14380 = vst [vmem:[#allocation39_spill] sm:$0xff] %v13025_v26  ;;  %14381 = vst [vmem:[#allocation30_spill] sm:$0xff] %v13027_v30  ;;  %v8114_v26 = vld [vmem:[%s8602_s5 + $0x1b8] sm:$0xff] }
 0x6d0   : > { %6828 = vrot.lane.b32.xlu1 %v8110_v16, %s8330_s23  ;;  %6826 = vrot.lane.b32.xlu0 %v8111_v63, %s8330_s23  ;;  %v8115_v63 = vld [vmem:[%s8602_s5 + $0x1b0] sm:$0xff] }
 0x6d2   : > { %v13033_v54 = vpop.permute.xlu1 %6620  ;;  %v13035_v38 = vpop.permute.xlu0 %6618 }
 0x6d4   : > { %6832 = vrot.lane.b32.xlu1 %v8112_v48, %s8330_s23  ;;  %6830 = vrot.lane.b32.xlu0 %v8113_v29, %s8330_s23  ;;  %v8117_v29 = vld [vmem:[%s8602_s5 + $0x1d0] sm:$0xff] }
 0x6d6   : > { %v13041_v30 = vpop.permute.xlu1 %6688  ;;  %v13043_v16 = vpop.permute.xlu0 %6686 }
 0x6d8   : > { %6836 = vrot.lane.b32.xlu1 %v8114_v26, %s8330_s23  ;;  %6834 = vrot.lane.b32.xlu0 %v8115_v63, %s8330_s23  ;;  %v8119_v63 = vld [vmem:[%s8602_s5 + $0x1f0] sm:$0xff]  ;;  %s8250_s5 = scalar_lea.vmem %s8249_s27, 16384 }
 0x6d9   : > { %p8252_p1 = scmp.lt.s32.totalorder %s8250_s5, %s8244_s14 }
 0x6da   : > { %v13049_v50 = vpop.permute.xlu1 %6692  ;;  %v13051_v48 = vpop.permute.xlu0 %6690 }
 0x6db   : > { %p8253_p3 = por %p8252_p1, %p8251_p9 }
 0x6dc   : > { %6840 = vrot.lane.b32.xlu1 %v8116_v46, %s8330_s23  ;;  %6838 = vrot.lane.b32.xlu0 %v8117_v29, %s8330_s23  ;;  %v8121_v29 = vld [vmem:[%s11189_s28 + $0x10] sm:$0xff] }
 0x6dd   : > { %p8254_p5 = pnand %p8253_p3, %p8247_p6 }
 0x6de   : > { %v13057_v28 = vpop.permute.xlu1 %6696  ;;  %v13059_v26 = vpop.permute.xlu0 %6694 }
 0x6e0   : > { %6844 = vrot.lane.b32.xlu1 %v8118_v56, %s8330_s23  ;;  %6842 = vrot.lane.b32.xlu0 %v8119_v63, %s8330_s23  ;;  %v8122_v56 = vld [vmem:[%s11189_s28 + $0x38] sm:$0xff] }
 0x6e2   : > { %v13065_v58 = vpop.permute.xlu1 %6700  ;;  %v13067_v46 = vpop.permute.xlu0 %6698 }
 0x6e3   : > { %14382 = vst [vmem:[#allocation46_spill] sm:$0xff] %v13067_v46  ;;  %v8124_v46 = vld [vmem:[%s11189_s28 + $0x58] sm:$0xff] }
 0x6e4   : > { %6880 = vrot.lane.b32.xlu1 %v8120_v60, %s8331_s6  ;;  %6878 = vrot.lane.b32.xlu0 %v8121_v29, %s8331_s6  ;;  %v8125_v60 = vld [vmem:[%s11189_s28 + $0x50] sm:$0xff] }
 0x6e6   : > { %v13073_v39 = vpop.permute.xlu1 %6704  ;;  %v13075_v57 = vpop.permute.xlu0 %6702 }
 0x6e7   : > { %14383 = vst [vmem:[#allocation81_spill] sm:$0xff] %v13073_v39 }
 0x6e8   : > { %6884 = vrot.lane.b32.xlu1 %v8122_v56, %s8331_s6  ;;  %6882 = vrot.lane.b32.xlu0 %v8123_v4, %s8331_s6 }
 0x6ea   : > { %v13081_v63 = vpop.permute.xlu1 %6708  ;;  %v13083_v40 = vpop.permute.xlu0 %6706 }
 0x6ec   : > { %6888 = vrot.lane.b32.xlu1 %v8124_v46, %s8331_s6  ;;  %6886 = vrot.lane.b32.xlu0 %v8125_v60, %s8331_s6 }
 0x6ee   : > { %v13089_v29 = vpop.permute.xlu1 %6712  ;;  %v13091_v39 = vpop.permute.xlu0 %6710 }
 0x6f0   : > { %6892 = vrot.lane.b32.xlu1 %v12390_v37, %s8331_s6  ;;  %6890 = vrot.lane.b32.xlu0 %v12393_v0, %s8331_s6 }
 0x6f2   : > { %v13097_v4 = vpop.permute.xlu1 %6716  ;;  %v13099_v56 = vpop.permute.xlu0 %6714 }
 0x6f4   : > { %6896 = vrot.lane.b32.xlu1 %v12432_v6, %s8331_s6  ;;  %6894 = vrot.lane.b32.xlu0 %v12435_v2, %s8331_s6 }
 0x6f6   : > { %v13105_v46 = vpop.permute.xlu1 %6720  ;;  %v13107_v60 = vpop.permute.xlu0 %6718 }
 0x6f7   : > { %14384 = vst [vmem:[#allocation85_spill] sm:$0xff] %v13105_v46  ;;  %14385 = vst [vmem:[#allocation91_spill] sm:$0xff] %v13107_v60  ;;  %v6147_v60 = vld [vmem:[#allocation3 + $0x228] sm:$0xff] }
 0x6f8   : > { %6900 = vrot.lane.b32.xlu1 %v12474_v61, %s8331_s6  ;;  %6898 = vrot.lane.b32.xlu0 %v12477_v27, %s8331_s6 }
 0x6fa   : > { %v13113_v37 = vpop.permute.xlu1 %6724  ;;  %v13115_v0 = vpop.permute.xlu0 %6722 }
 0x6fb   : > { %14386 = vst [vmem:[#allocation92_spill] sm:$0xff] %v13113_v37  ;;  %14387 = vst [vmem:[#allocation64_spill] sm:$0xff] %v13115_v0 }
 0x6fc   : > { %6904 = vrot.lane.b32.xlu1 %v12516_v49, %s8331_s6  ;;  %6902 = vrot.lane.b32.xlu0 %v12519_v15, %s8331_s6 }
 0x6fe   : > { %v13121_v6 = vpop.permute.xlu1 %6728  ;;  %v13123_v2 = vpop.permute.xlu0 %6726 }
 0x6ff   : > { %14388 = vst [vmem:[#allocation53_spill] sm:$0xff] %v13121_v6  ;;  %14389 = vst [vmem:[#allocation58_spill] sm:$0xff] %v13123_v2  ;;  %v6173_v2 = vld [vmem:[#allocation3 + $0x2f8] sm:$0xff]  ;;  %v6172_v6 = vld [vmem:[#allocation3 + $0x2f0] sm:$0xff] }
 0x700   : > { %6908 = vrot.lane.b32.xlu1 %v12554_v23, %s8331_s6  ;;  %6906 = vrot.lane.b32.xlu0 %v12557_v22, %s8331_s6  ;;  %v6205_v23 = vsub.f32 %v6173_v2, %v11619_v47  ;;  %v6204_v22 = vsub.f32 %v6172_v6, %v11619_v47 }
 0x702   : > { %v13129_v61 = vpop.permute.xlu1 %6732  ;;  %v13131_v27 = vpop.permute.xlu0 %6730 }
 0x703   : > { %14390 = vst [vmem:[#allocation47_spill] sm:$0xff] %v13129_v61  ;;  %14391 = vst [vmem:[#allocation83_spill] sm:$0xff] %v13131_v27  ;;  %v6142_v61 = vld [vmem:[#allocation3 + $0x200] sm:$0xff] }
 0x704   : > { %6912 = vrot.lane.b32.xlu1 %v12590_v34, %s8331_s6  ;;  %6910 = vrot.lane.b32.xlu0 %v12593_v31, %s8331_s6  ;;  %v6237_v31 = vmul.f32 %v11643_v52, %v6205_v23 }
 0x706   : > { %v13137_v49 = vpop.permute.xlu1 %6736  ;;  %v13139_v15 = vpop.permute.xlu0 %6734  ;;  %v6269_v2 = vmax.f32 %v6237_v31, 0.0 }
 0x707   : > { %14392 = vst [vmem:[#allocation88_spill] sm:$0xff] %v13137_v49  ;;  %14393 = vst [vmem:[#allocation93_spill] sm:$0xff] %v13139_v15  ;;  %v6236_v15 = vmul.f32 %v11643_v52, %v6204_v22  ;;  %v6143_v49 = vld [vmem:[#allocation3 + $0x208] sm:$0xff] }
 0x708   : > { %6916 = vrot.lane.b32.xlu1 %v12624_v55, %s8331_s6  ;;  %6914 = vrot.lane.b32.xlu0 %v12627_v44, %s8331_s6  ;;  %v7005_v23 = vsel %vm305_vm0, %v6269_v2, %v12903_v51 }
 0x709   : > { %v6268_v6 = vmax.f32 %v6236_v15, 0.0 }
 0x70a   : > { %v13147_v34 = vpop.permute.xlu1 %6740  ;;  %v13149_v27 = vpop.permute.xlu0 %6738 }
 0x70b   : > { %14394 = vst [vmem:[#allocation94_spill] sm:$0xff] %v13147_v34  ;;  %14395 = vst [vmem:[#allocation55_spill] sm:$0xff] %v13149_v27 }
 0x70c   : > { %6920 = vrot.lane.b32.xlu1 %v12656_v59, %s8331_s6  ;;  %6918 = vrot.lane.b32.xlu0 %v12659_v8, %s8331_s6  ;;  %v7004_v59 = vsel %vm305_vm0, %v6268_v6, %v12905_v19  ;;  %v7037_v8 = vsel %vm970_vm2, %v7005_v23, %v13033_v54 }
 0x70d   : > { %v7036_v22 = vsel %vm970_vm2, %v7004_v59, %v13035_v38 }
 0x70e   : > { %v13157_v55 = vpop.permute.xlu1 %6744  ;;  %v13159_v44 = vpop.permute.xlu0 %6742 }
 0x70f   : > { %14396 = vst [vmem:[#allocation56_spill] sm:$0xff] %v13157_v55  ;;  %14397 = vst [vmem:[#allocation45_spill] sm:$0xff] %v13159_v44 }
 0x710   : > { %6924 = vrot.lane.b32.xlu1 %v12688_v45, %s8331_s6  ;;  %6922 = vrot.lane.b32.xlu0 %v12691_v36, %s8331_s6 }
 0x712   : > { %v6749_v31 = vpop.permute.xlu1 %6748  ;;  %v6747_v15 = vpop.permute.xlu0 %6746 }
 0x713   : > { %v13174_v44 = vsel %vm5944_vm5, %v7037_v8, %v6749_v31  ;;  %v13177_v45 = vsel %vm5944_vm5, %v7036_v22, %v6747_v15 }
 0x714   : > { %14398 = vst [vmem:[#allocation34_spill] sm:$0xff] %v13174_v44  ;;  %14399 = vst [vmem:[#allocation84_spill] sm:$0xff] %v13177_v45  ;;  %6928 = vrot.lane.b32.xlu1 %v12716_v20, %s8331_s6  ;;  %6926 = vrot.lane.b32.xlu0 %v12719_v7, %s8331_s6 }
 0x716   : > { %v13183_v36 = vpop.permute.xlu1 %6784  ;;  %v13185_v51 = vpop.permute.xlu0 %6782 }
 0x718   : > { %6932 = vrot.lane.b32.xlu1 %v12736_v53, %s8331_s6  ;;  %6930 = vrot.lane.b32.xlu0 %v12739_v24, %s8331_s6 }
 0x71a   : > { %v13191_v19 = vpop.permute.xlu1 %6788  ;;  %v13193_v54 = vpop.permute.xlu0 %6786 }
 0x71c   : > { %6936 = vrot.lane.b32.xlu1 %v12750_v42, %s8331_s6  ;;  %6934 = vrot.lane.b32.xlu0 %v12753_v41, %s8331_s6 }
 0x71e   : > { %v13199_v20 = vpop.permute.xlu1 %6792  ;;  %v13201_v7 = vpop.permute.xlu0 %6790 }
 0x720   : > { %6940 = vrot.lane.b32.xlu1 %v12766_v11, %s8331_s6  ;;  %6938 = vrot.lane.b32.xlu0 %v12769_v21, %s8331_s6 }
 0x722   : > { %v13207_v53 = vpop.permute.xlu1 %6796  ;;  %v13209_v24 = vpop.permute.xlu0 %6794 }
 0x726   : > { %v13211_v38 = vpop.permute.xlu1 %6800  ;;  %v13213_v42 = vpop.permute.xlu0 %6798 }
 0x72a   : > { %v13215_v2 = vpop.permute.xlu1 %6804  ;;  %v13217_v41 = vpop.permute.xlu0 %6802 }
 0x72e   : > { %v13219_v6 = vpop.permute.xlu1 %6808  ;;  %v13221_v23 = vpop.permute.xlu0 %6806 }
 0x732   : > { %v13223_v11 = vpop.permute.xlu1 %6812  ;;  %v13225_v59 = vpop.permute.xlu0 %6810 }
 0x733   : > { %14400 = vst [vmem:[#allocation89_spill] sm:$0xff] %v13225_v59 }
 0x736   : > { %v13227_v21 = vpop.permute.xlu1 %6816  ;;  %v13229_v8 = vpop.permute.xlu0 %6814 }
 0x737   : > { %14401 = vst [vmem:[#allocation95_spill] sm:$0xff] %v13227_v21  ;;  %14402 = vst [vmem:[#allocation96_spill] sm:$0xff] %v13229_v8 }
 0x73a   : > { %v13231_v22 = vpop.permute.xlu1 %6820  ;;  %v13233_v31 = vpop.permute.xlu0 %6818 }
 0x73b   : > { %14403 = vst [vmem:[#allocation67_spill] sm:$0xff] %v13231_v22  ;;  %14404 = vst [vmem:[#allocation17_spill] sm:$0xff] %v13233_v31  ;;  %v6175_v31 = vsub.f32 %v6143_v49, %v11619_v47  ;;  %v6145_v22 = vld [vmem:[#allocation3 + $0x218] sm:$0xff] }
 0x73e   : > { %v13235_v15 = vpop.permute.xlu1 %6824  ;;  %v13237_v45 = vpop.permute.xlu0 %6822 }
 0x73f   : > { %14405 = vst [vmem:[#allocation87_spill] sm:$0xff] %v13235_v15  ;;  %14406 = vst [vmem:[#allocation29_spill] sm:$0xff] %v13237_v45  ;;  %v6174_v15 = vsub.f32 %v6142_v61, %v11619_v47  ;;  %v6207_v45 = vmul.f32 %v11643_v52, %v6175_v31  ;;  %v6146_v31 = vld [vmem:[#allocation3 + $0x220] sm:$0xff] }
 0x740   : > { %v6178_v46 = vsub.f32 %v6146_v31, %v11619_v47 }
 0x741   : > { %v6239_v21 = vmax.f32 %v6207_v45, 0.0 }
 0x742   : > { %v13239_v44 = vpop.permute.xlu1 %6828  ;;  %v13241_v55 = vpop.permute.xlu0 %6826 }
 0x743   : > { %14407 = vst [vmem:[#allocation90_spill] sm:$0xff] %v13239_v44  ;;  %14408 = vst [vmem:[#allocation82_spill] sm:$0xff] %v13241_v55  ;;  %v6206_v44 = vmul.f32 %v11643_v52, %v6174_v15  ;;  %v6144_v55 = vld [vmem:[#allocation3 + $0x210] sm:$0xff]  ;;  %v6179_v15 = vsub.f32 %v6147_v60, %v11619_v47 }
 0x746   : > { %v13243_v27 = vpop.permute.xlu1 %6832  ;;  %v13245_v34 = vpop.permute.xlu0 %6830 }
 0x747   : > { %14409 = vst [vmem:[#allocation97_spill] sm:$0xff] %v13243_v27  ;;  %14410 = vst [vmem:[#allocation98_spill] sm:$0xff] %v13245_v34  ;;  %v6177_v34 = vsub.f32 %v6145_v22, %v11619_v47  ;;  %v6975_v22 = vsel %vm305_vm0, %v6239_v21, %v12741_v35 }
 0x749   : > { %v6209_v49 = vmul.f32 %v11643_v52, %v6177_v34  ;;  %v6211_v34 = vmul.f32 %v11643_v52, %v6179_v15 }
 0x74a   : > { %v13247_v0 = vpop.permute.xlu1 %6836  ;;  %v13249_v37 = vpop.permute.xlu0 %6834 }
 0x74b   : > { %14411 = vst [vmem:[#allocation24_spill] sm:$0xff] %v13247_v0  ;;  %14412 = vst [vmem:[#allocation57_spill] sm:$0xff] %v13249_v37  ;;  %v6176_v0 = vsub.f32 %v6144_v55, %v11619_v47  ;;  %v6238_v37 = vmax.f32 %v6206_v44, 0.0  ;;  %v7007_v44 = vsel %vm970_vm2, %v6975_v22, %v12913_v12  ;;  %v6241_v45 = vmax.f32 %v6209_v49, 0.0  ;;  %v6151_v22 = vld [vmem:[#allocation3 + $0x248] sm:$0xff] }
 0x74c   : > { %v7039_v35 = vsel %vm5944_vm5, %v7007_v44, %v13041_v30 }
 0x74d   : > { %v6208_v61 = vmul.f32 %v11643_v52, %v6176_v0  ;;  %v6974_v55 = vsel %vm305_vm0, %v6238_v37, %v12743_v5  ;;  %v6210_v0 = vmul.f32 %v11643_v52, %v6178_v46  ;;  %v7071_v12 = vsel %vm5977_vm6, %v7039_v35, %v13183_v36 }
 0x74e   : > { %v13255_v8 = vpop.permute.xlu1 %6840  ;;  %v13257_v27 = vpop.permute.xlu0 %6838  ;;  %v7006_v60 = vsel %vm970_vm2, %v6974_v55, %v12915_v17  ;;  %v6977_v30 = vsel %vm305_vm0, %v6241_v45, %v12755_v33  ;;  %v6243_v33 = vmax.f32 %v6211_v34, 0.0  ;;  %v6150_v55 = vld [vmem:[#allocation3 + $0x240] sm:$0xff] }
 0x74f   : > { %14413 = vst [vmem:[#allocation33_spill] sm:$0xff] %v13255_v8  ;;  %v6240_v31 = vmax.f32 %v6208_v61, 0.0  ;;  %v7038_v5 = vsel %vm5944_vm5, %v7006_v60, %v13043_v16  ;;  %v7009_v36 = vsel %vm970_vm2, %v6977_v30, %v12923_v18  ;;  %v6183_v18 = vsub.f32 %v6151_v22, %v11619_v47 }
 0x750   : > { %v7070_v17 = vsel %vm5977_vm6, %v7038_v5, %v13185_v51  ;;  %v7041_v44 = vsel %vm5944_vm5, %v7009_v36, %v13049_v50  ;;  %v6979_v50 = vsel %vm305_vm0, %v6243_v33, %v12771_v62  ;;  %v6155_v33 = vld [vmem:[#allocation3 + $0x268] sm:$0xff] }
 0x751   : > { %v6976_v61 = vsel %vm305_vm0, %v6240_v31, %v12757_v32  ;;  %v6242_v32 = vmax.f32 %v6210_v0, 0.0  ;;  %v7073_v45 = vsel %vm5977_vm6, %v7041_v44, %v13191_v19  ;;  %v7011_v19 = vsel %vm970_vm2, %v6979_v50, %v12931_v43 }
 0x752   : > { %v13265_v59 = vpop.permute.xlu1 %6844  ;;  %v13267_v8 = vpop.permute.xlu0 %6842  ;;  %v7008_v51 = vsel %vm970_vm2, %v6976_v61, %v12925_v1  ;;  %v6182_v1 = vsub.f32 %v6150_v55, %v11619_v47  ;;  %v6215_v62 = vmul.f32 %v11643_v52, %v6183_v18  ;;  %v14416_v55 = vld [vmem:[#allocation46_spill] sm:$0xff] }
 0x753   : > { %14414 = vst [vmem:[#allocation49_spill] sm:$0xff] %v13265_v59  ;;  %14415 = vst [vmem:[#allocation72_spill] sm:$0xff] %v13267_v8  ;;  %v6149_v59 = vld [vmem:[#allocation3 + $0x238] sm:$0xff]  ;;  %v6148_v8 = vld [vmem:[#allocation3 + $0x230] sm:$0xff]  ;;  %v7040_v60 = vsel %vm5944_vm5, %v7008_v51, %v13051_v48  ;;  %v6978_v35 = vsel %vm305_vm0, %v6242_v32, %v12773_v14 }
 0x754   : > { %v6181_v46 = vsub.f32 %v6149_v59, %v11619_v47  ;;  %v6180_v37 = vsub.f32 %v6148_v8, %v11619_v47  ;;  %v7072_v34 = vsel %vm5977_vm6, %v7040_v60, %v13193_v54  ;;  %v7010_v54 = vsel %vm970_vm2, %v6978_v35, %v12933_v3  ;;  %v6154_v32 = vld [vmem:[#allocation3 + $0x260] sm:$0xff] }
 0x755   : > { %v6214_v14 = vmul.f32 %v11643_v52, %v6182_v1  ;;  %v7042_v43 = vsel %vm5944_vm5, %v7010_v54, %v13059_v26 }
 0x756   : > { %v6881_v21 = vpop.permute.xlu1 %6880  ;;  %v6879_v49 = vpop.permute.xlu0 %6878  ;;  %v6213_v8 = vmul.f32 %v11643_v52, %v6181_v46  ;;  %v6212_v15 = vmul.f32 %v11643_v52, %v6180_v37  ;;  %v7074_v61 = vsel %vm5977_vm6, %v7042_v43, %v13201_v7 }
 0x757   : > { %v7103_v16 = vsel %vm6010_vm7, %v7071_v12, %v6881_v21  ;;  %v7102_v59 = vsel %vm6010_vm7, %v7070_v17, %v6879_v49  ;;  %v6153_v12 = vld [vmem:[#allocation3 + $0x258] sm:$0xff]  ;;  %v6152_v17 = vld [vmem:[#allocation3 + $0x250] sm:$0xff]  ;;  %v7043_v21 = vsel %vm5944_vm5, %v7011_v19, %v13057_v28 }
 0x758   : > { %7516 = vst.msk [vmem:[%s12196_s26 + $0x18] sm:$0xff] %vm6043_vm8, %v7103_v16  ;;  %7515 = vst.msk [vmem:[%s12196_s26 + $0x10] sm:$0xff] %vm6043_vm8, %v7102_v59  ;;  %v6245_v46 = vmax.f32 %v6213_v8, 0.0  ;;  %v6244_v37 = vmax.f32 %v6212_v15, 0.0  ;;  %v6185_v3 = vsub.f32 %v6153_v12, %v11619_v47  ;;  %v6184_v49 = vsub.f32 %v6152_v17, %v11619_v47  ;;  %v14421_v12 = vld [vmem:[#allocation81_spill] sm:$0xff] }
 0x759   : > { %v7075_v30 = vsel %vm5977_vm6, %v7043_v21, %v13199_v20 }
 0x75a   : > { %v6885_v0 = vpop.permute.xlu1 %6884  ;;  %v6883_v31 = vpop.permute.xlu0 %6882  ;;  %v6981_v28 = vsel %vm305_vm0, %v6245_v46, %v12783_v9  ;;  %v6980_v8 = vsel %vm305_vm0, %v6244_v37, %v12785_v25  ;;  %v6217_v36 = vmul.f32 %v11643_v52, %v6185_v3  ;;  %v6216_v51 = vmul.f32 %v11643_v52, %v6184_v49  ;;  %v14419_v46 = vld [vmem:[#allocation23_spill] sm:$0xff]  ;;  %v14420_v37 = vld [vmem:[#allocation16_spill] sm:$0xff] }
 0x75b   : > { %v7105_v48 = vsel %vm6010_vm7, %v7073_v45, %v6885_v0  ;;  %v7104_v5 = vsel %vm6010_vm7, %v7072_v34, %v6883_v31  ;;  %v7013_v20 = vsel %vm970_vm2, %v6981_v28, %v12937_v13  ;;  %v7012_v7 = vsel %vm970_vm2, %v6980_v8, %v12939_v10  ;;  %v14417_v34 = vld [vmem:[#allocation35_spill] sm:$0xff]  ;;  %v14418_v0 = vld [vmem:[#allocation40_spill] sm:$0xff]  ;;  %v14423_v8 = vld [vmem:[#allocation66_spill] sm:$0xff] }
 0x75c   : > { %7518 = vst.msk [vmem:[%s12196_s26 + $0x38] sm:$0xff] %vm6043_vm8, %v7105_v48  ;;  %7517 = vst.msk [vmem:[%s12196_s26 + $0x30] sm:$0xff] %vm6043_vm8, %v7104_v5  ;;  %v6247_v9 = vmax.f32 %v6215_v62, 0.0  ;;  %v6246_v25 = vmax.f32 %v6214_v14, 0.0  ;;  %v7045_v22 = vsel %vm5944_vm5, %v7013_v20, %v13065_v58  ;;  %v7044_v44 = vsel %vm5944_vm5, %v7012_v7, %v14416_v55  ;;  %v6157_v62 = vld [vmem:[#allocation3 + $0x278] sm:$0xff]  ;;  %v6156_v14 = vld [vmem:[#allocation3 + $0x270] sm:$0xff] }
 0x75d   : > { %v6187_v13 = vsub.f32 %v6155_v33, %v11619_v47  ;;  %v6186_v10 = vsub.f32 %v6154_v32, %v11619_v47  ;;  %v7077_v60 = vsel %vm5977_vm6, %v7045_v22, %v13207_v53  ;;  %v7076_v18 = vsel %vm5977_vm6, %v7044_v44, %v13209_v24  ;;  %v6159_v33 = vld [vmem:[#allocation3 + $0x288] sm:$0xff]  ;;  %v6158_v32 = vld [vmem:[#allocation3 + $0x280] sm:$0xff] }
 0x75e   : > { %v6889_v16 = vpop.permute.xlu1 %6888  ;;  %v6887_v59 = vpop.permute.xlu0 %6886  ;;  %v6983_v58 = vsel %vm305_vm0, %v6247_v9, %v14417_v34  ;;  %v6982_v31 = vsel %vm305_vm0, %v6246_v25, %v14418_v0  ;;  %v6249_v48 = vmax.f32 %v6217_v36, 0.0  ;;  %v6248_v5 = vmax.f32 %v6216_v51, 0.0  ;;  %v14427_v34 = vld [vmem:[#allocation73_spill] sm:$0xff] }
 0x75f   : > { %v7107_v26 = vsel %vm6010_vm7, %v7075_v30, %v6889_v16  ;;  %v7106_v15 = vsel %vm6010_vm7, %v7074_v61, %v6887_v59  ;;  %v7015_v53 = vsel %vm970_vm2, %v6983_v58, %v14419_v46  ;;  %v7014_v24 = vsel %vm970_vm2, %v6982_v31, %v14420_v37  ;;  %v14422_v59 = vld [vmem:[#allocation86_spill] sm:$0xff] }
 0x760   : > { %7520 = vst.msk [vmem:[%s12196_s26 + $0x58] sm:$0xff] %vm6043_vm8, %v7107_v26  ;;  %7519 = vst.msk [vmem:[%s12196_s26 + $0x50] sm:$0xff] %vm6043_vm8, %v7106_v15  ;;  %v6219_v19 = vmul.f32 %v11643_v52, %v6187_v13  ;;  %v6218_v54 = vmul.f32 %v11643_v52, %v6186_v10  ;;  %v7047_v17 = vsel %vm5944_vm5, %v7015_v53, %v14421_v12  ;;  %v6161_v53 = vld [vmem:[#allocation3 + $0x298] sm:$0xff]  ;;  %v6160_v37 = vld [vmem:[#allocation3 + $0x290] sm:$0xff] }
 0x761   : > { %v7046_v21 = vsel %vm5944_vm5, %v7014_v24, %v13075_v57  ;;  %v6189_v43 = vsub.f32 %v6157_v62, %v11619_v47  ;;  %v6188_v3 = vsub.f32 %v6156_v14, %v11619_v47  ;;  %v7079_v49 = vsel %vm5977_vm6, %v7047_v17, %v13211_v38  ;;  %v14424_v38 = vld [vmem:[#allocation38_spill] sm:$0xff] }
 0x762   : > { %v6893_v1 = vpop.permute.xlu1 %6892  ;;  %v6891_v45 = vpop.permute.xlu0 %6890  ;;  %v7078_v30 = vsel %vm5977_vm6, %v7046_v21, %v13213_v42  ;;  %v6985_v28 = vsel %vm305_vm0, %v6249_v48, %v14422_v59  ;;  %v6984_v26 = vsel %vm305_vm0, %v6248_v5, %v14423_v8  ;;  %v14425_v42 = vld [vmem:[#allocation70_spill] sm:$0xff]  ;;  %v6251_v9 = vmax.f32 %v6219_v19, 0.0  ;;  %v14429_v48 = vld [vmem:[#allocation43_spill] sm:$0xff] }
 0x763   : > { %v7109_v50 = vsel %vm6010_vm7, %v7077_v60, %v6893_v1  ;;  %v7108_v35 = vsel %vm6010_vm7, %v7076_v18, %v6891_v45  ;;  %v6221_v36 = vmul.f32 %v11643_v52, %v6189_v43  ;;  %v6220_v51 = vmul.f32 %v11643_v52, %v6188_v3  ;;  %v14426_v45 = vld [vmem:[#allocation25_spill] sm:$0xff]  ;;  %v14430_v43 = vld [vmem:[#allocation76_spill] sm:$0xff] }
 0x764   : > { %7522 = vst.msk [vmem:[%s12196_s26 + $0x78] sm:$0xff] %vm6043_vm8, %v7109_v50  ;;  %7521 = vst.msk [vmem:[%s12196_s26 + $0x70] sm:$0xff] %vm6043_vm8, %v7108_v35  ;;  %v7017_v20 = vsel %vm970_vm2, %v6985_v28, %v14424_v38  ;;  %v7016_v7 = vsel %vm970_vm2, %v6984_v26, %v14425_v42  ;;  %v6250_v25 = vmax.f32 %v6218_v54, 0.0  ;;  %v6191_v44 = vsub.f32 %v6159_v33, %v11619_v47  ;;  %v14428_v35 = vld [vmem:[#allocation50_spill] sm:$0xff]  ;;  %v14431_v3 = vld [vmem:[#allocation20_spill] sm:$0xff] }
 0x765   : > { %v7049_v22 = vsel %vm5944_vm5, %v7017_v20, %v13081_v63  ;;  %v7048_v55 = vsel %vm5944_vm5, %v7016_v7, %v13083_v40  ;;  %v6190_v13 = vsub.f32 %v6158_v32, %v11619_v47  ;;  %v6987_v63 = vsel %vm305_vm0, %v6251_v9, %v14426_v45  ;;  %v14434_v7 = vld [vmem:[#allocation89_spill] sm:$0xff]  ;;  %v14435_v32 = vld [vmem:[#allocation19_spill] sm:$0xff] }
 0x766   : > { %v6897_v61 = vpop.permute.xlu1 %6896  ;;  %v6895_v16 = vpop.permute.xlu0 %6894  ;;  %v7081_v10 = vsel %vm5977_vm6, %v7049_v22, %v13215_v2  ;;  %v7080_v60 = vsel %vm5977_vm6, %v7048_v55, %v13217_v41  ;;  %v6986_v58 = vsel %vm305_vm0, %v6250_v25, %v14427_v34  ;;  %v6253_v31 = vmax.f32 %v6221_v36, 0.0  ;;  %v14436_v22 = vld [vmem:[#allocation31_spill] sm:$0xff] }
 0x767   : > { %v7111_v57 = vsel %vm6010_vm7, %v7079_v49, %v6897_v61  ;;  %v7110_v15 = vsel %vm6010_vm7, %v7078_v30, %v6895_v16  ;;  %v6252_v50 = vmax.f32 %v6220_v51, 0.0  ;;  %v7019_v2 = vsel %vm970_vm2, %v6987_v63, %v14428_v35  ;;  %v6165_v34 = vld [vmem:[#allocation3 + $0x2b8] sm:$0xff] }
 0x768   : > { %7524 = vst.msk [vmem:[%s12196_s26 + $0x98] sm:$0xff] %vm6043_vm8, %v7111_v57  ;;  %7523 = vst.msk [vmem:[%s12196_s26 + $0x90] sm:$0xff] %vm6043_vm8, %v7110_v15  ;;  %v7018_v41 = vsel %vm970_vm2, %v6986_v58, %v14429_v48  ;;  %v6223_v5 = vmul.f32 %v11643_v52, %v6191_v44  ;;  %v6222_v46 = vmul.f32 %v11643_v52, %v6190_v13  ;;  %v6163_v57 = vld [vmem:[#allocation3 + $0x2a8] sm:$0xff]  ;;  %v6162_v15 = vld [vmem:[#allocation3 + $0x2a0] sm:$0xff] }
 0x769   : > { %v7051_v24 = vsel %vm5944_vm5, %v7019_v2, %v13089_v29  ;;  %v7050_v19 = vsel %vm5944_vm5, %v7018_v41, %v13091_v39  ;;  %v6193_v54 = vsub.f32 %v6161_v53, %v11619_v47  ;;  %v6192_v62 = vsub.f32 %v6160_v37, %v11619_v47  ;;  %v6164_v58 = vld [vmem:[#allocation3 + $0x2b0] sm:$0xff]  ;;  %v14441_v48 = vld [vmem:[#allocation95_spill] sm:$0xff] }
 0x76a   : > { %v6901_v18 = vpop.permute.xlu1 %6900  ;;  %v6899_v1 = vpop.permute.xlu0 %6898  ;;  %v7083_v14 = vsel %vm5977_vm6, %v7051_v24, %v13219_v6  ;;  %v7082_v12 = vsel %vm5977_vm6, %v7050_v19, %v13221_v23  ;;  %v6989_v29 = vsel %vm305_vm0, %v6253_v31, %v14430_v43  ;;  %v6988_v49 = vsel %vm305_vm0, %v6252_v50, %v14431_v3  ;;  %v14432_v6 = vld [vmem:[#allocation21_spill] sm:$0xff]  ;;  %v14433_v23 = vld [vmem:[#allocation71_spill] sm:$0xff]  ;;  %v14443_v24 = vld [vmem:[#allocation48_spill] sm:$0xff] }
 0x76b   : > { %v7113_v40 = vsel %vm6010_vm7, %v7081_v10, %v6901_v18  ;;  %v7112_v0 = vsel %vm6010_vm7, %v7080_v60, %v6899_v1  ;;  %v6225_v61 = vmul.f32 %v11643_v52, %v6193_v54  ;;  %v6224_v16 = vmul.f32 %v11643_v52, %v6192_v62  ;;  %v14437_v60 = vld [vmem:[#allocation75_spill] sm:$0xff]  ;;  %v14438_v18 = vld [vmem:[#allocation60_spill] sm:$0xff] }
 0x76c   : > { %7526 = vst.msk [vmem:[%s12196_s26 + $0xb8] sm:$0xff] %vm6043_vm8, %v7113_v40  ;;  %7525 = vst.msk [vmem:[%s12196_s26 + $0xb0] sm:$0xff] %vm6043_vm8, %v7112_v0  ;;  %v7021_v59 = vsel %vm970_vm2, %v6989_v29, %v14432_v6  ;;  %v7020_v28 = vsel %vm970_vm2, %v6988_v49, %v14433_v23  ;;  %v6255_v8 = vmax.f32 %v6223_v5, 0.0  ;;  %v6254_v26 = vmax.f32 %v6222_v46, 0.0  ;;  %v14439_v40 = vld [vmem:[#allocation85_spill] sm:$0xff]  ;;  %v14440_v31 = vld [vmem:[#allocation91_spill] sm:$0xff] }
 0x76d   : > { %v7053_v36 = vsel %vm5944_vm5, %v7021_v59, %v13097_v4  ;;  %v7052_v51 = vsel %vm5944_vm5, %v7020_v28, %v13099_v56  ;;  %v6195_v38 = vsub.f32 %v6163_v57, %v11619_v47  ;;  %v6194_v20 = vsub.f32 %v6162_v15, %v11619_v47  ;;  %v14442_v5 = vld [vmem:[#allocation96_spill] sm:$0xff]  ;;  %v14446_v3 = vld [vmem:[#allocation51_spill] sm:$0xff] }
 0x76e   : > { %v6905_v17 = vpop.permute.xlu1 %6904  ;;  %v6903_v21 = vpop.permute.xlu0 %6902  ;;  %v7085_v42 = vsel %vm5977_vm6, %v7053_v36, %v13223_v11  ;;  %v7084_v9 = vsel %vm5977_vm6, %v7052_v51, %v14434_v7  ;;  %v6991_v4 = vsel %vm305_vm0, %v6255_v8, %v14435_v32  ;;  %v6990_v55 = vsel %vm305_vm0, %v6254_v26, %v14436_v22  ;;  %v14444_v54 = vld [vmem:[#allocation44_spill] sm:$0xff]  ;;  %v14449_v57 = vld [vmem:[#allocation67_spill] sm:$0xff]  ;;  %v14450_v36 = vld [vmem:[#allocation17_spill] sm:$0xff] }
 0x76f   : > { %v7115_v39 = vsel %vm6010_vm7, %v7083_v14, %v6905_v17  ;;  %v7114_v30 = vsel %vm6010_vm7, %v7082_v12, %v6903_v21  ;;  %v6257_v13 = vmax.f32 %v6225_v61, 0.0  ;;  %v6256_v10 = vmax.f32 %v6224_v16, 0.0  ;;  %v14445_v43 = vld [vmem:[#allocation80_spill] sm:$0xff]  ;;  %v6167_v61 = vld [vmem:[#allocation3 + $0x2c8] sm:$0xff] }
 0x770   : > { %7528 = vst.msk [vmem:[%s12196_s26 + $0xd8] sm:$0xff] %vm6043_vm8, %v7115_v39  ;;  %7527 = vst.msk [vmem:[%s12196_s26 + $0xd0] sm:$0xff] %vm6043_vm8, %v7114_v30  ;;  %v7023_v11 = vsel %vm970_vm2, %v6991_v4, %v14437_v60  ;;  %v7022_v1 = vsel %vm970_vm2, %v6990_v55, %v14438_v18  ;;  %v6227_v45 = vmul.f32 %v11643_v52, %v6195_v38  ;;  %v6166_v16 = vld [vmem:[#allocation3 + $0x2c0] sm:$0xff]  ;;  %v6168_v18 = vld [vmem:[#allocation3 + $0x2d0] sm:$0xff] }
 0x771   : > { %v6226_v63 = vmul.f32 %v11643_v52, %v6194_v20  ;;  %v7055_v0 = vsel %vm5944_vm5, %v7023_v11, %v14439_v40  ;;  %v7054_v50 = vsel %vm5944_vm5, %v7022_v1, %v14440_v31  ;;  %v6197_v35 = vsub.f32 %v6165_v34, %v11619_v47  ;;  %v14447_v6 = vld [vmem:[#allocation92_spill] sm:$0xff]  ;;  %v6169_v11 = vld [vmem:[#allocation3 + $0x2d8] sm:$0xff]  ;;  %v14455_v1 = vld [vmem:[#allocation53_spill] sm:$0xff] }
 0x772   : > { %v6909_v25 = vpop.permute.xlu1 %6908  ;;  %v6907_v33 = vpop.permute.xlu0 %6906  ;;  %v6196_v2 = vsub.f32 %v6164_v58, %v11619_v47  ;;  %v7087_v41 = vsel %vm5977_vm6, %v7055_v0, %v14441_v48  ;;  %v7086_v46 = vsel %vm5977_vm6, %v7054_v50, %v14442_v5  ;;  %v6993_v19 = vsel %vm305_vm0, %v6257_v13, %v14443_v24  ;;  %v14448_v23 = vld [vmem:[#allocation64_spill] sm:$0xff]  ;;  %v14457_v0 = vld [vmem:[#allocation87_spill] sm:$0xff]  ;;  %v14458_v50 = vld [vmem:[#allocation29_spill] sm:$0xff] }
 0x773   : > { %v7117_v56 = vsel %vm6010_vm7, %v7085_v42, %v6909_v25  ;;  %v7116_v44 = vsel %vm6010_vm7, %v7084_v9, %v6907_v33  ;;  %v6992_v62 = vsel %vm305_vm0, %v6256_v10, %v14444_v54  ;;  %v6229_v17 = vmul.f32 %v11643_v52, %v6197_v35  ;;  %v14451_v42 = vld [vmem:[#allocation37_spill] sm:$0xff]  ;;  %v14452_v9 = vld [vmem:[#allocation36_spill] sm:$0xff] }
 0x774   : > { %7530 = vst.msk [vmem:[%s12196_s26 + $0xf8] sm:$0xff] %vm6043_vm8, %v7117_v56  ;;  %7529 = vst.msk [vmem:[%s12196_s26 + $0xf0] sm:$0xff] %vm6043_vm8, %v7116_v44  ;;  %v6228_v21 = vmul.f32 %v11643_v52, %v6196_v2  ;;  %v7025_v29 = vsel %vm970_vm2, %v6993_v19, %v14445_v43  ;;  %v7024_v49 = vsel %vm970_vm2, %v6992_v62, %v14446_v3  ;;  %v6259_v39 = vmax.f32 %v6227_v45, 0.0  ;;  %v14453_v55 = vld [vmem:[#allocation52_spill] sm:$0xff]  ;;  %v14454_v44 = vld [vmem:[#allocation27_spill] sm:$0xff] }
 0x775   : > { %v6258_v30 = vmax.f32 %v6226_v63, 0.0  ;;  %v7057_v59 = vsel %vm5944_vm5, %v7025_v29, %v14447_v6  ;;  %v7056_v28 = vsel %vm5944_vm5, %v7024_v49, %v14448_v23  ;;  %v6199_v8 = vsub.f32 %v6167_v61, %v11619_v47  ;;  %v14456_v63 = vld [vmem:[#allocation58_spill] sm:$0xff]  ;;  %v14461_v62 = vld [vmem:[#allocation28_spill] sm:$0xff]  ;;  %v6171_v29 = vld [vmem:[#allocation3 + $0x2e8] sm:$0xff] }
 0x776   : > { %v6913_v53 = vpop.permute.xlu1 %6912  ;;  %v6911_v37 = vpop.permute.xlu0 %6910  ;;  %v6198_v26 = vsub.f32 %v6166_v16, %v11619_v47  ;;  %v7089_v15 = vsel %vm5977_vm6, %v7057_v59, %v14449_v57  ;;  %v7088_v51 = vsel %vm5977_vm6, %v7056_v28, %v14450_v36  ;;  %v6995_v7 = vsel %vm305_vm0, %v6259_v39, %v14451_v42  ;;  %v6170_v3 = vld [vmem:[#allocation3 + $0x2e0] sm:$0xff]  ;;  %v14463_v49 = vld [vmem:[#allocation47_spill] sm:$0xff]  ;;  %v14465_v59 = vld [vmem:[#allocation90_spill] sm:$0xff] }
 0x777   : > { %v7119_v14 = vsel %vm6010_vm7, %v7087_v41, %v6913_v53  ;;  %v7118_v12 = vsel %vm6010_vm7, %v7086_v46, %v6911_v37  ;;  %v6994_v25 = vsel %vm305_vm0, %v6258_v30, %v14452_v9  ;;  %v6261_v4 = vmax.f32 %v6229_v17, 0.0  ;;  %v14459_v41 = vld [vmem:[#allocation65_spill] sm:$0xff]  ;;  %v14460_v46 = vld [vmem:[#allocation26_spill] sm:$0xff]  ;;  %v14464_v30 = vld [vmem:[#allocation83_spill] sm:$0xff] }
 0x778   : > { %7532 = vst.msk [vmem:[%s12196_s26 + $0x118] sm:$0xff] %vm6043_vm8, %v7119_v14  ;;  %7531 = vst.msk [vmem:[%s12196_s26 + $0x110] sm:$0xff] %vm6043_vm8, %v7118_v12  ;;  %v6260_v22 = vmax.f32 %v6228_v21, 0.0  ;;  %v7027_v56 = vsel %vm970_vm2, %v6995_v7, %v14453_v55  ;;  %v7026_v13 = vsel %vm970_vm2, %v6994_v25, %v14454_v44  ;;  %v6231_v10 = vmul.f32 %v11643_v52, %v6199_v8  ;;  %v14462_v12 = vld [vmem:[#allocation77_spill] sm:$0xff]  ;;  %v14466_v28 = vld [vmem:[#allocation82_spill] sm:$0xff] }
 0x779   : > { %v6230_v60 = vmul.f32 %v11643_v52, %v6198_v26  ;;  %v7059_v45 = vsel %vm5944_vm5, %v7027_v56, %v14455_v1  ;;  %v7058_v34 = vsel %vm5944_vm5, %v7026_v13, %v14456_v63  ;;  %v6201_v58 = vsub.f32 %v6169_v11, %v11619_v47  ;;  %v14469_v9 = vld [vmem:[#allocation79_spill] sm:$0xff]  ;;  %v14471_v55 = vld [vmem:[#allocation88_spill] sm:$0xff]  ;;  %v14472_v44 = vld [vmem:[#allocation93_spill] sm:$0xff] }
 0x77a   : > { %v6917_v38 = vpop.permute.xlu1 %6916  ;;  %v6915_v20 = vpop.permute.xlu0 %6914  ;;  %v6200_v40 = vsub.f32 %v6168_v18, %v11619_v47  ;;  %v7091_v31 = vsel %vm5977_vm6, %v7059_v45, %v14457_v0  ;;  %v7090_v35 = vsel %vm5977_vm6, %v7058_v34, %v14458_v50  ;;  %v6997_v5 = vsel %vm305_vm0, %v6261_v4, %v14459_v41  ;;  %v14474_v11 = vld [vmem:[#allocation98_spill] sm:$0xff] }
 0x77b   : > { %v7121_v33 = vsel %vm6010_vm7, %v7089_v15, %v6917_v38  ;;  %v7120_v32 = vsel %vm6010_vm7, %v7088_v51, %v6915_v20  ;;  %v6996_v53 = vsel %vm305_vm0, %v6260_v22, %v14460_v46  ;;  %v6233_v19 = vmul.f32 %v11643_v52, %v6201_v58  ;;  %v14467_v15 = vld [vmem:[#allocation74_spill] sm:$0xff] }
 0x77c   : > { %7534 = vst.msk [vmem:[%s12196_s26 + $0x138] sm:$0xff] %vm6043_vm8, %v7121_v33  ;;  %7533 = vst.msk [vmem:[%s12196_s26 + $0x130] sm:$0xff] %vm6043_vm8, %v7120_v32  ;;  %v6232_v54 = vmul.f32 %v11643_v52, %v6200_v40  ;;  %v7029_v14 = vsel %vm970_vm2, %v6997_v5, %v14461_v62  ;;  %v7028_v17 = vsel %vm970_vm2, %v6996_v53, %v14462_v12  ;;  %v6263_v21 = vmax.f32 %v6231_v10, 0.0  ;;  %v14468_v51 = vld [vmem:[#allocation54_spill] sm:$0xff]  ;;  %v14473_v10 = vld [vmem:[#allocation97_spill] sm:$0xff] }
 0x77d   : > { %v6262_v43 = vmax.f32 %v6230_v60, 0.0  ;;  %v7061_v39 = vsel %vm5944_vm5, %v7029_v14, %v14463_v49  ;;  %v7060_v61 = vsel %vm5944_vm5, %v7028_v17, %v14464_v30  ;;  %v6203_v16 = vsub.f32 %v6171_v29, %v11619_v47  ;;  %v14470_v33 = vld [vmem:[#allocation62_spill] sm:$0xff]  ;;  %v14480_v53 = vld [vmem:[#allocation55_spill] sm:$0xff] }
 0x77e   : > { %v6921_v2 = vpop.permute.xlu1 %6920  ;;  %v6919_v48 = vpop.permute.xlu0 %6918  ;;  %v6202_v6 = vsub.f32 %v6170_v3, %v11619_v47  ;;  %v7093_v23 = vsel %vm5977_vm6, %v7061_v39, %v14465_v59  ;;  %v7092_v8 = vsel %vm5977_vm6, %v7060_v61, %v14466_v28  ;;  %v6999_v36 = vsel %vm305_vm0, %v6263_v21, %v14467_v15  ;;  %v14475_v63 = vld [vmem:[#allocation18_spill] sm:$0xff]  ;;  %v14485_v39 = vld [vmem:[#allocation39_spill] sm:$0xff] }
 0x77f   : > { %v7123_v37 = vsel %vm6010_vm7, %v7091_v31, %v6921_v2  ;;  %v7122_v24 = vsel %vm6010_vm7, %v7090_v35, %v6919_v48  ;;  %v6998_v38 = vsel %vm305_vm0, %v6262_v43, %v14468_v51  ;;  %v6265_v7 = vmax.f32 %v6233_v19, 0.0  ;;  %v14476_v58 = vld [vmem:[#allocation22_spill] sm:$0xff]  ;;  %v14477_v31 = vld [vmem:[#allocation32_spill] sm:$0xff]  ;;  %v14478_v35 = vld [vmem:[#allocation59_spill] sm:$0xff] }
 0x780   : > { %7536 = vst.msk [vmem:[%s12196_s26 + $0x158] sm:$0xff] %vm6043_vm8, %v7123_v37  ;;  %7535 = vst.msk [vmem:[%s12196_s26 + $0x150] sm:$0xff] %vm6043_vm8, %v7122_v24  ;;  %v6264_v47 = vmax.f32 %v6232_v54, 0.0  ;;  %v7031_v25 = vsel %vm970_vm2, %v6999_v36, %v14469_v9  ;;  %v7030_v32 = vsel %vm970_vm2, %v6998_v38, %v14470_v33  ;;  %v6235_v4 = vmul.f32 %v11643_v52, %v6203_v16  ;;  %v14479_v5 = vld [vmem:[#allocation94_spill] sm:$0xff]  ;;  %v14481_v24 = vld [vmem:[#allocation24_spill] sm:$0xff] }
 0x781   : > { %v6234_v22 = vmul.f32 %v11643_v52, %v6202_v6  ;;  %v7063_v56 = vsel %vm5944_vm5, %v7031_v25, %v14471_v55  ;;  %v7062_v13 = vsel %vm5944_vm5, %v7030_v32, %v14472_v44  ;;  %v7001_v34 = vsel %vm305_vm0, %v6265_v7, %v14475_v63  ;;  %v14482_v54 = vld [vmem:[#allocation57_spill] sm:$0xff]  ;;  %v14483_v17 = vld [vmem:[#allocation78_spill] sm:$0xff]  ;;  %v14487_v6 = vld [vmem:[#allocation56_spill] sm:$0xff] }
 0x782   : > { %v6925_v26 = vpop.permute.xlu1 %6924  ;;  %v6923_v57 = vpop.permute.xlu0 %6922  ;;  %v7095_v60 = vsel %vm5977_vm6, %v7063_v56, %v14473_v10  ;;  %v7094_v18 = vsel %vm5977_vm6, %v7062_v13, %v14474_v11  ;;  %v7000_v52 = vsel %vm305_vm0, %v6264_v47, %v14476_v58  ;;  %v7033_v50 = vsel %vm970_vm2, %v7001_v34, %v14477_v31  ;;  %v14484_v43 = vld [vmem:[#allocation69_spill] sm:$0xff]  ;;  %v14486_v61 = vld [vmem:[#allocation30_spill] sm:$0xff]  ;;  %v14492_v7 = vld [vmem:[#allocation72_spill] sm:$0xff] }
 0x783   : > { %v7125_v20 = vsel %vm6010_vm7, %v7093_v23, %v6925_v26  ;;  %v7124_v42 = vsel %vm6010_vm7, %v7092_v8, %v6923_v57  ;;  %v7032_v2 = vsel %vm970_vm2, %v7000_v52, %v14478_v35  ;;  %v6267_v48 = vmax.f32 %v6235_v4, 0.0  ;;  %v14488_v23 = vld [vmem:[#allocation45_spill] sm:$0xff]  ;;  %v14493_v47 = vld [vmem:[#allocation84_spill] sm:$0xff] }
 0x784   : > { %7538 = vst.msk [vmem:[%s12196_s26 + $0x178] sm:$0xff] %vm6043_vm8, %v7125_v20  ;;  %7537 = vst.msk [vmem:[%s12196_s26 + $0x170] sm:$0xff] %vm6043_vm8, %v7124_v42  ;;  %v6266_v41 = vmax.f32 %v6234_v22, 0.0  ;;  %v7065_v46 = vsel %vm5944_vm5, %v7033_v50, %v14479_v5  ;;  %v7064_v37 = vsel %vm5944_vm5, %v7032_v2, %v14480_v53  ;;  %v14489_v8 = vld [vmem:[#allocation33_spill] sm:$0xff]  ;;  %v14491_v20 = vld [vmem:[#allocation34_spill] sm:$0xff]  ;;  %v7100_v9 = vsel %vm5977_vm6, %v14493_v47, %v14492_v7 }
 0x785   : > { %v7097_v19 = vsel %vm5977_vm6, %v7065_v46, %v14481_v24  ;;  %v7096_v62 = vsel %vm5977_vm6, %v7064_v37, %v14482_v54  ;;  %v7003_v21 = vsel %vm305_vm0, %v6267_v48, %v14483_v17 }
 0x786   : > { %v6929_v1 = vpop.permute.xlu1 %6928  ;;  %v6927_v45 = vpop.permute.xlu0 %6926  ;;  %v7002_v29 = vsel %vm305_vm0, %v6266_v41, %v14484_v43  ;;  %v7035_v30 = vsel %vm970_vm2, %v7003_v21, %v14485_v39 }
 0x787   : > { %v7127_v40 = vsel %vm6010_vm7, %v7095_v60, %v6929_v1  ;;  %v7126_v0 = vsel %vm6010_vm7, %v7094_v18, %v6927_v45  ;;  %v7034_v16 = vsel %vm970_vm2, %v7002_v29, %v14486_v61  ;;  %v7067_v59 = vsel %vm5944_vm5, %v7035_v30, %v14487_v6 }
 0x788   : > { %7540 = vst.msk [vmem:[%s12196_s26 + $0x198] sm:$0xff] %vm6043_vm8, %v7127_v40  ;;  %7539 = vst.msk [vmem:[%s12196_s26 + $0x190] sm:$0xff] %vm6043_vm8, %v7126_v0  ;;  %v7066_v28 = vsel %vm5944_vm5, %v7034_v16, %v14488_v23  ;;  %v7099_v26 = vsel %vm5977_vm6, %v7067_v59, %v14489_v8 }
 0x789   : > { %v7098_v57 = vsel %vm5977_vm6, %v7066_v28, %v13257_v27  ;;  %v14490_v27 = vld [vmem:[#allocation49_spill] sm:$0xff] }
 0x78a   : > { %v6933_v14 = vpop.permute.xlu1 %6932  ;;  %v6931_v12 = vpop.permute.xlu0 %6930  ;;  %v7101_v42 = vsel %vm5977_vm6, %v14491_v20, %v14490_v27 }
 0x78b   : > { %v7129_v3 = vsel %vm6010_vm7, %v7097_v19, %v6933_v14  ;;  %v7128_v49 = vsel %vm6010_vm7, %v7096_v62, %v6931_v12 }
 0x78c   : > { %7542 = vst.msk [vmem:[%s12196_s26 + $0x1b8] sm:$0xff] %vm6043_vm8, %v7129_v3  ;;  %7541 = vst.msk [vmem:[%s12196_s26 + $0x1b0] sm:$0xff] %vm6043_vm8, %v7128_v49 }
 0x78e   : > { %v6937_v15 = vpop.permute.xlu1 %6936  ;;  %v6935_v36 = vpop.permute.xlu0 %6934 }
 0x78f   : > { %v7131_v51 = vsel %vm6010_vm7, %v7099_v26, %v6937_v15  ;;  %v7130_v38 = vsel %vm6010_vm7, %v7098_v57, %v6935_v36 }
 0x790   : > { %7544 = vst.msk [vmem:[%s12196_s26 + $0x1d8] sm:$0xff] %vm6043_vm8, %v7131_v51  ;;  %7543 = vst.msk [vmem:[%s12196_s26 + $0x1d0] sm:$0xff] %vm6043_vm8, %v7130_v38 }
 0x792   : > { %v6941_v25 = vpop.permute.xlu1 %6940  ;;  %v6939_v33 = vpop.permute.xlu0 %6938 }
 0x793   : > { %v7133_v32 = vsel %vm6010_vm7, %v7101_v42, %v6941_v25  ;;  %v7132_v4 = vsel %vm6010_vm7, %v7100_v9, %v6939_v33 }
 0x794   : > { %7546 = vst.msk [vmem:[%s12196_s26 + $0x1f8] sm:$0xff] %vm6043_vm8, %v7133_v32  ;;  %7545 = vst.msk [vmem:[%s12196_s26 + $0x1f0] sm:$0xff] %vm6043_vm8, %v7132_v4 }
 0x795   : > { %8257 = shalt.err (!%p8254_p5)
}
 0x796   : > { %s8258_s29 = scalar_lea.hbm %s13654_s24, 8192  ;;  %s8262_s23 = scalar_lea.hbm %s13717_s4, 16384 }
 0x797   : > { %p8259_p11 = scmp.ne.s32.totalorder %s13654_s24, %s8258_s29  ;;  %p8263_p7 = scmp.lt.u32.totalorder %s13654_s24, %s13717_s4 }
 0x798   : > { %p8264_p2 = scmp.lt.u32.totalorder %s8262_s23, %s8258_s29  ;;  %p8266_p0 = scmp.lt.u32.totalorder %s8258_s29, %s13654_s24 }
 0x799   : > { %p8260_p4 = pnand %p8259_p11, %p14494_p13 }
 0x79a   : > { %p8265_p12 = por %p8264_p2, %p8263_p7 }
 0x79b   : > { %p8261_p8 = pneg %p8260_p4 }
 0x79c   : > { %p8267_p10 = por %p8266_p0, %p8265_p12 }
 0x79e   : > { %p8268_p6 = pnand %p8267_p10, %p8261_p8 }
 0x7a0   : > { %8271 = shalt.err (!%p8268_p6)
}
 0x7a1   : > { %s8333_s8 = smov 128  }
 0x7a2   : > { %7926 = dma.vmem_to_hbm [thread:$0]  (%p14494_p13), %s13662_s25, 8192, %s13654_s24, %s7168_s12, %s8333_s8, %s8333_s8, %s8328_s21  }
 0x7a3 PF: > { %s7196_s11 = sand.u32 1, %s8306_s15   ;;  %p14495_p9 = scmp.ne.s32.totalorder %s13803_s13, 0 }
 0x7a4   : > { %p14496_p1 = scmp.ge.s32.totalorder %s8318_s18, 2  ;;  %s7197_s7 = scalar_lea.sflag [#allocation6], %s7196_s11 }
 0x7a6   : > { %p7943_p3 = pnand %p14496_p1, %p14495_p9 }
 0x7a8   : > { %8301 = dma.done.wait (!%p7943_p3), %s7197_s7, 8192  }
 0x7a9   : > { %8303 = vsyncadd (!%p7943_p3), %s7197_s7, 4294959104  ;;  %p18_p5 = scmp.ge.s32.totalorder %s8380_s19, 4   ;;  %s14497_s15 = smov %s8310_s16 }
 0x7aa   : > { %s14498_s16 = smov %s8314_s17  ;;  %s14499_s17 = smov %s8389_s22 }
 0x7ab   : > { %s14500_s18 = smov %s8380_s19  ;;  %20 = sbr.rel (!%p18_p5) target bundleno = 6 (0x6), region = 118 }
 0x7b2   :  { %7202 = vsyncpa [#allocation5], 1 }
 0x7b3   :  { %7204 = vsyncpa [#allocation5 + $0x1], 1 }
 0x7b4   :  { %7205 = vsyncpa [#allocation8], 1 }
 0x7b5   :  { %7206 = vsyncpa [#allocation6], 1 }
 0x7b6   :  { %7208 = vsyncpa [#allocation6 + $0x1], 1 }

</bundles_post_ra>
